<compile_context>
chip_gen: v7x
topology: tpu7x:2x2x1
jax: 0.10.0
libtpu: 0.0.40
codegen_flags: <defaults>
</compile_context>

<pallas_src>
import functools

import jax
import jax.numpy as jnp
from jax.experimental import pallas as pl
from jax.experimental.pallas import tpu as pltpu


# ----------------------------------------------------------------------------
# Fused (X @ W + b) [+ ReLU] Pallas kernel -- single full-K pass, grid over M.
# ----------------------------------------------------------------------------
def _matmul_bias_act_kernel(x_ref, w_ref, b_ref, o_ref, *, relu):
    acc = jnp.dot(x_ref[...], w_ref[...], preferred_element_type=jnp.float32)
    acc = acc + b_ref[...]                 # (TM, N) + (1, N) broadcast, f32
    if relu:
        acc = jnp.maximum(acc, 0.0)
    o_ref[...] = acc.astype(o_ref.dtype)


def _pick_tm(m, target=512):
    """Row tile: largest 8-aligned divisor of m <= target (full m if small)."""
    if m <= target:
        # Split cleanly in two when possible so the M grid keeps >=2 steps
        # (lets v7x shard the 'parallel' axis across its two TensorCores).
        if m % 16 == 0 and m // 2 >= 128:
            return m // 2
        return m
    for t in range(target, 7, -8):
        if m % t == 0:
            return t
    return target  # fallback: pad M up to a multiple of `target`


def matmul_bias_act(x, w, b2d, *, relu, out_dtype):
    """x: (M, K) bf16, w: (K, N) bf16, b2d: (1, N) f32 -> (M, N) out_dtype.

    K and N are taken whole (full-dim blocks are legal and always fit VMEM
    here), so the grid is 1-D over M and there is no accumulator scratch.
    The W / bias blocks map to the same block index at every grid step, so
    they stay resident in VMEM across the whole call.
    """
    M, K = x.shape
    K2, N = w.shape
    assert K == K2
    tm = _pick_tm(M)
    mp = ((M + tm - 1) // tm) * tm
    if mp != M:
        x = jnp.pad(x, ((0, mp - M), (0, 0)))

    out = pl.pallas_call(
        functools.partial(_matmul_bias_act_kernel, relu=relu),
        out_shape=jax.ShapeDtypeStruct((mp, N), out_dtype),
        grid_spec=pltpu.PrefetchScalarGridSpec(
            num_scalar_prefetch=0,
            grid=(mp // tm,),
            in_specs=[
                pl.BlockSpec((tm, K), lambda i: (i, 0)),
                pl.BlockSpec((K, N), lambda i: (0, 0)),   # resident across grid
                pl.BlockSpec((1, N), lambda i: (0, 0)),   # resident across grid
            ],
            out_specs=pl.BlockSpec((tm, N), lambda i: (i, 0)),
        ),
        compiler_params=pltpu.CompilerParams(
            dimension_semantics=("parallel",)),
    )(x, w, b2d)
    return out if mp == M else out[:M]


# ----------------------------------------------------------------------------
# Conv2d(k=4, s=2, p=1) via NHWC im2col (plain-JAX glue) + Pallas matmul
# ----------------------------------------------------------------------------
def _im2col_nhwc(x, k, s, p):
    """x: (B, H, W, C) -> (B*Ho*Wo, k*k*C) with (kh, kw, C) patch ordering."""
    B, H, W, C = x.shape
    xp = jnp.pad(x, ((0, 0), (p, p), (p, p), (0, 0)))
    Ho = (H + 2 * p - k) // s + 1
    Wo = (W + 2 * p - k) // s + 1
    cols = []
    for kh in range(k):
        for kw in range(k):
            cols.append(xp[:, kh:kh + s * Ho:s, kw:kw + s * Wo:s, :])  # (B,Ho,Wo,C)
    pat = jnp.concatenate(cols, axis=-1)            # (B, Ho, Wo, k*k*C)
    return pat.reshape(B * Ho * Wo, k * k * C), Ho, Wo


def conv2d_relu_nhwc(x, w_mat, b2d):
    """x: (B, H, W, C_in) bf16; w_mat: (16*C_in, C_out) bf16; b2d: (1, C_out) f32.
    Returns (B, H/2, W/2, C_out) bf16 -- Conv2d(kernel=4, stride=2, pad=1) + ReLU."""
    B = x.shape[0]
    patches, Ho, Wo = _im2col_nhwc(x, k=4, s=2, p=1)
    Cout = w_mat.shape[1]
    y = matmul_bias_act(patches, w_mat, b2d, relu=True, out_dtype=jnp.bfloat16)
    return y.reshape(B, Ho, Wo, Cout)


# ----------------------------------------------------------------------------
# One-time weight preparation (reorder / transpose / cast) -- not per-forward.
# ----------------------------------------------------------------------------
def prepare_params(params):
    def conv_w(w):  # (C_out, C_in, kh, kw) -> (kh*kw*C_in, C_out), bf16
        Cout, Cin, kh, kw = w.shape
        return (w.transpose(2, 3, 1, 0)
                 .reshape(kh * kw * Cin, Cout)
                 .astype(jnp.bfloat16))

    def bias(b):
        return b.reshape(1, -1).astype(jnp.float32)

    # Fold PyTorch's NCHW-flatten permutation into the Linear weight columns so
    # the kernel can consume the NHWC-flattened features directly.
    L = params["w4"].shape[0]
    C, Hf, Wf = 128, 12, 12
    w4 = (params["w4"].reshape(L, C, Hf, Wf)
                      .transpose(2, 3, 1, 0)            # (Hf, Wf, C, L)
                      .reshape(Hf * Wf * C, L)
                      .astype(jnp.bfloat16))

    return {
        "w1": conv_w(params["w1"]), "b1": bias(params["b1"]),
        "w2": conv_w(params["w2"]), "b2": bias(params["b2"]),
        "w3": conv_w(params["w3"]), "b3": bias(params["b3"]),
        "w4": w4,                   "b4": bias(params["b4"]),
    }


# ----------------------------------------------------------------------------
# ConvEncoder forward (input NCHW, like the PyTorch module)
# ----------------------------------------------------------------------------
def conv_encoder_forward(x_nchw, prepped):
    x = x_nchw.transpose(0, 2, 3, 1).astype(jnp.bfloat16)        # NCHW->NHWC once
    h = conv2d_relu_nhwc(x, prepped["w1"], prepped["b1"])        # (B,48,48,32)
    h = conv2d_relu_nhwc(h, prepped["w2"], prepped["b2"])        # (B,24,24,64)
    h = conv2d_relu_nhwc(h, prepped["w3"], prepped["b3"])        # (B,12,12,128)
    B = h.shape[0]
    flat = h.reshape(B, -1)                                      # NHWC flatten
    z = matmul_bias_act(flat, prepped["w4"], prepped["b4"],
                        relu=False, out_dtype=jnp.float32)
    return z


def init_params(key, latent_dim):
    """Deterministic init mimicking PyTorch default (uniform +-1/sqrt(fan_in))."""
    ks = jax.random.split(key, 8)

    def u(k, shape, fan_in):
        bound = 1.0 / jnp.sqrt(fan_in)
        return jax.random.uniform(k, shape, jnp.float32, -bound, bound)

    return {
        "w1": u(ks[0], (32, 4, 4, 4), 4 * 16),
        "b1": u(ks[1], (32,), 4 * 16),
        "w2": u(ks[2], (64, 32, 4, 4), 32 * 16),
        "b2": u(ks[3], (64,), 32 * 16),
        "w3": u(ks[4], (128, 64, 4, 4), 64 * 16),
        "b3": u(ks[5], (128,), 64 * 16),
        "w4": u(ks[6], (latent_dim, 128 * 12 * 12), 128 * 12 * 12),
        "b4": u(ks[7], (latent_dim,), 128 * 12 * 12),
    }


# ----------------------------------------------------------------------------
# Pure-JAX f32 reference for correctness check
# ----------------------------------------------------------------------------
def _ref_forward(x, params):
    dn = jax.lax.conv_dimension_numbers(x.shape, params["w1"].shape,
                                        ("NCHW", "OIHW", "NCHW"))

    def conv(h, w, b):
        y = jax.lax.conv_general_dilated(h, w, (2, 2), [(1, 1), (1, 1)],
                                         dimension_numbers=dn)
        return jax.nn.relu(y + b[None, :, None, None])

    h = conv(x, params["w1"], params["b1"])
    h = conv(h, params["w2"], params["b2"])
    h = conv(h, params["w3"], params["b3"])
    flat = h.reshape(h.shape[0], -1)
    return flat @ params["w4"].T + params["b4"]


if __name__ == "__main__":
    latent_dim = 32
    batch = 2

    key = jax.random.PRNGKey(0)
    k_x, k_p = jax.random.split(key)
    # Input spatial size 96x96 is required by Linear(128*12*12, latent_dim).
    x = jax.random.normal(k_x, (batch, 4, 96, 96), jnp.float32)
    params = init_params(k_p, latent_dim)
    prepped = prepare_params(params)            # one-time weight prep, off hot path

    fwd = jax.jit(conv_encoder_forward)
    z = jax.block_until_ready(fwd(x, prepped))
    assert z.shape == (batch, latent_dim), z.shape

    z_ref = _ref_forward(x, params)
    # bf16 operands (f32 accumulation) -> slightly relaxed tolerance vs the
    # pure-f32 reference.
    max_err = float(jnp.max(jnp.abs(z - z_ref)))
    assert jnp.allclose(z, z_ref, rtol=2e-2, atol=2e-2), max_err

    print("KERNEL_OK")
</pallas_src>

<mosaic_0001>
module attributes {stable_mosaic.version = 11 : i64} {
  func.func @_matmul_bias_act_kernel(%arg0: i32, %arg1: memref<512x64xbf16, #tpu.memory_space<vmem>>, %arg2: memref<64x32xbf16, #tpu.memory_space<vmem>>, %arg3: memref<1x32xf32, #tpu.memory_space<vmem>>, %arg4: memref<512x32xbf16, #tpu.memory_space<vmem>>) attributes {dimension_semantics = [#tpu.dimension_semantics<parallel>], iteration_bounds = array<i64: 9>, scalar_prefetch = 0 : i64, scratch_operands = 0 : i64, tpu.core_type = #tpu.core_type<tc>, window_params = [{transform_indices = @transform_0, window_bounds = array<i64: 512, 64>}, {pipeline_mode = #tpu.pipeline_mode<synchronous>, transform_indices = @transform_1, window_bounds = array<i64: 64, 32>}, {pipeline_mode = #tpu.pipeline_mode<synchronous>, transform_indices = @transform_2, window_bounds = array<i64: 1, 32>}, {transform_indices = @transform_3, window_bounds = array<i64: 512, 32>}]} {
    %c0 = arith.constant 0 : index
    %c0_0 = arith.constant 0 : index
    %0 = vector.load %arg1[%c0, %c0_0] : memref<512x64xbf16, #tpu.memory_space<vmem>>, vector<512x64xbf16>
    %c0_1 = arith.constant 0 : index
    %c0_2 = arith.constant 0 : index
    %1 = vector.load %arg2[%c0_1, %c0_2] : memref<64x32xbf16, #tpu.memory_space<vmem>>, vector<64x32xbf16>
    %cst = arith.constant dense<0.000000e+00> : vector<512x32xf32>
    %2 = tpu.matmul %0, %1, %cst {dimension_numbers = #tpu.dot_dimension_numbers<[1], [0], [0], [1], [0, 0, 1, 1], [], []>} : vector<512x64xbf16>, vector<64x32xbf16>, vector<512x32xf32> -> vector<512x32xf32>
    %c0_3 = arith.constant 0 : index
    %c0_4 = arith.constant 0 : index
    %3 = vector.load %arg3[%c0_3, %c0_4] : memref<1x32xf32, #tpu.memory_space<vmem>>, vector<1x32xf32>
    %4 = vector.broadcast %3 : vector<1x32xf32> to vector<512x32xf32>
    %5 = arith.addf %2, %4 : vector<512x32xf32>
    %cst_5 = arith.constant 0.000000e+00 : f32
    %6 = vector.broadcast %cst_5 : f32 to vector<512x32xf32>
    %7 = arith.maximumf %5, %6 : vector<512x32xf32>
    %8 = arith.truncf %7 : vector<512x32xf32> to vector<512x32xbf16>
    %c0_6 = arith.constant 0 : index
    %c0_7 = arith.constant 0 : index
    %9 = vector.load %arg4[%c0_6, %c0_7] : memref<512x32xbf16, #tpu.memory_space<vmem>>, vector<512x32xbf16>
    tpu.vector_store %arg4[%c0_6, %c0_7], %8 {strides = array<i32>} : memref<512x32xbf16, #tpu.memory_space<vmem>>, vector<512x32xbf16>,
    return
  }
  func.func @transform_0(%arg0: i32) -> (i32, i32) {
    %c0_i32 = arith.constant 0 : i32
    %c0_i32_0 = arith.constant 0 : i32
    return %arg0, %c0_i32 : i32, i32
  }
  func.func @transform_1(%arg0: i32) -> (i32, i32) {
    %c0_i32 = arith.constant 0 : i32
    %c0_i32_0 = arith.constant 0 : i32
    %c0_i32_1 = arith.constant 0 : i32
    return %c0_i32, %c0_i32_0 : i32, i32
  }
  func.func @transform_2(%arg0: i32) -> (i32, i32) {
    %c0_i32 = arith.constant 0 : i32
    %c0_i32_0 = arith.constant 0 : i32
    %c0_i32_1 = arith.constant 0 : i32
    return %c0_i32, %c0_i32_0 : i32, i32
  }
  func.func @transform_3(%arg0: i32) -> (i32, i32) {
    %c0_i32 = arith.constant 0 : i32
    %c0_i32_0 = arith.constant 0 : i32
    return %arg0, %c0_i32 : i32, i32
  }
}

module attributes {stable_mosaic.version = 11 : i64} {
  func.func @_matmul_bias_act_kernel(%arg0: i32, %arg1: memref<384x512xbf16, #tpu.memory_space<vmem>>, %arg2: memref<512x64xbf16, #tpu.memory_space<vmem>>, %arg3: memref<1x64xf32, #tpu.memory_space<vmem>>, %arg4: memref<384x64xbf16, #tpu.memory_space<vmem>>) attributes {dimension_semantics = [#tpu.dimension_semantics<parallel>], iteration_bounds = array<i64: 3>, scalar_prefetch = 0 : i64, scratch_operands = 0 : i64, tpu.core_type = #tpu.core_type<tc>, window_params = [{transform_indices = @transform_0, window_bounds = array<i64: 384, 512>}, {pipeline_mode = #tpu.pipeline_mode<synchronous>, transform_indices = @transform_1, window_bounds = array<i64: 512, 64>}, {pipeline_mode = #tpu.pipeline_mode<synchronous>, transform_indices = @transform_2, window_bounds = array<i64: 1, 64>}, {transform_indices = @transform_3, window_bounds = array<i64: 384, 64>}]} {
    %c0 = arith.constant 0 : index
    %c0_0 = arith.constant 0 : index
    %0 = vector.load %arg1[%c0, %c0_0] : memref<384x512xbf16, #tpu.memory_space<vmem>>, vector<384x512xbf16>
    %c0_1 = arith.constant 0 : index
    %c0_2 = arith.constant 0 : index
    %1 = vector.load %arg2[%c0_1, %c0_2] : memref<512x64xbf16, #tpu.memory_space<vmem>>, vector<512x64xbf16>
    %cst = arith.constant dense<0.000000e+00> : vector<384x64xf32>
    %2 = tpu.matmul %0, %1, %cst {dimension_numbers = #tpu.dot_dimension_numbers<[1], [0], [0], [1], [0, 0, 1, 1], [], []>} : vector<384x512xbf16>, vector<512x64xbf16>, vector<384x64xf32> -> vector<384x64xf32>
    %c0_3 = arith.constant 0 : index
    %c0_4 = arith.constant 0 : index
    %3 = vector.load %arg3[%c0_3, %c0_4] : memref<1x64xf32, #tpu.memory_space<vmem>>, vector<1x64xf32>
    %4 = vector.broadcast %3 : vector<1x64xf32> to vector<384x64xf32>
    %5 = arith.addf %2, %4 : vector<384x64xf32>
    %cst_5 = arith.constant 0.000000e+00 : f32
    %6 = vector.broadcast %cst_5 : f32 to vector<384x64xf32>
    %7 = arith.maximumf %5, %6 : vector<384x64xf32>
    %8 = arith.truncf %7 : vector<384x64xf32> to vector<384x64xbf16>
    %c0_6 = arith.constant 0 : index
    %c0_7 = arith.constant 0 : index
    %9 = vector.load %arg4[%c0_6, %c0_7] : memref<384x64xbf16, #tpu.memory_space<vmem>>, vector<384x64xbf16>
    tpu.vector_store %arg4[%c0_6, %c0_7], %8 {strides = array<i32>} : memref<384x64xbf16, #tpu.memory_space<vmem>>, vector<384x64xbf16>,
    return
  }
  func.func @transform_0(%arg0: i32) -> (i32, i32) {
    %c0_i32 = arith.constant 0 : i32
    %c0_i32_0 = arith.constant 0 : i32
    return %arg0, %c0_i32 : i32, i32
  }
  func.func @transform_1(%arg0: i32) -> (i32, i32) {
    %c0_i32 = arith.constant 0 : i32
    %c0_i32_0 = arith.constant 0 : i32
    %c0_i32_1 = arith.constant 0 : i32
    return %c0_i32, %c0_i32_0 : i32, i32
  }
  func.func @transform_2(%arg0: i32) -> (i32, i32) {
    %c0_i32 = arith.constant 0 : i32
    %c0_i32_0 = arith.constant 0 : i32
    %c0_i32_1 = arith.constant 0 : i32
    return %c0_i32, %c0_i32_0 : i32, i32
  }
  func.func @transform_3(%arg0: i32) -> (i32, i32) {
    %c0_i32 = arith.constant 0 : i32
    %c0_i32_0 = arith.constant 0 : i32
    return %arg0, %c0_i32 : i32, i32
  }
}

module attributes {stable_mosaic.version = 11 : i64} {
  func.func @_matmul_bias_act_kernel(%arg0: i32, %arg1: memref<144x1024xbf16, #tpu.memory_space<vmem>>, %arg2: memref<1024x128xbf16, #tpu.memory_space<vmem>>, %arg3: memref<1x128xf32, #tpu.memory_space<vmem>>, %arg4: memref<144x128xbf16, #tpu.memory_space<vmem>>) attributes {dimension_semantics = [#tpu.dimension_semantics<parallel>], iteration_bounds = array<i64: 2>, scalar_prefetch = 0 : i64, scratch_operands = 0 : i64, tpu.core_type = #tpu.core_type<tc>, window_params = [{transform_indices = @transform_0, window_bounds = array<i64: 144, 1024>}, {pipeline_mode = #tpu.pipeline_mode<synchronous>, transform_indices = @transform_1, window_bounds = array<i64: 1024, 128>}, {pipeline_mode = #tpu.pipeline_mode<synchronous>, transform_indices = @transform_2, window_bounds = array<i64: 1, 128>}, {transform_indices = @transform_3, window_bounds = array<i64: 144, 128>}]} {
    %c0 = arith.constant 0 : index
    %c0_0 = arith.constant 0 : index
    %0 = vector.load %arg1[%c0, %c0_0] : memref<144x1024xbf16, #tpu.memory_space<vmem>>, vector<144x1024xbf16>
    %c0_1 = arith.constant 0 : index
    %c0_2 = arith.constant 0 : index
    %1 = vector.load %arg2[%c0_1, %c0_2] : memref<1024x128xbf16, #tpu.memory_space<vmem>>, vector<1024x128xbf16>
    %cst = arith.constant dense<0.000000e+00> : vector<144x128xf32>
    %2 = tpu.matmul %0, %1, %cst {dimension_numbers = #tpu.dot_dimension_numbers<[1], [0], [0], [1], [0, 0, 1, 1], [], []>} : vector<144x1024xbf16>, vector<1024x128xbf16>, vector<144x128xf32> -> vector<144x128xf32>
    %c0_3 = arith.constant 0 : index
    %c0_4 = arith.constant 0 : index
    %3 = vector.load %arg3[%c0_3, %c0_4] : memref<1x128xf32, #tpu.memory_space<vmem>>, vector<1x128xf32>
    %4 = vector.broadcast %3 : vector<1x128xf32> to vector<144x128xf32>
    %5 = arith.addf %2, %4 : vector<144x128xf32>
    %cst_5 = arith.constant 0.000000e+00 : f32
    %6 = vector.broadcast %cst_5 : f32 to vector<144x128xf32>
    %7 = arith.maximumf %5, %6 : vector<144x128xf32>
    %8 = arith.truncf %7 : vector<144x128xf32> to vector<144x128xbf16>
    %c0_6 = arith.constant 0 : index
    %c0_7 = arith.constant 0 : index
    %9 = vector.load %arg4[%c0_6, %c0_7] : memref<144x128xbf16, #tpu.memory_space<vmem>>, vector<144x128xbf16>
    tpu.vector_store %arg4[%c0_6, %c0_7], %8 {strides = array<i32>} : memref<144x128xbf16, #tpu.memory_space<vmem>>, vector<144x128xbf16>,
    return
  }
  func.func @transform_0(%arg0: i32) -> (i32, i32) {
    %c0_i32 = arith.constant 0 : i32
    %c0_i32_0 = arith.constant 0 : i32
    return %arg0, %c0_i32 : i32, i32
  }
  func.func @transform_1(%arg0: i32) -> (i32, i32) {
    %c0_i32 = arith.constant 0 : i32
    %c0_i32_0 = arith.constant 0 : i32
    %c0_i32_1 = arith.constant 0 : i32
    return %c0_i32, %c0_i32_0 : i32, i32
  }
  func.func @transform_2(%arg0: i32) -> (i32, i32) {
    %c0_i32 = arith.constant 0 : i32
    %c0_i32_0 = arith.constant 0 : i32
    %c0_i32_1 = arith.constant 0 : i32
    return %c0_i32, %c0_i32_0 : i32, i32
  }
  func.func @transform_3(%arg0: i32) -> (i32, i32) {
    %c0_i32 = arith.constant 0 : i32
    %c0_i32_0 = arith.constant 0 : i32
    return %arg0, %c0_i32 : i32, i32
  }
}

module attributes {stable_mosaic.version = 11 : i64} {
  func.func @_matmul_bias_act_kernel(%arg0: i32, %arg1: memref<2x18432xbf16, #tpu.memory_space<vmem>>, %arg2: memref<18432x32xbf16, #tpu.memory_space<vmem>>, %arg3: memref<1x32xf32, #tpu.memory_space<vmem>>, %arg4: memref<2x32xf32, #tpu.memory_space<vmem>>) attributes {dimension_semantics = [#tpu.dimension_semantics<parallel>], iteration_bounds = array<i64: 1>, scalar_prefetch = 0 : i64, scratch_operands = 0 : i64, tpu.core_type = #tpu.core_type<tc>, window_params = [{transform_indices = @transform_0, window_bounds = array<i64: 2, 18432>}, {pipeline_mode = #tpu.pipeline_mode<synchronous>, transform_indices = @transform_1, window_bounds = array<i64: 18432, 32>}, {pipeline_mode = #tpu.pipeline_mode<synchronous>, transform_indices = @transform_2, window_bounds = array<i64: 1, 32>}, {transform_indices = @transform_3, window_bounds = array<i64: 2, 32>}]} {
    %c0 = arith.constant 0 : index
    %c0_0 = arith.constant 0 : index
    %0 = vector.load %arg1[%c0, %c0_0] : memref<2x18432xbf16, #tpu.memory_space<vmem>>, vector<2x18432xbf16>
    %c0_1 = arith.constant 0 : index
    %c0_2 = arith.constant 0 : index
    %1 = vector.load %arg2[%c0_1, %c0_2] : memref<18432x32xbf16, #tpu.memory_space<vmem>>, vector<18432x32xbf16>
    %cst = arith.constant dense<0.000000e+00> : vector<2x32xf32>
    %2 = tpu.matmul %0, %1, %cst {dimension_numbers = #tpu.dot_dimension_numbers<[1], [0], [0], [1], [0, 0, 1, 1], [], []>} : vector<2x18432xbf16>, vector<18432x32xbf16>, vector<2x32xf32> -> vector<2x32xf32>
    %c0_3 = arith.constant 0 : index
    %c0_4 = arith.constant 0 : index
    %3 = vector.load %arg3[%c0_3, %c0_4] : memref<1x32xf32, #tpu.memory_space<vmem>>, vector<1x32xf32>
    %4 = vector.broadcast %3 : vector<1x32xf32> to vector<2x32xf32>
    %5 = arith.addf %2, %4 : vector<2x32xf32>
    %c0_5 = arith.constant 0 : index
    %c0_6 = arith.constant 0 : index
    %6 = vector.load %arg4[%c0_5, %c0_6] : memref<2x32xf32, #tpu.memory_space<vmem>>, vector<2x32xf32>
    tpu.vector_store %arg4[%c0_5, %c0_6], %5 {strides = array<i32>} : memref<2x32xf32, #tpu.memory_space<vmem>>, vector<2x32xf32>,
    return
  }
  func.func @transform_0(%arg0: i32) -> (i32, i32) {
    %c0_i32 = arith.constant 0 : i32
    %c0_i32_0 = arith.constant 0 : i32
    return %arg0, %c0_i32 : i32, i32
  }
  func.func @transform_1(%arg0: i32) -> (i32, i32) {
    %c0_i32 = arith.constant 0 : i32
    %c0_i32_0 = arith.constant 0 : i32
    %c0_i32_1 = arith.constant 0 : i32
    return %c0_i32, %c0_i32_0 : i32, i32
  }
  func.func @transform_2(%arg0: i32) -> (i32, i32) {
    %c0_i32 = arith.constant 0 : i32
    %c0_i32_0 = arith.constant 0 : i32
    %c0_i32_1 = arith.constant 0 : i32
    return %c0_i32, %c0_i32_0 : i32, i32
  }
  func.func @transform_3(%arg0: i32) -> (i32, i32) {
    %c0_i32 = arith.constant 0 : i32
    %c0_i32_0 = arith.constant 0 : i32
    return %arg0, %c0_i32 : i32, i32
  }
}

</mosaic_0001>

<bundles_post_ra>
// kernel: conv_encoder_forward.4
= control target key start
LH: loop header
LB: loop body
LE: loop exit
PB: predicated region body
PF: predicated region fallthrough
CT: control target
= control target key end

     0   :  { %s1661_s12 = smov 0   ;;  %s1962_s0 = inlined_call_operand.vmem [shape: bf16[4608,64], index: 0, kind: input, shape index: {}]   ;;  %s1963_s1 = inlined_call_operand.vmem [shape: bf16[64,32], index: 1, kind: input, shape index: {}]   ;;  %s1964_s2 = inlined_call_operand.vmem [shape: f32[1,32], index: 2, kind: input, shape index: {}]   ;;  %s1965_s3 = inlined_call_operand.vmem [shape: bf16[4608,32], index: 3, kind: output, shape index: {}]  }
   0x1 LB: > { %s1265_s13 = sadd.s32 4294967295, %s1639_s12   ;;  %p1269_p0 = scmp.ge.s32.totalorder %s1639_s12, 1  ;;  %s1639_s12 = sphi %s1661_s12, %s13_s12  }
   0x2   : > { %p138_p1 = scmp.lt.s32.totalorder %s1639_s12, 10 }
   0x4   : > { %p139_p2 = pnand %p1269_p0, %p138_p1 }
   0x5   : > { %v1597_v0 = vld [vmem:[%s1963_s1] sm:$0xff] (!%p139_p2)   ;;  %s1270_s16 = sshll.u32 (!%p139_p2), %s1265_s13, 6  ;;  %v1598_v1 = vld [vmem:[%s1963_s1 + $0x8] sm:$0xff] (!%p139_p2)   ;;  %v1599_v2 = vld [vmem:[%s1963_s1 + $0x10] sm:$0xff] (!%p139_p2)   ;;  %vm438_vm0 = vcmask (!%p139_p2), 523264   ;;  %vm1144_vm1 = vcmask (!%p139_p2), 257024  }
   0x6   : > { %142 = sbr.rel (%p139_p2) target bundleno = 300 (0x12c), region = 32  ;;  %p163_p3 = scmp.lt.s32.totalorder (!%p139_p2), %s1270_s16, 575  ;;  %1509 = vmatprep.subr.bf16.mxu0 (!%p139_p2), %v1597_v0  ;;  %1581 = vmatprep.subr.bf16.mxu1 (!%p139_p2), %v1597_v0  ;;  %v1600_v3 = vld [vmem:[%s1963_s1 + $0x18] sm:$0xff] (!%p139_p2)   ;;  %v1758_v36 = vld [vmem:[%s1964_s2] ss:$0 sm:$0xff] (!%p139_p2) }
   0x7   : > { %1510 = vmatpush3.bf16.msra.mxu0 (!%p139_p2), %v1597_v0  ;;  %1585 = vmatpush3.bf16.msra.mxu1 (!%p139_p2), %v1597_v0 }
   0x8   : > { %1511 = vmatprep.subr.bf16.mxu0 (!%p139_p2), %v1598_v1  ;;  %1582 = vmatprep.subr.bf16.mxu1 (!%p139_p2), %v1598_v1 }
   0xb   : > { %1512 = vmatpush3.bf16.msra.mxu0 (!%p139_p2), %v1598_v1  ;;  %1586 = vmatpush3.bf16.msra.mxu1 (!%p139_p2), %v1598_v1 }
   0xc   : > { %1513 = vmatprep.subr.bf16.mxu0 (!%p139_p2), %v1599_v2  ;;  %1583 = vmatprep.subr.bf16.mxu1 (!%p139_p2), %v1599_v2 }
   0xd   : > { %s1967_s16 = smov (!%p163_p3, %s1270_s16), 575 }
   0xe   : > { %s1271_s21 = sshll.u32 %s1967_s16, 2 }
   0xf   : > { %s1689_s26 = scalar_lea.vmem %s1962_s0, %s1271_s21  ;;  %1514 = vmatpush3.bf16.msra.mxu0 %v1599_v2  ;;  %1587 = vmatpush3.bf16.msra.mxu1 %v1599_v2  ;;  %s1771_s4 = scalar_lea.vmem %s1965_s3, %s1271_s21 }
  0x10   : > { %v1601_v4 = vld [vmem:[%s1689_s26] sm:$0xff]   ;;  %1515 = vmatprep.subr.bf16.mxu0 %v1600_v3  ;;  %1584 = vmatprep.subr.bf16.mxu1 %v1600_v3  ;;  %v1603_v6 = vld [vmem:[%s1689_s26 + $0x8] sm:$0xff]   ;;  %v1605_v8 = vld [vmem:[%s1689_s26 + $0x10] sm:$0xff]  }
  0x11   : > { %v1602_v5 = vld [vmem:[%s1689_s26 + $0x80] sm:$0xff]   ;;  %1517 = vmatprep.mubr.msk.bf16.mxu0 %vm438_vm0, %v1601_v4  ;;  %v1604_v7 = vld [vmem:[%s1689_s26 + $0x88] sm:$0xff]   ;;  %v1606_v9 = vld [vmem:[%s1689_s26 + $0x90] sm:$0xff]  }
  0x12   : > { %1549 = vmatprep.mubr.msk.bf16.mxu1 %vm438_vm0, %v1602_v5  ;;  %v1607_v10 = vld [vmem:[%s1689_s26 + $0x18] sm:$0xff]   ;;  %v1609_v12 = vld [vmem:[%s1689_s26 + $0x20] sm:$0xff]   ;;  %v1611_v14 = vld [vmem:[%s1689_s26 + $0x28] sm:$0xff]  }
  0x13   : > { %1516 = vmatpush3.bf16.msra.mxu0 %v1600_v3  ;;  %1588 = vmatpush3.bf16.msra.mxu1 %v1600_v3  ;;  %v1608_v11 = vld [vmem:[%s1689_s26 + $0x98] sm:$0xff]   ;;  %v1610_v13 = vld [vmem:[%s1689_s26 + $0xa0] sm:$0xff]   ;;  %v1612_v15 = vld [vmem:[%s1689_s26 + $0xa8] sm:$0xff]  }
  0x14   : > { %v1613_v16 = vld [vmem:[%s1689_s26 + $0x30] sm:$0xff]   ;;  %v1615_v18 = vld [vmem:[%s1689_s26 + $0x38] sm:$0xff]   ;;  %v1617_v20 = vld [vmem:[%s1689_s26 + $0x40] sm:$0xff]  }
  0x15   : > { %v1614_v17 = vld [vmem:[%s1689_s26 + $0xb0] sm:$0xff]   ;;  %v1616_v19 = vld [vmem:[%s1689_s26 + $0xb8] sm:$0xff]   ;;  %v1618_v21 = vld [vmem:[%s1689_s26 + $0xc0] sm:$0xff]  }
  0x16   : > { %1518 = vmatmul.mubr.msk.bf16.vlgmr.msra.gmra.mrb[0].mxu0 %vm438_vm0, %v1603_v6  ;;  %1550 = vmatmul.mubr.msk.bf16.vlgmr.msra.gmra.mrb[0].mxu1 %vm438_vm0, %v1604_v7  ;;  %v1619_v22 = vld [vmem:[%s1689_s26 + $0x48] sm:$0xff]   ;;  %v1621_v24 = vld [vmem:[%s1689_s26 + $0x50] sm:$0xff]   ;;  %v1623_v26 = vld [vmem:[%s1689_s26 + $0x58] sm:$0xff]  }
  0x17   : > { %1521 = vmatprep.mubr.msk.bf16.mxu0 %vm438_vm0, %v1605_v8  ;;  %1553 = vmatprep.mubr.msk.bf16.mxu1 %vm438_vm0, %v1606_v9  ;;  %v1620_v23 = vld [vmem:[%s1689_s26 + $0xc8] sm:$0xff]   ;;  %v1622_v25 = vld [vmem:[%s1689_s26 + $0xd0] sm:$0xff]   ;;  %v1624_v27 = vld [vmem:[%s1689_s26 + $0xd8] sm:$0xff]  }
  0x18   : > { %v1625_v28 = vld [vmem:[%s1689_s26 + $0x60] sm:$0xff]   ;;  %v1627_v30 = vld [vmem:[%s1689_s26 + $0x68] sm:$0xff]   ;;  %v1629_v32 = vld [vmem:[%s1689_s26 + $0x70] sm:$0xff]  }
  0x19   : > { %v1626_v29 = vld [vmem:[%s1689_s26 + $0xe0] sm:$0xff]   ;;  %v1628_v31 = vld [vmem:[%s1689_s26 + $0xe8] sm:$0xff]   ;;  %v1630_v33 = vld [vmem:[%s1689_s26 + $0xf0] sm:$0xff]  }
  0x1a   : > { %v1631_v34 = vld [vmem:[%s1689_s26 + $0x78] sm:$0xff]  }
  0x1b   : > { %v1632_v35 = vld [vmem:[%s1689_s26 + $0xf8] sm:$0xff]  }
  0x1e   : > { %1522 = vmatmul.mubr.msk.bf16.gmra.mrb[4].mxu0 %vm438_vm0, %v1607_v10  ;;  %1554 = vmatmul.mubr.msk.bf16.gmra.mrb[4].mxu1 %vm438_vm0, %v1608_v11 }
  0x1f   : > { %1525 = vmatprep.mubr.msk.bf16.mxu0 %vm438_vm0, %v1609_v12  ;;  %1557 = vmatprep.mubr.msk.bf16.mxu1 %vm438_vm0, %v1610_v13 }
  0x26   : > { %1526 = vmatmul.mubr.msk.bf16.gmra.mrb[8].mxu0 %vm438_vm0, %v1611_v14  ;;  %1558 = vmatmul.mubr.msk.bf16.gmra.mrb[8].mxu1 %vm438_vm0, %v1612_v15 }
  0x27   : > { %1529 = vmatprep.mubr.msk.bf16.mxu0 %vm438_vm0, %v1613_v16  ;;  %1561 = vmatprep.mubr.msk.bf16.mxu1 %vm438_vm0, %v1614_v17 }
  0x2e   : > { %1530 = vmatmul.mubr.msk.bf16.gmra.mrb[12].mxu0 %vm438_vm0, %v1615_v18  ;;  %1562 = vmatmul.mubr.msk.bf16.gmra.mrb[12].mxu1 %vm438_vm0, %v1616_v19 }
  0x2f   : > { %1533 = vmatprep.mubr.msk.bf16.mxu0 %vm438_vm0, %v1617_v20  ;;  %1565 = vmatprep.mubr.msk.bf16.mxu1 %vm438_vm0, %v1618_v21 }
  0x36   : > { %1534 = vmatmul.mubr.msk.bf16.gmra.mrb[16].mxu0 %vm438_vm0, %v1619_v22  ;;  %1566 = vmatmul.mubr.msk.bf16.gmra.mrb[16].mxu1 %vm438_vm0, %v1620_v23 }
  0x37   : > { %1537 = vmatprep.mubr.msk.bf16.mxu0 %vm438_vm0, %v1621_v24  ;;  %1569 = vmatprep.mubr.msk.bf16.mxu1 %vm438_vm0, %v1622_v25 }
  0x3e   : > { %1538 = vmatmul.mubr.msk.bf16.gmra.mrb[20].mxu0 %vm438_vm0, %v1623_v26  ;;  %1570 = vmatmul.mubr.msk.bf16.gmra.mrb[20].mxu1 %vm438_vm0, %v1624_v27 }
  0x3f   : > { %1541 = vmatprep.mubr.msk.bf16.mxu0 %vm438_vm0, %v1625_v28  ;;  %1573 = vmatprep.mubr.msk.bf16.mxu1 %vm438_vm0, %v1626_v29 }
  0x46   : > { %1542 = vmatmul.mubr.msk.bf16.gmra.mrb[24].mxu0 %vm438_vm0, %v1627_v30  ;;  %1574 = vmatmul.mubr.msk.bf16.gmra.mrb[24].mxu1 %vm438_vm0, %v1628_v31 }
  0x47   : > { %1545 = vmatprep.mubr.msk.bf16.mxu0 %vm438_vm0, %v1629_v32  ;;  %1577 = vmatprep.mubr.msk.bf16.mxu1 %vm438_vm0, %v1630_v33 }
  0x4e   : > { %1546 = vmatmul.mubr.msk.bf16.gmra.mrb[28].mxu0 %vm438_vm0, %v1631_v34  ;;  %1578 = vmatmul.mubr.msk.bf16.gmra.mrb[28].mxu1 %vm438_vm0, %v1632_v35 }
  0xe9   : > { %v1519_v37 = vpop.f32.mrb[0].mxu0  ;;  %v1551_v38 = vpop.f32.mrb[0].mxu1 }
  0xea   : > { %v578_v39 = vadd.f32 %v1519_v37, %v1758_v36  ;;  %v706_v40 = vadd.f32 %v1551_v38, %v1758_v36  ;;  %v569_v41 = vpop.f32.mrb[1].mxu0  ;;  %v697_v42 = vpop.f32.mrb[1].mxu1 }
  0xeb   : > { %v570_v43 = vadd.f32 %v1758_v36, %v569_v41  ;;  %v698_v44 = vadd.f32 %v1758_v36, %v697_v42  ;;  %v1520_v45 = vpop.f32.mrb[2].mxu0  ;;  %v1552_v46 = vpop.f32.mrb[2].mxu1 }
  0xec   : > { %v826_v47 = vmax.f32 %v578_v39, 0.0  ;;  %v858_v48 = vmax.f32 %v706_v40, 0.0  ;;  %v581_v49 = vadd.f32 %v1520_v45, %v1758_v36  ;;  %v709_v50 = vadd.f32 %v1552_v46, %v1758_v36  ;;  %v572_v51 = vpop.f32.mrb[3].mxu0  ;;  %v700_v52 = vpop.f32.mrb[3].mxu1 }
  0xed   : > { %v824_v53 = vmax.f32 %v570_v43, 0.0  ;;  %v856_v54 = vmax.f32 %v698_v44, 0.0  ;;  %v573_v55 = vadd.f32 %v1758_v36, %v572_v51  ;;  %v701_v56 = vadd.f32 %v1758_v36, %v700_v52 }
  0xee   : > { %v1411_v57 = vpack.c.bf16 %v826_v47, %v826_v47  ;;  %v1443_v58 = vpack.c.bf16 %v858_v48, %v858_v48  ;;  %v827_v59 = vmax.f32 %v581_v49, 0.0  ;;  %v859_v60 = vmax.f32 %v709_v50, 0.0 }
  0xef   : > { %v1409_v61 = vpack.c.bf16 %v824_v53, %v824_v53  ;;  %v1441_v62 = vpack.c.bf16 %v856_v54, %v856_v54  ;;  %v825_v63 = vmax.f32 %v573_v55, 0.0  ;;  %v857_v0 = vmax.f32 %v701_v56, 0.0 }
  0xf0   : > { %1147 = vst.msk [vmem:[%s1771_s4 + $0x8] sm:$0xf] %vm1144_vm1, %v1411_v57  ;;  %1179 = vst.msk [vmem:[%s1771_s4 + $0x88] sm:$0xf] %vm1144_vm1, %v1443_v58  ;;  %v1412_v1 = vpack.c.bf16 %v827_v59, %v827_v59  ;;  %v1444_v2 = vpack.c.bf16 %v859_v60, %v859_v60 }
  0xf1   : > { %1145 = vst.msk [vmem:[%s1771_s4] sm:$0xf] %vm1144_vm1, %v1409_v61  ;;  %1177 = vst.msk [vmem:[%s1771_s4 + $0x80] sm:$0xf] %vm1144_vm1, %v1441_v62  ;;  %v1410_v3 = vpack.c.bf16 %v825_v63, %v825_v63  ;;  %v1442_v4 = vpack.c.bf16 %v857_v0, %v857_v0  ;;  %v1523_v5 = vpop.f32.mrb[4].mxu0  ;;  %v1555_v6 = vpop.f32.mrb[4].mxu1 }
  0xf2   : > { %1148 = vst.msk [vmem:[%s1771_s4 + $0xc] sm:$0xf] %vm1144_vm1, %v1412_v1  ;;  %1180 = vst.msk [vmem:[%s1771_s4 + $0x8c] sm:$0xf] %vm1144_vm1, %v1444_v2  ;;  %v594_v7 = vadd.f32 %v1523_v5, %v1758_v36  ;;  %v722_v8 = vadd.f32 %v1555_v6, %v1758_v36  ;;  %v585_v9 = vpop.f32.mrb[5].mxu0  ;;  %v713_v10 = vpop.f32.mrb[5].mxu1 }
  0xf3   : > { %1146 = vst.msk [vmem:[%s1771_s4 + $0x4] sm:$0xf] %vm1144_vm1, %v1410_v3  ;;  %1178 = vst.msk [vmem:[%s1771_s4 + $0x84] sm:$0xf] %vm1144_vm1, %v1442_v4  ;;  %v586_v11 = vadd.f32 %v1758_v36, %v585_v9  ;;  %v714_v12 = vadd.f32 %v1758_v36, %v713_v10  ;;  %v1524_v13 = vpop.f32.mrb[6].mxu0  ;;  %v1556_v14 = vpop.f32.mrb[6].mxu1 }
  0xf4   : > { %v830_v15 = vmax.f32 %v594_v7, 0.0  ;;  %v862_v16 = vmax.f32 %v722_v8, 0.0  ;;  %v597_v17 = vadd.f32 %v1524_v13, %v1758_v36  ;;  %v725_v18 = vadd.f32 %v1556_v14, %v1758_v36  ;;  %v588_v19 = vpop.f32.mrb[7].mxu0  ;;  %v716_v20 = vpop.f32.mrb[7].mxu1 }
  0xf5   : > { %v828_v21 = vmax.f32 %v586_v11, 0.0  ;;  %v860_v22 = vmax.f32 %v714_v12, 0.0  ;;  %v589_v23 = vadd.f32 %v1758_v36, %v588_v19  ;;  %v717_v24 = vadd.f32 %v1758_v36, %v716_v20 }
  0xf6   : > { %v1415_v25 = vpack.c.bf16 %v830_v15, %v830_v15  ;;  %v1447_v26 = vpack.c.bf16 %v862_v16, %v862_v16  ;;  %v831_v27 = vmax.f32 %v597_v17, 0.0  ;;  %v863_v28 = vmax.f32 %v725_v18, 0.0 }
  0xf7   : > { %v1413_v29 = vpack.c.bf16 %v828_v21, %v828_v21  ;;  %v1445_v30 = vpack.c.bf16 %v860_v22, %v860_v22  ;;  %v829_v31 = vmax.f32 %v589_v23, 0.0  ;;  %v861_v32 = vmax.f32 %v717_v24, 0.0 }
  0xf8   : > { %1151 = vst.msk [vmem:[%s1771_s4 + $0x18] sm:$0xf] %vm1144_vm1, %v1415_v25  ;;  %1183 = vst.msk [vmem:[%s1771_s4 + $0x98] sm:$0xf] %vm1144_vm1, %v1447_v26  ;;  %v1416_v33 = vpack.c.bf16 %v831_v27, %v831_v27  ;;  %v1448_v34 = vpack.c.bf16 %v863_v28, %v863_v28 }
  0xf9   : > { %1149 = vst.msk [vmem:[%s1771_s4 + $0x10] sm:$0xf] %vm1144_vm1, %v1413_v29  ;;  %1181 = vst.msk [vmem:[%s1771_s4 + $0x90] sm:$0xf] %vm1144_vm1, %v1445_v30  ;;  %v1414_v35 = vpack.c.bf16 %v829_v31, %v829_v31  ;;  %v1446_v37 = vpack.c.bf16 %v861_v32, %v861_v32  ;;  %v1527_v38 = vpop.f32.mrb[8].mxu0  ;;  %v1559_v39 = vpop.f32.mrb[8].mxu1 }
  0xfa   : > { %1152 = vst.msk [vmem:[%s1771_s4 + $0x1c] sm:$0xf] %vm1144_vm1, %v1416_v33  ;;  %1184 = vst.msk [vmem:[%s1771_s4 + $0x9c] sm:$0xf] %vm1144_vm1, %v1448_v34  ;;  %v610_v40 = vadd.f32 %v1527_v38, %v1758_v36  ;;  %v738_v41 = vadd.f32 %v1559_v39, %v1758_v36  ;;  %v601_v42 = vpop.f32.mrb[9].mxu0  ;;  %v729_v43 = vpop.f32.mrb[9].mxu1 }
  0xfb   : > { %1150 = vst.msk [vmem:[%s1771_s4 + $0x14] sm:$0xf] %vm1144_vm1, %v1414_v35  ;;  %1182 = vst.msk [vmem:[%s1771_s4 + $0x94] sm:$0xf] %vm1144_vm1, %v1446_v37  ;;  %v602_v44 = vadd.f32 %v1758_v36, %v601_v42  ;;  %v730_v45 = vadd.f32 %v1758_v36, %v729_v43  ;;  %v1528_v46 = vpop.f32.mrb[10].mxu0  ;;  %v1560_v47 = vpop.f32.mrb[10].mxu1 }
  0xfc   : > { %v834_v48 = vmax.f32 %v610_v40, 0.0  ;;  %v866_v49 = vmax.f32 %v738_v41, 0.0  ;;  %v613_v50 = vadd.f32 %v1528_v46, %v1758_v36  ;;  %v741_v51 = vadd.f32 %v1560_v47, %v1758_v36  ;;  %v604_v52 = vpop.f32.mrb[11].mxu0  ;;  %v732_v53 = vpop.f32.mrb[11].mxu1 }
  0xfd   : > { %v832_v54 = vmax.f32 %v602_v44, 0.0  ;;  %v864_v55 = vmax.f32 %v730_v45, 0.0  ;;  %v605_v56 = vadd.f32 %v1758_v36, %v604_v52  ;;  %v733_v57 = vadd.f32 %v1758_v36, %v732_v53 }
  0xfe   : > { %v1419_v58 = vpack.c.bf16 %v834_v48, %v834_v48  ;;  %v1451_v59 = vpack.c.bf16 %v866_v49, %v866_v49  ;;  %v835_v60 = vmax.f32 %v613_v50, 0.0  ;;  %v867_v61 = vmax.f32 %v741_v51, 0.0 }
  0xff   : > { %v1417_v62 = vpack.c.bf16 %v832_v54, %v832_v54  ;;  %v1449_v63 = vpack.c.bf16 %v864_v55, %v864_v55  ;;  %v833_v0 = vmax.f32 %v605_v56, 0.0  ;;  %v865_v1 = vmax.f32 %v733_v57, 0.0 }
 0x100   : > { %1155 = vst.msk [vmem:[%s1771_s4 + $0x28] sm:$0xf] %vm1144_vm1, %v1419_v58  ;;  %1187 = vst.msk [vmem:[%s1771_s4 + $0xa8] sm:$0xf] %vm1144_vm1, %v1451_v59  ;;  %v1420_v2 = vpack.c.bf16 %v835_v60, %v835_v60  ;;  %v1452_v3 = vpack.c.bf16 %v867_v61, %v867_v61 }
 0x101   : > { %1153 = vst.msk [vmem:[%s1771_s4 + $0x20] sm:$0xf] %vm1144_vm1, %v1417_v62  ;;  %1185 = vst.msk [vmem:[%s1771_s4 + $0xa0] sm:$0xf] %vm1144_vm1, %v1449_v63  ;;  %v1418_v4 = vpack.c.bf16 %v833_v0, %v833_v0  ;;  %v1450_v5 = vpack.c.bf16 %v865_v1, %v865_v1  ;;  %v1531_v6 = vpop.f32.mrb[12].mxu0  ;;  %v1563_v7 = vpop.f32.mrb[12].mxu1 }
 0x102   : > { %1156 = vst.msk [vmem:[%s1771_s4 + $0x2c] sm:$0xf] %vm1144_vm1, %v1420_v2  ;;  %1188 = vst.msk [vmem:[%s1771_s4 + $0xac] sm:$0xf] %vm1144_vm1, %v1452_v3  ;;  %v626_v8 = vadd.f32 %v1531_v6, %v1758_v36  ;;  %v754_v9 = vadd.f32 %v1563_v7, %v1758_v36  ;;  %v617_v10 = vpop.f32.mrb[13].mxu0  ;;  %v745_v11 = vpop.f32.mrb[13].mxu1 }
 0x103   : > { %1154 = vst.msk [vmem:[%s1771_s4 + $0x24] sm:$0xf] %vm1144_vm1, %v1418_v4  ;;  %1186 = vst.msk [vmem:[%s1771_s4 + $0xa4] sm:$0xf] %vm1144_vm1, %v1450_v5  ;;  %v618_v12 = vadd.f32 %v1758_v36, %v617_v10  ;;  %v746_v13 = vadd.f32 %v1758_v36, %v745_v11  ;;  %v1532_v14 = vpop.f32.mrb[14].mxu0  ;;  %v1564_v15 = vpop.f32.mrb[14].mxu1 }
 0x104   : > { %v838_v16 = vmax.f32 %v626_v8, 0.0  ;;  %v870_v17 = vmax.f32 %v754_v9, 0.0  ;;  %v629_v18 = vadd.f32 %v1532_v14, %v1758_v36  ;;  %v757_v19 = vadd.f32 %v1564_v15, %v1758_v36  ;;  %v620_v20 = vpop.f32.mrb[15].mxu0  ;;  %v748_v21 = vpop.f32.mrb[15].mxu1 }
 0x105   : > { %v836_v22 = vmax.f32 %v618_v12, 0.0  ;;  %v868_v23 = vmax.f32 %v746_v13, 0.0  ;;  %v621_v24 = vadd.f32 %v1758_v36, %v620_v20  ;;  %v749_v25 = vadd.f32 %v1758_v36, %v748_v21 }
 0x106   : > { %v1423_v26 = vpack.c.bf16 %v838_v16, %v838_v16  ;;  %v1455_v27 = vpack.c.bf16 %v870_v17, %v870_v17  ;;  %v839_v28 = vmax.f32 %v629_v18, 0.0  ;;  %v871_v29 = vmax.f32 %v757_v19, 0.0 }
 0x107   : > { %v1421_v30 = vpack.c.bf16 %v836_v22, %v836_v22  ;;  %v1453_v31 = vpack.c.bf16 %v868_v23, %v868_v23  ;;  %v837_v32 = vmax.f32 %v621_v24, 0.0  ;;  %v869_v33 = vmax.f32 %v749_v25, 0.0 }
 0x108   : > { %1159 = vst.msk [vmem:[%s1771_s4 + $0x38] sm:$0xf] %vm1144_vm1, %v1423_v26  ;;  %1191 = vst.msk [vmem:[%s1771_s4 + $0xb8] sm:$0xf] %vm1144_vm1, %v1455_v27  ;;  %v1424_v34 = vpack.c.bf16 %v839_v28, %v839_v28  ;;  %v1456_v35 = vpack.c.bf16 %v871_v29, %v871_v29 }
 0x109   : > { %1157 = vst.msk [vmem:[%s1771_s4 + $0x30] sm:$0xf] %vm1144_vm1, %v1421_v30  ;;  %1189 = vst.msk [vmem:[%s1771_s4 + $0xb0] sm:$0xf] %vm1144_vm1, %v1453_v31  ;;  %v1422_v37 = vpack.c.bf16 %v837_v32, %v837_v32  ;;  %v1454_v38 = vpack.c.bf16 %v869_v33, %v869_v33  ;;  %v1535_v39 = vpop.f32.mrb[16].mxu0  ;;  %v1567_v40 = vpop.f32.mrb[16].mxu1 }
 0x10a   : > { %1160 = vst.msk [vmem:[%s1771_s4 + $0x3c] sm:$0xf] %vm1144_vm1, %v1424_v34  ;;  %1192 = vst.msk [vmem:[%s1771_s4 + $0xbc] sm:$0xf] %vm1144_vm1, %v1456_v35  ;;  %v642_v41 = vadd.f32 %v1535_v39, %v1758_v36  ;;  %v770_v42 = vadd.f32 %v1567_v40, %v1758_v36  ;;  %v633_v43 = vpop.f32.mrb[17].mxu0  ;;  %v761_v44 = vpop.f32.mrb[17].mxu1 }
 0x10b   : > { %1158 = vst.msk [vmem:[%s1771_s4 + $0x34] sm:$0xf] %vm1144_vm1, %v1422_v37  ;;  %1190 = vst.msk [vmem:[%s1771_s4 + $0xb4] sm:$0xf] %vm1144_vm1, %v1454_v38  ;;  %v634_v45 = vadd.f32 %v1758_v36, %v633_v43  ;;  %v762_v46 = vadd.f32 %v1758_v36, %v761_v44  ;;  %v1536_v47 = vpop.f32.mrb[18].mxu0  ;;  %v1568_v48 = vpop.f32.mrb[18].mxu1 }
 0x10c   : > { %v842_v49 = vmax.f32 %v642_v41, 0.0  ;;  %v874_v50 = vmax.f32 %v770_v42, 0.0  ;;  %v645_v51 = vadd.f32 %v1536_v47, %v1758_v36  ;;  %v773_v52 = vadd.f32 %v1568_v48, %v1758_v36  ;;  %v636_v53 = vpop.f32.mrb[19].mxu0  ;;  %v764_v54 = vpop.f32.mrb[19].mxu1 }
 0x10d   : > { %v840_v55 = vmax.f32 %v634_v45, 0.0  ;;  %v872_v56 = vmax.f32 %v762_v46, 0.0  ;;  %v637_v57 = vadd.f32 %v1758_v36, %v636_v53  ;;  %v765_v58 = vadd.f32 %v1758_v36, %v764_v54 }
 0x10e   : > { %v1427_v59 = vpack.c.bf16 %v842_v49, %v842_v49  ;;  %v1459_v60 = vpack.c.bf16 %v874_v50, %v874_v50  ;;  %v843_v61 = vmax.f32 %v645_v51, 0.0  ;;  %v875_v62 = vmax.f32 %v773_v52, 0.0 }
 0x10f   : > { %v1425_v63 = vpack.c.bf16 %v840_v55, %v840_v55  ;;  %v1457_v0 = vpack.c.bf16 %v872_v56, %v872_v56  ;;  %v841_v1 = vmax.f32 %v637_v57, 0.0  ;;  %v873_v2 = vmax.f32 %v765_v58, 0.0 }
 0x110   : > { %1163 = vst.msk [vmem:[%s1771_s4 + $0x48] sm:$0xf] %vm1144_vm1, %v1427_v59  ;;  %1195 = vst.msk [vmem:[%s1771_s4 + $0xc8] sm:$0xf] %vm1144_vm1, %v1459_v60  ;;  %v1428_v3 = vpack.c.bf16 %v843_v61, %v843_v61  ;;  %v1460_v4 = vpack.c.bf16 %v875_v62, %v875_v62 }
 0x111   : > { %1161 = vst.msk [vmem:[%s1771_s4 + $0x40] sm:$0xf] %vm1144_vm1, %v1425_v63  ;;  %1193 = vst.msk [vmem:[%s1771_s4 + $0xc0] sm:$0xf] %vm1144_vm1, %v1457_v0  ;;  %v1426_v5 = vpack.c.bf16 %v841_v1, %v841_v1  ;;  %v1458_v6 = vpack.c.bf16 %v873_v2, %v873_v2  ;;  %v1539_v7 = vpop.f32.mrb[20].mxu0  ;;  %v1571_v8 = vpop.f32.mrb[20].mxu1 }
 0x112   : > { %1164 = vst.msk [vmem:[%s1771_s4 + $0x4c] sm:$0xf] %vm1144_vm1, %v1428_v3  ;;  %1196 = vst.msk [vmem:[%s1771_s4 + $0xcc] sm:$0xf] %vm1144_vm1, %v1460_v4  ;;  %v658_v9 = vadd.f32 %v1539_v7, %v1758_v36  ;;  %v786_v10 = vadd.f32 %v1571_v8, %v1758_v36  ;;  %v649_v11 = vpop.f32.mrb[21].mxu0  ;;  %v777_v12 = vpop.f32.mrb[21].mxu1 }
 0x113   : > { %1162 = vst.msk [vmem:[%s1771_s4 + $0x44] sm:$0xf] %vm1144_vm1, %v1426_v5  ;;  %1194 = vst.msk [vmem:[%s1771_s4 + $0xc4] sm:$0xf] %vm1144_vm1, %v1458_v6  ;;  %v650_v13 = vadd.f32 %v1758_v36, %v649_v11  ;;  %v778_v14 = vadd.f32 %v1758_v36, %v777_v12  ;;  %v1540_v15 = vpop.f32.mrb[22].mxu0  ;;  %v1572_v16 = vpop.f32.mrb[22].mxu1 }
 0x114   : > { %v846_v17 = vmax.f32 %v658_v9, 0.0  ;;  %v878_v18 = vmax.f32 %v786_v10, 0.0  ;;  %v661_v19 = vadd.f32 %v1540_v15, %v1758_v36  ;;  %v789_v20 = vadd.f32 %v1572_v16, %v1758_v36  ;;  %v652_v21 = vpop.f32.mrb[23].mxu0  ;;  %v780_v22 = vpop.f32.mrb[23].mxu1 }
 0x115   : > { %v844_v23 = vmax.f32 %v650_v13, 0.0  ;;  %v876_v24 = vmax.f32 %v778_v14, 0.0  ;;  %v653_v25 = vadd.f32 %v1758_v36, %v652_v21  ;;  %v781_v26 = vadd.f32 %v1758_v36, %v780_v22 }
 0x116   : > { %v1431_v27 = vpack.c.bf16 %v846_v17, %v846_v17  ;;  %v1463_v28 = vpack.c.bf16 %v878_v18, %v878_v18  ;;  %v847_v29 = vmax.f32 %v661_v19, 0.0  ;;  %v879_v30 = vmax.f32 %v789_v20, 0.0 }
 0x117   : > { %v1429_v31 = vpack.c.bf16 %v844_v23, %v844_v23  ;;  %v1461_v32 = vpack.c.bf16 %v876_v24, %v876_v24  ;;  %v845_v33 = vmax.f32 %v653_v25, 0.0  ;;  %v877_v34 = vmax.f32 %v781_v26, 0.0 }
 0x118   : > { %1167 = vst.msk [vmem:[%s1771_s4 + $0x58] sm:$0xf] %vm1144_vm1, %v1431_v27  ;;  %1199 = vst.msk [vmem:[%s1771_s4 + $0xd8] sm:$0xf] %vm1144_vm1, %v1463_v28  ;;  %v1432_v35 = vpack.c.bf16 %v847_v29, %v847_v29  ;;  %v1464_v37 = vpack.c.bf16 %v879_v30, %v879_v30 }
 0x119   : > { %1165 = vst.msk [vmem:[%s1771_s4 + $0x50] sm:$0xf] %vm1144_vm1, %v1429_v31  ;;  %1197 = vst.msk [vmem:[%s1771_s4 + $0xd0] sm:$0xf] %vm1144_vm1, %v1461_v32  ;;  %v1430_v38 = vpack.c.bf16 %v845_v33, %v845_v33  ;;  %v1462_v39 = vpack.c.bf16 %v877_v34, %v877_v34  ;;  %v1543_v40 = vpop.f32.mrb[24].mxu0  ;;  %v1575_v41 = vpop.f32.mrb[24].mxu1 }
 0x11a   : > { %1168 = vst.msk [vmem:[%s1771_s4 + $0x5c] sm:$0xf] %vm1144_vm1, %v1432_v35  ;;  %1200 = vst.msk [vmem:[%s1771_s4 + $0xdc] sm:$0xf] %vm1144_vm1, %v1464_v37  ;;  %v674_v42 = vadd.f32 %v1543_v40, %v1758_v36  ;;  %v802_v43 = vadd.f32 %v1575_v41, %v1758_v36  ;;  %v665_v44 = vpop.f32.mrb[25].mxu0  ;;  %v793_v45 = vpop.f32.mrb[25].mxu1 }
 0x11b   : > { %1166 = vst.msk [vmem:[%s1771_s4 + $0x54] sm:$0xf] %vm1144_vm1, %v1430_v38  ;;  %1198 = vst.msk [vmem:[%s1771_s4 + $0xd4] sm:$0xf] %vm1144_vm1, %v1462_v39  ;;  %v666_v46 = vadd.f32 %v1758_v36, %v665_v44  ;;  %v794_v47 = vadd.f32 %v1758_v36, %v793_v45  ;;  %v1544_v48 = vpop.f32.mrb[26].mxu0  ;;  %v1576_v49 = vpop.f32.mrb[26].mxu1 }
 0x11c   : > { %v850_v50 = vmax.f32 %v674_v42, 0.0  ;;  %v882_v51 = vmax.f32 %v802_v43, 0.0  ;;  %v677_v52 = vadd.f32 %v1544_v48, %v1758_v36  ;;  %v805_v53 = vadd.f32 %v1576_v49, %v1758_v36  ;;  %v668_v54 = vpop.f32.mrb[27].mxu0  ;;  %v796_v55 = vpop.f32.mrb[27].mxu1 }
 0x11d   : > { %v848_v56 = vmax.f32 %v666_v46, 0.0  ;;  %v880_v57 = vmax.f32 %v794_v47, 0.0  ;;  %v669_v58 = vadd.f32 %v1758_v36, %v668_v54  ;;  %v797_v59 = vadd.f32 %v1758_v36, %v796_v55 }
 0x11e   : > { %v1435_v60 = vpack.c.bf16 %v850_v50, %v850_v50  ;;  %v1467_v61 = vpack.c.bf16 %v882_v51, %v882_v51  ;;  %v851_v62 = vmax.f32 %v677_v52, 0.0  ;;  %v883_v63 = vmax.f32 %v805_v53, 0.0 }
 0x11f   : > { %v1433_v0 = vpack.c.bf16 %v848_v56, %v848_v56  ;;  %v1465_v1 = vpack.c.bf16 %v880_v57, %v880_v57  ;;  %v849_v2 = vmax.f32 %v669_v58, 0.0  ;;  %v881_v3 = vmax.f32 %v797_v59, 0.0 }
 0x120   : > { %1171 = vst.msk [vmem:[%s1771_s4 + $0x68] sm:$0xf] %vm1144_vm1, %v1435_v60  ;;  %1203 = vst.msk [vmem:[%s1771_s4 + $0xe8] sm:$0xf] %vm1144_vm1, %v1467_v61  ;;  %v1436_v4 = vpack.c.bf16 %v851_v62, %v851_v62  ;;  %v1468_v5 = vpack.c.bf16 %v883_v63, %v883_v63 }
 0x121   : > { %1169 = vst.msk [vmem:[%s1771_s4 + $0x60] sm:$0xf] %vm1144_vm1, %v1433_v0  ;;  %1201 = vst.msk [vmem:[%s1771_s4 + $0xe0] sm:$0xf] %vm1144_vm1, %v1465_v1  ;;  %v1434_v6 = vpack.c.bf16 %v849_v2, %v849_v2  ;;  %v1466_v7 = vpack.c.bf16 %v881_v3, %v881_v3  ;;  %v1547_v8 = vpop.f32.mrb[28].mxu0  ;;  %v1579_v9 = vpop.f32.mrb[28].mxu1 }
 0x122   : > { %1172 = vst.msk [vmem:[%s1771_s4 + $0x6c] sm:$0xf] %vm1144_vm1, %v1436_v4  ;;  %1204 = vst.msk [vmem:[%s1771_s4 + $0xec] sm:$0xf] %vm1144_vm1, %v1468_v5  ;;  %v690_v10 = vadd.f32 %v1547_v8, %v1758_v36  ;;  %v818_v11 = vadd.f32 %v1579_v9, %v1758_v36  ;;  %v681_v12 = vpop.f32.mrb[29].mxu0  ;;  %v809_v13 = vpop.f32.mrb[29].mxu1 }
 0x123   : > { %1170 = vst.msk [vmem:[%s1771_s4 + $0x64] sm:$0xf] %vm1144_vm1, %v1434_v6  ;;  %1202 = vst.msk [vmem:[%s1771_s4 + $0xe4] sm:$0xf] %vm1144_vm1, %v1466_v7  ;;  %v682_v14 = vadd.f32 %v1758_v36, %v681_v12  ;;  %v810_v15 = vadd.f32 %v1758_v36, %v809_v13  ;;  %v1548_v16 = vpop.f32.mrb[30].mxu0  ;;  %v1580_v17 = vpop.f32.mrb[30].mxu1 }
 0x124   : > { %v854_v18 = vmax.f32 %v690_v10, 0.0  ;;  %v886_v19 = vmax.f32 %v818_v11, 0.0  ;;  %v693_v20 = vadd.f32 %v1548_v16, %v1758_v36  ;;  %v821_v21 = vadd.f32 %v1580_v17, %v1758_v36  ;;  %v684_v22 = vpop.f32.mrb[31].mxu0  ;;  %v812_v23 = vpop.f32.mrb[31].mxu1 }
 0x125   : > { %v852_v24 = vmax.f32 %v682_v14, 0.0  ;;  %v884_v25 = vmax.f32 %v810_v15, 0.0  ;;  %v685_v26 = vadd.f32 %v1758_v36, %v684_v22  ;;  %v813_v27 = vadd.f32 %v1758_v36, %v812_v23 }
 0x126   : > { %v1439_v28 = vpack.c.bf16 %v854_v18, %v854_v18  ;;  %v1471_v29 = vpack.c.bf16 %v886_v19, %v886_v19  ;;  %v855_v30 = vmax.f32 %v693_v20, 0.0  ;;  %v887_v31 = vmax.f32 %v821_v21, 0.0 }
 0x127   : > { %v1437_v32 = vpack.c.bf16 %v852_v24, %v852_v24  ;;  %v1469_v33 = vpack.c.bf16 %v884_v25, %v884_v25  ;;  %v853_v34 = vmax.f32 %v685_v26, 0.0  ;;  %v885_v35 = vmax.f32 %v813_v27, 0.0 }
 0x128   : > { %1175 = vst.msk [vmem:[%s1771_s4 + $0x78] sm:$0xf] %vm1144_vm1, %v1439_v28  ;;  %1207 = vst.msk [vmem:[%s1771_s4 + $0xf8] sm:$0xf] %vm1144_vm1, %v1471_v29  ;;  %v1440_v37 = vpack.c.bf16 %v855_v30, %v855_v30  ;;  %v1472_v38 = vpack.c.bf16 %v887_v31, %v887_v31 }
 0x129   : > { %1173 = vst.msk [vmem:[%s1771_s4 + $0x70] sm:$0xf] %vm1144_vm1, %v1437_v32  ;;  %1205 = vst.msk [vmem:[%s1771_s4 + $0xf0] sm:$0xf] %vm1144_vm1, %v1469_v33  ;;  %v1438_v36 = vpack.c.bf16 %v853_v34, %v853_v34  ;;  %v1470_v39 = vpack.c.bf16 %v885_v35, %v885_v35 }
 0x12a   : > { %1176 = vst.msk [vmem:[%s1771_s4 + $0x7c] sm:$0xf] %vm1144_vm1, %v1440_v37  ;;  %1208 = vst.msk [vmem:[%s1771_s4 + $0xfc] sm:$0xf] %vm1144_vm1, %v1472_v38 }
 0x12b   : > { %1174 = vst.msk [vmem:[%s1771_s4 + $0x74] sm:$0xf] %vm1144_vm1, %v1438_v36  ;;  %1206 = vst.msk [vmem:[%s1771_s4 + $0xf4] sm:$0xf] %vm1144_vm1, %v1470_v39 }
 0x12c PF: > { %s13_s12 = sadd.s32 1, %s1639_s12  }
 0x12d   : > { %p10_p4 = scmp.ge.s32.totalorder %s13_s12, 11  }
 0x12f   :  { %12 = sbr.rel (!%p10_p4) target bundleno = 1 (0x1), region = 62 }

// kernel: conv_encoder_forward.5
= control target key start
LH: loop header
LB: loop body
LE: loop exit
PB: predicated region body
PF: predicated region fallthrough
CT: control target
= control target key end

     0   :  { %s2358_s12 = smov 0   ;;  %s2758_s0 = inlined_call_operand.vmem [shape: bf16[1152,512], index: 0, kind: input, shape index: {}]   ;;  %s2759_s1 = inlined_call_operand.vmem [shape: bf16[512,64], index: 1, kind: input, shape index: {}]   ;;  %s2760_s2 = inlined_call_operand.vmem [shape: f32[1,64], index: 2, kind: input, shape index: {}]   ;;  %s2761_s3 = inlined_call_operand.vmem [shape: bf16[1152,64], index: 3, kind: output, shape index: {}]  }
   0x1 LB: > { %s1812_s13 = sadd.s32 4294967295, %s2335_s12   ;;  %p1816_p0 = scmp.ge.s32.totalorder %s2335_s12, 1  ;;  %s2335_s12 = sphi %s2358_s12, %s13_s12  }
   0x2   : > { %p139_p1 = scmp.lt.s32.totalorder %s2335_s12, 4 }
   0x4   : > { %p140_p2 = pnand %p1816_p0, %p139_p1 }
   0x5   : > { %v2153_v0 = vld [vmem:[%s2759_s1] sm:$0xff] (!%p140_p2)   ;;  %v2337_v1 = vmov (!%p140_p2), 0   ;;  %v2155_v3 = vld [vmem:[%s2759_s1 + $0x8] sm:$0xff] (!%p140_p2)   ;;  %v2157_v5 = vld [vmem:[%s2759_s1 + $0x10] sm:$0xff] (!%p140_p2)   ;;  %s164_s7 = smul.u32 (!%p140_p2), 48, %s1812_s13  ;;  %vm1707_vm0 = vcmask (!%p140_p2), 519168  }
   0x6   : > { %143 = sbr.rel (%p140_p2) target bundleno = 477 (0x1dd), region = 32  ;;  %1017 = vmatprep.subr.bf16.mxu1 (!%p140_p2), %v2337_v1  ;;  %1242 = vmatprep.subr.bf16.mxu0 (!%p140_p2), %v2337_v1  ;;  %v2154_v2 = vld [vmem:[%s2759_s1 + $0x80] sm:$0xff] (!%p140_p2)   ;;  %v2156_v4 = vld [vmem:[%s2759_s1 + $0x88] sm:$0xff] (!%p140_p2)   ;;  %v2158_v6 = vld [vmem:[%s2759_s1 + $0x90] sm:$0xff] (!%p140_p2)  }
   0x7   : > { %1018 = vmatpush1.bf16.msra.mxu1 (!%p140_p2), %v2153_v0  ;;  %1243 = vmatpush1.bf16.msra.mxu0 (!%p140_p2), %v2154_v2  ;;  %v2159_v7 = vld [vmem:[%s2759_s1 + $0x18] sm:$0xff] (!%p140_p2)   ;;  %v2161_v9 = vld [vmem:[%s2759_s1 + $0x20] sm:$0xff] (!%p140_p2)   ;;  %v2163_v11 = vld [vmem:[%s2759_s1 + $0x28] sm:$0xff] (!%p140_p2)   ;;  %p165_p3 = scmp.lt.s32.totalorder (!%p140_p2), %s164_s7, 143 }
   0x8   : > { %1019 = vmatprep.subr.bf16.mxu1 (!%p140_p2), %v2337_v1  ;;  %1244 = vmatprep.subr.bf16.mxu0 (!%p140_p2), %v2337_v1  ;;  %v2160_v8 = vld [vmem:[%s2759_s1 + $0x98] sm:$0xff] (!%p140_p2)   ;;  %v2162_v10 = vld [vmem:[%s2759_s1 + $0xa0] sm:$0xff] (!%p140_p2)   ;;  %v2164_v12 = vld [vmem:[%s2759_s1 + $0xa8] sm:$0xff] (!%p140_p2)  }
   0x9   : > { %v2165_v13 = vld [vmem:[%s2759_s1 + $0x30] sm:$0xff] (!%p140_p2)   ;;  %v2167_v15 = vld [vmem:[%s2759_s1 + $0x38] sm:$0xff] (!%p140_p2)   ;;  %v2169_v17 = vld [vmem:[%s2759_s1 + $0x40] sm:$0xff] (!%p140_p2)  }
   0xa   : > { %v2166_v14 = vld [vmem:[%s2759_s1 + $0xb0] sm:$0xff] (!%p140_p2)   ;;  %v2168_v16 = vld [vmem:[%s2759_s1 + $0xb8] sm:$0xff] (!%p140_p2)   ;;  %v2170_v18 = vld [vmem:[%s2759_s1 + $0xc0] sm:$0xff] (!%p140_p2)  }
   0xb   : > { %1020 = vmatpush1.bf16.msra.mxu1 (!%p140_p2), %v2155_v3  ;;  %1245 = vmatpush1.bf16.msra.mxu0 (!%p140_p2), %v2156_v4  ;;  %v2171_v20 = vld [vmem:[%s2759_s1 + $0x48] sm:$0xff] (!%p140_p2)   ;;  %v2173_v23 = vld [vmem:[%s2759_s1 + $0x50] sm:$0xff] (!%p140_p2)   ;;  %v2175_v25 = vld [vmem:[%s2759_s1 + $0x58] sm:$0xff] (!%p140_p2)  }
   0xc   : > { %1021 = vmatprep.subr.bf16.mxu1 (!%p140_p2), %v2337_v1  ;;  %1246 = vmatprep.subr.bf16.mxu0 (!%p140_p2), %v2337_v1  ;;  %v2172_v22 = vld [vmem:[%s2759_s1 + $0xc8] sm:$0xff] (!%p140_p2)   ;;  %v2174_v24 = vld [vmem:[%s2759_s1 + $0xd0] sm:$0xff] (!%p140_p2)   ;;  %v2176_v26 = vld [vmem:[%s2759_s1 + $0xd8] sm:$0xff] (!%p140_p2)  }
   0xd   : > { %s2763_s7 = smov (!%p165_p3, %s164_s7), 143  ;;  %v2177_v27 = vld [vmem:[%s2759_s1 + $0x60] sm:$0xff]   ;;  %v2179_v29 = vld [vmem:[%s2759_s1 + $0x68] sm:$0xff]   ;;  %v2181_v31 = vld [vmem:[%s2759_s1 + $0x70] sm:$0xff]  }
   0xe   : > { %s1999_s21 = sshll.u32 %s2763_s7, 4  ;;  %v2178_v28 = vld [vmem:[%s2759_s1 + $0xe0] sm:$0xff]   ;;  %v2180_v30 = vld [vmem:[%s2759_s1 + $0xe8] sm:$0xff]   ;;  %v2182_v32 = vld [vmem:[%s2759_s1 + $0xf0] sm:$0xff]   ;;  %s1819_s9 = sshll.u32 %s2763_s7, 2 }
   0xf   : > { %1022 = vmatpush1.bf16.msra.mxu1 %v2157_v5  ;;  %1247 = vmatpush1.bf16.msra.mxu0 %v2158_v6  ;;  %s2441_s26 = scalar_lea.vmem %s2758_s0, %s1999_s21  ;;  %v2183_v33 = vld [vmem:[%s2759_s1 + $0x78] sm:$0xff]   ;;  %s2611_s11 = scalar_lea.vmem %s2761_s3, %s1819_s9 }
  0x10   : > { %1023 = vmatprep.subr.bf16.mxu1 %v2337_v1  ;;  %1248 = vmatprep.subr.bf16.mxu0 %v2337_v1  ;;  %v2187_v19 = vld [vmem:[%s2441_s26 + $0x4] ss:$16 sps:$4 sm:$0xff]   ;;  %v2190_v21 = vld [vmem:[%s2441_s26 + $0xc] ss:$16 sps:$4 sm:$0xff]   ;;  %v2185_v35 = vld [vmem:[%s2441_s26] ss:$16 sps:$4 sm:$0xff]  }
  0x11   : > { %1049 = vmatprep.mubr.bf16.mxu1 %v2187_v19  ;;  %1274 = vmatprep.mubr.bf16.mxu0 %v2190_v21  ;;  %v2184_v34 = vld [vmem:[%s2759_s1 + $0xf8] sm:$0xff]   ;;  %v2191_v37 = vld [vmem:[%s2441_s26 + $0x24] ss:$16 sps:$4 sm:$0xff]   ;;  %v2195_v39 = vld [vmem:[%s2441_s26 + $0x20] ss:$16 sps:$4 sm:$0xff]  }
  0x12   : > { %v2188_v36 = vld [vmem:[%s2441_s26 + $0x8] ss:$16 sps:$4 sm:$0xff]   ;;  %v2193_v38 = vld [vmem:[%s2441_s26 + $0x2c] ss:$16 sps:$4 sm:$0xff]   ;;  %v2197_v41 = vld [vmem:[%s2441_s26 + $0x44] ss:$16 sps:$4 sm:$0xff]  }
  0x13   : > { %1024 = vmatpush1.bf16.msra.mxu1 %v2159_v7  ;;  %1249 = vmatpush1.bf16.msra.mxu0 %v2160_v8  ;;  %v2196_v40 = vld [vmem:[%s2441_s26 + $0x28] ss:$16 sps:$4 sm:$0xff]   ;;  %v2199_v42 = vld [vmem:[%s2441_s26 + $0x4c] ss:$16 sps:$4 sm:$0xff]   ;;  %v2201_v43 = vld [vmem:[%s2441_s26 + $0x40] ss:$16 sps:$4 sm:$0xff]  }
  0x14   : > { %1025 = vmatprep.subr.bf16.mxu1 %v2337_v1  ;;  %1250 = vmatprep.subr.bf16.mxu0 %v2337_v1  ;;  %v2202_v44 = vld [vmem:[%s2441_s26 + $0x48] ss:$16 sps:$4 sm:$0xff]   ;;  %v2203_v45 = vld [vmem:[%s2441_s26 + $0x64] ss:$16 sps:$4 sm:$0xff]   ;;  %v2205_v46 = vld [vmem:[%s2441_s26 + $0x6c] ss:$16 sps:$4 sm:$0xff]  }
  0x15   : > { %v2207_v47 = vld [vmem:[%s2441_s26 + $0x60] ss:$16 sps:$4 sm:$0xff]   ;;  %v2208_v48 = vld [vmem:[%s2441_s26 + $0x68] ss:$16 sps:$4 sm:$0xff]   ;;  %v2209_v49 = vld [vmem:[%s2441_s26 + $0x84] ss:$16 sps:$4 sm:$0xff]  }
  0x16   : > { %v2211_v50 = vld [vmem:[%s2441_s26 + $0x8c] ss:$16 sps:$4 sm:$0xff]   ;;  %v2213_v51 = vld [vmem:[%s2441_s26 + $0x80] ss:$16 sps:$4 sm:$0xff]   ;;  %v2214_v52 = vld [vmem:[%s2441_s26 + $0x88] ss:$16 sps:$4 sm:$0xff]  }
  0x17   : > { %1026 = vmatpush1.bf16.msra.mxu1 %v2161_v9  ;;  %1251 = vmatpush1.bf16.msra.mxu0 %v2162_v10  ;;  %v2215_v53 = vld [vmem:[%s2441_s26 + $0xa4] ss:$16 sps:$4 sm:$0xff]   ;;  %v2217_v54 = vld [vmem:[%s2441_s26 + $0xac] ss:$16 sps:$4 sm:$0xff]   ;;  %v2219_v55 = vld [vmem:[%s2441_s26 + $0xa0] ss:$16 sps:$4 sm:$0xff]  }
  0x18   : > { %1027 = vmatprep.subr.bf16.mxu1 %v2337_v1  ;;  %1252 = vmatprep.subr.bf16.mxu0 %v2337_v1  ;;  %v2220_v56 = vld [vmem:[%s2441_s26 + $0xa8] ss:$16 sps:$4 sm:$0xff]   ;;  %v2221_v57 = vld [vmem:[%s2441_s26 + $0xc4] ss:$16 sps:$4 sm:$0xff]   ;;  %v2223_v58 = vld [vmem:[%s2441_s26 + $0xcc] ss:$16 sps:$4 sm:$0xff]  }
  0x19   : > { %v2225_v59 = vld [vmem:[%s2441_s26 + $0xc0] ss:$16 sps:$4 sm:$0xff]   ;;  %v2226_v60 = vld [vmem:[%s2441_s26 + $0xc8] ss:$16 sps:$4 sm:$0xff]   ;;  %v2227_v61 = vld [vmem:[%s2441_s26 + $0xe4] ss:$16 sps:$4 sm:$0xff]  }
  0x1a   : > { %v2229_v62 = vld [vmem:[%s2441_s26 + $0xec] ss:$16 sps:$4 sm:$0xff]   ;;  %v2231_v63 = vld [vmem:[%s2441_s26 + $0xe0] ss:$16 sps:$4 sm:$0xff]   ;;  %v2232_v0 = vld [vmem:[%s2441_s26 + $0xe8] ss:$16 sps:$4 sm:$0xff]  }
  0x1b   : > { %1028 = vmatpush1.bf16.msra.mxu1 %v2163_v11  ;;  %1253 = vmatpush1.bf16.msra.mxu0 %v2164_v12  ;;  %v2235_v2 = vld [vmem:[%s2441_s26 + $0x10c] ss:$16 sps:$4 sm:$0xff]   ;;  %v2237_v3 = vld [vmem:[%s2441_s26 + $0x100] ss:$16 sps:$4 sm:$0xff]   ;;  %v2238_v4 = vld [vmem:[%s2441_s26 + $0x108] ss:$16 sps:$4 sm:$0xff]  }
  0x1c   : > { %1029 = vmatprep.subr.bf16.mxu1 %v2337_v1  ;;  %1254 = vmatprep.subr.bf16.mxu0 %v2337_v1  ;;  %v2239_v5 = vld [vmem:[%s2441_s26 + $0x124] ss:$16 sps:$4 sm:$0xff]   ;;  %v2241_v6 = vld [vmem:[%s2441_s26 + $0x12c] ss:$16 sps:$4 sm:$0xff]   ;;  %v2243_v7 = vld [vmem:[%s2441_s26 + $0x120] ss:$16 sps:$4 sm:$0xff]  }
  0x1d   : > { %v2244_v8 = vld [vmem:[%s2441_s26 + $0x128] ss:$16 sps:$4 sm:$0xff]   ;;  %v2245_v9 = vld [vmem:[%s2441_s26 + $0x144] ss:$16 sps:$4 sm:$0xff]   ;;  %v2247_v10 = vld [vmem:[%s2441_s26 + $0x14c] ss:$16 sps:$4 sm:$0xff]  }
  0x1e   : > { %v2249_v11 = vld [vmem:[%s2441_s26 + $0x140] ss:$16 sps:$4 sm:$0xff]   ;;  %v2250_v12 = vld [vmem:[%s2441_s26 + $0x148] ss:$16 sps:$4 sm:$0xff]   ;;  %v2263_v21 = vld [vmem:[%s2441_s26 + $0x1a4] ss:$16 sps:$4 sm:$0xff]  }
  0x1f   : > { %1030 = vmatpush1.bf16.msra.mxu1 %v2165_v13  ;;  %1255 = vmatpush1.bf16.msra.mxu0 %v2166_v14  ;;  %v2251_v13 = vld [vmem:[%s2441_s26 + $0x164] ss:$16 sps:$4 sm:$0xff]   ;;  %v2253_v14 = vld [vmem:[%s2441_s26 + $0x16c] ss:$16 sps:$4 sm:$0xff]   ;;  %v2261_v19 = vld [vmem:[%s2441_s26 + $0x180] ss:$16 sps:$4 sm:$0xff]  }
  0x20   : > { %1031 = vmatprep.subr.bf16.mxu1 %v2337_v1  ;;  %1256 = vmatprep.subr.bf16.mxu0 %v2337_v1 }
  0x23   : > { %1032 = vmatpush1.bf16.msra.mxu1 %v2167_v15  ;;  %1257 = vmatpush1.bf16.msra.mxu0 %v2168_v16  ;;  %v2255_v15 = vld [vmem:[%s2441_s26 + $0x160] ss:$16 sps:$4 sm:$0xff]   ;;  %v2256_v16 = vld [vmem:[%s2441_s26 + $0x168] ss:$16 sps:$4 sm:$0xff]  }
  0x24   : > { %1033 = vmatprep.subr.bf16.mxu1 %v2337_v1  ;;  %1258 = vmatprep.subr.bf16.mxu0 %v2337_v1 }
  0x27   : > { %1034 = vmatpush1.bf16.msra.mxu1 %v2169_v17  ;;  %1259 = vmatpush1.bf16.msra.mxu0 %v2170_v18  ;;  %v2257_v17 = vld [vmem:[%s2441_s26 + $0x184] ss:$16 sps:$4 sm:$0xff]   ;;  %v2259_v18 = vld [vmem:[%s2441_s26 + $0x18c] ss:$16 sps:$4 sm:$0xff]  }
  0x28   : > { %1035 = vmatprep.subr.bf16.mxu1 %v2337_v1  ;;  %1260 = vmatprep.subr.bf16.mxu0 %v2337_v1 }
  0x2b   : > { %1036 = vmatpush1.bf16.msra.mxu1 %v2171_v20  ;;  %1261 = vmatpush1.bf16.msra.mxu0 %v2172_v22  ;;  %v2262_v20 = vld [vmem:[%s2441_s26 + $0x188] ss:$16 sps:$4 sm:$0xff]   ;;  %v2265_v22 = vld [vmem:[%s2441_s26 + $0x1ac] ss:$16 sps:$4 sm:$0xff]  }
  0x2c   : > { %1037 = vmatprep.subr.bf16.mxu1 %v2337_v1  ;;  %1262 = vmatprep.subr.bf16.mxu0 %v2337_v1 }
  0x2f   : > { %1038 = vmatpush1.bf16.msra.mxu1 %v2173_v23  ;;  %1263 = vmatpush1.bf16.msra.mxu0 %v2174_v24  ;;  %v2267_v23 = vld [vmem:[%s2441_s26 + $0x1a0] ss:$16 sps:$4 sm:$0xff]   ;;  %v2268_v24 = vld [vmem:[%s2441_s26 + $0x1a8] ss:$16 sps:$4 sm:$0xff]  }
  0x30   : > { %1039 = vmatprep.subr.bf16.mxu1 %v2337_v1  ;;  %1264 = vmatprep.subr.bf16.mxu0 %v2337_v1 }
  0x33   : > { %1040 = vmatpush1.bf16.msra.mxu1 %v2175_v25  ;;  %1265 = vmatpush1.bf16.msra.mxu0 %v2176_v26  ;;  %v2269_v25 = vld [vmem:[%s2441_s26 + $0x1c4] ss:$16 sps:$4 sm:$0xff]   ;;  %v2271_v26 = vld [vmem:[%s2441_s26 + $0x1cc] ss:$16 sps:$4 sm:$0xff]  }
  0x34   : > { %1041 = vmatprep.subr.bf16.mxu1 %v2337_v1  ;;  %1266 = vmatprep.subr.bf16.mxu0 %v2337_v1 }
  0x37   : > { %1042 = vmatpush1.bf16.msra.mxu1 %v2177_v27  ;;  %1267 = vmatpush1.bf16.msra.mxu0 %v2178_v28  ;;  %v2273_v27 = vld [vmem:[%s2441_s26 + $0x1c0] ss:$16 sps:$4 sm:$0xff]   ;;  %v2274_v28 = vld [vmem:[%s2441_s26 + $0x1c8] ss:$16 sps:$4 sm:$0xff]  }
  0x38   : > { %1043 = vmatprep.subr.bf16.mxu1 %v2337_v1  ;;  %1268 = vmatprep.subr.bf16.mxu0 %v2337_v1 }
  0x3b   : > { %1044 = vmatpush1.bf16.msra.mxu1 %v2179_v29  ;;  %1269 = vmatpush1.bf16.msra.mxu0 %v2180_v30  ;;  %v2275_v29 = vld [vmem:[%s2441_s26 + $0x1e4] ss:$16 sps:$4 sm:$0xff]   ;;  %v2277_v30 = vld [vmem:[%s2441_s26 + $0x1ec] ss:$16 sps:$4 sm:$0xff]  }
  0x3c   : > { %1045 = vmatprep.subr.bf16.mxu1 %v2337_v1  ;;  %1270 = vmatprep.subr.bf16.mxu0 %v2337_v1 }
  0x3f   : > { %1046 = vmatpush1.bf16.msra.mxu1 %v2181_v31  ;;  %1271 = vmatpush1.bf16.msra.mxu0 %v2182_v32  ;;  %v2279_v31 = vld [vmem:[%s2441_s26 + $0x1e0] ss:$16 sps:$4 sm:$0xff]   ;;  %v2280_v32 = vld [vmem:[%s2441_s26 + $0x1e8] ss:$16 sps:$4 sm:$0xff]  }
  0x40   : > { %1047 = vmatprep.subr.bf16.mxu1 %v2337_v1  ;;  %1272 = vmatprep.subr.bf16.mxu0 %v2337_v1  ;;  %v2233_v1 = vld [vmem:[%s2441_s26 + $0x104] ss:$16 sps:$4 sm:$0xff]  }
  0x43   : > { %1048 = vmatpush1.bf16.msra.mxu1 %v2183_v33  ;;  %1273 = vmatpush1.bf16.msra.mxu0 %v2184_v34  ;;  %v2281_v33 = vld [vmem:[%s2441_s26 + $0x204] ss:$16 sps:$4 sm:$0xff]   ;;  %v2283_v34 = vld [vmem:[%s2441_s26 + $0x20c] ss:$16 sps:$4 sm:$0xff]  }
  0x46   : > { %1050 = vmatmul.mubr.bf16.vlgmr.msra.gmra.mrb[0].mxu1 %v2185_v35  ;;  %1275 = vmatmul.mubr.bf16.vlgmr.msra.gmra.mrb[0].mxu0 %v2188_v36  ;;  %v2285_v35 = vld [vmem:[%s2441_s26 + $0x200] ss:$16 sps:$4 sm:$0xff]   ;;  %v2286_v36 = vld [vmem:[%s2441_s26 + $0x208] ss:$16 sps:$4 sm:$0xff]  }
  0x47   : > { %1057 = vmatprep.mubr.bf16.mxu1 %v2191_v37  ;;  %1282 = vmatprep.mubr.bf16.mxu0 %v2193_v38  ;;  %v2287_v37 = vld [vmem:[%s2441_s26 + $0x224] ss:$16 sps:$4 sm:$0xff]   ;;  %v2289_v38 = vld [vmem:[%s2441_s26 + $0x22c] ss:$16 sps:$4 sm:$0xff]  }
  0x4e   : > { %1058 = vmatmul.mubr.bf16.gmra.mrb[4].mxu1 %v2195_v39  ;;  %1283 = vmatmul.mubr.bf16.gmra.mrb[4].mxu0 %v2196_v40  ;;  %v2291_v39 = vld [vmem:[%s2441_s26 + $0x220] ss:$16 sps:$4 sm:$0xff]   ;;  %v2292_v40 = vld [vmem:[%s2441_s26 + $0x228] ss:$16 sps:$4 sm:$0xff]  }
  0x4f   : > { %1065 = vmatprep.mubr.bf16.mxu1 %v2197_v41  ;;  %1290 = vmatprep.mubr.bf16.mxu0 %v2199_v42  ;;  %v2293_v41 = vld [vmem:[%s2441_s26 + $0x244] ss:$16 sps:$4 sm:$0xff]   ;;  %v2295_v42 = vld [vmem:[%s2441_s26 + $0x24c] ss:$16 sps:$4 sm:$0xff]  }
  0x56   : > { %1066 = vmatmul.mubr.bf16.gmra.mrb[8].mxu1 %v2201_v43  ;;  %1291 = vmatmul.mubr.bf16.gmra.mrb[8].mxu0 %v2202_v44  ;;  %v2297_v43 = vld [vmem:[%s2441_s26 + $0x240] ss:$16 sps:$4 sm:$0xff]   ;;  %v2298_v44 = vld [vmem:[%s2441_s26 + $0x248] ss:$16 sps:$4 sm:$0xff]  }
  0x57   : > { %1073 = vmatprep.mubr.bf16.mxu1 %v2203_v45  ;;  %1298 = vmatprep.mubr.bf16.mxu0 %v2205_v46  ;;  %v2299_v45 = vld [vmem:[%s2441_s26 + $0x264] ss:$16 sps:$4 sm:$0xff]   ;;  %v2301_v46 = vld [vmem:[%s2441_s26 + $0x26c] ss:$16 sps:$4 sm:$0xff]  }
  0x5e   : > { %1074 = vmatmul.mubr.bf16.gmra.mrb[12].mxu1 %v2207_v47  ;;  %1299 = vmatmul.mubr.bf16.gmra.mrb[12].mxu0 %v2208_v48  ;;  %v2303_v47 = vld [vmem:[%s2441_s26 + $0x260] ss:$16 sps:$4 sm:$0xff]   ;;  %v2304_v48 = vld [vmem:[%s2441_s26 + $0x268] ss:$16 sps:$4 sm:$0xff]  }
  0x5f   : > { %1081 = vmatprep.mubr.bf16.mxu1 %v2209_v49  ;;  %1306 = vmatprep.mubr.bf16.mxu0 %v2211_v50  ;;  %v2305_v49 = vld [vmem:[%s2441_s26 + $0x284] ss:$16 sps:$4 sm:$0xff]   ;;  %v2307_v50 = vld [vmem:[%s2441_s26 + $0x28c] ss:$16 sps:$4 sm:$0xff]  }
  0x66   : > { %1082 = vmatmul.mubr.bf16.gmra.mrb[16].mxu1 %v2213_v51  ;;  %1307 = vmatmul.mubr.bf16.gmra.mrb[16].mxu0 %v2214_v52  ;;  %v2309_v51 = vld [vmem:[%s2441_s26 + $0x280] ss:$16 sps:$4 sm:$0xff]   ;;  %v2310_v52 = vld [vmem:[%s2441_s26 + $0x288] ss:$16 sps:$4 sm:$0xff]  }
  0x67   : > { %1089 = vmatprep.mubr.bf16.mxu1 %v2215_v53  ;;  %1314 = vmatprep.mubr.bf16.mxu0 %v2217_v54  ;;  %v2311_v53 = vld [vmem:[%s2441_s26 + $0x2a4] ss:$16 sps:$4 sm:$0xff]   ;;  %v2313_v54 = vld [vmem:[%s2441_s26 + $0x2ac] ss:$16 sps:$4 sm:$0xff]  }
  0x6e   : > { %1090 = vmatmul.mubr.bf16.gmra.mrb[20].mxu1 %v2219_v55  ;;  %1315 = vmatmul.mubr.bf16.gmra.mrb[20].mxu0 %v2220_v56  ;;  %v2315_v55 = vld [vmem:[%s2441_s26 + $0x2a0] ss:$16 sps:$4 sm:$0xff]   ;;  %v2316_v56 = vld [vmem:[%s2441_s26 + $0x2a8] ss:$16 sps:$4 sm:$0xff]  }
  0x6f   : > { %1097 = vmatprep.mubr.bf16.mxu1 %v2221_v57  ;;  %1322 = vmatprep.mubr.bf16.mxu0 %v2223_v58  ;;  %v2317_v57 = vld [vmem:[%s2441_s26 + $0x2c4] ss:$16 sps:$4 sm:$0xff]   ;;  %v2319_v58 = vld [vmem:[%s2441_s26 + $0x2cc] ss:$16 sps:$4 sm:$0xff]  }
  0x76   : > { %1098 = vmatmul.mubr.bf16.gmra.mrb[24].mxu1 %v2225_v59  ;;  %1323 = vmatmul.mubr.bf16.gmra.mrb[24].mxu0 %v2226_v60  ;;  %v2321_v59 = vld [vmem:[%s2441_s26 + $0x2c0] ss:$16 sps:$4 sm:$0xff]   ;;  %v2322_v60 = vld [vmem:[%s2441_s26 + $0x2c8] ss:$16 sps:$4 sm:$0xff]  }
  0x77   : > { %1105 = vmatprep.mubr.bf16.mxu1 %v2227_v61  ;;  %1330 = vmatprep.mubr.bf16.mxu0 %v2229_v62  ;;  %v2323_v61 = vld [vmem:[%s2441_s26 + $0x2e4] ss:$16 sps:$4 sm:$0xff]   ;;  %v2325_v62 = vld [vmem:[%s2441_s26 + $0x2ec] ss:$16 sps:$4 sm:$0xff]  }
  0x7e   : > { %1106 = vmatmul.mubr.bf16.gmra.mrb[28].mxu1 %v2231_v63  ;;  %1331 = vmatmul.mubr.bf16.gmra.mrb[28].mxu0 %v2232_v0  ;;  %v2327_v63 = vld [vmem:[%s2441_s26 + $0x2e0] ss:$16 sps:$4 sm:$0xff]   ;;  %v2328_v0 = vld [vmem:[%s2441_s26 + $0x2e8] ss:$16 sps:$4 sm:$0xff]  }
  0x7f   : > { %1113 = vmatprep.mubr.bf16.mxu1 %v2233_v1  ;;  %1338 = vmatprep.mubr.bf16.mxu0 %v2235_v2  ;;  %v2603_v1 = vld [vmem:[%s2760_s2] ss:$0 sm:$0xff] }
  0x86   : > { %1114 = vmatmul.mubr.bf16.gmra.mrb[32].mxu1 %v2237_v3  ;;  %1339 = vmatmul.mubr.bf16.gmra.mrb[32].mxu0 %v2238_v4 }
  0x87   : > { %1121 = vmatprep.mubr.bf16.mxu1 %v2239_v5  ;;  %1346 = vmatprep.mubr.bf16.mxu0 %v2241_v6 }
  0x8e   : > { %1122 = vmatmul.mubr.bf16.gmra.mrb[36].mxu1 %v2243_v7  ;;  %1347 = vmatmul.mubr.bf16.gmra.mrb[36].mxu0 %v2244_v8 }
  0x8f   : > { %1129 = vmatprep.mubr.bf16.mxu1 %v2245_v9  ;;  %1354 = vmatprep.mubr.bf16.mxu0 %v2247_v10 }
  0x96   : > { %1130 = vmatmul.mubr.bf16.gmra.mrb[40].mxu1 %v2249_v11  ;;  %1355 = vmatmul.mubr.bf16.gmra.mrb[40].mxu0 %v2250_v12 }
  0x97   : > { %1137 = vmatprep.mubr.bf16.mxu1 %v2251_v13  ;;  %1362 = vmatprep.mubr.bf16.mxu0 %v2253_v14 }
  0x9e   : > { %1138 = vmatmul.mubr.bf16.gmra.mrb[44].mxu1 %v2255_v15  ;;  %1363 = vmatmul.mubr.bf16.gmra.mrb[44].mxu0 %v2256_v16 }
  0x9f   : > { %1145 = vmatprep.mubr.bf16.mxu1 %v2257_v17  ;;  %1370 = vmatprep.mubr.bf16.mxu0 %v2259_v18 }
  0xa6   : > { %1146 = vmatmul.mubr.bf16.gmra.mrb[48].mxu1 %v2261_v19  ;;  %1371 = vmatmul.mubr.bf16.gmra.mrb[48].mxu0 %v2262_v20 }
  0xa7   : > { %1153 = vmatprep.mubr.bf16.mxu1 %v2263_v21  ;;  %1378 = vmatprep.mubr.bf16.mxu0 %v2265_v22 }
  0xae   : > { %1154 = vmatmul.mubr.bf16.gmra.mrb[52].mxu1 %v2267_v23  ;;  %1379 = vmatmul.mubr.bf16.gmra.mrb[52].mxu0 %v2268_v24 }
  0xaf   : > { %1161 = vmatprep.mubr.bf16.mxu1 %v2269_v25  ;;  %1386 = vmatprep.mubr.bf16.mxu0 %v2271_v26 }
  0xb6   : > { %1162 = vmatmul.mubr.bf16.gmra.mrb[56].mxu1 %v2273_v27  ;;  %1387 = vmatmul.mubr.bf16.gmra.mrb[56].mxu0 %v2274_v28 }
  0xb7   : > { %1169 = vmatprep.mubr.bf16.mxu1 %v2275_v29  ;;  %1394 = vmatprep.mubr.bf16.mxu0 %v2277_v30 }
  0xbe   : > { %1170 = vmatmul.mubr.bf16.gmra.mrb[60].mxu1 %v2279_v31  ;;  %1395 = vmatmul.mubr.bf16.gmra.mrb[60].mxu0 %v2280_v32 }
  0xbf   : > { %1177 = vmatprep.mubr.bf16.mxu1 %v2281_v33  ;;  %1402 = vmatprep.mubr.bf16.mxu0 %v2283_v34 }
  0xc6   : > { %1178 = vmatmul.mubr.bf16.gmra.mrb[64].mxu1 %v2285_v35  ;;  %1403 = vmatmul.mubr.bf16.gmra.mrb[64].mxu0 %v2286_v36 }
  0xc7   : > { %1185 = vmatprep.mubr.bf16.mxu1 %v2287_v37  ;;  %1410 = vmatprep.mubr.bf16.mxu0 %v2289_v38 }
  0xce   : > { %1186 = vmatmul.mubr.bf16.gmra.mrb[68].mxu1 %v2291_v39  ;;  %1411 = vmatmul.mubr.bf16.gmra.mrb[68].mxu0 %v2292_v40 }
  0xcf   : > { %1193 = vmatprep.mubr.bf16.mxu1 %v2293_v41  ;;  %1418 = vmatprep.mubr.bf16.mxu0 %v2295_v42 }
  0xd6   : > { %1194 = vmatmul.mubr.bf16.gmra.mrb[72].mxu1 %v2297_v43  ;;  %1419 = vmatmul.mubr.bf16.gmra.mrb[72].mxu0 %v2298_v44 }
  0xd7   : > { %1201 = vmatprep.mubr.bf16.mxu1 %v2299_v45  ;;  %1426 = vmatprep.mubr.bf16.mxu0 %v2301_v46 }
  0xde   : > { %1202 = vmatmul.mubr.bf16.gmra.mrb[76].mxu1 %v2303_v47  ;;  %1427 = vmatmul.mubr.bf16.gmra.mrb[76].mxu0 %v2304_v48 }
  0xdf   : > { %1209 = vmatprep.mubr.bf16.mxu1 %v2305_v49  ;;  %1434 = vmatprep.mubr.bf16.mxu0 %v2307_v50 }
  0xe6   : > { %1210 = vmatmul.mubr.bf16.gmra.mrb[80].mxu1 %v2309_v51  ;;  %1435 = vmatmul.mubr.bf16.gmra.mrb[80].mxu0 %v2310_v52 }
  0xe7   : > { %1217 = vmatprep.mubr.bf16.mxu1 %v2311_v53  ;;  %1442 = vmatprep.mubr.bf16.mxu0 %v2313_v54 }
  0xee   : > { %1218 = vmatmul.mubr.bf16.gmra.mrb[84].mxu1 %v2315_v55  ;;  %1443 = vmatmul.mubr.bf16.gmra.mrb[84].mxu0 %v2316_v56 }
  0xef   : > { %1225 = vmatprep.mubr.bf16.mxu1 %v2317_v57  ;;  %1450 = vmatprep.mubr.bf16.mxu0 %v2319_v58 }
  0xf6   : > { %1226 = vmatmul.mubr.bf16.gmra.mrb[88].mxu1 %v2321_v59  ;;  %1451 = vmatmul.mubr.bf16.gmra.mrb[88].mxu0 %v2322_v60 }
  0xf7   : > { %1233 = vmatprep.mubr.bf16.mxu1 %v2323_v61  ;;  %1458 = vmatprep.mubr.bf16.mxu0 %v2325_v62 }
  0xfe   : > { %1234 = vmatmul.mubr.bf16.gmra.mrb[92].mxu1 %v2327_v63  ;;  %1459 = vmatmul.mubr.bf16.gmra.mrb[92].mxu0 %v2328_v0 }
 0x119   : > { %v1051_v2 = vpop.f32.mrb[0].mxu1  ;;  %v1276_v4 = vpop.f32.mrb[0].mxu0 }
 0x11a   : > { %v1052_v3 = vadd.f32 %v2603_v1, %v1051_v2  ;;  %v1053_v5 = vpop.f32.mrb[1].mxu1  ;;  %v1278_v6 = vpop.f32.mrb[1].mxu0 }
 0x11b   : > { %v1054_v7 = vpop.f32.mrb[2].mxu1  ;;  %v1279_v10 = vpop.f32.mrb[2].mxu0 }
 0x11c   : > { %v1277_v8 = vadd.f32 %v1276_v4, %v1052_v3  ;;  %v1055_v9 = vadd.f32 %v2603_v1, %v1054_v7  ;;  %v1056_v11 = vpop.f32.mrb[3].mxu1  ;;  %v1281_v12 = vpop.f32.mrb[3].mxu0 }
 0x11e   : > { %v1467_v13 = vmax.f32 %v1277_v8, 0.0  ;;  %v1280_v14 = vadd.f32 %v1279_v10, %v1055_v9 }
 0x120   : > { %v2000_v15 = vpack.c.bf16 %v1467_v13, %v1467_v13  ;;  %v1468_v16 = vmax.f32 %v1280_v14, 0.0 }
 0x121   : > { %v1059_v17 = vpop.f32.mrb[4].mxu1  ;;  %v1284_v20 = vpop.f32.mrb[4].mxu0 }
 0x122   : > { %1708 = vst.msk [vmem:[%s2611_s11] sm:$0xf] %vm1707_vm0, %v2000_v15  ;;  %v2001_v18 = vpack.c.bf16 %v1468_v16, %v1468_v16  ;;  %v1060_v19 = vadd.f32 %v2603_v1, %v1059_v17  ;;  %v1061_v21 = vpop.f32.mrb[5].mxu1  ;;  %v1286_v22 = vpop.f32.mrb[5].mxu0 }
 0x123   : > { %v1062_v23 = vpop.f32.mrb[6].mxu1  ;;  %v1287_v26 = vpop.f32.mrb[6].mxu0 }
 0x124   : > { %1709 = vst.msk [vmem:[%s2611_s11 + $0x4] sm:$0xf] %vm1707_vm0, %v2001_v18  ;;  %v1285_v24 = vadd.f32 %v1284_v20, %v1060_v19  ;;  %v1063_v25 = vadd.f32 %v2603_v1, %v1062_v23  ;;  %v1064_v27 = vpop.f32.mrb[7].mxu1  ;;  %v1289_v28 = vpop.f32.mrb[7].mxu0 }
 0x126   : > { %v1469_v29 = vmax.f32 %v1285_v24, 0.0  ;;  %v1288_v30 = vadd.f32 %v1287_v26, %v1063_v25 }
 0x128   : > { %v2002_v31 = vpack.c.bf16 %v1469_v29, %v1469_v29  ;;  %v1470_v32 = vmax.f32 %v1288_v30, 0.0 }
 0x129   : > { %v1067_v33 = vpop.f32.mrb[8].mxu1  ;;  %v1292_v36 = vpop.f32.mrb[8].mxu0 }
 0x12a   : > { %1710 = vst.msk [vmem:[%s2611_s11 + $0x8] sm:$0xf] %vm1707_vm0, %v2002_v31  ;;  %v2003_v34 = vpack.c.bf16 %v1470_v32, %v1470_v32  ;;  %v1068_v35 = vadd.f32 %v2603_v1, %v1067_v33  ;;  %v1069_v37 = vpop.f32.mrb[9].mxu1  ;;  %v1294_v38 = vpop.f32.mrb[9].mxu0 }
 0x12b   : > { %v1070_v39 = vpop.f32.mrb[10].mxu1  ;;  %v1295_v42 = vpop.f32.mrb[10].mxu0 }
 0x12c   : > { %1711 = vst.msk [vmem:[%s2611_s11 + $0xc] sm:$0xf] %vm1707_vm0, %v2003_v34  ;;  %v1293_v40 = vadd.f32 %v1292_v36, %v1068_v35  ;;  %v1071_v41 = vadd.f32 %v2603_v1, %v1070_v39  ;;  %v1072_v43 = vpop.f32.mrb[11].mxu1  ;;  %v1297_v44 = vpop.f32.mrb[11].mxu0 }
 0x12e   : > { %v1471_v45 = vmax.f32 %v1293_v40, 0.0  ;;  %v1296_v46 = vadd.f32 %v1295_v42, %v1071_v41 }
 0x130   : > { %v2004_v47 = vpack.c.bf16 %v1471_v45, %v1471_v45  ;;  %v1472_v48 = vmax.f32 %v1296_v46, 0.0 }
 0x131   : > { %v1075_v49 = vpop.f32.mrb[12].mxu1  ;;  %v1300_v52 = vpop.f32.mrb[12].mxu0 }
 0x132   : > { %1712 = vst.msk [vmem:[%s2611_s11 + $0x10] sm:$0xf] %vm1707_vm0, %v2004_v47  ;;  %v2005_v50 = vpack.c.bf16 %v1472_v48, %v1472_v48  ;;  %v1076_v51 = vadd.f32 %v2603_v1, %v1075_v49  ;;  %v1077_v53 = vpop.f32.mrb[13].mxu1  ;;  %v1302_v54 = vpop.f32.mrb[13].mxu0 }
 0x133   : > { %v1078_v55 = vpop.f32.mrb[14].mxu1  ;;  %v1303_v58 = vpop.f32.mrb[14].mxu0 }
 0x134   : > { %1713 = vst.msk [vmem:[%s2611_s11 + $0x14] sm:$0xf] %vm1707_vm0, %v2005_v50  ;;  %v1301_v56 = vadd.f32 %v1300_v52, %v1076_v51  ;;  %v1079_v57 = vadd.f32 %v2603_v1, %v1078_v55  ;;  %v1080_v59 = vpop.f32.mrb[15].mxu1  ;;  %v1305_v60 = vpop.f32.mrb[15].mxu0 }
 0x136   : > { %v1473_v61 = vmax.f32 %v1301_v56, 0.0  ;;  %v1304_v62 = vadd.f32 %v1303_v58, %v1079_v57 }
 0x138   : > { %v2006_v63 = vpack.c.bf16 %v1473_v61, %v1473_v61  ;;  %v1474_v0 = vmax.f32 %v1304_v62, 0.0 }
 0x139   : > { %v1083_v2 = vpop.f32.mrb[16].mxu1  ;;  %v1308_v5 = vpop.f32.mrb[16].mxu0 }
 0x13a   : > { %1714 = vst.msk [vmem:[%s2611_s11 + $0x18] sm:$0xf] %vm1707_vm0, %v2006_v63  ;;  %v2007_v3 = vpack.c.bf16 %v1474_v0, %v1474_v0  ;;  %v1084_v4 = vadd.f32 %v2603_v1, %v1083_v2  ;;  %v1085_v6 = vpop.f32.mrb[17].mxu1  ;;  %v1310_v7 = vpop.f32.mrb[17].mxu0 }
 0x13b   : > { %v1086_v8 = vpop.f32.mrb[18].mxu1  ;;  %v1311_v11 = vpop.f32.mrb[18].mxu0 }
 0x13c   : > { %1715 = vst.msk [vmem:[%s2611_s11 + $0x1c] sm:$0xf] %vm1707_vm0, %v2007_v3  ;;  %v1309_v9 = vadd.f32 %v1308_v5, %v1084_v4  ;;  %v1087_v10 = vadd.f32 %v2603_v1, %v1086_v8  ;;  %v1088_v12 = vpop.f32.mrb[19].mxu1  ;;  %v1313_v13 = vpop.f32.mrb[19].mxu0 }
 0x13e   : > { %v1475_v14 = vmax.f32 %v1309_v9, 0.0  ;;  %v1312_v15 = vadd.f32 %v1311_v11, %v1087_v10 }
 0x140   : > { %v2008_v16 = vpack.c.bf16 %v1475_v14, %v1475_v14  ;;  %v1476_v17 = vmax.f32 %v1312_v15, 0.0 }
 0x141   : > { %v1091_v18 = vpop.f32.mrb[20].mxu1  ;;  %v1316_v21 = vpop.f32.mrb[20].mxu0 }
 0x142   : > { %1716 = vst.msk [vmem:[%s2611_s11 + $0x20] sm:$0xf] %vm1707_vm0, %v2008_v16  ;;  %v2009_v19 = vpack.c.bf16 %v1476_v17, %v1476_v17  ;;  %v1092_v20 = vadd.f32 %v2603_v1, %v1091_v18  ;;  %v1093_v22 = vpop.f32.mrb[21].mxu1  ;;  %v1318_v23 = vpop.f32.mrb[21].mxu0 }
 0x143   : > { %v1094_v24 = vpop.f32.mrb[22].mxu1  ;;  %v1319_v27 = vpop.f32.mrb[22].mxu0 }
 0x144   : > { %1717 = vst.msk [vmem:[%s2611_s11 + $0x24] sm:$0xf] %vm1707_vm0, %v2009_v19  ;;  %v1317_v25 = vadd.f32 %v1316_v21, %v1092_v20  ;;  %v1095_v26 = vadd.f32 %v2603_v1, %v1094_v24  ;;  %v1096_v28 = vpop.f32.mrb[23].mxu1  ;;  %v1321_v29 = vpop.f32.mrb[23].mxu0 }
 0x146   : > { %v1477_v30 = vmax.f32 %v1317_v25, 0.0  ;;  %v1320_v31 = vadd.f32 %v1319_v27, %v1095_v26 }
 0x148   : > { %v2010_v32 = vpack.c.bf16 %v1477_v30, %v1477_v30  ;;  %v1478_v33 = vmax.f32 %v1320_v31, 0.0 }
 0x149   : > { %v1099_v34 = vpop.f32.mrb[24].mxu1  ;;  %v1324_v37 = vpop.f32.mrb[24].mxu0 }
 0x14a   : > { %1718 = vst.msk [vmem:[%s2611_s11 + $0x28] sm:$0xf] %vm1707_vm0, %v2010_v32  ;;  %v2011_v35 = vpack.c.bf16 %v1478_v33, %v1478_v33  ;;  %v1100_v36 = vadd.f32 %v2603_v1, %v1099_v34  ;;  %v1101_v38 = vpop.f32.mrb[25].mxu1  ;;  %v1326_v39 = vpop.f32.mrb[25].mxu0 }
 0x14b   : > { %v1102_v40 = vpop.f32.mrb[26].mxu1  ;;  %v1327_v43 = vpop.f32.mrb[26].mxu0 }
 0x14c   : > { %1719 = vst.msk [vmem:[%s2611_s11 + $0x2c] sm:$0xf] %vm1707_vm0, %v2011_v35  ;;  %v1325_v41 = vadd.f32 %v1324_v37, %v1100_v36  ;;  %v1103_v42 = vadd.f32 %v2603_v1, %v1102_v40  ;;  %v1104_v44 = vpop.f32.mrb[27].mxu1  ;;  %v1329_v45 = vpop.f32.mrb[27].mxu0 }
 0x14e   : > { %v1479_v46 = vmax.f32 %v1325_v41, 0.0  ;;  %v1328_v47 = vadd.f32 %v1327_v43, %v1103_v42 }
 0x150   : > { %v2012_v48 = vpack.c.bf16 %v1479_v46, %v1479_v46  ;;  %v1480_v49 = vmax.f32 %v1328_v47, 0.0 }
 0x151   : > { %v1107_v50 = vpop.f32.mrb[28].mxu1  ;;  %v1332_v53 = vpop.f32.mrb[28].mxu0 }
 0x152   : > { %1720 = vst.msk [vmem:[%s2611_s11 + $0x30] sm:$0xf] %vm1707_vm0, %v2012_v48  ;;  %v2013_v51 = vpack.c.bf16 %v1480_v49, %v1480_v49  ;;  %v1108_v52 = vadd.f32 %v2603_v1, %v1107_v50  ;;  %v1109_v54 = vpop.f32.mrb[29].mxu1  ;;  %v1334_v55 = vpop.f32.mrb[29].mxu0 }
 0x153   : > { %v1110_v56 = vpop.f32.mrb[30].mxu1  ;;  %v1335_v59 = vpop.f32.mrb[30].mxu0 }
 0x154   : > { %1721 = vst.msk [vmem:[%s2611_s11 + $0x34] sm:$0xf] %vm1707_vm0, %v2013_v51  ;;  %v1333_v57 = vadd.f32 %v1332_v53, %v1108_v52  ;;  %v1111_v58 = vadd.f32 %v2603_v1, %v1110_v56  ;;  %v1112_v60 = vpop.f32.mrb[31].mxu1  ;;  %v1337_v61 = vpop.f32.mrb[31].mxu0 }
 0x156   : > { %v1481_v62 = vmax.f32 %v1333_v57, 0.0  ;;  %v1336_v63 = vadd.f32 %v1335_v59, %v1111_v58 }
 0x158   : > { %v2014_v0 = vpack.c.bf16 %v1481_v62, %v1481_v62  ;;  %v1482_v2 = vmax.f32 %v1336_v63, 0.0 }
 0x159   : > { %v1115_v3 = vpop.f32.mrb[32].mxu1  ;;  %v1340_v6 = vpop.f32.mrb[32].mxu0 }
 0x15a   : > { %1722 = vst.msk [vmem:[%s2611_s11 + $0x38] sm:$0xf] %vm1707_vm0, %v2014_v0  ;;  %v2015_v4 = vpack.c.bf16 %v1482_v2, %v1482_v2  ;;  %v1116_v5 = vadd.f32 %v2603_v1, %v1115_v3  ;;  %v1117_v7 = vpop.f32.mrb[33].mxu1  ;;  %v1342_v8 = vpop.f32.mrb[33].mxu0 }
 0x15b   : > { %v1118_v9 = vpop.f32.mrb[34].mxu1  ;;  %v1343_v12 = vpop.f32.mrb[34].mxu0 }
 0x15c   : > { %1723 = vst.msk [vmem:[%s2611_s11 + $0x3c] sm:$0xf] %vm1707_vm0, %v2015_v4  ;;  %v1341_v10 = vadd.f32 %v1340_v6, %v1116_v5  ;;  %v1119_v11 = vadd.f32 %v2603_v1, %v1118_v9  ;;  %v1120_v13 = vpop.f32.mrb[35].mxu1  ;;  %v1345_v14 = vpop.f32.mrb[35].mxu0 }
 0x15e   : > { %v1483_v15 = vmax.f32 %v1341_v10, 0.0  ;;  %v1344_v16 = vadd.f32 %v1343_v12, %v1119_v11 }
 0x160   : > { %v2016_v17 = vpack.c.bf16 %v1483_v15, %v1483_v15  ;;  %v1484_v18 = vmax.f32 %v1344_v16, 0.0 }
 0x161   : > { %v1123_v19 = vpop.f32.mrb[36].mxu1  ;;  %v1348_v22 = vpop.f32.mrb[36].mxu0 }
 0x162   : > { %1724 = vst.msk [vmem:[%s2611_s11 + $0x40] sm:$0xf] %vm1707_vm0, %v2016_v17  ;;  %v2017_v20 = vpack.c.bf16 %v1484_v18, %v1484_v18  ;;  %v1124_v21 = vadd.f32 %v2603_v1, %v1123_v19  ;;  %v1125_v23 = vpop.f32.mrb[37].mxu1  ;;  %v1350_v24 = vpop.f32.mrb[37].mxu0 }
 0x163   : > { %v1126_v25 = vpop.f32.mrb[38].mxu1  ;;  %v1351_v28 = vpop.f32.mrb[38].mxu0 }
 0x164   : > { %1725 = vst.msk [vmem:[%s2611_s11 + $0x44] sm:$0xf] %vm1707_vm0, %v2017_v20  ;;  %v1349_v26 = vadd.f32 %v1348_v22, %v1124_v21  ;;  %v1127_v27 = vadd.f32 %v2603_v1, %v1126_v25  ;;  %v1128_v29 = vpop.f32.mrb[39].mxu1  ;;  %v1353_v30 = vpop.f32.mrb[39].mxu0 }
 0x166   : > { %v1485_v31 = vmax.f32 %v1349_v26, 0.0  ;;  %v1352_v32 = vadd.f32 %v1351_v28, %v1127_v27 }
 0x168   : > { %v2018_v33 = vpack.c.bf16 %v1485_v31, %v1485_v31  ;;  %v1486_v34 = vmax.f32 %v1352_v32, 0.0 }
 0x169   : > { %v1131_v35 = vpop.f32.mrb[40].mxu1  ;;  %v1356_v38 = vpop.f32.mrb[40].mxu0 }
 0x16a   : > { %1726 = vst.msk [vmem:[%s2611_s11 + $0x48] sm:$0xf] %vm1707_vm0, %v2018_v33  ;;  %v2019_v36 = vpack.c.bf16 %v1486_v34, %v1486_v34  ;;  %v1132_v37 = vadd.f32 %v2603_v1, %v1131_v35  ;;  %v1133_v39 = vpop.f32.mrb[41].mxu1  ;;  %v1358_v40 = vpop.f32.mrb[41].mxu0 }
 0x16b   : > { %v1134_v41 = vpop.f32.mrb[42].mxu1  ;;  %v1359_v44 = vpop.f32.mrb[42].mxu0 }
 0x16c   : > { %1727 = vst.msk [vmem:[%s2611_s11 + $0x4c] sm:$0xf] %vm1707_vm0, %v2019_v36  ;;  %v1357_v42 = vadd.f32 %v1356_v38, %v1132_v37  ;;  %v1135_v43 = vadd.f32 %v2603_v1, %v1134_v41  ;;  %v1136_v45 = vpop.f32.mrb[43].mxu1  ;;  %v1361_v46 = vpop.f32.mrb[43].mxu0 }
 0x16e   : > { %v1487_v47 = vmax.f32 %v1357_v42, 0.0  ;;  %v1360_v48 = vadd.f32 %v1359_v44, %v1135_v43 }
 0x170   : > { %v2020_v49 = vpack.c.bf16 %v1487_v47, %v1487_v47  ;;  %v1488_v50 = vmax.f32 %v1360_v48, 0.0 }
 0x171   : > { %v1139_v51 = vpop.f32.mrb[44].mxu1  ;;  %v1364_v54 = vpop.f32.mrb[44].mxu0 }
 0x172   : > { %1728 = vst.msk [vmem:[%s2611_s11 + $0x50] sm:$0xf] %vm1707_vm0, %v2020_v49  ;;  %v2021_v52 = vpack.c.bf16 %v1488_v50, %v1488_v50  ;;  %v1140_v53 = vadd.f32 %v2603_v1, %v1139_v51  ;;  %v1141_v55 = vpop.f32.mrb[45].mxu1  ;;  %v1366_v56 = vpop.f32.mrb[45].mxu0 }
 0x173   : > { %v1142_v57 = vpop.f32.mrb[46].mxu1  ;;  %v1367_v60 = vpop.f32.mrb[46].mxu0 }
 0x174   : > { %1729 = vst.msk [vmem:[%s2611_s11 + $0x54] sm:$0xf] %vm1707_vm0, %v2021_v52  ;;  %v1365_v58 = vadd.f32 %v1364_v54, %v1140_v53  ;;  %v1143_v59 = vadd.f32 %v2603_v1, %v1142_v57  ;;  %v1144_v61 = vpop.f32.mrb[47].mxu1  ;;  %v1369_v62 = vpop.f32.mrb[47].mxu0 }
 0x176   : > { %v1489_v63 = vmax.f32 %v1365_v58, 0.0  ;;  %v1368_v0 = vadd.f32 %v1367_v60, %v1143_v59 }
 0x178   : > { %v2022_v2 = vpack.c.bf16 %v1489_v63, %v1489_v63  ;;  %v1490_v3 = vmax.f32 %v1368_v0, 0.0 }
 0x179   : > { %v1147_v4 = vpop.f32.mrb[48].mxu1  ;;  %v1372_v7 = vpop.f32.mrb[48].mxu0 }
 0x17a   : > { %1730 = vst.msk [vmem:[%s2611_s11 + $0x58] sm:$0xf] %vm1707_vm0, %v2022_v2  ;;  %v2023_v5 = vpack.c.bf16 %v1490_v3, %v1490_v3  ;;  %v1148_v6 = vadd.f32 %v2603_v1, %v1147_v4  ;;  %v1149_v8 = vpop.f32.mrb[49].mxu1  ;;  %v1374_v9 = vpop.f32.mrb[49].mxu0 }
 0x17b   : > { %v1150_v10 = vpop.f32.mrb[50].mxu1  ;;  %v1375_v13 = vpop.f32.mrb[50].mxu0 }
 0x17c   : > { %1731 = vst.msk [vmem:[%s2611_s11 + $0x5c] sm:$0xf] %vm1707_vm0, %v2023_v5  ;;  %v1373_v11 = vadd.f32 %v1372_v7, %v1148_v6  ;;  %v1151_v12 = vadd.f32 %v2603_v1, %v1150_v10  ;;  %v1152_v14 = vpop.f32.mrb[51].mxu1  ;;  %v1377_v15 = vpop.f32.mrb[51].mxu0 }
 0x17e   : > { %v1491_v16 = vmax.f32 %v1373_v11, 0.0  ;;  %v1376_v17 = vadd.f32 %v1375_v13, %v1151_v12 }
 0x180   : > { %v2024_v18 = vpack.c.bf16 %v1491_v16, %v1491_v16  ;;  %v1492_v19 = vmax.f32 %v1376_v17, 0.0 }
 0x181   : > { %v1155_v20 = vpop.f32.mrb[52].mxu1  ;;  %v1380_v23 = vpop.f32.mrb[52].mxu0 }
 0x182   : > { %1732 = vst.msk [vmem:[%s2611_s11 + $0x60] sm:$0xf] %vm1707_vm0, %v2024_v18  ;;  %v2025_v21 = vpack.c.bf16 %v1492_v19, %v1492_v19  ;;  %v1156_v22 = vadd.f32 %v2603_v1, %v1155_v20  ;;  %v1157_v24 = vpop.f32.mrb[53].mxu1  ;;  %v1382_v25 = vpop.f32.mrb[53].mxu0 }
 0x183   : > { %v1158_v26 = vpop.f32.mrb[54].mxu1  ;;  %v1383_v29 = vpop.f32.mrb[54].mxu0 }
 0x184   : > { %1733 = vst.msk [vmem:[%s2611_s11 + $0x64] sm:$0xf] %vm1707_vm0, %v2025_v21  ;;  %v1381_v27 = vadd.f32 %v1380_v23, %v1156_v22  ;;  %v1159_v28 = vadd.f32 %v2603_v1, %v1158_v26  ;;  %v1160_v30 = vpop.f32.mrb[55].mxu1  ;;  %v1385_v31 = vpop.f32.mrb[55].mxu0 }
 0x186   : > { %v1493_v32 = vmax.f32 %v1381_v27, 0.0  ;;  %v1384_v33 = vadd.f32 %v1383_v29, %v1159_v28 }
 0x188   : > { %v2026_v34 = vpack.c.bf16 %v1493_v32, %v1493_v32  ;;  %v1494_v35 = vmax.f32 %v1384_v33, 0.0 }
 0x189   : > { %v1163_v36 = vpop.f32.mrb[56].mxu1  ;;  %v1388_v39 = vpop.f32.mrb[56].mxu0 }
 0x18a   : > { %1734 = vst.msk [vmem:[%s2611_s11 + $0x68] sm:$0xf] %vm1707_vm0, %v2026_v34  ;;  %v2027_v37 = vpack.c.bf16 %v1494_v35, %v1494_v35  ;;  %v1164_v38 = vadd.f32 %v2603_v1, %v1163_v36  ;;  %v1165_v40 = vpop.f32.mrb[57].mxu1  ;;  %v1390_v41 = vpop.f32.mrb[57].mxu0 }
 0x18b   : > { %v1166_v42 = vpop.f32.mrb[58].mxu1  ;;  %v1391_v45 = vpop.f32.mrb[58].mxu0 }
 0x18c   : > { %1735 = vst.msk [vmem:[%s2611_s11 + $0x6c] sm:$0xf] %vm1707_vm0, %v2027_v37  ;;  %v1389_v43 = vadd.f32 %v1388_v39, %v1164_v38  ;;  %v1167_v44 = vadd.f32 %v2603_v1, %v1166_v42  ;;  %v1168_v46 = vpop.f32.mrb[59].mxu1  ;;  %v1393_v47 = vpop.f32.mrb[59].mxu0 }
 0x18e   : > { %v1495_v48 = vmax.f32 %v1389_v43, 0.0  ;;  %v1392_v49 = vadd.f32 %v1391_v45, %v1167_v44 }
 0x190   : > { %v2028_v50 = vpack.c.bf16 %v1495_v48, %v1495_v48  ;;  %v1496_v51 = vmax.f32 %v1392_v49, 0.0 }
 0x191   : > { %v1171_v52 = vpop.f32.mrb[60].mxu1  ;;  %v1396_v55 = vpop.f32.mrb[60].mxu0 }
 0x192   : > { %1736 = vst.msk [vmem:[%s2611_s11 + $0x70] sm:$0xf] %vm1707_vm0, %v2028_v50  ;;  %v2029_v53 = vpack.c.bf16 %v1496_v51, %v1496_v51  ;;  %v1172_v54 = vadd.f32 %v2603_v1, %v1171_v52  ;;  %v1173_v56 = vpop.f32.mrb[61].mxu1  ;;  %v1398_v57 = vpop.f32.mrb[61].mxu0 }
 0x193   : > { %v1174_v58 = vpop.f32.mrb[62].mxu1  ;;  %v1399_v61 = vpop.f32.mrb[62].mxu0 }
 0x194   : > { %1737 = vst.msk [vmem:[%s2611_s11 + $0x74] sm:$0xf] %vm1707_vm0, %v2029_v53  ;;  %v1397_v59 = vadd.f32 %v1396_v55, %v1172_v54  ;;  %v1175_v60 = vadd.f32 %v2603_v1, %v1174_v58  ;;  %v1176_v62 = vpop.f32.mrb[63].mxu1  ;;  %v1401_v63 = vpop.f32.mrb[63].mxu0 }
 0x196   : > { %v1497_v0 = vmax.f32 %v1397_v59, 0.0  ;;  %v1400_v2 = vadd.f32 %v1399_v61, %v1175_v60 }
 0x198   : > { %v2030_v3 = vpack.c.bf16 %v1497_v0, %v1497_v0  ;;  %v1498_v4 = vmax.f32 %v1400_v2, 0.0 }
 0x199   : > { %v1179_v5 = vpop.f32.mrb[64].mxu1  ;;  %v1404_v8 = vpop.f32.mrb[64].mxu0 }
 0x19a   : > { %1738 = vst.msk [vmem:[%s2611_s11 + $0x78] sm:$0xf] %vm1707_vm0, %v2030_v3  ;;  %v2031_v6 = vpack.c.bf16 %v1498_v4, %v1498_v4  ;;  %v1180_v7 = vadd.f32 %v2603_v1, %v1179_v5  ;;  %v1181_v9 = vpop.f32.mrb[65].mxu1  ;;  %v1406_v10 = vpop.f32.mrb[65].mxu0 }
 0x19b   : > { %v1182_v11 = vpop.f32.mrb[66].mxu1  ;;  %v1407_v14 = vpop.f32.mrb[66].mxu0 }
 0x19c   : > { %1739 = vst.msk [vmem:[%s2611_s11 + $0x7c] sm:$0xf] %vm1707_vm0, %v2031_v6  ;;  %v1405_v12 = vadd.f32 %v1404_v8, %v1180_v7  ;;  %v1183_v13 = vadd.f32 %v2603_v1, %v1182_v11  ;;  %v1184_v15 = vpop.f32.mrb[67].mxu1  ;;  %v1409_v16 = vpop.f32.mrb[67].mxu0 }
 0x19e   : > { %v1499_v17 = vmax.f32 %v1405_v12, 0.0  ;;  %v1408_v18 = vadd.f32 %v1407_v14, %v1183_v13 }
 0x1a0   : > { %v2032_v19 = vpack.c.bf16 %v1499_v17, %v1499_v17  ;;  %v1500_v20 = vmax.f32 %v1408_v18, 0.0 }
 0x1a1   : > { %v1187_v21 = vpop.f32.mrb[68].mxu1  ;;  %v1412_v24 = vpop.f32.mrb[68].mxu0 }
 0x1a2   : > { %1740 = vst.msk [vmem:[%s2611_s11 + $0x80] sm:$0xf] %vm1707_vm0, %v2032_v19  ;;  %v2033_v22 = vpack.c.bf16 %v1500_v20, %v1500_v20  ;;  %v1188_v23 = vadd.f32 %v2603_v1, %v1187_v21  ;;  %v1189_v25 = vpop.f32.mrb[69].mxu1  ;;  %v1414_v26 = vpop.f32.mrb[69].mxu0 }
 0x1a3   : > { %v1190_v27 = vpop.f32.mrb[70].mxu1  ;;  %v1415_v30 = vpop.f32.mrb[70].mxu0 }
 0x1a4   : > { %1741 = vst.msk [vmem:[%s2611_s11 + $0x84] sm:$0xf] %vm1707_vm0, %v2033_v22  ;;  %v1413_v28 = vadd.f32 %v1412_v24, %v1188_v23  ;;  %v1191_v29 = vadd.f32 %v2603_v1, %v1190_v27  ;;  %v1192_v31 = vpop.f32.mrb[71].mxu1  ;;  %v1417_v32 = vpop.f32.mrb[71].mxu0 }
 0x1a6   : > { %v1501_v33 = vmax.f32 %v1413_v28, 0.0  ;;  %v1416_v34 = vadd.f32 %v1415_v30, %v1191_v29 }
 0x1a8   : > { %v2034_v35 = vpack.c.bf16 %v1501_v33, %v1501_v33  ;;  %v1502_v36 = vmax.f32 %v1416_v34, 0.0 }
 0x1a9   : > { %v1195_v37 = vpop.f32.mrb[72].mxu1  ;;  %v1420_v40 = vpop.f32.mrb[72].mxu0 }
 0x1aa   : > { %1742 = vst.msk [vmem:[%s2611_s11 + $0x88] sm:$0xf] %vm1707_vm0, %v2034_v35  ;;  %v2035_v38 = vpack.c.bf16 %v1502_v36, %v1502_v36  ;;  %v1196_v39 = vadd.f32 %v2603_v1, %v1195_v37  ;;  %v1197_v41 = vpop.f32.mrb[73].mxu1  ;;  %v1422_v42 = vpop.f32.mrb[73].mxu0 }
 0x1ab   : > { %v1198_v43 = vpop.f32.mrb[74].mxu1  ;;  %v1423_v46 = vpop.f32.mrb[74].mxu0 }
 0x1ac   : > { %1743 = vst.msk [vmem:[%s2611_s11 + $0x8c] sm:$0xf] %vm1707_vm0, %v2035_v38  ;;  %v1421_v44 = vadd.f32 %v1420_v40, %v1196_v39  ;;  %v1199_v45 = vadd.f32 %v2603_v1, %v1198_v43  ;;  %v1200_v47 = vpop.f32.mrb[75].mxu1  ;;  %v1425_v48 = vpop.f32.mrb[75].mxu0 }
 0x1ae   : > { %v1503_v49 = vmax.f32 %v1421_v44, 0.0  ;;  %v1424_v50 = vadd.f32 %v1423_v46, %v1199_v45 }
 0x1b0   : > { %v2036_v51 = vpack.c.bf16 %v1503_v49, %v1503_v49  ;;  %v1504_v52 = vmax.f32 %v1424_v50, 0.0 }
 0x1b1   : > { %v1203_v53 = vpop.f32.mrb[76].mxu1  ;;  %v1428_v56 = vpop.f32.mrb[76].mxu0 }
 0x1b2   : > { %1744 = vst.msk [vmem:[%s2611_s11 + $0x90] sm:$0xf] %vm1707_vm0, %v2036_v51  ;;  %v2037_v54 = vpack.c.bf16 %v1504_v52, %v1504_v52  ;;  %v1204_v55 = vadd.f32 %v2603_v1, %v1203_v53  ;;  %v1205_v57 = vpop.f32.mrb[77].mxu1  ;;  %v1430_v58 = vpop.f32.mrb[77].mxu0 }
 0x1b3   : > { %v1206_v59 = vpop.f32.mrb[78].mxu1  ;;  %v1431_v62 = vpop.f32.mrb[78].mxu0 }
 0x1b4   : > { %1745 = vst.msk [vmem:[%s2611_s11 + $0x94] sm:$0xf] %vm1707_vm0, %v2037_v54  ;;  %v1429_v60 = vadd.f32 %v1428_v56, %v1204_v55  ;;  %v1207_v61 = vadd.f32 %v2603_v1, %v1206_v59  ;;  %v1208_v63 = vpop.f32.mrb[79].mxu1  ;;  %v1433_v0 = vpop.f32.mrb[79].mxu0 }
 0x1b6   : > { %v1505_v2 = vmax.f32 %v1429_v60, 0.0  ;;  %v1432_v3 = vadd.f32 %v1431_v62, %v1207_v61 }
 0x1b8   : > { %v2038_v4 = vpack.c.bf16 %v1505_v2, %v1505_v2  ;;  %v1506_v5 = vmax.f32 %v1432_v3, 0.0 }
 0x1b9   : > { %v1211_v6 = vpop.f32.mrb[80].mxu1  ;;  %v1436_v9 = vpop.f32.mrb[80].mxu0 }
 0x1ba   : > { %1746 = vst.msk [vmem:[%s2611_s11 + $0x98] sm:$0xf] %vm1707_vm0, %v2038_v4  ;;  %v2039_v7 = vpack.c.bf16 %v1506_v5, %v1506_v5  ;;  %v1212_v8 = vadd.f32 %v2603_v1, %v1211_v6  ;;  %v1213_v10 = vpop.f32.mrb[81].mxu1  ;;  %v1438_v11 = vpop.f32.mrb[81].mxu0 }
 0x1bb   : > { %v1214_v12 = vpop.f32.mrb[82].mxu1  ;;  %v1439_v15 = vpop.f32.mrb[82].mxu0 }
 0x1bc   : > { %1747 = vst.msk [vmem:[%s2611_s11 + $0x9c] sm:$0xf] %vm1707_vm0, %v2039_v7  ;;  %v1437_v13 = vadd.f32 %v1436_v9, %v1212_v8  ;;  %v1215_v14 = vadd.f32 %v2603_v1, %v1214_v12  ;;  %v1216_v16 = vpop.f32.mrb[83].mxu1  ;;  %v1441_v17 = vpop.f32.mrb[83].mxu0 }
 0x1be   : > { %v1507_v18 = vmax.f32 %v1437_v13, 0.0  ;;  %v1440_v19 = vadd.f32 %v1439_v15, %v1215_v14 }
 0x1c0   : > { %v2040_v20 = vpack.c.bf16 %v1507_v18, %v1507_v18  ;;  %v1508_v21 = vmax.f32 %v1440_v19, 0.0 }
 0x1c1   : > { %v1219_v22 = vpop.f32.mrb[84].mxu1  ;;  %v1444_v25 = vpop.f32.mrb[84].mxu0 }
 0x1c2   : > { %1748 = vst.msk [vmem:[%s2611_s11 + $0xa0] sm:$0xf] %vm1707_vm0, %v2040_v20  ;;  %v2041_v23 = vpack.c.bf16 %v1508_v21, %v1508_v21  ;;  %v1220_v24 = vadd.f32 %v2603_v1, %v1219_v22  ;;  %v1221_v26 = vpop.f32.mrb[85].mxu1  ;;  %v1446_v27 = vpop.f32.mrb[85].mxu0 }
 0x1c3   : > { %v1222_v28 = vpop.f32.mrb[86].mxu1  ;;  %v1447_v31 = vpop.f32.mrb[86].mxu0 }
 0x1c4   : > { %1749 = vst.msk [vmem:[%s2611_s11 + $0xa4] sm:$0xf] %vm1707_vm0, %v2041_v23  ;;  %v1445_v29 = vadd.f32 %v1444_v25, %v1220_v24  ;;  %v1223_v30 = vadd.f32 %v2603_v1, %v1222_v28  ;;  %v1224_v32 = vpop.f32.mrb[87].mxu1  ;;  %v1449_v33 = vpop.f32.mrb[87].mxu0 }
 0x1c6   : > { %v1509_v34 = vmax.f32 %v1445_v29, 0.0  ;;  %v1448_v35 = vadd.f32 %v1447_v31, %v1223_v30 }
 0x1c8   : > { %v2042_v36 = vpack.c.bf16 %v1509_v34, %v1509_v34  ;;  %v1510_v37 = vmax.f32 %v1448_v35, 0.0 }
 0x1c9   : > { %v1227_v38 = vpop.f32.mrb[88].mxu1  ;;  %v1452_v41 = vpop.f32.mrb[88].mxu0 }
 0x1ca   : > { %1750 = vst.msk [vmem:[%s2611_s11 + $0xa8] sm:$0xf] %vm1707_vm0, %v2042_v36  ;;  %v2043_v39 = vpack.c.bf16 %v1510_v37, %v1510_v37  ;;  %v1228_v40 = vadd.f32 %v2603_v1, %v1227_v38  ;;  %v1229_v42 = vpop.f32.mrb[89].mxu1  ;;  %v1454_v43 = vpop.f32.mrb[89].mxu0 }
 0x1cb   : > { %v1230_v44 = vpop.f32.mrb[90].mxu1  ;;  %v1455_v47 = vpop.f32.mrb[90].mxu0 }
 0x1cc   : > { %1751 = vst.msk [vmem:[%s2611_s11 + $0xac] sm:$0xf] %vm1707_vm0, %v2043_v39  ;;  %v1453_v45 = vadd.f32 %v1452_v41, %v1228_v40  ;;  %v1231_v46 = vadd.f32 %v2603_v1, %v1230_v44  ;;  %v1232_v48 = vpop.f32.mrb[91].mxu1  ;;  %v1457_v49 = vpop.f32.mrb[91].mxu0 }
 0x1ce   : > { %v1511_v50 = vmax.f32 %v1453_v45, 0.0  ;;  %v1456_v51 = vadd.f32 %v1455_v47, %v1231_v46 }
 0x1d0   : > { %v2044_v52 = vpack.c.bf16 %v1511_v50, %v1511_v50  ;;  %v1512_v53 = vmax.f32 %v1456_v51, 0.0 }
 0x1d1   : > { %v1235_v54 = vpop.f32.mrb[92].mxu1  ;;  %v1460_v57 = vpop.f32.mrb[92].mxu0 }
 0x1d2   : > { %1752 = vst.msk [vmem:[%s2611_s11 + $0xb0] sm:$0xf] %vm1707_vm0, %v2044_v52  ;;  %v2045_v55 = vpack.c.bf16 %v1512_v53, %v1512_v53  ;;  %v1236_v56 = vadd.f32 %v2603_v1, %v1235_v54  ;;  %v1237_v58 = vpop.f32.mrb[93].mxu1  ;;  %v1462_v59 = vpop.f32.mrb[93].mxu0 }
 0x1d3   : > { %v1238_v60 = vpop.f32.mrb[94].mxu1  ;;  %v1463_v63 = vpop.f32.mrb[94].mxu0 }
 0x1d4   : > { %1753 = vst.msk [vmem:[%s2611_s11 + $0xb4] sm:$0xf] %vm1707_vm0, %v2045_v55  ;;  %v1461_v61 = vadd.f32 %v1460_v57, %v1236_v56  ;;  %v1239_v62 = vadd.f32 %v2603_v1, %v1238_v60  ;;  %v1240_v0 = vpop.f32.mrb[95].mxu1  ;;  %v1465_v2 = vpop.f32.mrb[95].mxu0 }
 0x1d6   : > { %v1513_v3 = vmax.f32 %v1461_v61, 0.0  ;;  %v1464_v4 = vadd.f32 %v1463_v63, %v1239_v62 }
 0x1d8   : > { %v2046_v5 = vpack.c.bf16 %v1513_v3, %v1513_v3  ;;  %v1514_v6 = vmax.f32 %v1464_v4, 0.0 }
 0x1da   : > { %1754 = vst.msk [vmem:[%s2611_s11 + $0xb8] sm:$0xf] %vm1707_vm0, %v2046_v5  ;;  %v2047_v7 = vpack.c.bf16 %v1514_v6, %v1514_v6 }
 0x1dc   : > { %1755 = vst.msk [vmem:[%s2611_s11 + $0xbc] sm:$0xf] %vm1707_vm0, %v2047_v7 }
 0x1dd PF: > { %s13_s12 = sadd.s32 1, %s2335_s12  }
 0x1de   : > { %p10_p4 = scmp.ge.s32.totalorder %s13_s12, 5  }
 0x1e0   :  { %12 = sbr.rel (!%p10_p4) target bundleno = 1 (0x1), region = 62 }

// kernel: conv_encoder_forward.6
= control target key start
LH: loop header
LB: loop body
LE: loop exit
PB: predicated region body
PF: predicated region fallthrough
CT: control target
= control target key end

     0   :  { %s2330_s12 = smov 0   ;;  %s2707_s0 = inlined_call_operand.vmem [shape: bf16[288,1024], index: 0, kind: input, shape index: {}]   ;;  %s2708_s1 = inlined_call_operand.vmem [shape: bf16[1024,128], index: 1, kind: input, shape index: {}]   ;;  %s2709_s2 = inlined_call_operand.vmem [shape: f32[1,128], index: 2, kind: input, shape index: {}]   ;;  %s2710_s3 = inlined_call_operand.vmem [shape: bf16[288,128], index: 3, kind: output, shape index: {}]  }
   0x1 LB: > { %s1713_s13 = sadd.s32 4294967295, %s2308_s12   ;;  %p1717_p0 = scmp.ge.s32.totalorder %s2308_s12, 1  ;;  %s2308_s12 = sphi %s2330_s12, %s13_s12  }
   0x2   : > { %p139_p1 = scmp.lt.s32.totalorder %s2308_s12, 3 }
   0x4   : > { %p140_p2 = pnand %p1717_p0, %p139_p1 }
   0x5   : > { %v2238_v0 = vld [vmem:[%s2708_s1 + $0x40] sm:$0xff] (!%p140_p2)   ;;  %v2242_v4 = vld [vmem:[%s2708_s1 + $0x48] sm:$0xff] (!%p140_p2)   ;;  %v2246_v8 = vld [vmem:[%s2708_s1 + $0x50] sm:$0xff] (!%p140_p2)   ;;  %s164_s19 = smul.u32 (!%p140_p2), 18, %s1713_s13 }
   0x6   : > { %143 = sbr.rel (%p140_p2) target bundleno = 401 (0x191), region = 32  ;;  %v2239_v1 = vld [vmem:[%s2708_s1 + $0xc0] sm:$0xff] (!%p140_p2)   ;;  %1950 = vmatprep.subr.bf16.mxu0 (!%p140_p2), %v2238_v0  ;;  %v2243_v5 = vld [vmem:[%s2708_s1 + $0xc8] sm:$0xff] (!%p140_p2)   ;;  %v2247_v9 = vld [vmem:[%s2708_s1 + $0xd0] sm:$0xff] (!%p140_p2)  }
   0x7   : > { %v2240_v2 = vld [vmem:[%s2708_s1] sm:$0xff] (!%p140_p2)   ;;  %2020 = vmatprep.subr.bf16.mxu1 (!%p140_p2), %v2239_v1  ;;  %v2244_v6 = vld [vmem:[%s2708_s1 + $0x8] sm:$0xff] (!%p140_p2)   ;;  %v2248_v10 = vld [vmem:[%s2708_s1 + $0x10] sm:$0xff] (!%p140_p2)   ;;  %p165_p3 = scmp.lt.s32.totalorder (!%p140_p2), %s164_s19, 35 }
   0x8   : > { %v2241_v3 = vld [vmem:[%s2708_s1 + $0x80] sm:$0xff] (!%p140_p2)   ;;  %1951 = vmatpush3.bf16.msra.mxu0 (!%p140_p2), %v2240_v2  ;;  %v2245_v7 = vld [vmem:[%s2708_s1 + $0x88] sm:$0xff] (!%p140_p2)   ;;  %v2249_v11 = vld [vmem:[%s2708_s1 + $0x90] sm:$0xff] (!%p140_p2)  }
   0x9   : > { %2021 = vmatpush3.bf16.msra.mxu1 (!%p140_p2), %v2241_v3  ;;  %1952 = vmatprep.subr.bf16.mxu0 (!%p140_p2), %v2242_v4  ;;  %v2250_v12 = vld [vmem:[%s2708_s1 + $0x58] sm:$0xff] (!%p140_p2)   ;;  %v2254_v16 = vld [vmem:[%s2708_s1 + $0x60] sm:$0xff] (!%p140_p2)   ;;  %v2258_v20 = vld [vmem:[%s2708_s1 + $0x68] sm:$0xff] (!%p140_p2)  }
   0xa   : > { %2022 = vmatprep.subr.bf16.mxu1 (!%p140_p2), %v2243_v5  ;;  %v2251_v13 = vld [vmem:[%s2708_s1 + $0xd8] sm:$0xff] (!%p140_p2)   ;;  %v2255_v17 = vld [vmem:[%s2708_s1 + $0xe0] sm:$0xff] (!%p140_p2)   ;;  %v2259_v21 = vld [vmem:[%s2708_s1 + $0xe8] sm:$0xff] (!%p140_p2)  }
   0xb   : > { %v2252_v14 = vld [vmem:[%s2708_s1 + $0x18] sm:$0xff] (!%p140_p2)   ;;  %v2256_v18 = vld [vmem:[%s2708_s1 + $0x20] sm:$0xff] (!%p140_p2)   ;;  %v2260_v22 = vld [vmem:[%s2708_s1 + $0x28] sm:$0xff] (!%p140_p2)  }
   0xc   : > { %1953 = vmatpush3.bf16.msra.mxu0 (!%p140_p2), %v2244_v6  ;;  %v2253_v15 = vld [vmem:[%s2708_s1 + $0x98] sm:$0xff] (!%p140_p2)   ;;  %v2257_v19 = vld [vmem:[%s2708_s1 + $0xa0] sm:$0xff] (!%p140_p2)   ;;  %v2261_v23 = vld [vmem:[%s2708_s1 + $0xa8] sm:$0xff] (!%p140_p2)  }
   0xd   : > { %2023 = vmatpush3.bf16.msra.mxu1 %v2245_v7  ;;  %1954 = vmatprep.subr.bf16.mxu0 %v2246_v8  ;;  %s2712_s19 = smov (!%p165_p3, %s164_s19), 35  ;;  %v2262_v24 = vld [vmem:[%s2708_s1 + $0x70] sm:$0xff]   ;;  %v2266_v28 = vld [vmem:[%s2708_s1 + $0x78] sm:$0xff]   ;;  %v2270_v40 = vld [vmem:[%s2708_s1 + $0x140] sm:$0xff]  }
   0xe   : > { %2024 = vmatprep.subr.bf16.mxu1 %v2247_v9  ;;  %v2263_v25 = vld [vmem:[%s2708_s1 + $0xf0] sm:$0xff]   ;;  %s1878_s18 = sshll.u32 %s2712_s19, 5  ;;  %v2267_v29 = vld [vmem:[%s2708_s1 + $0xf8] sm:$0xff]   ;;  %v2271_v41 = vld [vmem:[%s2708_s1 + $0x100] sm:$0xff]  }
   0xf   : > { %v2264_v26 = vld [vmem:[%s2708_s1 + $0x30] sm:$0xff]   ;;  %s2436_s13 = scalar_lea.vmem %s2707_s0, %s1878_s18  ;;  %v2268_v30 = vld [vmem:[%s2708_s1 + $0x38] sm:$0xff]   ;;  %v2272_v42 = vld [vmem:[%s2708_s1 + $0x1c0] sm:$0xff]  }
  0x10   : > { %1955 = vmatpush3.bf16.msra.mxu0 %v2248_v10  ;;  %v2265_v27 = vld [vmem:[%s2708_s1 + $0xb0] sm:$0xff]   ;;  %v2269_v31 = vld [vmem:[%s2708_s1 + $0xb8] sm:$0xff]   ;;  %v178_v32 = vld [vmem:[%s2436_s13] sm:$0xff] }
  0x11   : > { %2025 = vmatpush3.bf16.msra.mxu1 %v2249_v11  ;;  %1956 = vmatprep.subr.bf16.mxu0 %v2250_v12  ;;  %v182_v33 = vld [vmem:[%s2436_s13 + $0x20] sm:$0xff]  ;;  %v179_v34 = vld [vmem:[%s2436_s13 + $0x8] sm:$0xff]  ;;  %v2278_v62 = vld [vmem:[%s2708_s1 + $0x150] sm:$0xff]  }
  0x12   : > { %2026 = vmatprep.subr.bf16.mxu1 %v2251_v13  ;;  %v1722_v35 = vcombine.low %v178_v32, %v182_v33  ;;  %v1723_v36 = vcombine.high %v178_v32, %v182_v33  ;;  %v183_v37 = vld [vmem:[%s2436_s13 + $0x28] sm:$0xff]  ;;  %v2273_v43 = vld [vmem:[%s2708_s1 + $0x180] sm:$0xff]   ;;  %v2279_v63 = vld [vmem:[%s2708_s1 + $0x110] sm:$0xff]  }
  0x13   : > { %v1724_v38 = vcombine.low %v179_v34, %v183_v37  ;;  %v1725_v39 = vcombine.high %v179_v34, %v183_v37  ;;  %v186_v44 = vld [vmem:[%s2436_s13 + $0x40] sm:$0xff]  ;;  %v187_v47 = vld [vmem:[%s2436_s13 + $0x48] sm:$0xff]  ;;  %v2280_v0 = vld [vmem:[%s2708_s1 + $0x1d0] sm:$0xff]  }
  0x14   : > { %1957 = vmatpush3.bf16.msra.mxu0 %v2252_v14  ;;  %1161 = vmatprep.mubr.bf16.mxu0 %v1723_v36  ;;  %v190_v45 = vld [vmem:[%s2436_s13 + $0x60] sm:$0xff]  ;;  %v191_v48 = vld [vmem:[%s2436_s13 + $0x68] sm:$0xff]  ;;  %v2281_v1 = vld [vmem:[%s2708_s1 + $0x190] sm:$0xff]  }
  0x15   : > { %2027 = vmatpush3.bf16.msra.mxu1 %v2253_v15  ;;  %1958 = vmatprep.subr.bf16.mxu0 %v2254_v16  ;;  %v1731_v46 = vcombine.high %v186_v44, %v190_v45  ;;  %v1733_v49 = vcombine.high %v187_v47, %v191_v48  ;;  %v2274_v50 = vld [vmem:[%s2708_s1 + $0x148] sm:$0xff]   ;;  %v1730_v51 = vcombine.low %v186_v44, %v190_v45  ;;  %v194_v56 = vld [vmem:[%s2436_s13 + $0x80] sm:$0xff]  ;;  %v2282_v10 = vld [vmem:[%s2708_s1 + $0x158] sm:$0xff]  }
  0x16   : > { %2028 = vmatprep.subr.bf16.mxu1 %v2255_v17  ;;  %1266 = vmatprep.mubr.bf16.mxu1 %v1725_v39  ;;  %v2275_v52 = vld [vmem:[%s2708_s1 + $0x108] sm:$0xff]   ;;  %v1732_v53 = vcombine.low %v187_v47, %v191_v48  ;;  %v198_v57 = vld [vmem:[%s2436_s13 + $0xa0] sm:$0xff]  ;;  %v2283_v11 = vld [vmem:[%s2708_s1 + $0x118] sm:$0xff]  }
  0x17   : > { %v2276_v54 = vld [vmem:[%s2708_s1 + $0x1c8] sm:$0xff]   ;;  %v1739_v60 = vcombine.high %v194_v56, %v198_v57  ;;  %v1738_v2 = vcombine.low %v194_v56, %v198_v57  ;;  %v202_v3 = vld [vmem:[%s2436_s13 + $0xc0] sm:$0xff]  ;;  %v2284_v12 = vld [vmem:[%s2708_s1 + $0x1d8] sm:$0xff]  }
  0x18   : > { %1959 = vmatpush3.bf16.msra.mxu0 %v2256_v18  ;;  %v2277_v55 = vld [vmem:[%s2708_s1 + $0x188] sm:$0xff]   ;;  %v206_v4 = vld [vmem:[%s2436_s13 + $0xe0] sm:$0xff]  ;;  %v2285_v13 = vld [vmem:[%s2708_s1 + $0x198] sm:$0xff]  }
  0x19   : > { %2029 = vmatpush3.bf16.msra.mxu1 %v2257_v19  ;;  %1960 = vmatprep.subr.bf16.mxu0 %v2258_v20  ;;  %v195_v58 = vld [vmem:[%s2436_s13 + $0x88] sm:$0xff]  ;;  %v1747_v7 = vcombine.high %v202_v3, %v206_v4  ;;  %v210_v14 = vld [vmem:[%s2436_s13 + $0x100] sm:$0xff]  ;;  %v1746_v19 = vcombine.low %v202_v3, %v206_v4  ;;  %v2298_v47 = vld [vmem:[%s2708_s1 + $0x178] sm:$0xff]  }
  0x1a   : > { %2030 = vmatprep.subr.bf16.mxu1 %v2259_v21  ;;  %v199_v59 = vld [vmem:[%s2436_s13 + $0xa8] sm:$0xff]  ;;  %v214_v15 = vld [vmem:[%s2436_s13 + $0x120] sm:$0xff] }
  0x1b   : > { %v1741_v61 = vcombine.high %v195_v58, %v199_v59  ;;  %v203_v5 = vld [vmem:[%s2436_s13 + $0xc8] sm:$0xff]  ;;  %v1740_v6 = vcombine.low %v195_v58, %v199_v59  ;;  %v2286_v18 = vld [vmem:[%s2708_s1 + $0x160] sm:$0xff]   ;;  %v1754_v32 = vcombine.low %v210_v14, %v214_v15 }
  0x1c   : > { %1961 = vmatpush3.bf16.msra.mxu0 %v2260_v22  ;;  %v207_v8 = vld [vmem:[%s2436_s13 + $0xe8] sm:$0xff]  ;;  %v2287_v20 = vld [vmem:[%s2708_s1 + $0x120] sm:$0xff]   ;;  %v1755_v22 = vcombine.high %v210_v14, %v214_v15  ;;  %v188_v14 = vld [vmem:[%s2436_s13 + $0x50] sm:$0xff] }
  0x1d   : > { %2031 = vmatpush3.bf16.msra.mxu1 %v2261_v23  ;;  %1962 = vmatprep.subr.bf16.mxu0 %v2262_v24  ;;  %v1749_v9 = vcombine.high %v203_v5, %v207_v8  ;;  %v211_v16 = vld [vmem:[%s2436_s13 + $0x108] sm:$0xff]  ;;  %v1748_v21 = vcombine.low %v203_v5, %v207_v8  ;;  %v2288_v23 = vld [vmem:[%s2708_s1 + $0x1e0] sm:$0xff]   ;;  %v181_v8 = vld [vmem:[%s2436_s13 + $0x18] sm:$0xff] }
  0x1e   : > { %2032 = vmatprep.subr.bf16.mxu1 %v2263_v25  ;;  %v215_v17 = vld [vmem:[%s2436_s13 + $0x128] sm:$0xff]  ;;  %v2289_v25 = vld [vmem:[%s2708_s1 + $0x1a0] sm:$0xff]   ;;  %v192_v15 = vld [vmem:[%s2436_s13 + $0x70] sm:$0xff] }
  0x1f   : > { %v1757_v24 = vcombine.high %v211_v16, %v215_v17  ;;  %v2292_v33 = vld [vmem:[%s2708_s1 + $0x1e8] sm:$0xff]   ;;  %v1756_v34 = vcombine.low %v211_v16, %v215_v17  ;;  %v226_v39 = vld [vmem:[%s2436_s13 + $0x180] sm:$0xff]  ;;  %v189_v16 = vld [vmem:[%s2436_s13 + $0x58] sm:$0xff] }
  0x20   : > { %1963 = vmatpush3.bf16.msra.mxu0 %v2264_v26  ;;  %v2290_v26 = vld [vmem:[%s2708_s1 + $0x168] sm:$0xff]   ;;  %v193_v17 = vld [vmem:[%s2436_s13 + $0x78] sm:$0xff] }
  0x21   : > { %2033 = vmatpush3.bf16.msra.mxu1 %v2265_v27  ;;  %1964 = vmatprep.subr.bf16.mxu0 %v2266_v28  ;;  %v2291_v27 = vld [vmem:[%s2708_s1 + $0x128] sm:$0xff]   ;;  %v218_v28 = vld [vmem:[%s2436_s13 + $0x140] sm:$0xff] }
  0x22   : > { %2034 = vmatprep.subr.bf16.mxu1 %v2267_v29  ;;  %v222_v29 = vld [vmem:[%s2436_s13 + $0x160] sm:$0xff]  ;;  %v2293_v36 = vld [vmem:[%s2708_s1 + $0x1a8] sm:$0xff]  }
  0x23   : > { %v227_v44 = vld [vmem:[%s2436_s13 + $0x188] sm:$0xff] }
  0x24   : > { %1965 = vmatpush3.bf16.msra.mxu0 %v2268_v30  ;;  %v219_v30 = vld [vmem:[%s2436_s13 + $0x148] sm:$0xff] }
  0x25   : > { %2035 = vmatpush3.bf16.msra.mxu1 %v2269_v31  ;;  %2090 = vmatprep.subr.bf16.mxu0 %v2270_v40  ;;  %v223_v31 = vld [vmem:[%s2436_s13 + $0x168] sm:$0xff]  ;;  %v2295_v40 = vld [vmem:[%s2708_s1 + $0x130] sm:$0xff]  }
  0x26   : > { %2160 = vmatprep.subr.bf16.mxu1 %v2272_v42  ;;  %v1765_v37 = vcombine.high %v219_v30, %v223_v31  ;;  %v230_v42 = vld [vmem:[%s2436_s13 + $0x1a0] sm:$0xff]  ;;  %v231_v45 = vld [vmem:[%s2436_s13 + $0x1a8] sm:$0xff]  ;;  %v1764_v48 = vcombine.low %v219_v30, %v223_v31  ;;  %v204_v30 = vld [vmem:[%s2436_s13 + $0xd0] sm:$0xff] }
  0x27   : > { %1162 = vmatmul.mubr.bf16.vlgmr.msra.gmra.mrb[0].mxu0 %v1722_v35  ;;  %v1763_v35 = vcombine.high %v218_v28, %v222_v29  ;;  %v235_v56 = vld [vmem:[%s2436_s13 + $0x1c8] sm:$0xff]  ;;  %v1770_v58 = vcombine.low %v226_v39, %v230_v42  ;;  %v1772_v59 = vcombine.low %v227_v44, %v231_v45  ;;  %v208_v31 = vld [vmem:[%s2436_s13 + $0xf0] sm:$0xff] }
  0x28   : > { %1267 = vmatmul.mubr.bf16.vlgmr.msra.gmra.mrb[0].mxu1 %v1724_v38  ;;  %2091 = vmatpush3.bf16.msra.mxu0 %v2271_v41  ;;  %v2294_v38 = vld [vmem:[%s2708_s1 + $0x170] sm:$0xff]   ;;  %v239_v57 = vld [vmem:[%s2436_s13 + $0x1e8] sm:$0xff] }
  0x29   : > { %2161 = vmatpush3.bf16.msra.mxu1 %v2273_v43  ;;  %1169 = vmatprep.mubr.bf16.mxu0 %v1731_v46  ;;  %v2296_v41 = vld [vmem:[%s2708_s1 + $0x1f0] sm:$0xff]   ;;  %v1762_v46 = vcombine.low %v218_v28, %v222_v29  ;;  %v1780_v3 = vcombine.low %v235_v56, %v239_v57 }
  0x2a   : > { %1274 = vmatprep.mubr.bf16.mxu1 %v1733_v49  ;;  %2092 = vmatprep.subr.bf16.mxu0 %v2274_v50  ;;  %v2297_v43 = vld [vmem:[%s2708_s1 + $0x1b0] sm:$0xff]   ;;  %v1771_v49 = vcombine.high %v226_v39, %v230_v42  ;;  %v2299_v50 = vld [vmem:[%s2708_s1 + $0x138] sm:$0xff]   ;;  %v1750_v42 = vcombine.low %v204_v30, %v208_v31 }
  0x2b   : > { %2162 = vmatprep.subr.bf16.mxu1 %v2276_v54  ;;  %v234_v54 = vld [vmem:[%s2436_s13 + $0x1c0] sm:$0xff]  ;;  %v216_v39 = vld [vmem:[%s2436_s13 + $0x130] sm:$0xff] }
  0x2c   : > { %2093 = vmatpush3.bf16.msra.mxu0 %v2275_v52  ;;  %v2300_v52 = vld [vmem:[%s2708_s1 + $0x1f8] sm:$0xff]  }
  0x2d   : > { %2163 = vmatpush3.bf16.msra.mxu1 %v2277_v55  ;;  %2094 = vmatprep.subr.bf16.mxu0 %v2278_v62  ;;  %v238_v55 = vld [vmem:[%s2436_s13 + $0x1e0] sm:$0xff] }
  0x2e   : > { %2164 = vmatprep.subr.bf16.mxu1 %v2280_v0  ;;  %v242_v62 = vld [vmem:[%s2436_s13 + $0x200] sm:$0xff]  ;;  %v243_v0 = vld [vmem:[%s2436_s13 + $0x208] sm:$0xff] }
  0x2f   : > { %1170 = vmatmul.mubr.bf16.gmra.mrb[4].mxu0 %v1730_v51  ;;  %v1773_v51 = vcombine.high %v227_v44, %v231_v45 }
  0x30   : > { %1275 = vmatmul.mubr.bf16.gmra.mrb[4].mxu1 %v1732_v53  ;;  %1177 = vmatprep.mubr.bf16.mxu0 %v1739_v60  ;;  %v2301_v53 = vld [vmem:[%s2708_s1 + $0x1b8] sm:$0xff]   ;;  %v1779_v60 = vcombine.high %v234_v54, %v238_v55 }
  0x31   : > { %1282 = vmatprep.mubr.bf16.mxu1 %v1741_v61  ;;  %2095 = vmatpush3.bf16.msra.mxu0 %v2279_v63  ;;  %v1781_v61 = vcombine.high %v235_v56, %v239_v57  ;;  %v246_v63 = vld [vmem:[%s2436_s13 + $0x220] sm:$0xff]  ;;  %v229_v56 = vld [vmem:[%s2436_s13 + $0x198] sm:$0xff] }
  0x32   : > { %2165 = vmatpush3.bf16.msra.mxu1 %v2281_v1  ;;  %2096 = vmatprep.subr.bf16.mxu0 %v2282_v10  ;;  %v247_v1 = vld [vmem:[%s2436_s13 + $0x228] sm:$0xff]  ;;  %v1787_v4 = vcombine.high %v242_v62, %v246_v63  ;;  %v1786_v10 = vcombine.low %v242_v62, %v246_v63  ;;  %v233_v57 = vld [vmem:[%s2436_s13 + $0x1b8] sm:$0xff]  ;;  %v236_v62 = vld [vmem:[%s2436_s13 + $0x1d0] sm:$0xff] }
  0x33   : > { %2166 = vmatprep.subr.bf16.mxu1 %v2284_v12  ;;  %v1789_v5 = vcombine.high %v243_v0, %v247_v1  ;;  %v240_v63 = vld [vmem:[%s2436_s13 + $0x1f0] sm:$0xff] }
  0x35   : > { %2097 = vmatpush3.bf16.msra.mxu0 %v2283_v11  ;;  %v1788_v11 = vcombine.low %v243_v0, %v247_v1  ;;  %v237_v0 = vld [vmem:[%s2436_s13 + $0x1d8] sm:$0xff] }
  0x36   : > { %2167 = vmatpush3.bf16.msra.mxu1 %v2285_v13  ;;  %2098 = vmatprep.subr.bf16.mxu0 %v2286_v18  ;;  %v241_v1 = vld [vmem:[%s2436_s13 + $0x1f8] sm:$0xff] }
  0x37   : > { %1178 = vmatmul.mubr.bf16.gmra.mrb[8].mxu0 %v1738_v2  ;;  %2168 = vmatprep.subr.bf16.mxu1 %v2288_v23  ;;  %v1778_v2 = vcombine.low %v234_v54, %v238_v55  ;;  %v200_v23 = vld [vmem:[%s2436_s13 + $0xb0] sm:$0xff] }
  0x38   : > { %1283 = vmatmul.mubr.bf16.gmra.mrb[8].mxu1 %v1740_v6  ;;  %1185 = vmatprep.mubr.bf16.mxu0 %v1747_v7  ;;  %v180_v6 = vld [vmem:[%s2436_s13 + $0x10] sm:$0xff] }
  0x39   : > { %1290 = vmatprep.mubr.bf16.mxu1 %v1749_v9  ;;  %2099 = vmatpush3.bf16.msra.mxu0 %v2287_v20  ;;  %v184_v7 = vld [vmem:[%s2436_s13 + $0x30] sm:$0xff]  ;;  %v185_v9 = vld [vmem:[%s2436_s13 + $0x38] sm:$0xff]  ;;  %v1735_v20 = vcombine.high %v188_v14, %v192_v15 }
  0x3a   : > { %2169 = vmatpush3.bf16.msra.mxu1 %v2289_v25  ;;  %2100 = vmatprep.subr.bf16.mxu0 %v2290_v26  ;;  %v1727_v12 = vcombine.high %v180_v6, %v184_v7  ;;  %v1729_v13 = vcombine.high %v181_v8, %v185_v9  ;;  %v1726_v18 = vcombine.low %v180_v6, %v184_v7  ;;  %v201_v25 = vld [vmem:[%s2436_s13 + $0xb8] sm:$0xff]  ;;  %v228_v54 = vld [vmem:[%s2436_s13 + $0x190] sm:$0xff] }
  0x3b   : > { %2170 = vmatprep.subr.bf16.mxu1 %v2292_v33  ;;  %v1734_v26 = vcombine.low %v188_v14, %v192_v15  ;;  %v209_v33 = vld [vmem:[%s2436_s13 + $0xf8] sm:$0xff]  ;;  %v232_v55 = vld [vmem:[%s2436_s13 + $0x1b0] sm:$0xff] }
  0x3c   : > { %v244_v6 = vld [vmem:[%s2436_s13 + $0x210] sm:$0xff] }
  0x3d   : > { %2101 = vmatpush3.bf16.msra.mxu0 %v2291_v27  ;;  %v1736_v27 = vcombine.low %v189_v16, %v193_v17  ;;  %v248_v7 = vld [vmem:[%s2436_s13 + $0x230] sm:$0xff] }
  0x3e   : > { %2171 = vmatpush3.bf16.msra.mxu1 %v2293_v36  ;;  %2102 = vmatprep.subr.bf16.mxu0 %v2294_v38  ;;  %v1751_v36 = vcombine.high %v204_v30, %v208_v31  ;;  %v212_v38 = vld [vmem:[%s2436_s13 + $0x110] sm:$0xff]  ;;  %v1790_v14 = vcombine.low %v244_v6, %v248_v7 }
  0x3f   : > { %1186 = vmatmul.mubr.bf16.gmra.mrb[12].mxu0 %v1746_v19  ;;  %2172 = vmatprep.subr.bf16.mxu1 %v2296_v41  ;;  %v1728_v19 = vcombine.low %v181_v8, %v185_v9  ;;  %v217_v41 = vld [vmem:[%s2436_s13 + $0x138] sm:$0xff]  ;;  %v1759_v44 = vcombine.high %v212_v38, %v216_v39 }
  0x40   : > { %1291 = vmatmul.mubr.bf16.gmra.mrb[12].mxu1 %v1748_v21  ;;  %1193 = vmatprep.mubr.bf16.mxu0 %v1755_v22  ;;  %v1737_v21 = vcombine.high %v189_v16, %v193_v17  ;;  %v196_v22 = vld [vmem:[%s2436_s13 + $0x90] sm:$0xff]  ;;  %v245_v8 = vld [vmem:[%s2436_s13 + $0x218] sm:$0xff] }
  0x41   : > { %1298 = vmatprep.mubr.bf16.mxu1 %v1757_v24  ;;  %2103 = vmatpush3.bf16.msra.mxu0 %v2295_v40  ;;  %v197_v24 = vld [vmem:[%s2436_s13 + $0x98] sm:$0xff]  ;;  %v1743_v28 = vcombine.high %v196_v22, %v200_v23 }
  0x42   : > { %2173 = vmatpush3.bf16.msra.mxu1 %v2297_v43  ;;  %2104 = vmatprep.subr.bf16.mxu0 %v2298_v47  ;;  %v1745_v29 = vcombine.high %v197_v24, %v201_v25  ;;  %v213_v40 = vld [vmem:[%s2436_s13 + $0x118] sm:$0xff]  ;;  %v224_v47 = vld [vmem:[%s2436_s13 + $0x170] sm:$0xff] }
  0x43   : > { %2174 = vmatprep.subr.bf16.mxu1 %v2300_v52  ;;  %v1761_v45 = vcombine.high %v213_v40, %v217_v41  ;;  %v249_v9 = vld [vmem:[%s2436_s13 + $0x238] sm:$0xff] }
  0x44   : > { %v1792_v15 = vcombine.low %v245_v8, %v249_v9 }
  0x45   : > { %2105 = vmatpush3.bf16.msra.mxu0 %v2299_v50  ;;  %v1758_v50 = vcombine.low %v212_v38, %v216_v39 }
  0x46   : > { %2175 = vmatpush3.bf16.msra.mxu1 %v2301_v53 }
  0x47   : > { %1194 = vmatmul.mubr.bf16.gmra.mrb[16].mxu0 %v1754_v32  ;;  %v205_v32 = vld [vmem:[%s2436_s13 + $0xd8] sm:$0xff] }
  0x48   : > { %1299 = vmatmul.mubr.bf16.gmra.mrb[16].mxu1 %v1756_v34  ;;  %1201 = vmatprep.mubr.bf16.mxu0 %v1763_v35  ;;  %v1742_v34 = vcombine.low %v196_v22, %v200_v23  ;;  %v1744_v35 = vcombine.low %v197_v24, %v201_v25  ;;  %v1752_v43 = vcombine.low %v205_v32, %v209_v33 }
  0x49   : > { %1306 = vmatprep.mubr.bf16.mxu1 %v1765_v37  ;;  %v1753_v37 = vcombine.high %v205_v32, %v209_v33 }
  0x4f   : > { %1202 = vmatmul.mubr.bf16.gmra.mrb[20].mxu0 %v1762_v46  ;;  %v220_v46 = vld [vmem:[%s2436_s13 + $0x150] sm:$0xff] }
  0x50   : > { %1307 = vmatmul.mubr.bf16.gmra.mrb[20].mxu1 %v1764_v48  ;;  %1209 = vmatprep.mubr.bf16.mxu0 %v1771_v49  ;;  %v221_v48 = vld [vmem:[%s2436_s13 + $0x158] sm:$0xff]  ;;  %v1767_v52 = vcombine.high %v220_v46, %v224_v47 }
  0x51   : > { %1314 = vmatprep.mubr.bf16.mxu1 %v1773_v51  ;;  %v225_v49 = vld [vmem:[%s2436_s13 + $0x178] sm:$0xff]  ;;  %v1760_v51 = vcombine.low %v213_v40, %v217_v41  ;;  %s1720_s13 = sshll.u32 %s2712_s19, 2 }
  0x52   : > { %v1769_v53 = vcombine.high %v221_v48, %v225_v49  ;;  %s2677_s28 = scalar_lea.vmem %s2710_s3, %s1720_s13 }
  0x57   : > { %1210 = vmatmul.mubr.bf16.gmra.mrb[24].mxu0 %v1770_v58  ;;  %v1766_v58 = vcombine.low %v220_v46, %v224_v47 }
  0x58   : > { %1315 = vmatmul.mubr.bf16.gmra.mrb[24].mxu1 %v1772_v59  ;;  %1217 = vmatprep.mubr.bf16.mxu0 %v1779_v60  ;;  %v1768_v59 = vcombine.low %v221_v48, %v225_v49  ;;  %v1775_v60 = vcombine.high %v228_v54, %v232_v55 }
  0x59   : > { %1322 = vmatprep.mubr.bf16.mxu1 %v1781_v61  ;;  %v1777_v61 = vcombine.high %v229_v56, %v233_v57 }
  0x5f   : > { %1218 = vmatmul.mubr.bf16.gmra.mrb[28].mxu0 %v1778_v2  ;;  %v1774_v2 = vcombine.low %v228_v54, %v232_v55 }
  0x60   : > { %1323 = vmatmul.mubr.bf16.gmra.mrb[28].mxu1 %v1780_v3  ;;  %1225 = vmatprep.mubr.bf16.mxu0 %v1787_v4  ;;  %v1776_v3 = vcombine.low %v229_v56, %v233_v57  ;;  %v1783_v4 = vcombine.high %v236_v62, %v240_v63 }
  0x61   : > { %1330 = vmatprep.mubr.bf16.mxu1 %v1789_v5  ;;  %v1785_v5 = vcombine.high %v237_v0, %v241_v1 }
  0x67   : > { %1226 = vmatmul.mubr.bf16.gmra.mrb[32].mxu0 %v1786_v10  ;;  %v1782_v10 = vcombine.low %v236_v62, %v240_v63 }
  0x68   : > { %1331 = vmatmul.mubr.bf16.gmra.mrb[32].mxu1 %v1788_v11  ;;  %1371 = vmatprep.mubr.bf16.mxu0 %v1727_v12  ;;  %v1784_v11 = vcombine.low %v237_v0, %v241_v1  ;;  %v1791_v12 = vcombine.high %v244_v6, %v248_v7 }
  0x69   : > { %1476 = vmatprep.mubr.bf16.mxu1 %v1729_v13  ;;  %v1793_v13 = vcombine.high %v245_v8, %v249_v9 }
  0x6f   : > { %1372 = vmatmul.mubr.bf16.vlgmr.msra.gmra.mrb[36].mxu0 %v1726_v18  ;;  %v2615_v18 = vld [vmem:[%s2709_s2] ss:$0 sm:$0xff] }
  0x70   : > { %1477 = vmatmul.mubr.bf16.vlgmr.msra.gmra.mrb[36].mxu1 %v1728_v19  ;;  %1379 = vmatprep.mubr.bf16.mxu0 %v1735_v20 }
  0x71   : > { %1484 = vmatprep.mubr.bf16.mxu1 %v1737_v21 }
  0x77   : > { %1380 = vmatmul.mubr.bf16.gmra.mrb[40].mxu0 %v1734_v26 }
  0x78   : > { %1485 = vmatmul.mubr.bf16.gmra.mrb[40].mxu1 %v1736_v27  ;;  %1387 = vmatprep.mubr.bf16.mxu0 %v1743_v28 }
  0x79   : > { %1492 = vmatprep.mubr.bf16.mxu1 %v1745_v29 }
  0x7f   : > { %1388 = vmatmul.mubr.bf16.gmra.mrb[44].mxu0 %v1742_v34 }
  0x80   : > { %1493 = vmatmul.mubr.bf16.gmra.mrb[44].mxu1 %v1744_v35  ;;  %1395 = vmatprep.mubr.bf16.mxu0 %v1751_v36 }
  0x81   : > { %1500 = vmatprep.mubr.bf16.mxu1 %v1753_v37 }
  0x87   : > { %1396 = vmatmul.mubr.bf16.gmra.mrb[48].mxu0 %v1750_v42 }
  0x88   : > { %1501 = vmatmul.mubr.bf16.gmra.mrb[48].mxu1 %v1752_v43  ;;  %1403 = vmatprep.mubr.bf16.mxu0 %v1759_v44 }
  0x89   : > { %1508 = vmatprep.mubr.bf16.mxu1 %v1761_v45 }
  0x8f   : > { %1404 = vmatmul.mubr.bf16.gmra.mrb[52].mxu0 %v1758_v50 }
  0x90   : > { %1509 = vmatmul.mubr.bf16.gmra.mrb[52].mxu1 %v1760_v51  ;;  %1411 = vmatprep.mubr.bf16.mxu0 %v1767_v52 }
  0x91   : > { %1516 = vmatprep.mubr.bf16.mxu1 %v1769_v53 }
  0x97   : > { %1412 = vmatmul.mubr.bf16.gmra.mrb[56].mxu0 %v1766_v58 }
  0x98   : > { %1517 = vmatmul.mubr.bf16.gmra.mrb[56].mxu1 %v1768_v59  ;;  %1419 = vmatprep.mubr.bf16.mxu0 %v1775_v60 }
  0x99   : > { %1524 = vmatprep.mubr.bf16.mxu1 %v1777_v61 }
  0x9f   : > { %1420 = vmatmul.mubr.bf16.gmra.mrb[60].mxu0 %v1774_v2 }
  0xa0   : > { %1525 = vmatmul.mubr.bf16.gmra.mrb[60].mxu1 %v1776_v3  ;;  %1427 = vmatprep.mubr.bf16.mxu0 %v1783_v4 }
  0xa1   : > { %1532 = vmatprep.mubr.bf16.mxu1 %v1785_v5 }
  0xa7   : > { %1428 = vmatmul.mubr.bf16.gmra.mrb[64].mxu0 %v1782_v10 }
  0xa8   : > { %1533 = vmatmul.mubr.bf16.gmra.mrb[64].mxu1 %v1784_v11  ;;  %1435 = vmatprep.mubr.bf16.mxu0 %v1791_v12 }
  0xa9   : > { %1540 = vmatprep.mubr.bf16.mxu1 %v1793_v13 }
  0xaf   : > { %1436 = vmatmul.mubr.bf16.gmra.mrb[68].mxu0 %v1790_v14 }
  0xb0   : > { %1541 = vmatmul.mubr.bf16.gmra.mrb[68].mxu1 %v1792_v15 }
  0xfa   : > { %v1966_v16 = vpop.f32.mrb[0].mxu0 }
  0xfb   : > { %v2036_v17 = vpop.f32.mrb[0].mxu1  ;;  %v1967_v19 = vpop.f32.mrb[1].mxu0 }
  0xfc   : > { %v1968_v20 = vadd.f32 %v1967_v19, %v1966_v16  ;;  %v2037_v21 = vpop.f32.mrb[1].mxu1  ;;  %v1969_v22 = vpop.f32.mrb[2].mxu0 }
  0xfd   : > { %v2038_v23 = vadd.f32 %v2037_v21, %v2036_v17  ;;  %v2039_v24 = vpop.f32.mrb[2].mxu1  ;;  %v1970_v25 = vpop.f32.mrb[3].mxu0 }
  0xfe   : > { %v1164_v26 = vadd.f32 %v1968_v20, %v2615_v18  ;;  %v1971_v27 = vadd.f32 %v1970_v25, %v1969_v22  ;;  %v2040_v28 = vpop.f32.mrb[3].mxu1 }
  0xff   : > { %v2041_v29 = vadd.f32 %v2040_v28, %v2039_v24 }
 0x100   : > { %v2618_v30 = vadd.f32 %v2038_v23, %v1164_v26  ;;  %v1167_v31 = vadd.f32 %v1971_v27, %v2615_v18 }
 0x102   : > { %v2621_v32 = vadd.f32 %v2041_v29, %v1167_v31  ;;  %v1972_v33 = vpop.f32.mrb[4].mxu0 }
 0x103   : > { %v2042_v34 = vpop.f32.mrb[4].mxu1  ;;  %v1973_v35 = vpop.f32.mrb[5].mxu0 }
 0x104   : > { %v1974_v36 = vadd.f32 %v1973_v35, %v1972_v33  ;;  %v2043_v37 = vpop.f32.mrb[5].mxu1  ;;  %v1975_v38 = vpop.f32.mrb[6].mxu0 }
 0x105   : > { %v2044_v39 = vadd.f32 %v2043_v37, %v2042_v34  ;;  %v2045_v40 = vpop.f32.mrb[6].mxu1  ;;  %v1976_v41 = vpop.f32.mrb[7].mxu0 }
 0x106   : > { %v1172_v42 = vadd.f32 %v1974_v36, %v2615_v18  ;;  %v1977_v43 = vadd.f32 %v1976_v41, %v1975_v38  ;;  %v2046_v44 = vpop.f32.mrb[7].mxu1 }
 0x107   : > { %v2047_v45 = vadd.f32 %v2046_v44, %v2045_v40 }
 0x108   : > { %v2624_v46 = vadd.f32 %v2044_v39, %v1172_v42  ;;  %v1175_v47 = vadd.f32 %v1977_v43, %v2615_v18 }
 0x10a   : > { %v2627_v48 = vadd.f32 %v2047_v45, %v1175_v47  ;;  %v1978_v49 = vpop.f32.mrb[8].mxu0 }
 0x10b   : > { %v2048_v50 = vpop.f32.mrb[8].mxu1  ;;  %v1979_v51 = vpop.f32.mrb[9].mxu0 }
 0x10c   : > { %v1980_v52 = vadd.f32 %v1979_v51, %v1978_v49  ;;  %v2049_v53 = vpop.f32.mrb[9].mxu1  ;;  %v1981_v54 = vpop.f32.mrb[10].mxu0 }
 0x10d   : > { %v2050_v55 = vadd.f32 %v2049_v53, %v2048_v50  ;;  %v2051_v56 = vpop.f32.mrb[10].mxu1  ;;  %v1982_v57 = vpop.f32.mrb[11].mxu0 }
 0x10e   : > { %v1180_v58 = vadd.f32 %v1980_v52, %v2615_v18  ;;  %v1983_v59 = vadd.f32 %v1982_v57, %v1981_v54  ;;  %v2052_v60 = vpop.f32.mrb[11].mxu1 }
 0x10f   : > { %v2053_v61 = vadd.f32 %v2052_v60, %v2051_v56 }
 0x110   : > { %v2630_v62 = vadd.f32 %v2050_v55, %v1180_v58  ;;  %v1183_v63 = vadd.f32 %v1983_v59, %v2615_v18 }
 0x112   : > { %v2633_v0 = vadd.f32 %v2053_v61, %v1183_v63  ;;  %v1984_v1 = vpop.f32.mrb[12].mxu0 }
 0x113   : > { %v2054_v2 = vpop.f32.mrb[12].mxu1  ;;  %v1985_v3 = vpop.f32.mrb[13].mxu0 }
 0x114   : > { %v1986_v4 = vadd.f32 %v1985_v3, %v1984_v1  ;;  %v2055_v5 = vpop.f32.mrb[13].mxu1  ;;  %v1987_v6 = vpop.f32.mrb[14].mxu0 }
 0x115   : > { %v2056_v7 = vadd.f32 %v2055_v5, %v2054_v2  ;;  %v2057_v8 = vpop.f32.mrb[14].mxu1  ;;  %v1988_v9 = vpop.f32.mrb[15].mxu0 }
 0x116   : > { %v1188_v10 = vadd.f32 %v1986_v4, %v2615_v18  ;;  %v1989_v11 = vadd.f32 %v1988_v9, %v1987_v6  ;;  %v2058_v12 = vpop.f32.mrb[15].mxu1 }
 0x117   : > { %v2059_v13 = vadd.f32 %v2058_v12, %v2057_v8 }
 0x118   : > { %v2636_v14 = vadd.f32 %v2056_v7, %v1188_v10  ;;  %v1191_v15 = vadd.f32 %v1989_v11, %v2615_v18 }
 0x11a   : > { %v2639_v16 = vadd.f32 %v2059_v13, %v1191_v15  ;;  %v1990_v17 = vpop.f32.mrb[16].mxu0 }
 0x11b   : > { %v2060_v19 = vpop.f32.mrb[16].mxu1  ;;  %v1991_v20 = vpop.f32.mrb[17].mxu0 }
 0x11c   : > { %v1992_v21 = vadd.f32 %v1991_v20, %v1990_v17  ;;  %v2061_v22 = vpop.f32.mrb[17].mxu1  ;;  %v1993_v23 = vpop.f32.mrb[18].mxu0 }
 0x11d   : > { %v2062_v24 = vadd.f32 %v2061_v22, %v2060_v19  ;;  %v2063_v25 = vpop.f32.mrb[18].mxu1  ;;  %v1994_v26 = vpop.f32.mrb[19].mxu0 }
 0x11e   : > { %v1196_v27 = vadd.f32 %v1992_v21, %v2615_v18  ;;  %v1995_v28 = vadd.f32 %v1994_v26, %v1993_v23  ;;  %v2064_v29 = vpop.f32.mrb[19].mxu1 }
 0x11f   : > { %v2065_v31 = vadd.f32 %v2064_v29, %v2063_v25 }
 0x120   : > { %v2642_v33 = vadd.f32 %v2062_v24, %v1196_v27  ;;  %v1199_v34 = vadd.f32 %v1995_v28, %v2615_v18 }
 0x122   : > { %v2645_v35 = vadd.f32 %v2065_v31, %v1199_v34  ;;  %v1996_v36 = vpop.f32.mrb[20].mxu0 }
 0x123   : > { %v2066_v37 = vpop.f32.mrb[20].mxu1  ;;  %v1997_v38 = vpop.f32.mrb[21].mxu0 }
 0x124   : > { %v1998_v39 = vadd.f32 %v1997_v38, %v1996_v36  ;;  %v2067_v40 = vpop.f32.mrb[21].mxu1  ;;  %v1999_v41 = vpop.f32.mrb[22].mxu0 }
 0x125   : > { %v2068_v42 = vadd.f32 %v2067_v40, %v2066_v37  ;;  %v2069_v43 = vpop.f32.mrb[22].mxu1  ;;  %v2000_v44 = vpop.f32.mrb[23].mxu0 }
 0x126   : > { %v1204_v45 = vadd.f32 %v1998_v39, %v2615_v18  ;;  %v2001_v47 = vadd.f32 %v2000_v44, %v1999_v41  ;;  %v2070_v49 = vpop.f32.mrb[23].mxu1 }
 0x127   : > { %v2071_v50 = vadd.f32 %v2070_v49, %v2069_v43 }
 0x128   : > { %v2648_v51 = vadd.f32 %v2068_v42, %v1204_v45  ;;  %v1207_v52 = vadd.f32 %v2001_v47, %v2615_v18 }
 0x12a   : > { %v2651_v53 = vadd.f32 %v2071_v50, %v1207_v52  ;;  %v2002_v54 = vpop.f32.mrb[24].mxu0 }
 0x12b   : > { %v2072_v55 = vpop.f32.mrb[24].mxu1  ;;  %v2003_v56 = vpop.f32.mrb[25].mxu0 }
 0x12c   : > { %v2004_v57 = vadd.f32 %v2003_v56, %v2002_v54  ;;  %v2073_v58 = vpop.f32.mrb[25].mxu1  ;;  %v2005_v59 = vpop.f32.mrb[26].mxu0 }
 0x12d   : > { %v2074_v60 = vadd.f32 %v2073_v58, %v2072_v55  ;;  %v2075_v61 = vpop.f32.mrb[26].mxu1  ;;  %v2006_v63 = vpop.f32.mrb[27].mxu0 }
 0x12e   : > { %v1212_v1 = vadd.f32 %v2004_v57, %v2615_v18  ;;  %v2007_v2 = vadd.f32 %v2006_v63, %v2005_v59  ;;  %v2076_v3 = vpop.f32.mrb[27].mxu1 }
 0x12f   : > { %v2077_v4 = vadd.f32 %v2076_v3, %v2075_v61 }
 0x130   : > { %v2654_v5 = vadd.f32 %v2074_v60, %v1212_v1  ;;  %v1215_v6 = vadd.f32 %v2007_v2, %v2615_v18 }
 0x132   : > { %v2657_v7 = vadd.f32 %v2077_v4, %v1215_v6  ;;  %v2008_v8 = vpop.f32.mrb[28].mxu0 }
 0x133   : > { %v2078_v9 = vpop.f32.mrb[28].mxu1  ;;  %v2009_v10 = vpop.f32.mrb[29].mxu0 }
 0x134   : > { %v2010_v11 = vadd.f32 %v2009_v10, %v2008_v8  ;;  %v2079_v12 = vpop.f32.mrb[29].mxu1  ;;  %v2011_v13 = vpop.f32.mrb[30].mxu0 }
 0x135   : > { %v2080_v15 = vadd.f32 %v2079_v12, %v2078_v9  ;;  %v2081_v17 = vpop.f32.mrb[30].mxu1  ;;  %v2012_v19 = vpop.f32.mrb[31].mxu0 }
 0x136   : > { %v1220_v20 = vadd.f32 %v2010_v11, %v2615_v18  ;;  %v2013_v21 = vadd.f32 %v2012_v19, %v2011_v13  ;;  %v2082_v22 = vpop.f32.mrb[31].mxu1 }
 0x137   : > { %v2083_v23 = vadd.f32 %v2082_v22, %v2081_v17 }
 0x138   : > { %v2660_v24 = vadd.f32 %v2080_v15, %v1220_v20  ;;  %v1223_v25 = vadd.f32 %v2013_v21, %v2615_v18 }
 0x13a   : > { %v2663_v26 = vadd.f32 %v2083_v23, %v1223_v25  ;;  %v2014_v27 = vpop.f32.mrb[32].mxu0 }
 0x13b   : > { %v2084_v28 = vpop.f32.mrb[32].mxu1  ;;  %v2015_v29 = vpop.f32.mrb[33].mxu0 }
 0x13c   : > { %v2016_v31 = vadd.f32 %v2015_v29, %v2014_v27  ;;  %v2085_v34 = vpop.f32.mrb[33].mxu1  ;;  %v2017_v36 = vpop.f32.mrb[34].mxu0 }
 0x13d   : > { %v2086_v37 = vadd.f32 %v2085_v34, %v2084_v28  ;;  %v2087_v38 = vpop.f32.mrb[34].mxu1  ;;  %v2018_v39 = vpop.f32.mrb[35].mxu0 }
 0x13e   : > { %v1228_v40 = vadd.f32 %v2016_v31, %v2615_v18  ;;  %v2019_v41 = vadd.f32 %v2018_v39, %v2017_v36  ;;  %v2088_v42 = vpop.f32.mrb[35].mxu1 }
 0x13f   : > { %v2089_v43 = vadd.f32 %v2088_v42, %v2087_v38 }
 0x140   : > { %v2666_v44 = vadd.f32 %v2086_v37, %v1228_v40  ;;  %v1231_v45 = vadd.f32 %v2019_v41, %v2615_v18 }
 0x142   : > { %v2669_v47 = vadd.f32 %v2089_v43, %v1231_v45  ;;  %v2106_v49 = vpop.f32.mrb[36].mxu0 }
 0x143   : > { %v2176_v50 = vpop.f32.mrb[36].mxu1  ;;  %v2107_v52 = vpop.f32.mrb[37].mxu0 }
 0x144   : > { %v2108_v54 = vadd.f32 %v2107_v52, %v2106_v49  ;;  %v2177_v55 = vpop.f32.mrb[37].mxu1  ;;  %v2109_v56 = vpop.f32.mrb[38].mxu0 }
 0x145   : > { %v2178_v57 = vadd.f32 %v2177_v55, %v2176_v50  ;;  %v2179_v58 = vpop.f32.mrb[38].mxu1  ;;  %v2110_v59 = vpop.f32.mrb[39].mxu0 }
 0x146   : > { %v1374_v60 = vadd.f32 %v2108_v54, %v2618_v30  ;;  %v2111_v61 = vadd.f32 %v2110_v59, %v2109_v56  ;;  %v2180_v63 = vpop.f32.mrb[39].mxu1 }
 0x147   : > { %v2181_v1 = vadd.f32 %v2180_v63, %v2179_v58 }
 0x148   : > { %v1479_v2 = vadd.f32 %v2178_v57, %v1374_v60  ;;  %v1377_v18 = vadd.f32 %v2111_v61, %v2621_v32 }
 0x14a   : > { %v1482_v3 = vadd.f32 %v2181_v1, %v1377_v18  ;;  %v2112_v4 = vpop.f32.mrb[40].mxu0  ;;  %v1549_v9 = vmax.f32 %v1479_v2, 0.0 }
 0x14b   : > { %v2182_v6 = vpop.f32.mrb[40].mxu1  ;;  %v2113_v8 = vpop.f32.mrb[41].mxu0 }
 0x14c   : > { %v1550_v10 = vmax.f32 %v1482_v3, 0.0  ;;  %v2114_v11 = vadd.f32 %v2113_v8, %v2112_v4  ;;  %v2183_v12 = vpop.f32.mrb[41].mxu1  ;;  %v2115_v13 = vpop.f32.mrb[42].mxu0 }
 0x14d   : > { %v2184_v30 = vadd.f32 %v2183_v12, %v2182_v6  ;;  %v2185_v15 = vpop.f32.mrb[42].mxu1  ;;  %v2116_v17 = vpop.f32.mrb[43].mxu0 }
 0x14e   : > { %v1900_v32 = vpack.c.bf16 %v1550_v10, %v1549_v9  ;;  %v1382_v19 = vadd.f32 %v2114_v11, %v2624_v46  ;;  %v2117_v20 = vadd.f32 %v2116_v17, %v2115_v13  ;;  %v2186_v21 = vpop.f32.mrb[43].mxu1 }
 0x14f   : > { %v2187_v22 = vadd.f32 %v2186_v21, %v2185_v15 }
 0x150   : > { %1901 = vst [vmem:[%s2677_s28] sm:$0xff] %v1900_v32   ;;  %v1487_v23 = vadd.f32 %v2184_v30, %v1382_v19  ;;  %v1385_v25 = vadd.f32 %v2117_v20, %v2627_v48 }
 0x152   : > { %v1490_v27 = vadd.f32 %v2187_v22, %v1385_v25  ;;  %v2118_v28 = vpop.f32.mrb[44].mxu0  ;;  %v1551_v34 = vmax.f32 %v1487_v23, 0.0 }
 0x153   : > { %v2188_v29 = vpop.f32.mrb[44].mxu1  ;;  %v2119_v31 = vpop.f32.mrb[45].mxu0 }
 0x154   : > { %v1552_v36 = vmax.f32 %v1490_v27, 0.0  ;;  %v2120_v37 = vadd.f32 %v2119_v31, %v2118_v28  ;;  %v2189_v38 = vpop.f32.mrb[45].mxu1  ;;  %v2121_v39 = vpop.f32.mrb[46].mxu0 }
 0x155   : > { %v2190_v40 = vadd.f32 %v2189_v38, %v2188_v29  ;;  %v2191_v41 = vpop.f32.mrb[46].mxu1  ;;  %v2122_v46 = vpop.f32.mrb[47].mxu0 }
 0x156   : > { %v1905_v42 = vpack.c.bf16 %v1552_v36, %v1551_v34  ;;  %v1390_v43 = vadd.f32 %v2120_v37, %v2630_v62  ;;  %v2123_v45 = vadd.f32 %v2122_v46, %v2121_v39  ;;  %v2192_v49 = vpop.f32.mrb[47].mxu1 }
 0x157   : > { %v2193_v50 = vadd.f32 %v2192_v49, %v2191_v41 }
 0x158   : > { %1942 = vst [vmem:[%s2677_s28 + $0x8] sm:$0xff] %v1905_v42   ;;  %v1495_v48 = vadd.f32 %v2190_v40, %v1390_v43  ;;  %v1393_v52 = vadd.f32 %v2123_v45, %v2633_v0 }
 0x15a   : > { %v1498_v54 = vadd.f32 %v2193_v50, %v1393_v52  ;;  %v2124_v55 = vpop.f32.mrb[48].mxu0  ;;  %v1553_v58 = vmax.f32 %v1495_v48, 0.0 }
 0x15b   : > { %v2194_v56 = vpop.f32.mrb[48].mxu1  ;;  %v2125_v57 = vpop.f32.mrb[49].mxu0 }
 0x15c   : > { %v1554_v59 = vmax.f32 %v1498_v54, 0.0  ;;  %v2126_v60 = vadd.f32 %v2125_v57, %v2124_v55  ;;  %v2195_v61 = vpop.f32.mrb[49].mxu1  ;;  %v2127_v63 = vpop.f32.mrb[50].mxu0 }
 0x15d   : > { %v2196_v1 = vadd.f32 %v2195_v61, %v2194_v56  ;;  %v2197_v2 = vpop.f32.mrb[50].mxu1  ;;  %v2128_v62 = vpop.f32.mrb[51].mxu0 }
 0x15e   : > { %v1910_v18 = vpack.c.bf16 %v1554_v59, %v1553_v58  ;;  %v1398_v3 = vadd.f32 %v2126_v60, %v2636_v14  ;;  %v2129_v4 = vadd.f32 %v2128_v62, %v2127_v63  ;;  %v2198_v6 = vpop.f32.mrb[51].mxu1 }
 0x15f   : > { %v2199_v8 = vadd.f32 %v2198_v6, %v2197_v2 }
 0x160   : > { %1943 = vst [vmem:[%s2677_s28 + $0x10] sm:$0xff] %v1910_v18   ;;  %v1503_v0 = vadd.f32 %v2196_v1, %v1398_v3  ;;  %v1401_v9 = vadd.f32 %v2129_v4, %v2639_v16 }
 0x162   : > { %v1506_v10 = vadd.f32 %v2199_v8, %v1401_v9  ;;  %v2130_v11 = vpop.f32.mrb[52].mxu0  ;;  %v1555_v30 = vmax.f32 %v1503_v0, 0.0 }
 0x163   : > { %v2200_v12 = vpop.f32.mrb[52].mxu1  ;;  %v2131_v13 = vpop.f32.mrb[53].mxu0 }
 0x164   : > { %v1556_v15 = vmax.f32 %v1506_v10, 0.0  ;;  %v2132_v17 = vadd.f32 %v2131_v13, %v2130_v11  ;;  %v2201_v32 = vpop.f32.mrb[53].mxu1  ;;  %v2133_v19 = vpop.f32.mrb[54].mxu0 }
 0x165   : > { %v2202_v20 = vadd.f32 %v2201_v32, %v2200_v12  ;;  %v2203_v21 = vpop.f32.mrb[54].mxu1  ;;  %v2134_v14 = vpop.f32.mrb[55].mxu0 }
 0x166   : > { %v1915_v22 = vpack.c.bf16 %v1556_v15, %v1555_v30  ;;  %v1406_v23 = vadd.f32 %v2132_v17, %v2642_v33  ;;  %v2135_v25 = vadd.f32 %v2134_v14, %v2133_v19  ;;  %v2204_v27 = vpop.f32.mrb[55].mxu1 }
 0x167   : > { %v2205_v28 = vadd.f32 %v2204_v27, %v2203_v21 }
 0x168   : > { %1944 = vst [vmem:[%s2677_s28 + $0x18] sm:$0xff] %v1915_v22   ;;  %v1511_v16 = vadd.f32 %v2202_v20, %v1406_v23  ;;  %v1409_v29 = vadd.f32 %v2135_v25, %v2645_v35 }
 0x16a   : > { %v1514_v31 = vadd.f32 %v2205_v28, %v1409_v29  ;;  %v2136_v34 = vpop.f32.mrb[56].mxu0  ;;  %v1557_v38 = vmax.f32 %v1511_v16, 0.0 }
 0x16b   : > { %v2206_v36 = vpop.f32.mrb[56].mxu1  ;;  %v2137_v37 = vpop.f32.mrb[57].mxu0 }
 0x16c   : > { %v1558_v39 = vmax.f32 %v1514_v31, 0.0  ;;  %v2138_v40 = vadd.f32 %v2137_v37, %v2136_v34  ;;  %v2207_v41 = vpop.f32.mrb[57].mxu1  ;;  %v2139_v46 = vpop.f32.mrb[58].mxu0 }
 0x16d   : > { %v2208_v42 = vadd.f32 %v2207_v41, %v2206_v36  ;;  %v2209_v43 = vpop.f32.mrb[58].mxu1  ;;  %v2140_v33 = vpop.f32.mrb[59].mxu0 }
 0x16e   : > { %v1920_v45 = vpack.c.bf16 %v1558_v39, %v1557_v38  ;;  %v1414_v49 = vadd.f32 %v2138_v40, %v2648_v51  ;;  %v2141_v50 = vadd.f32 %v2140_v33, %v2139_v46  ;;  %v2210_v48 = vpop.f32.mrb[59].mxu1 }
 0x16f   : > { %v2211_v52 = vadd.f32 %v2210_v48, %v2209_v43 }
 0x170   : > { %1945 = vst [vmem:[%s2677_s28 + $0x20] sm:$0xff] %v1920_v45   ;;  %v1519_v35 = vadd.f32 %v2208_v42, %v1414_v49  ;;  %v1417_v54 = vadd.f32 %v2141_v50, %v2651_v53 }
 0x172   : > { %v1522_v55 = vadd.f32 %v2211_v52, %v1417_v54  ;;  %v2142_v56 = vpop.f32.mrb[60].mxu0  ;;  %v1559_v59 = vmax.f32 %v1519_v35, 0.0 }
 0x173   : > { %v2212_v57 = vpop.f32.mrb[60].mxu1  ;;  %v2143_v58 = vpop.f32.mrb[61].mxu0 }
 0x174   : > { %v1560_v60 = vmax.f32 %v1522_v55, 0.0  ;;  %v2144_v61 = vadd.f32 %v2143_v58, %v2142_v56  ;;  %v2213_v63 = vpop.f32.mrb[61].mxu1  ;;  %v2145_v1 = vpop.f32.mrb[62].mxu0 }
 0x175   : > { %v2214_v2 = vadd.f32 %v2213_v63, %v2212_v57  ;;  %v2215_v62 = vpop.f32.mrb[62].mxu1  ;;  %v2146_v51 = vpop.f32.mrb[63].mxu0 }
 0x176   : > { %v1925_v18 = vpack.c.bf16 %v1560_v60, %v1559_v59  ;;  %v1422_v3 = vadd.f32 %v2144_v61, %v2654_v5  ;;  %v2147_v4 = vadd.f32 %v2146_v51, %v2145_v1  ;;  %v2216_v6 = vpop.f32.mrb[63].mxu1 }
 0x177   : > { %v2217_v8 = vadd.f32 %v2216_v6, %v2215_v62 }
 0x178   : > { %1946 = vst [vmem:[%s2677_s28 + $0x28] sm:$0xff] %v1925_v18   ;;  %v1527_v53 = vadd.f32 %v2214_v2, %v1422_v3  ;;  %v1425_v0 = vadd.f32 %v2147_v4, %v2657_v7 }
 0x17a   : > { %v1530_v9 = vadd.f32 %v2217_v8, %v1425_v0  ;;  %v2148_v10 = vpop.f32.mrb[64].mxu0  ;;  %v1561_v13 = vmax.f32 %v1527_v53, 0.0 }
 0x17b   : > { %v2218_v11 = vpop.f32.mrb[64].mxu1  ;;  %v2149_v12 = vpop.f32.mrb[65].mxu0 }
 0x17c   : > { %v1562_v30 = vmax.f32 %v1530_v9, 0.0  ;;  %v2150_v15 = vadd.f32 %v2149_v12, %v2148_v10  ;;  %v2219_v17 = vpop.f32.mrb[65].mxu1  ;;  %v2151_v32 = vpop.f32.mrb[66].mxu0 }
 0x17d   : > { %v2220_v19 = vadd.f32 %v2219_v17, %v2218_v11  ;;  %v2221_v20 = vpop.f32.mrb[66].mxu1  ;;  %v2152_v5 = vpop.f32.mrb[67].mxu0 }
 0x17e   : > { %v1930_v21 = vpack.c.bf16 %v1562_v30, %v1561_v13  ;;  %v1430_v14 = vadd.f32 %v2150_v15, %v2660_v24  ;;  %v2153_v22 = vadd.f32 %v2152_v5, %v2151_v32  ;;  %v2222_v23 = vpop.f32.mrb[67].mxu1 }
 0x17f   : > { %v2223_v25 = vadd.f32 %v2222_v23, %v2221_v20 }
 0x180   : > { %1947 = vst [vmem:[%s2677_s28 + $0x30] sm:$0xff] %v1930_v21   ;;  %v1535_v7 = vadd.f32 %v2220_v19, %v1430_v14  ;;  %v1433_v27 = vadd.f32 %v2153_v22, %v2663_v26 }
 0x182   : > { %v1538_v28 = vadd.f32 %v2223_v25, %v1433_v27  ;;  %v2154_v16 = vpop.f32.mrb[68].mxu0  ;;  %v1563_v34 = vmax.f32 %v1535_v7, 0.0 }
 0x183   : > { %v2224_v29 = vpop.f32.mrb[68].mxu1  ;;  %v2155_v31 = vpop.f32.mrb[69].mxu0 }
 0x184   : > { %v1564_v36 = vmax.f32 %v1538_v28, 0.0  ;;  %v2156_v37 = vadd.f32 %v2155_v31, %v2154_v16  ;;  %v2225_v38 = vpop.f32.mrb[69].mxu1  ;;  %v2157_v39 = vpop.f32.mrb[70].mxu0 }
 0x185   : > { %v2226_v40 = vadd.f32 %v2225_v38, %v2224_v29  ;;  %v2227_v24 = vpop.f32.mrb[70].mxu1  ;;  %v2158_v41 = vpop.f32.mrb[71].mxu0 }
 0x186   : > { %v1935_v46 = vpack.c.bf16 %v1564_v36, %v1563_v34  ;;  %v1438_v42 = vadd.f32 %v2156_v37, %v2666_v44  ;;  %v2159_v43 = vadd.f32 %v2158_v41, %v2157_v39  ;;  %v2228_v33 = vpop.f32.mrb[71].mxu1 }
 0x187   : > { %v2229_v26 = vadd.f32 %v2228_v33, %v2227_v24 }
 0x188   : > { %1948 = vst [vmem:[%s2677_s28 + $0x38] sm:$0xff] %v1935_v46   ;;  %v1543_v45 = vadd.f32 %v2226_v40, %v1438_v42  ;;  %v1441_v49 = vadd.f32 %v2159_v43, %v2669_v47 }
 0x18a   : > { %v1546_v50 = vadd.f32 %v2229_v26, %v1441_v49  ;;  %v1565_v48 = vmax.f32 %v1543_v45, 0.0 }
 0x18c   : > { %v1566_v52 = vmax.f32 %v1546_v50, 0.0 }
 0x18e   : > { %v1940_v35 = vpack.c.bf16 %v1566_v52, %v1565_v48 }
 0x190   : > { %1949 = vst [vmem:[%s2677_s28 + $0x40] sm:$0xff] %v1940_v35  }
 0x191 PF: > { %s13_s12 = sadd.s32 1, %s2308_s12  }
 0x192   : > { %p10_p4 = scmp.ge.s32.totalorder %s13_s12, 4  }
 0x194   :  { %12 = sbr.rel (!%p10_p4) target bundleno = 1 (0x1), region = 62 }

// kernel: conv_encoder_forward.7
= control target key start
LH: loop header
LB: loop body
LE: loop exit
PB: predicated region body
PF: predicated region fallthrough
CT: control target
= control target key end

     0   :  { %v2367_v28 = vlaneseq  ;;  %v17130_v36 = vmov 1966171168   ;;  %s20961_s0 = inlined_call_operand.vmem [shape: bf16[2,18432], index: 0, kind: input, shape index: {}]   ;;  %s20962_s1 = inlined_call_operand.vmem [shape: bf16[18432,32], index: 1, kind: input, shape index: {}]   ;;  %s20963_s2 = inlined_call_operand.vmem [shape: f32[1,32], index: 2, kind: input, shape index: {}]   ;;  %s20964_s3 = inlined_call_operand.hbm [shape: f32[2,32], index: 3, kind: output, shape index: {}]  }
   0x1   :  { %v15936_v0 = vld [vmem:[%s20962_s1 + $0x40] sm:$0xff]   ;;  %v15940_v4 = vld [vmem:[%s20962_s1 + $0x48] sm:$0xff]   ;;  %v15944_v8 = vld [vmem:[%s20962_s1 + $0x50] sm:$0xff]   ;;  %v2365_v37 = vunpack.c.l.s4 %v17130_v36 }
   0x2   :  { %v15937_v1 = vld [vmem:[%s20962_s1 + $0xc0] sm:$0xff]   ;;  %14350 = vmatprep.subr.bf16.mxu0 %v15936_v0  ;;  %v15941_v5 = vld [vmem:[%s20962_s1 + $0xc8] sm:$0xff]   ;;  %v15945_v9 = vld [vmem:[%s20962_s1 + $0xd0] sm:$0xff]   ;;  %v2368_v33 = vshrl.u32 %v2367_v28, 7 }
   0x3   :  { %v15938_v2 = vld [vmem:[%s20962_s1] sm:$0xff]   ;;  %14372 = vmatprep.subr.bf16.mxu1 %v15937_v1  ;;  %v15942_v6 = vld [vmem:[%s20962_s1 + $0x8] sm:$0xff]   ;;  %v15946_v10 = vld [vmem:[%s20962_s1 + $0x10] sm:$0xff]   ;;  %v2366_v40 = vunpack.c.0.s8 %v2365_v37 }
   0x4   :  { %v15939_v3 = vld [vmem:[%s20962_s1 + $0x80] sm:$0xff]   ;;  %14351 = vmatpush3.bf16.msra.mxu0 %v15938_v2  ;;  %v15943_v7 = vld [vmem:[%s20962_s1 + $0x88] sm:$0xff]   ;;  %v15947_v11 = vld [vmem:[%s20962_s1 + $0x90] sm:$0xff]  }
   0x5   :  { %14373 = vmatpush3.bf16.msra.mxu1 %v15939_v3  ;;  %14352 = vmatprep.subr.bf16.mxu0 %v15940_v4  ;;  %v15948_v12 = vld [vmem:[%s20962_s1 + $0x58] sm:$0xff]   ;;  %v15952_v16 = vld [vmem:[%s20962_s1 + $0x60] sm:$0xff]   ;;  %v15956_v20 = vld [vmem:[%s20962_s1 + $0x68] sm:$0xff]   ;;  %v17257_v41 = vsub.s32 %v2366_v40, %v2368_v33 }
   0x6   :  { %14374 = vmatprep.subr.bf16.mxu1 %v15941_v5  ;;  %v15949_v13 = vld [vmem:[%s20962_s1 + $0xd8] sm:$0xff]   ;;  %v15953_v17 = vld [vmem:[%s20962_s1 + $0xe0] sm:$0xff]   ;;  %v15957_v21 = vld [vmem:[%s20962_s1 + $0xe8] sm:$0xff]  }
   0x7   :  { %v15950_v14 = vld [vmem:[%s20962_s1 + $0x18] sm:$0xff]   ;;  %v15954_v18 = vld [vmem:[%s20962_s1 + $0x20] sm:$0xff]   ;;  %v15958_v22 = vld [vmem:[%s20962_s1 + $0x28] sm:$0xff]  }
   0x8   :  { %14353 = vmatpush3.bf16.msra.mxu0 %v15942_v6  ;;  %v15951_v15 = vld [vmem:[%s20962_s1 + $0x98] sm:$0xff]   ;;  %v15955_v19 = vld [vmem:[%s20962_s1 + $0xa0] sm:$0xff]   ;;  %v15959_v23 = vld [vmem:[%s20962_s1 + $0xa8] sm:$0xff]  }
   0x9   :  { %14375 = vmatpush3.bf16.msra.mxu1 %v15943_v7  ;;  %14354 = vmatprep.subr.bf16.mxu0 %v15944_v8  ;;  %v15960_v24 = vld [vmem:[%s20962_s1 + $0x70] sm:$0xff]   ;;  %v15964_v29 = vld [vmem:[%s20962_s1 + $0x78] sm:$0xff]   ;;  %v16_v34 = vld [vmem:[%s20961_s0] sm:$0xff] }
   0xa   :  { %14376 = vmatprep.subr.bf16.mxu1 %v15945_v9  ;;  %v15961_v25 = vld [vmem:[%s20962_s1 + $0xf0] sm:$0xff]   ;;  %v15965_v30 = vld [vmem:[%s20962_s1 + $0xf8] sm:$0xff]   ;;  %v15969_v35 = vld [vmem:[%s20962_s1 + $0x140] sm:$0xff]   ;;  %v2363_v39 = vcombine.high %v16_v34, %v16_v34  ;;  %v2370_v42 = vrot.slane %v16_v34, %v17257_v41 }
   0xb   :  { %v15962_v26 = vld [vmem:[%s20962_s1 + $0x30] sm:$0xff]   ;;  %v15966_v31 = vld [vmem:[%s20962_s1 + $0x38] sm:$0xff]   ;;  %v15970_v38 = vld [vmem:[%s20962_s1 + $0x1c0] sm:$0xff]  }
   0xc   :  { %14355 = vmatpush3.bf16.msra.mxu0 %v15946_v10  ;;  %v15963_v27 = vld [vmem:[%s20962_s1 + $0xb0] sm:$0xff]   ;;  %v15967_v32 = vld [vmem:[%s20962_s1 + $0xb8] sm:$0xff]   ;;  %v17261_v43 = vrot.slane %v2363_v39, %v17257_v41  ;;  %v2378_v44 = vcombine.high %v2370_v42, %v2370_v42  ;;  %v2386_v45 = vrot.slane %v2370_v42, %v17257_v41  ;;  %v15971_v47 = vld [vmem:[%s20962_s1 + $0x100] sm:$0xff]  }
   0xd   :  { %14377 = vmatpush3.bf16.msra.mxu1 %v15947_v11  ;;  %14356 = vmatprep.subr.bf16.mxu0 %v15948_v12  ;;  %v15972_v49 = vld [vmem:[%s20962_s1 + $0x180] sm:$0xff]   ;;  %v15973_v52 = vld [vmem:[%s20962_s1 + $0x148] sm:$0xff]   ;;  %v15977_v58 = vld [vmem:[%s20962_s1 + $0x150] sm:$0xff]  }
   0xe   :  { %14378 = vmatprep.subr.bf16.mxu1 %v15949_v13  ;;  %v2379_v46 = vcombine.high %v17261_v43, %v17261_v43  ;;  %v2400_v48 = vrot.slane %v2378_v44, %v17257_v41  ;;  %v2408_v51 = vcombine.high %v2386_v45, %v2386_v45  ;;  %v15974_v54 = vld [vmem:[%s20962_s1 + $0x1c8] sm:$0xff]   ;;  %v15978_v59 = vld [vmem:[%s20962_s1 + $0x1d0] sm:$0xff]   ;;  %v15981_v62 = vld [vmem:[%s20962_s1 + $0x158] sm:$0xff]  }
   0xf   :  { %v15975_v55 = vld [vmem:[%s20962_s1 + $0x108] sm:$0xff]   ;;  %v15979_v60 = vld [vmem:[%s20962_s1 + $0x110] sm:$0xff]   ;;  %v15982_v63 = vld [vmem:[%s20962_s1 + $0x1d8] sm:$0xff]  }
  0x10   :  { %14357 = vmatpush3.bf16.msra.mxu0 %v15950_v14  ;;  %v2407_v50 = vrot.slane %v2379_v46, %v17257_v41  ;;  %10333 = vmatprep.mubr.bf16.mxu0 %v2400_v48  ;;  %v2410_v53 = vcombine.high %v2400_v48, %v2400_v48  ;;  %v15976_v57 = vld [vmem:[%s20962_s1 + $0x188] sm:$0xff]   ;;  %v15980_v61 = vld [vmem:[%s20962_s1 + $0x190] sm:$0xff]   ;;  %v15983_v0 = vld [vmem:[%s20962_s1 + $0x118] sm:$0xff]  }
  0x11   :  { %14379 = vmatpush3.bf16.msra.mxu1 %v15951_v15  ;;  %14358 = vmatprep.subr.bf16.mxu0 %v15952_v16  ;;  %v15984_v1 = vld [vmem:[%s20962_s1 + $0x198] sm:$0xff]   ;;  %v15985_v2 = vld [vmem:[%s20962_s1 + $0x160] sm:$0xff]   ;;  %v15989_v6 = vld [vmem:[%s20962_s1 + $0x168] sm:$0xff]  }
  0x12   :  { %14380 = vmatprep.subr.bf16.mxu1 %v15953_v17  ;;  %v2411_v56 = vcombine.high %v2407_v50, %v2407_v50  ;;  %10373 = vmatprep.mubr.bf16.mxu1 %v2410_v53  ;;  %v15986_v3 = vld [vmem:[%s20962_s1 + $0x1e0] sm:$0xff]   ;;  %v15990_v7 = vld [vmem:[%s20962_s1 + $0x1e8] sm:$0xff]   ;;  %v15993_v10 = vld [vmem:[%s20962_s1 + $0x170] sm:$0xff]  }
  0x13   :  { %v15987_v4 = vld [vmem:[%s20962_s1 + $0x120] sm:$0xff]   ;;  %v15991_v8 = vld [vmem:[%s20962_s1 + $0x128] sm:$0xff]   ;;  %v15994_v11 = vld [vmem:[%s20962_s1 + $0x1f0] sm:$0xff]  }
  0x14   :  { %14359 = vmatpush3.bf16.msra.mxu0 %v15954_v18  ;;  %v15988_v5 = vld [vmem:[%s20962_s1 + $0x1a0] sm:$0xff]   ;;  %v15992_v9 = vld [vmem:[%s20962_s1 + $0x1a8] sm:$0xff]   ;;  %v15995_v12 = vld [vmem:[%s20962_s1 + $0x130] sm:$0xff]   ;;  %v2393_v18 = vrot.slane %v17261_v43, %v17257_v41 }
  0x15   :  { %14381 = vmatpush3.bf16.msra.mxu1 %v15955_v19  ;;  %14360 = vmatprep.subr.bf16.mxu0 %v15956_v20  ;;  %v15996_v13 = vld [vmem:[%s20962_s1 + $0x1b0] sm:$0xff]   ;;  %v15997_v14 = vld [vmem:[%s20962_s1 + $0x178] sm:$0xff]   ;;  %v16001_v19 = vld [vmem:[%s20962_s1 + $0x240] sm:$0xff]  }
  0x16   :  { %14382 = vmatprep.subr.bf16.mxu1 %v15957_v21  ;;  %v15998_v15 = vld [vmem:[%s20962_s1 + $0x1f8] sm:$0xff]   ;;  %v16002_v20 = vld [vmem:[%s20962_s1 + $0x2c0] sm:$0xff]   ;;  %v16009_v28 = vld [vmem:[%s20962_s1 + $0x250] sm:$0xff]  }
  0x17   :  { %v15999_v16 = vld [vmem:[%s20962_s1 + $0x138] sm:$0xff]   ;;  %v16003_v21 = vld [vmem:[%s20962_s1 + $0x200] sm:$0xff]   ;;  %v16021_v40 = vld [vmem:[%s20962_s1 + $0x268] sm:$0xff]  }
  0x18   :  { %14361 = vmatpush3.bf16.msra.mxu0 %v15958_v22  ;;  %v16000_v17 = vld [vmem:[%s20962_s1 + $0x1b8] sm:$0xff]   ;;  %v16004_v22 = vld [vmem:[%s20962_s1 + $0x280] sm:$0xff]   ;;  %v16022_v42 = vld [vmem:[%s20962_s1 + $0x2e8] sm:$0xff]  }
  0x19   :  { %14383 = vmatpush3.bf16.msra.mxu1 %v15959_v23  ;;  %14362 = vmatprep.subr.bf16.mxu0 %v15960_v24  ;;  %v2409_v23 = vcombine.high %v2393_v18, %v2393_v18  ;;  %v16005_v24 = vld [vmem:[%s20962_s1 + $0x248] sm:$0xff]   ;;  %v16014_v33 = vld [vmem:[%s20962_s1 + $0x2d8] sm:$0xff]   ;;  %v16017_v36 = vld [vmem:[%s20962_s1 + $0x260] sm:$0xff]  }
  0x1a   :  { %14384 = vmatprep.subr.bf16.mxu1 %v15961_v25  ;;  %v16006_v25 = vld [vmem:[%s20962_s1 + $0x2c8] sm:$0xff]   ;;  %v16015_v34 = vld [vmem:[%s20962_s1 + $0x218] sm:$0xff]   ;;  %v16018_v37 = vld [vmem:[%s20962_s1 + $0x2e0] sm:$0xff]  }
  0x1b   :  { %v16020_v39 = vld [vmem:[%s20962_s1 + $0x2a0] sm:$0xff]   ;;  %v16023_v43 = vld [vmem:[%s20962_s1 + $0x228] sm:$0xff]  }
  0x1c   :  { %14363 = vmatpush3.bf16.msra.mxu0 %v15962_v26  ;;  %v16007_v26 = vld [vmem:[%s20962_s1 + $0x208] sm:$0xff]  }
  0x1d   :  { %14385 = vmatpush3.bf16.msra.mxu1 %v15963_v27  ;;  %14364 = vmatprep.subr.bf16.mxu0 %v15964_v29  ;;  %v16008_v27 = vld [vmem:[%s20962_s1 + $0x288] sm:$0xff]   ;;  %v16010_v29 = vld [vmem:[%s20962_s1 + $0x2d0] sm:$0xff]  }
  0x1e   :  { %14386 = vmatprep.subr.bf16.mxu1 %v15965_v30  ;;  %v16011_v30 = vld [vmem:[%s20962_s1 + $0x210] sm:$0xff]   ;;  %v16024_v44 = vld [vmem:[%s20962_s1 + $0x2a8] sm:$0xff]  }
  0x1f   :  { %v17_v46 = vld [vmem:[%s20961_s0 + $0x8] sm:$0xff] }
  0x20   :  { %14365 = vmatpush3.bf16.msra.mxu0 %v15966_v31  ;;  %v16012_v31 = vld [vmem:[%s20962_s1 + $0x290] sm:$0xff]   ;;  %v2419_v48 = vrot.slane %v17_v46, %v17257_v41 }
  0x21   :  { %14387 = vmatpush3.bf16.msra.mxu1 %v15967_v32  ;;  %14394 = vmatprep.subr.bf16.mxu0 %v15969_v35  ;;  %v16013_v32 = vld [vmem:[%s20962_s1 + $0x258] sm:$0xff]  }
  0x22   :  { %14416 = vmatprep.subr.bf16.mxu1 %v15970_v38  ;;  %v16016_v35 = vld [vmem:[%s20962_s1 + $0x298] sm:$0xff]   ;;  %v16019_v38 = vld [vmem:[%s20962_s1 + $0x220] sm:$0xff]  }
  0x23   :  { %10334 = vmatmul.mubr.bf16.vlgmr.msra.gmra.mrb[0].mxu0 %v2386_v45  ;;  %v16025_v45 = vld [vmem:[%s20962_s1 + $0x270] sm:$0xff]  }
  0x24   :  { %14395 = vmatpush3.bf16.msra.mxu0 %v15971_v47  ;;  %10374 = vmatmul.mubr.bf16.vlgmr.msra.gmra.mrb[0].mxu1 %v2408_v51  ;;  %v16026_v47 = vld [vmem:[%s20962_s1 + $0x2f0] sm:$0xff]  }
  0x25   :  { %14396 = vmatprep.subr.bf16.mxu0 %v15973_v52  ;;  %14417 = vmatpush3.bf16.msra.mxu1 %v15972_v49  ;;  %v2412_v49 = vcombine.high %v17_v46, %v17_v46  ;;  %v16028_v51 = vld [vmem:[%s20962_s1 + $0x2b0] sm:$0xff]   ;;  %v2427_v52 = vcombine.high %v2419_v48, %v2419_v48 }
  0x26   :  { %10413 = vmatprep.mubr.bf16.mxu0 %v2407_v50  ;;  %14418 = vmatprep.subr.bf16.mxu1 %v15974_v54  ;;  %v16027_v50 = vld [vmem:[%s20962_s1 + $0x230] sm:$0xff]   ;;  %v16029_v54 = vld [vmem:[%s20962_s1 + $0x278] sm:$0xff]  }
  0x27   :  { %10453 = vmatprep.mubr.bf16.mxu1 %v2411_v56  ;;  %v17449_v53 = vrot.slane %v2412_v49, %v17257_v41  ;;  %v2449_v56 = vrot.slane %v2427_v52, %v17257_v41  ;;  %v16076_v46 = vld [vmem:[%s20962_s1 + $0x410] sm:$0xff]   ;;  %v16079_v49 = vld [vmem:[%s20962_s1 + $0x4d8] sm:$0xff]   ;;  %v16082_v52 = vld [vmem:[%s20962_s1 + $0x460] sm:$0xff]  }
  0x28   :  { %14397 = vmatpush3.bf16.msra.mxu0 %v15975_v55  ;;  %v16030_v55 = vld [vmem:[%s20962_s1 + $0x2f8] sm:$0xff]  }
  0x29   :  { %14398 = vmatprep.subr.bf16.mxu0 %v15977_v58  ;;  %14419 = vmatpush3.bf16.msra.mxu1 %v15976_v57  ;;  %v2428_v57 = vcombine.high %v17449_v53, %v17449_v53  ;;  %v16031_v58 = vld [vmem:[%s20962_s1 + $0x238] sm:$0xff]  }
  0x2a   :  { %14420 = vmatprep.subr.bf16.mxu1 %v15978_v59  ;;  %v16032_v59 = vld [vmem:[%s20962_s1 + $0x2b8] sm:$0xff]  }
  0x2c   :  { %14399 = vmatpush3.bf16.msra.mxu0 %v15979_v60  ;;  %v2459_v60 = vcombine.high %v2449_v56, %v2449_v56 }
  0x2d   :  { %14400 = vmatprep.subr.bf16.mxu0 %v15981_v62  ;;  %14421 = vmatpush3.bf16.msra.mxu1 %v15980_v61  ;;  %v2435_v61 = vrot.slane %v2419_v48, %v17257_v41  ;;  %v16033_v62 = vld [vmem:[%s20962_s1 + $0x340] sm:$0xff]   ;;  %v16078_v48 = vld [vmem:[%s20962_s1 + $0x458] sm:$0xff]  }
  0x2e   :  { %14422 = vmatprep.subr.bf16.mxu1 %v15982_v63  ;;  %v16034_v63 = vld [vmem:[%s20962_s1 + $0x3c0] sm:$0xff]  }
  0x30   :  { %14401 = vmatpush3.bf16.msra.mxu0 %v15983_v0  ;;  %v2456_v0 = vrot.slane %v2428_v57, %v17257_v41  ;;  %v16087_v57 = vld [vmem:[%s20962_s1 + $0x4e8] sm:$0xff]  }
  0x31   :  { %14402 = vmatprep.subr.bf16.mxu0 %v15985_v2  ;;  %14423 = vmatpush3.bf16.msra.mxu1 %v15984_v1  ;;  %v16035_v1 = vld [vmem:[%s20962_s1 + $0x300] sm:$0xff]  }
  0x32   :  { %14424 = vmatprep.subr.bf16.mxu1 %v15986_v3  ;;  %v16036_v2 = vld [vmem:[%s20962_s1 + $0x380] sm:$0xff]   ;;  %v2457_v3 = vcombine.high %v2435_v61, %v2435_v61 }
  0x34   :  { %14403 = vmatpush3.bf16.msra.mxu0 %v15987_v4  ;;  %v16037_v4 = vld [vmem:[%s20962_s1 + $0x348] sm:$0xff]  }
  0x35   :  { %14404 = vmatprep.subr.bf16.mxu0 %v15989_v6  ;;  %14425 = vmatpush3.bf16.msra.mxu1 %v15988_v5  ;;  %v16038_v5 = vld [vmem:[%s20962_s1 + $0x3c8] sm:$0xff]   ;;  %v2460_v6 = vcombine.high %v2456_v0, %v2456_v0 }
  0x36   :  { %14426 = vmatprep.subr.bf16.mxu1 %v15990_v7  ;;  %v16039_v7 = vld [vmem:[%s20962_s1 + $0x308] sm:$0xff]  }
  0x38   :  { %14405 = vmatpush3.bf16.msra.mxu0 %v15991_v8  ;;  %v16040_v8 = vld [vmem:[%s20962_s1 + $0x388] sm:$0xff]  }
  0x39   :  { %14406 = vmatprep.subr.bf16.mxu0 %v15993_v10  ;;  %14427 = vmatpush3.bf16.msra.mxu1 %v15992_v9  ;;  %v16041_v9 = vld [vmem:[%s20962_s1 + $0x350] sm:$0xff]  }
  0x3a   :  { %14428 = vmatprep.subr.bf16.mxu1 %v15994_v11  ;;  %v16042_v10 = vld [vmem:[%s20962_s1 + $0x3d0] sm:$0xff]  }
  0x3b   :  { %v16043_v11 = vld [vmem:[%s20962_s1 + $0x310] sm:$0xff]  }
  0x3c   :  { %14407 = vmatpush3.bf16.msra.mxu0 %v15995_v12  ;;  %v16044_v12 = vld [vmem:[%s20962_s1 + $0x390] sm:$0xff]  }
  0x3d   :  { %14408 = vmatprep.subr.bf16.mxu0 %v15997_v14  ;;  %14429 = vmatpush3.bf16.msra.mxu1 %v15996_v13  ;;  %v16045_v13 = vld [vmem:[%s20962_s1 + $0x358] sm:$0xff]  }
  0x3e   :  { %14430 = vmatprep.subr.bf16.mxu1 %v15998_v15  ;;  %v16046_v14 = vld [vmem:[%s20962_s1 + $0x3d8] sm:$0xff]  }
  0x3f   :  { %v16047_v15 = vld [vmem:[%s20962_s1 + $0x318] sm:$0xff]  }
  0x40   :  { %14409 = vmatpush3.bf16.msra.mxu0 %v15999_v16  ;;  %v16048_v16 = vld [vmem:[%s20962_s1 + $0x398] sm:$0xff]  }
  0x41   :  { %14438 = vmatprep.subr.bf16.mxu0 %v16001_v19  ;;  %14431 = vmatpush3.bf16.msra.mxu1 %v16000_v17  ;;  %v16049_v17 = vld [vmem:[%s20962_s1 + $0x360] sm:$0xff]  }
  0x42   :  { %14460 = vmatprep.subr.bf16.mxu1 %v16002_v20  ;;  %v16051_v19 = vld [vmem:[%s20962_s1 + $0x320] sm:$0xff]  }
  0x43   :  { %10414 = vmatmul.mubr.bf16.vlgmr.msra.gmra.mrb[4].mxu0 %v2393_v18  ;;  %v16050_v18 = vld [vmem:[%s20962_s1 + $0x3e0] sm:$0xff]  }
  0x44   :  { %14439 = vmatpush3.bf16.msra.mxu0 %v16003_v21  ;;  %10454 = vmatmul.mubr.bf16.vlgmr.msra.gmra.mrb[4].mxu1 %v2409_v23  ;;  %v16052_v20 = vld [vmem:[%s20962_s1 + $0x3a0] sm:$0xff]   ;;  %v16053_v21 = vld [vmem:[%s20962_s1 + $0x368] sm:$0xff]  }
  0x45   :  { %14440 = vmatprep.subr.bf16.mxu0 %v16005_v24  ;;  %14461 = vmatpush3.bf16.msra.mxu1 %v16004_v22  ;;  %v16054_v22 = vld [vmem:[%s20962_s1 + $0x3e8] sm:$0xff]  }
  0x46   :  { %14462 = vmatprep.subr.bf16.mxu1 %v16006_v25  ;;  %10493 = vmatprep.mubr.bf16.mxu0 %v2449_v56  ;;  %v16055_v23 = vld [vmem:[%s20962_s1 + $0x328] sm:$0xff]   ;;  %v16057_v25 = vld [vmem:[%s20962_s1 + $0x370] sm:$0xff]  }
  0x47   :  { %10533 = vmatprep.mubr.bf16.mxu1 %v2459_v60  ;;  %v16056_v24 = vld [vmem:[%s20962_s1 + $0x3a8] sm:$0xff]   ;;  %v16090_v60 = vld [vmem:[%s20962_s1 + $0x470] sm:$0xff]  }
  0x48   :  { %14441 = vmatpush3.bf16.msra.mxu0 %v16007_v26  ;;  %v16058_v26 = vld [vmem:[%s20962_s1 + $0x3f0] sm:$0xff]   ;;  %v16086_v56 = vld [vmem:[%s20962_s1 + $0x468] sm:$0xff]  }
  0x49   :  { %14442 = vmatprep.subr.bf16.mxu0 %v16009_v28  ;;  %14463 = vmatpush3.bf16.msra.mxu1 %v16008_v27  ;;  %v16059_v27 = vld [vmem:[%s20962_s1 + $0x330] sm:$0xff]  }
  0x4a   :  { %14464 = vmatprep.subr.bf16.mxu1 %v16010_v29  ;;  %v16060_v28 = vld [vmem:[%s20962_s1 + $0x3b0] sm:$0xff]   ;;  %v16061_v29 = vld [vmem:[%s20962_s1 + $0x378] sm:$0xff]  }
  0x4c   :  { %14443 = vmatpush3.bf16.msra.mxu0 %v16011_v30  ;;  %v16062_v30 = vld [vmem:[%s20962_s1 + $0x3f8] sm:$0xff]  }
  0x4d   :  { %14444 = vmatprep.subr.bf16.mxu0 %v16013_v32  ;;  %14465 = vmatpush3.bf16.msra.mxu1 %v16012_v31  ;;  %v16063_v31 = vld [vmem:[%s20962_s1 + $0x338] sm:$0xff]  }
  0x4e   :  { %14466 = vmatprep.subr.bf16.mxu1 %v16014_v33  ;;  %v16064_v32 = vld [vmem:[%s20962_s1 + $0x3b8] sm:$0xff]   ;;  %v2442_v33 = vrot.slane %v17449_v53, %v17257_v41  ;;  %v16083_v53 = vld [vmem:[%s20962_s1 + $0x4e0] sm:$0xff]  }
  0x50   :  { %14445 = vmatpush3.bf16.msra.mxu0 %v16015_v34  ;;  %v16066_v34 = vld [vmem:[%s20962_s1 + $0x440] sm:$0xff]  }
  0x51   :  { %14446 = vmatprep.subr.bf16.mxu0 %v16017_v36  ;;  %14467 = vmatpush3.bf16.msra.mxu1 %v16016_v35  ;;  %v16067_v35 = vld [vmem:[%s20962_s1 + $0x4c0] sm:$0xff]  }
  0x52   :  { %14468 = vmatprep.subr.bf16.mxu1 %v16018_v37  ;;  %v16068_v36 = vld [vmem:[%s20962_s1 + $0x400] sm:$0xff]  }
  0x53   :  { %v16069_v37 = vld [vmem:[%s20962_s1 + $0x480] sm:$0xff]  }
  0x54   :  { %14447 = vmatpush3.bf16.msra.mxu0 %v16019_v38  ;;  %v2458_v38 = vcombine.high %v2442_v33, %v2442_v33 }
  0x55   :  { %14448 = vmatprep.subr.bf16.mxu0 %v16021_v40  ;;  %14469 = vmatpush3.bf16.msra.mxu1 %v16020_v39  ;;  %v16070_v39 = vld [vmem:[%s20962_s1 + $0x448] sm:$0xff]  }
  0x56   :  { %14470 = vmatprep.subr.bf16.mxu1 %v16022_v42  ;;  %v16071_v40 = vld [vmem:[%s20962_s1 + $0x4c8] sm:$0xff]  }
  0x57   :  { %v16072_v42 = vld [vmem:[%s20962_s1 + $0x408] sm:$0xff]  }
  0x58   :  { %14449 = vmatpush3.bf16.msra.mxu0 %v16023_v43  ;;  %v16073_v43 = vld [vmem:[%s20962_s1 + $0x488] sm:$0xff]  }
  0x59   :  { %14450 = vmatprep.subr.bf16.mxu0 %v16025_v45  ;;  %14471 = vmatpush3.bf16.msra.mxu1 %v16024_v44  ;;  %v16074_v44 = vld [vmem:[%s20962_s1 + $0x450] sm:$0xff]  }
  0x5a   :  { %14472 = vmatprep.subr.bf16.mxu1 %v16026_v47  ;;  %v16075_v45 = vld [vmem:[%s20962_s1 + $0x4d0] sm:$0xff]  }
  0x5b   :  { %v16077_v47 = vld [vmem:[%s20962_s1 + $0x490] sm:$0xff]  }
  0x5c   :  { %14451 = vmatpush3.bf16.msra.mxu0 %v16027_v50  ;;  %v16080_v50 = vld [vmem:[%s20962_s1 + $0x418] sm:$0xff]  }
  0x5d   :  { %14452 = vmatprep.subr.bf16.mxu0 %v16029_v54  ;;  %14473 = vmatpush3.bf16.msra.mxu1 %v16028_v51  ;;  %v16081_v51 = vld [vmem:[%s20962_s1 + $0x498] sm:$0xff]   ;;  %v16084_v54 = vld [vmem:[%s20962_s1 + $0x420] sm:$0xff]  }
  0x5e   :  { %14474 = vmatprep.subr.bf16.mxu1 %v16030_v55  ;;  %v16085_v55 = vld [vmem:[%s20962_s1 + $0x4a0] sm:$0xff]  }
  0x60   :  { %14453 = vmatpush3.bf16.msra.mxu0 %v16031_v58  ;;  %v16088_v58 = vld [vmem:[%s20962_s1 + $0x428] sm:$0xff]  }
  0x61   :  { %14482 = vmatprep.subr.bf16.mxu0 %v16033_v62  ;;  %14475 = vmatpush3.bf16.msra.mxu1 %v16032_v59  ;;  %v16089_v59 = vld [vmem:[%s20962_s1 + $0x4a8] sm:$0xff]   ;;  %v16091_v62 = vld [vmem:[%s20962_s1 + $0x4f0] sm:$0xff]  }
  0x62   :  { %14504 = vmatprep.subr.bf16.mxu1 %v16034_v63 }
  0x63   :  { %10494 = vmatmul.mubr.bf16.vlgmr.msra.gmra.mrb[8].mxu0 %v2435_v61  ;;  %v18_v61 = vld [vmem:[%s20961_s0 + $0x10] sm:$0xff] }
  0x64   :  { %14483 = vmatpush3.bf16.msra.mxu0 %v16035_v1  ;;  %10573 = vmatprep.mubr.bf16.mxu0 %v2456_v0  ;;  %v2468_v63 = vrot.slane %v18_v61, %v17257_v41  ;;  %v2461_v0 = vcombine.high %v18_v61, %v18_v61  ;;  %v16092_v1 = vld [vmem:[%s20962_s1 + $0x430] sm:$0xff]  }
  0x65   :  { %10534 = vmatmul.mubr.bf16.vlgmr.msra.gmra.mrb[8].mxu1 %v2457_v3  ;;  %14484 = vmatprep.subr.bf16.mxu0 %v16037_v4  ;;  %v16141_v61 = vld [vmem:[%s20962_s1 + $0x610] sm:$0xff]  }
  0x66   :  { %14505 = vmatpush3.bf16.msra.mxu1 %v16036_v2  ;;  %10613 = vmatprep.mubr.bf16.mxu1 %v2460_v6  ;;  %v16093_v2 = vld [vmem:[%s20962_s1 + $0x4b0] sm:$0xff]   ;;  %v2476_v3 = vcombine.high %v2468_v63, %v2468_v63  ;;  %v17655_v4 = vrot.slane %v2461_v0, %v17257_v41  ;;  %v16095_v6 = vld [vmem:[%s20962_s1 + $0x4f8] sm:$0xff]  }
  0x67   :  { %14506 = vmatprep.subr.bf16.mxu1 %v16038_v5  ;;  %v16094_v5 = vld [vmem:[%s20962_s1 + $0x478] sm:$0xff]  }
  0x68   :  { %14485 = vmatpush3.bf16.msra.mxu0 %v16039_v7  ;;  %v2498_v7 = vrot.slane %v2476_v3, %v17257_v41  ;;  %v16144_v0 = vld [vmem:[%s20962_s1 + $0x6d8] sm:$0xff]   ;;  %v16147_v3 = vld [vmem:[%s20962_s1 + $0x660] sm:$0xff]  }
  0x69   :  { %14486 = vmatprep.subr.bf16.mxu0 %v16041_v9  ;;  %v16096_v9 = vld [vmem:[%s20962_s1 + $0x438] sm:$0xff]  }
  0x6a   :  { %14507 = vmatpush3.bf16.msra.mxu1 %v16040_v8  ;;  %v2477_v8 = vcombine.high %v17655_v4, %v17655_v4 }
  0x6b   :  { %14508 = vmatprep.subr.bf16.mxu1 %v16042_v10  ;;  %v16097_v10 = vld [vmem:[%s20962_s1 + $0x4b8] sm:$0xff]  }
  0x6c   :  { %14487 = vmatpush3.bf16.msra.mxu0 %v16043_v11  ;;  %v2508_v11 = vcombine.high %v2498_v7, %v2498_v7 }
  0x6d   :  { %14488 = vmatprep.subr.bf16.mxu0 %v16045_v13  ;;  %v16098_v13 = vld [vmem:[%s20962_s1 + $0x540] sm:$0xff]  }
  0x6e   :  { %14509 = vmatpush3.bf16.msra.mxu1 %v16044_v12  ;;  %v2484_v12 = vrot.slane %v2468_v63, %v17257_v41  ;;  %v16143_v63 = vld [vmem:[%s20962_s1 + $0x658] sm:$0xff]  }
  0x6f   :  { %14510 = vmatprep.subr.bf16.mxu1 %v16046_v14  ;;  %v16099_v14 = vld [vmem:[%s20962_s1 + $0x5c0] sm:$0xff]  }
  0x70   :  { %14489 = vmatpush3.bf16.msra.mxu0 %v16047_v15  ;;  %v2505_v15 = vrot.slane %v2477_v8, %v17257_v41  ;;  %v16152_v8 = vld [vmem:[%s20962_s1 + $0x6e8] sm:$0xff]  }
  0x71   :  { %14490 = vmatprep.subr.bf16.mxu0 %v16049_v17  ;;  %v16101_v17 = vld [vmem:[%s20962_s1 + $0x580] sm:$0xff]  }
  0x72   :  { %14511 = vmatpush3.bf16.msra.mxu1 %v16048_v16  ;;  %v16100_v16 = vld [vmem:[%s20962_s1 + $0x500] sm:$0xff]  }
  0x73   :  { %14512 = vmatprep.subr.bf16.mxu1 %v16050_v18  ;;  %v2506_v18 = vcombine.high %v2484_v12, %v2484_v12 }
  0x74   :  { %14491 = vmatpush3.bf16.msra.mxu0 %v16051_v19  ;;  %v16102_v19 = vld [vmem:[%s20962_s1 + $0x548] sm:$0xff]  }
  0x75   :  { %14492 = vmatprep.subr.bf16.mxu0 %v16053_v21  ;;  %v2509_v21 = vcombine.high %v2505_v15, %v2505_v15 }
  0x76   :  { %14513 = vmatpush3.bf16.msra.mxu1 %v16052_v20  ;;  %v16103_v20 = vld [vmem:[%s20962_s1 + $0x5c8] sm:$0xff]  }
  0x77   :  { %14514 = vmatprep.subr.bf16.mxu1 %v16054_v22  ;;  %v16104_v22 = vld [vmem:[%s20962_s1 + $0x508] sm:$0xff]  }
  0x78   :  { %14493 = vmatpush3.bf16.msra.mxu0 %v16055_v23  ;;  %v16105_v23 = vld [vmem:[%s20962_s1 + $0x588] sm:$0xff]  }
  0x79   :  { %14494 = vmatprep.subr.bf16.mxu0 %v16057_v25  ;;  %v16107_v25 = vld [vmem:[%s20962_s1 + $0x5d0] sm:$0xff]  }
  0x7a   :  { %14515 = vmatpush3.bf16.msra.mxu1 %v16056_v24  ;;  %v16106_v24 = vld [vmem:[%s20962_s1 + $0x550] sm:$0xff]  }
  0x7b   :  { %14516 = vmatprep.subr.bf16.mxu1 %v16058_v26  ;;  %v16108_v26 = vld [vmem:[%s20962_s1 + $0x510] sm:$0xff]  }
  0x7c   :  { %14495 = vmatpush3.bf16.msra.mxu0 %v16059_v27  ;;  %v16109_v27 = vld [vmem:[%s20962_s1 + $0x590] sm:$0xff]  }
  0x7d   :  { %14496 = vmatprep.subr.bf16.mxu0 %v16061_v29  ;;  %v16111_v29 = vld [vmem:[%s20962_s1 + $0x5d8] sm:$0xff]  }
  0x7e   :  { %14517 = vmatpush3.bf16.msra.mxu1 %v16060_v28  ;;  %v16110_v28 = vld [vmem:[%s20962_s1 + $0x558] sm:$0xff]  }
  0x7f   :  { %14518 = vmatprep.subr.bf16.mxu1 %v16062_v30  ;;  %v16112_v30 = vld [vmem:[%s20962_s1 + $0x518] sm:$0xff]  }
  0x80   :  { %14497 = vmatpush3.bf16.msra.mxu0 %v16063_v31  ;;  %v16113_v31 = vld [vmem:[%s20962_s1 + $0x598] sm:$0xff]  }
  0x81   :  { %14526 = vmatprep.subr.bf16.mxu0 %v16066_v34  ;;  %v16116_v34 = vld [vmem:[%s20962_s1 + $0x520] sm:$0xff]  }
  0x82   :  { %14519 = vmatpush3.bf16.msra.mxu1 %v16064_v32  ;;  %v16114_v32 = vld [vmem:[%s20962_s1 + $0x560] sm:$0xff]  }
  0x83   :  { %10574 = vmatmul.mubr.bf16.vlgmr.msra.gmra.mrb[12].mxu0 %v2442_v33  ;;  %14548 = vmatprep.subr.bf16.mxu1 %v16067_v35  ;;  %v16115_v33 = vld [vmem:[%s20962_s1 + $0x5e0] sm:$0xff]  }
  0x84   :  { %14527 = vmatpush3.bf16.msra.mxu0 %v16068_v36  ;;  %10653 = vmatprep.mubr.bf16.mxu0 %v2498_v7  ;;  %v16117_v35 = vld [vmem:[%s20962_s1 + $0x5a0] sm:$0xff]   ;;  %v16118_v36 = vld [vmem:[%s20962_s1 + $0x568] sm:$0xff]  }
  0x85   :  { %10614 = vmatmul.mubr.bf16.vlgmr.msra.gmra.mrb[12].mxu1 %v2458_v38  ;;  %14528 = vmatprep.subr.bf16.mxu0 %v16070_v39  ;;  %v16120_v38 = vld [vmem:[%s20962_s1 + $0x528] sm:$0xff]  }
  0x86   :  { %14549 = vmatpush3.bf16.msra.mxu1 %v16069_v37  ;;  %10693 = vmatprep.mubr.bf16.mxu1 %v2508_v11  ;;  %v16119_v37 = vld [vmem:[%s20962_s1 + $0x5e8] sm:$0xff]   ;;  %v16155_v11 = vld [vmem:[%s20962_s1 + $0x670] sm:$0xff]  }
  0x87   :  { %14550 = vmatprep.subr.bf16.mxu1 %v16071_v40  ;;  %v16121_v39 = vld [vmem:[%s20962_s1 + $0x5a8] sm:$0xff]   ;;  %v16122_v40 = vld [vmem:[%s20962_s1 + $0x570] sm:$0xff]  }
  0x88   :  { %14529 = vmatpush3.bf16.msra.mxu0 %v16072_v42  ;;  %v16123_v42 = vld [vmem:[%s20962_s1 + $0x5f0] sm:$0xff]   ;;  %v16151_v7 = vld [vmem:[%s20962_s1 + $0x668] sm:$0xff]  }
  0x89   :  { %14530 = vmatprep.subr.bf16.mxu0 %v16074_v44  ;;  %v16125_v44 = vld [vmem:[%s20962_s1 + $0x5b0] sm:$0xff]  }
  0x8a   :  { %14551 = vmatpush3.bf16.msra.mxu1 %v16073_v43  ;;  %v16124_v43 = vld [vmem:[%s20962_s1 + $0x530] sm:$0xff]  }
  0x8b   :  { %14552 = vmatprep.subr.bf16.mxu1 %v16075_v45  ;;  %v16126_v45 = vld [vmem:[%s20962_s1 + $0x578] sm:$0xff]  }
  0x8c   :  { %14531 = vmatpush3.bf16.msra.mxu0 %v16076_v46  ;;  %v16127_v46 = vld [vmem:[%s20962_s1 + $0x5f8] sm:$0xff]  }
  0x8d   :  { %14532 = vmatprep.subr.bf16.mxu0 %v16078_v48  ;;  %v16129_v48 = vld [vmem:[%s20962_s1 + $0x5b8] sm:$0xff]  }
  0x8e   :  { %14553 = vmatpush3.bf16.msra.mxu1 %v16077_v47  ;;  %v16128_v47 = vld [vmem:[%s20962_s1 + $0x538] sm:$0xff]  }
  0x8f   :  { %14554 = vmatprep.subr.bf16.mxu1 %v16079_v49  ;;  %v2491_v49 = vrot.slane %v17655_v4, %v17257_v41  ;;  %v16148_v4 = vld [vmem:[%s20962_s1 + $0x6e0] sm:$0xff]  }
  0x90   :  { %14533 = vmatpush3.bf16.msra.mxu0 %v16080_v50  ;;  %v16131_v50 = vld [vmem:[%s20962_s1 + $0x640] sm:$0xff]  }
  0x91   :  { %14534 = vmatprep.subr.bf16.mxu0 %v16082_v52  ;;  %v16133_v52 = vld [vmem:[%s20962_s1 + $0x600] sm:$0xff]  }
  0x92   :  { %14555 = vmatpush3.bf16.msra.mxu1 %v16081_v51  ;;  %v16132_v51 = vld [vmem:[%s20962_s1 + $0x6c0] sm:$0xff]  }
  0x93   :  { %14556 = vmatprep.subr.bf16.mxu1 %v16083_v53  ;;  %v16134_v53 = vld [vmem:[%s20962_s1 + $0x680] sm:$0xff]  }
  0x94   :  { %14535 = vmatpush3.bf16.msra.mxu0 %v16084_v54  ;;  %v2507_v54 = vcombine.high %v2491_v49, %v2491_v49 }
  0x95   :  { %14536 = vmatprep.subr.bf16.mxu0 %v16086_v56  ;;  %v16136_v56 = vld [vmem:[%s20962_s1 + $0x6c8] sm:$0xff]  }
  0x96   :  { %14557 = vmatpush3.bf16.msra.mxu1 %v16085_v55  ;;  %v16135_v55 = vld [vmem:[%s20962_s1 + $0x648] sm:$0xff]  }
  0x97   :  { %14558 = vmatprep.subr.bf16.mxu1 %v16087_v57  ;;  %v16137_v57 = vld [vmem:[%s20962_s1 + $0x608] sm:$0xff]  }
  0x98   :  { %14537 = vmatpush3.bf16.msra.mxu0 %v16088_v58  ;;  %v16138_v58 = vld [vmem:[%s20962_s1 + $0x688] sm:$0xff]  }
  0x99   :  { %14538 = vmatprep.subr.bf16.mxu0 %v16090_v60  ;;  %v16140_v60 = vld [vmem:[%s20962_s1 + $0x6d0] sm:$0xff]  }
  0x9a   :  { %14559 = vmatpush3.bf16.msra.mxu1 %v16089_v59  ;;  %v16139_v59 = vld [vmem:[%s20962_s1 + $0x650] sm:$0xff]  }
  0x9b   :  { %14560 = vmatprep.subr.bf16.mxu1 %v16091_v62  ;;  %v16142_v62 = vld [vmem:[%s20962_s1 + $0x690] sm:$0xff]  }
  0x9c   :  { %14539 = vmatpush3.bf16.msra.mxu0 %v16092_v1  ;;  %v16145_v1 = vld [vmem:[%s20962_s1 + $0x618] sm:$0xff]  }
  0x9d   :  { %14540 = vmatprep.subr.bf16.mxu0 %v16094_v5  ;;  %v16149_v5 = vld [vmem:[%s20962_s1 + $0x620] sm:$0xff]  }
  0x9e   :  { %14561 = vmatpush3.bf16.msra.mxu1 %v16093_v2  ;;  %v16146_v2 = vld [vmem:[%s20962_s1 + $0x698] sm:$0xff]  }
  0x9f   :  { %14562 = vmatprep.subr.bf16.mxu1 %v16095_v6  ;;  %v16150_v6 = vld [vmem:[%s20962_s1 + $0x6a0] sm:$0xff]  }
  0xa0   :  { %14541 = vmatpush3.bf16.msra.mxu0 %v16096_v9  ;;  %v16153_v9 = vld [vmem:[%s20962_s1 + $0x628] sm:$0xff]  }
  0xa1   :  { %14570 = vmatprep.subr.bf16.mxu0 %v16098_v13  ;;  %v16156_v13 = vld [vmem:[%s20962_s1 + $0x6f0] sm:$0xff]  }
  0xa2   :  { %14563 = vmatpush3.bf16.msra.mxu1 %v16097_v10  ;;  %v16154_v10 = vld [vmem:[%s20962_s1 + $0x6a8] sm:$0xff]  }
  0xa3   :  { %10654 = vmatmul.mubr.bf16.vlgmr.msra.gmra.mrb[16].mxu0 %v2484_v12  ;;  %14592 = vmatprep.subr.bf16.mxu1 %v16099_v14  ;;  %v19_v12 = vld [vmem:[%s20961_s0 + $0x18] sm:$0xff] }
  0xa4   :  { %14571 = vmatpush3.bf16.msra.mxu0 %v16100_v16  ;;  %10733 = vmatprep.mubr.bf16.mxu0 %v2505_v15  ;;  %v2517_v14 = vrot.slane %v19_v12, %v17257_v41  ;;  %v2510_v15 = vcombine.high %v19_v12, %v19_v12  ;;  %v16157_v16 = vld [vmem:[%s20962_s1 + $0x630] sm:$0xff]   ;;  %v16194_v12 = vld [vmem:[%s20962_s1 + $0x7b8] sm:$0xff]  }
  0xa5   :  { %10694 = vmatmul.mubr.bf16.vlgmr.msra.gmra.mrb[16].mxu1 %v2506_v18  ;;  %14572 = vmatprep.subr.bf16.mxu0 %v16102_v19 }
  0xa6   :  { %14593 = vmatpush3.bf16.msra.mxu1 %v16101_v17  ;;  %10773 = vmatprep.mubr.bf16.mxu1 %v2509_v21  ;;  %v16159_v17 = vld [vmem:[%s20962_s1 + $0x678] sm:$0xff]   ;;  %v2525_v18 = vcombine.high %v2517_v14, %v2517_v14  ;;  %v17861_v19 = vrot.slane %v2510_v15, %v17257_v41  ;;  %v16197_v15 = vld [vmem:[%s20962_s1 + $0x8c0] sm:$0xff]  }
  0xa7   :  { %14594 = vmatprep.subr.bf16.mxu1 %v16103_v20  ;;  %v16158_v20 = vld [vmem:[%s20962_s1 + $0x6b0] sm:$0xff]   ;;  %v16160_v21 = vld [vmem:[%s20962_s1 + $0x6f8] sm:$0xff]  }
  0xa8   :  { %14573 = vmatpush3.bf16.msra.mxu0 %v16104_v22  ;;  %v2547_v22 = vrot.slane %v2525_v18, %v17257_v41 }
  0xa9   :  { %14574 = vmatprep.subr.bf16.mxu0 %v16106_v24  ;;  %v16161_v24 = vld [vmem:[%s20962_s1 + $0x638] sm:$0xff]  }
  0xaa   :  { %14595 = vmatpush3.bf16.msra.mxu1 %v16105_v23  ;;  %v2526_v23 = vcombine.high %v17861_v19, %v17861_v19 }
  0xab   :  { %14596 = vmatprep.subr.bf16.mxu1 %v16107_v25  ;;  %v2557_v25 = vcombine.high %v2547_v22, %v2547_v22 }
  0xac   :  { %14575 = vmatpush3.bf16.msra.mxu0 %v16108_v26  ;;  %v2533_v26 = vrot.slane %v2517_v14, %v17257_v41  ;;  %v16196_v14 = vld [vmem:[%s20962_s1 + $0x840] sm:$0xff]  }
  0xad   :  { %14576 = vmatprep.subr.bf16.mxu0 %v16110_v28  ;;  %v16162_v28 = vld [vmem:[%s20962_s1 + $0x6b8] sm:$0xff]  }
  0xae   :  { %14597 = vmatpush3.bf16.msra.mxu1 %v16109_v27  ;;  %v16163_v27 = vld [vmem:[%s20962_s1 + $0x740] sm:$0xff]  }
  0xaf   :  { %14598 = vmatprep.subr.bf16.mxu1 %v16111_v29  ;;  %v2554_v29 = vrot.slane %v2526_v23, %v17257_v41  ;;  %v16204_v23 = vld [vmem:[%s20962_s1 + $0x850] sm:$0xff]  }
  0xb0   :  { %14577 = vmatpush3.bf16.msra.mxu0 %v16112_v30  ;;  %v16164_v30 = vld [vmem:[%s20962_s1 + $0x7c0] sm:$0xff]  }
  0xb1   :  { %14578 = vmatprep.subr.bf16.mxu0 %v16114_v32  ;;  %v2555_v32 = vcombine.high %v2533_v26, %v2533_v26 }
  0xb2   :  { %14599 = vmatpush3.bf16.msra.mxu1 %v16113_v31  ;;  %v16165_v31 = vld [vmem:[%s20962_s1 + $0x700] sm:$0xff]  }
  0xb3   :  { %14600 = vmatprep.subr.bf16.mxu1 %v16115_v33  ;;  %v16167_v33 = vld [vmem:[%s20962_s1 + $0x748] sm:$0xff]  }
  0xb4   :  { %14579 = vmatpush3.bf16.msra.mxu0 %v16116_v34  ;;  %v16166_v34 = vld [vmem:[%s20962_s1 + $0x780] sm:$0xff]  }
  0xb5   :  { %14580 = vmatprep.subr.bf16.mxu0 %v16118_v36  ;;  %v16168_v36 = vld [vmem:[%s20962_s1 + $0x7c8] sm:$0xff]  }
  0xb6   :  { %14601 = vmatpush3.bf16.msra.mxu1 %v16117_v35  ;;  %v2558_v35 = vcombine.high %v2554_v29, %v2554_v29 }
  0xb7   :  { %14602 = vmatprep.subr.bf16.mxu1 %v16119_v37  ;;  %v16169_v37 = vld [vmem:[%s20962_s1 + $0x708] sm:$0xff]  }
  0xb8   :  { %14581 = vmatpush3.bf16.msra.mxu0 %v16120_v38  ;;  %v16171_v38 = vld [vmem:[%s20962_s1 + $0x750] sm:$0xff]  }
  0xb9   :  { %14582 = vmatprep.subr.bf16.mxu0 %v16122_v40  ;;  %v16172_v40 = vld [vmem:[%s20962_s1 + $0x7d0] sm:$0xff]  }
  0xba   :  { %14603 = vmatpush3.bf16.msra.mxu1 %v16121_v39  ;;  %v16170_v39 = vld [vmem:[%s20962_s1 + $0x788] sm:$0xff]  }
  0xbb   :  { %14604 = vmatprep.subr.bf16.mxu1 %v16123_v42  ;;  %v16173_v42 = vld [vmem:[%s20962_s1 + $0x710] sm:$0xff]  }
  0xbc   :  { %14583 = vmatpush3.bf16.msra.mxu0 %v16124_v43  ;;  %v16175_v43 = vld [vmem:[%s20962_s1 + $0x758] sm:$0xff]  }
  0xbd   :  { %14584 = vmatprep.subr.bf16.mxu0 %v16126_v45  ;;  %v16176_v45 = vld [vmem:[%s20962_s1 + $0x7d8] sm:$0xff]  }
  0xbe   :  { %14605 = vmatpush3.bf16.msra.mxu1 %v16125_v44  ;;  %v16174_v44 = vld [vmem:[%s20962_s1 + $0x790] sm:$0xff]  }
  0xbf   :  { %14606 = vmatprep.subr.bf16.mxu1 %v16127_v46  ;;  %v16177_v46 = vld [vmem:[%s20962_s1 + $0x718] sm:$0xff]  }
  0xc0   :  { %14585 = vmatpush3.bf16.msra.mxu0 %v16128_v47  ;;  %v16178_v47 = vld [vmem:[%s20962_s1 + $0x798] sm:$0xff]  }
  0xc1   :  { %14614 = vmatprep.subr.bf16.mxu0 %v16131_v50  ;;  %v16181_v50 = vld [vmem:[%s20962_s1 + $0x720] sm:$0xff]  }
  0xc2   :  { %14607 = vmatpush3.bf16.msra.mxu1 %v16129_v48  ;;  %v16179_v48 = vld [vmem:[%s20962_s1 + $0x760] sm:$0xff]  }
  0xc3   :  { %10734 = vmatmul.mubr.bf16.vlgmr.msra.gmra.mrb[20].mxu0 %v2491_v49  ;;  %14636 = vmatprep.subr.bf16.mxu1 %v16132_v51  ;;  %v16180_v49 = vld [vmem:[%s20962_s1 + $0x7e0] sm:$0xff]  }
  0xc4   :  { %14615 = vmatpush3.bf16.msra.mxu0 %v16133_v52  ;;  %10813 = vmatprep.mubr.bf16.mxu0 %v2547_v22  ;;  %v16182_v51 = vld [vmem:[%s20962_s1 + $0x7a0] sm:$0xff]   ;;  %v16183_v52 = vld [vmem:[%s20962_s1 + $0x768] sm:$0xff]  }
  0xc5   :  { %10774 = vmatmul.mubr.bf16.vlgmr.msra.gmra.mrb[20].mxu1 %v2507_v54  ;;  %14616 = vmatprep.subr.bf16.mxu0 %v16135_v55  ;;  %v16185_v54 = vld [vmem:[%s20962_s1 + $0x728] sm:$0xff]  }
  0xc6   :  { %14637 = vmatpush3.bf16.msra.mxu1 %v16134_v53  ;;  %10853 = vmatprep.mubr.bf16.mxu1 %v2557_v25  ;;  %v16184_v53 = vld [vmem:[%s20962_s1 + $0x7e8] sm:$0xff]   ;;  %v16206_v25 = vld [vmem:[%s20962_s1 + $0x810] sm:$0xff]  }
  0xc7   :  { %14638 = vmatprep.subr.bf16.mxu1 %v16136_v56  ;;  %v16186_v55 = vld [vmem:[%s20962_s1 + $0x7a8] sm:$0xff]   ;;  %v13197_v56 = vld [vmem:[%s20963_s2] ss:$0 sm:$0xff] }
  0xc8   :  { %14617 = vmatpush3.bf16.msra.mxu0 %v16137_v57  ;;  %v16187_v57 = vld [vmem:[%s20962_s1 + $0x770] sm:$0xff]   ;;  %v16203_v22 = vld [vmem:[%s20962_s1 + $0x888] sm:$0xff]  }
  0xc9   :  { %14618 = vmatprep.subr.bf16.mxu0 %v16139_v59  ;;  %v16188_v59 = vld [vmem:[%s20962_s1 + $0x7f0] sm:$0xff]  }
  0xca   :  { %14639 = vmatpush3.bf16.msra.mxu1 %v16138_v58 }
  0xcb   :  { %14640 = vmatprep.subr.bf16.mxu1 %v16140_v60 }
  0xcc   :  { %14619 = vmatpush3.bf16.msra.mxu0 %v16141_v61  ;;  %v16189_v61 = vld [vmem:[%s20962_s1 + $0x730] sm:$0xff]  }
  0xcd   :  { %14620 = vmatprep.subr.bf16.mxu0 %v16143_v63 }
  0xce   :  { %14641 = vmatpush3.bf16.msra.mxu1 %v16142_v62 }
  0xcf   :  { %14642 = vmatprep.subr.bf16.mxu1 %v16144_v0 }
  0xd0   :  { %14621 = vmatpush3.bf16.msra.mxu0 %v16145_v1  ;;  %v16190_v1 = vld [vmem:[%s20962_s1 + $0x7b0] sm:$0xff]  }
  0xd1   :  { %14622 = vmatprep.subr.bf16.mxu0 %v16147_v3 }
  0xd2   :  { %14643 = vmatpush3.bf16.msra.mxu1 %v16146_v2  ;;  %v16191_v2 = vld [vmem:[%s20962_s1 + $0x778] sm:$0xff]  }
  0xd3   :  { %14644 = vmatprep.subr.bf16.mxu1 %v16148_v4 }
  0xd4   :  { %14623 = vmatpush3.bf16.msra.mxu0 %v16149_v5 }
  0xd5   :  { %14624 = vmatprep.subr.bf16.mxu0 %v16151_v7 }
  0xd6   :  { %14645 = vmatpush3.bf16.msra.mxu1 %v16150_v6 }
  0xd7   :  { %14646 = vmatprep.subr.bf16.mxu1 %v16152_v8  ;;  %v16192_v8 = vld [vmem:[%s20962_s1 + $0x7f8] sm:$0xff]  }
  0xd8   :  { %14625 = vmatpush3.bf16.msra.mxu0 %v16153_v9 }
  0xd9   :  { %14626 = vmatprep.subr.bf16.mxu0 %v16155_v11 }
  0xda   :  { %14647 = vmatpush3.bf16.msra.mxu1 %v16154_v10  ;;  %v16193_v10 = vld [vmem:[%s20962_s1 + $0x738] sm:$0xff]  }
  0xdb   :  { %14648 = vmatprep.subr.bf16.mxu1 %v16156_v13  ;;  %v2540_v13 = vrot.slane %v17861_v19, %v17257_v41  ;;  %v16200_v19 = vld [vmem:[%s20962_s1 + $0x848] sm:$0xff]  }
  0xdc   :  { %14627 = vmatpush3.bf16.msra.mxu0 %v16157_v16  ;;  %v16198_v16 = vld [vmem:[%s20962_s1 + $0x800] sm:$0xff]  }
  0xdd   :  { %14628 = vmatprep.subr.bf16.mxu0 %v16159_v17  ;;  %v16199_v17 = vld [vmem:[%s20962_s1 + $0x880] sm:$0xff]   ;;  %v2556_v18 = vcombine.high %v2540_v13, %v2540_v13 }
  0xde   :  { %14649 = vmatpush3.bf16.msra.mxu1 %v16158_v20  ;;  %v16201_v20 = vld [vmem:[%s20962_s1 + $0x8c8] sm:$0xff]  }
  0xdf   :  { %14650 = vmatprep.subr.bf16.mxu1 %v16160_v21  ;;  %v16202_v21 = vld [vmem:[%s20962_s1 + $0x808] sm:$0xff]  }
  0xe0   :  { %14629 = vmatpush3.bf16.msra.mxu0 %v16161_v24  ;;  %v16205_v24 = vld [vmem:[%s20962_s1 + $0x8d0] sm:$0xff]  }
  0xe1   :  { %14658 = vmatprep.subr.bf16.mxu0 %v16163_v27  ;;  %v16208_v27 = vld [vmem:[%s20962_s1 + $0x858] sm:$0xff]  }
  0xe2   :  { %14651 = vmatpush3.bf16.msra.mxu1 %v16162_v28  ;;  %v16209_v28 = vld [vmem:[%s20962_s1 + $0x8d8] sm:$0xff]  }
  0xe3   :  { %10814 = vmatmul.mubr.bf16.vlgmr.msra.gmra.mrb[24].mxu0 %v2533_v26  ;;  %14680 = vmatprep.subr.bf16.mxu1 %v16164_v30  ;;  %v16207_v26 = vld [vmem:[%s20962_s1 + $0x890] sm:$0xff]   ;;  %v16211_v30 = vld [vmem:[%s20962_s1 + $0x898] sm:$0xff]  }
  0xe4   :  { %14659 = vmatpush3.bf16.msra.mxu0 %v16165_v31  ;;  %10893 = vmatprep.mubr.bf16.mxu0 %v2554_v29  ;;  %v16210_v29 = vld [vmem:[%s20962_s1 + $0x818] sm:$0xff]   ;;  %v16212_v31 = vld [vmem:[%s20962_s1 + $0x860] sm:$0xff]  }
  0xe5   :  { %10854 = vmatmul.mubr.bf16.vlgmr.msra.gmra.mrb[24].mxu1 %v2555_v32  ;;  %14660 = vmatprep.subr.bf16.mxu0 %v16167_v33  ;;  %v16213_v32 = vld [vmem:[%s20962_s1 + $0x8e0] sm:$0xff]  }
  0xe6   :  { %14681 = vmatpush3.bf16.msra.mxu1 %v16166_v34  ;;  %10933 = vmatprep.mubr.bf16.mxu1 %v2558_v35  ;;  %v16214_v33 = vld [vmem:[%s20962_s1 + $0x820] sm:$0xff]   ;;  %v16216_v35 = vld [vmem:[%s20962_s1 + $0x868] sm:$0xff]  }
  0xe7   :  { %14682 = vmatprep.subr.bf16.mxu1 %v16168_v36  ;;  %v16215_v34 = vld [vmem:[%s20962_s1 + $0x8a0] sm:$0xff]   ;;  %v16217_v36 = vld [vmem:[%s20962_s1 + $0x8e8] sm:$0xff]  }
  0xe8   :  { %14661 = vmatpush3.bf16.msra.mxu0 %v16169_v37  ;;  %v16218_v37 = vld [vmem:[%s20962_s1 + $0x828] sm:$0xff]  }
  0xe9   :  { %14662 = vmatprep.subr.bf16.mxu0 %v16171_v38  ;;  %v16219_v38 = vld [vmem:[%s20962_s1 + $0x8a8] sm:$0xff]  }
  0xea   :  { %14683 = vmatpush3.bf16.msra.mxu1 %v16170_v39  ;;  %v16220_v39 = vld [vmem:[%s20962_s1 + $0x870] sm:$0xff]  }
  0xeb   :  { %14684 = vmatprep.subr.bf16.mxu1 %v16172_v40  ;;  %v16221_v40 = vld [vmem:[%s20962_s1 + $0x8f0] sm:$0xff]  }
  0xec   :  { %14663 = vmatpush3.bf16.msra.mxu0 %v16173_v42 }
  0xed   :  { %14664 = vmatprep.subr.bf16.mxu0 %v16175_v43  ;;  %v16222_v43 = vld [vmem:[%s20962_s1 + $0x830] sm:$0xff]  }
  0xee   :  { %14685 = vmatpush3.bf16.msra.mxu1 %v16174_v44 }
  0xef   :  { %14686 = vmatprep.subr.bf16.mxu1 %v16176_v45  ;;  %v20_v45 = vld [vmem:[%s20961_s0 + $0x20] sm:$0xff] }
  0xf0   :  { %14665 = vmatpush3.bf16.msra.mxu0 %v16177_v46 }
  0xf1   :  { %14666 = vmatprep.subr.bf16.mxu0 %v16179_v48 }
  0xf2   :  { %14687 = vmatpush3.bf16.msra.mxu1 %v16178_v47 }
  0xf3   :  { %14688 = vmatprep.subr.bf16.mxu1 %v16180_v49  ;;  %v16223_v49 = vld [vmem:[%s20962_s1 + $0x8b0] sm:$0xff]  }
  0xf4   :  { %14667 = vmatpush3.bf16.msra.mxu0 %v16181_v50  ;;  %v16224_v50 = vld [vmem:[%s20962_s1 + $0x878] sm:$0xff]  }
  0xf5   :  { %14668 = vmatprep.subr.bf16.mxu0 %v16183_v52  ;;  %v2559_v52 = vcombine.high %v20_v45, %v20_v45 }
  0xf6   :  { %14689 = vmatpush3.bf16.msra.mxu1 %v16182_v51  ;;  %v14366_v58 = vpop.f32.mrb[0].mxu0  ;;  %v2566_v51 = vrot.slane %v20_v45, %v17257_v41 }
  0xf7   :  { %v14367_v60 = vpop.f32.mrb[1].mxu0  ;;  %14690 = vmatprep.subr.bf16.mxu1 %v16184_v53  ;;  %v14388_v62 = vpop.f32.mrb[0].mxu1 }
  0xf8   :  { %v14368_v63 = vadd.f32 %v14367_v60, %v14366_v58  ;;  %v14369_v0 = vpop.f32.mrb[2].mxu0  ;;  %14669 = vmatpush3.bf16.msra.mxu0 %v16185_v54  ;;  %v14389_v3 = vpop.f32.mrb[1].mxu1  ;;  %v16225_v58 = vld [vmem:[%s20962_s1 + $0x8f8] sm:$0xff]  }
  0xf9   :  { %v14370_v4 = vpop.f32.mrb[3].mxu0  ;;  %14670 = vmatprep.subr.bf16.mxu0 %v16187_v57  ;;  %v14390_v6 = vadd.f32 %v14389_v3, %v14388_v62  ;;  %v14391_v7 = vpop.f32.mrb[2].mxu1  ;;  %v18082_v62 = vrot.slane %v2559_v52, %v17257_v41  ;;  %v16227_v0 = vld [vmem:[%s20962_s1 + $0x8b8] sm:$0xff]   ;;  %v16228_v3 = vld [vmem:[%s20962_s1 + $0x940] sm:$0xff]  }
  0xfa   :  { %v10336_v5 = vadd.f32 %v14368_v63, %v13197_v56  ;;  %14691 = vmatpush3.bf16.msra.mxu1 %v16186_v55  ;;  %v14392_v9 = vpop.f32.mrb[3].mxu1  ;;  %v16230_v7 = vld [vmem:[%s20962_s1 + $0x900] sm:$0xff]   ;;  %v16259_v52 = vld [vmem:[%s20962_s1 + $0x9b8] sm:$0xff]  }
  0xfb   :  { %14692 = vmatprep.subr.bf16.mxu1 %v16188_v59  ;;  %v2574_v59 = vcombine.high %v2566_v51, %v2566_v51  ;;  %v2575_v4 = vcombine.high %v18082_v62, %v18082_v62  ;;  %v16231_v9 = vld [vmem:[%s20962_s1 + $0x980] sm:$0xff]  }
  0xfc   :  { %v17976_v11 = vadd.f32 %v14390_v6, %v10336_v5  ;;  %14671 = vmatpush3.bf16.msra.mxu0 %v16189_v61  ;;  %v16226_v61 = vld [vmem:[%s20962_s1 + $0x838] sm:$0xff]   ;;  %v16229_v6 = vld [vmem:[%s20962_s1 + $0x9c0] sm:$0xff]  }
  0xfd   :  { %14672 = vmatprep.subr.bf16.mxu0 %v16191_v2  ;;  %v2582_v2 = vrot.slane %v2566_v51, %v17257_v41 }
  0xfe   :  { %14693 = vmatpush3.bf16.msra.mxu1 %v16190_v1  ;;  %v2596_v1 = vrot.slane %v2574_v59, %v17257_v41  ;;  %v16265_v59 = vld [vmem:[%s20962_s1 + $0xa48] sm:$0xff]  }
  0xff   :  { %14694 = vmatprep.subr.bf16.mxu1 %v16192_v8  ;;  %v2603_v8 = vrot.slane %v2575_v4, %v17257_v41  ;;  %v16274_v4 = vld [vmem:[%s20962_s1 + $0xad8] sm:$0xff]  }
 0x100   :  { %14673 = vmatpush3.bf16.msra.mxu0 %v16193_v10  ;;  %v2606_v5 = vcombine.high %v2596_v1, %v2596_v1  ;;  %v2604_v10 = vcombine.high %v2582_v2, %v2582_v2 }
 0x101   :  { %14702 = vmatprep.subr.bf16.mxu0 %v16196_v14  ;;  %v16234_v14 = vld [vmem:[%s20962_s1 + $0x908] sm:$0xff]  }
 0x102   :  { %14695 = vmatpush3.bf16.msra.mxu1 %v16194_v12  ;;  %v16233_v12 = vld [vmem:[%s20962_s1 + $0x9c8] sm:$0xff]  }
 0x103   :  { %10894 = vmatmul.mubr.bf16.vlgmr.msra.gmra.mrb[28].mxu0 %v2540_v13  ;;  %14724 = vmatprep.subr.bf16.mxu1 %v16197_v15  ;;  %v2607_v13 = vcombine.high %v2603_v8, %v2603_v8  ;;  %v16235_v15 = vld [vmem:[%s20962_s1 + $0x988] sm:$0xff]  }
 0x104   :  { %14703 = vmatpush3.bf16.msra.mxu0 %v16198_v16  ;;  %10973 = vmatprep.mubr.bf16.mxu0 %v2596_v1  ;;  %v16236_v16 = vld [vmem:[%s20962_s1 + $0x950] sm:$0xff]  }
 0x105   :  { %10934 = vmatmul.mubr.bf16.vlgmr.msra.gmra.mrb[28].mxu1 %v2556_v18  ;;  %14704 = vmatprep.subr.bf16.mxu0 %v16200_v19  ;;  %v16238_v18 = vld [vmem:[%s20962_s1 + $0x910] sm:$0xff]  }
 0x106   :  { %14725 = vmatpush3.bf16.msra.mxu1 %v16199_v17  ;;  %11013 = vmatprep.mubr.bf16.mxu1 %v2606_v5  ;;  %v16237_v17 = vld [vmem:[%s20962_s1 + $0x9d0] sm:$0xff]   ;;  %v16275_v5 = vld [vmem:[%s20962_s1 + $0xa18] sm:$0xff]  }
 0x107   :  { %14726 = vmatprep.subr.bf16.mxu1 %v16201_v20  ;;  %v16239_v19 = vld [vmem:[%s20962_s1 + $0x990] sm:$0xff]   ;;  %v16240_v20 = vld [vmem:[%s20962_s1 + $0x958] sm:$0xff]  }
 0x108   :  { %14705 = vmatpush3.bf16.msra.mxu0 %v16202_v21  ;;  %v16241_v21 = vld [vmem:[%s20962_s1 + $0x9d8] sm:$0xff]   ;;  %v16271_v1 = vld [vmem:[%s20962_s1 + $0xa10] sm:$0xff]  }
 0x109   :  { %14706 = vmatprep.subr.bf16.mxu0 %v16204_v23  ;;  %v16243_v23 = vld [vmem:[%s20962_s1 + $0x998] sm:$0xff]  }
 0x10a   :  { %14727 = vmatpush3.bf16.msra.mxu1 %v16203_v22  ;;  %v16242_v22 = vld [vmem:[%s20962_s1 + $0x918] sm:$0xff]  }
 0x10b   :  { %14728 = vmatprep.subr.bf16.mxu1 %v16205_v24  ;;  %v16244_v24 = vld [vmem:[%s20962_s1 + $0x960] sm:$0xff]  }
 0x10c   :  { %14707 = vmatpush3.bf16.msra.mxu0 %v16206_v25  ;;  %v16245_v25 = vld [vmem:[%s20962_s1 + $0x9e0] sm:$0xff]  }
 0x10d   :  { %14708 = vmatprep.subr.bf16.mxu0 %v16208_v27  ;;  %v16247_v27 = vld [vmem:[%s20962_s1 + $0x9a0] sm:$0xff]  }
 0x10e   :  { %14729 = vmatpush3.bf16.msra.mxu1 %v16207_v26  ;;  %v16246_v26 = vld [vmem:[%s20962_s1 + $0x920] sm:$0xff]  }
 0x10f   :  { %14730 = vmatprep.subr.bf16.mxu1 %v16209_v28  ;;  %v16248_v28 = vld [vmem:[%s20962_s1 + $0x968] sm:$0xff]  }
 0x110   :  { %14709 = vmatpush3.bf16.msra.mxu0 %v16210_v29  ;;  %v16249_v29 = vld [vmem:[%s20962_s1 + $0x9e8] sm:$0xff]  }
 0x111   :  { %14710 = vmatprep.subr.bf16.mxu0 %v16212_v31  ;;  %v16251_v31 = vld [vmem:[%s20962_s1 + $0x9a8] sm:$0xff]  }
 0x112   :  { %14731 = vmatpush3.bf16.msra.mxu1 %v16211_v30  ;;  %v16250_v30 = vld [vmem:[%s20962_s1 + $0x928] sm:$0xff]  }
 0x113   :  { %14732 = vmatprep.subr.bf16.mxu1 %v16213_v32  ;;  %v16252_v32 = vld [vmem:[%s20962_s1 + $0x970] sm:$0xff]  }
 0x114   :  { %14711 = vmatpush3.bf16.msra.mxu0 %v16214_v33 }
 0x115   :  { %14712 = vmatprep.subr.bf16.mxu0 %v16216_v35 }
 0x116   :  { %14733 = vmatpush3.bf16.msra.mxu1 %v16215_v34  ;;  %v14410_v42 = vpop.f32.mrb[4].mxu0  ;;  %v16253_v34 = vld [vmem:[%s20962_s1 + $0x9f0] sm:$0xff]  }
 0x117   :  { %v14411_v44 = vpop.f32.mrb[5].mxu0  ;;  %14734 = vmatprep.subr.bf16.mxu1 %v16217_v36  ;;  %v14432_v46 = vpop.f32.mrb[4].mxu1  ;;  %v16254_v36 = vld [vmem:[%s20962_s1 + $0x930] sm:$0xff]  }
 0x118   :  { %v14412_v47 = vadd.f32 %v14411_v44, %v14410_v42  ;;  %v14413_v48 = vpop.f32.mrb[6].mxu0  ;;  %14713 = vmatpush3.bf16.msra.mxu0 %v16218_v37  ;;  %v14433_v53 = vpop.f32.mrb[5].mxu1  ;;  %v16256_v42 = vld [vmem:[%s20962_s1 + $0x978] sm:$0xff]  }
 0x119   :  { %v14414_v54 = vpop.f32.mrb[7].mxu0  ;;  %14714 = vmatprep.subr.bf16.mxu0 %v16220_v39  ;;  %v14434_v56 = vadd.f32 %v14433_v53, %v14432_v46  ;;  %v14435_v57 = vpop.f32.mrb[6].mxu1  ;;  %v16257_v48 = vld [vmem:[%s20962_s1 + $0x9f8] sm:$0xff]   ;;  %v2589_v53 = vrot.slane %v18082_v62, %v17257_v41  ;;  %v16268_v62 = vld [vmem:[%s20962_s1 + $0xa88] sm:$0xff]  }
 0x11a   :  { %v10416_v55 = vadd.f32 %v14412_v47, %v17976_v11  ;;  %14735 = vmatpush3.bf16.msra.mxu1 %v16219_v38  ;;  %v14436_v60 = vpop.f32.mrb[7].mxu1  ;;  %v16232_v11 = vld [vmem:[%s20962_s1 + $0x948] sm:$0xff]   ;;  %v16261_v54 = vld [vmem:[%s20962_s1 + $0xa40] sm:$0xff]  }
 0x11b   :  { %14736 = vmatprep.subr.bf16.mxu1 %v16221_v40  ;;  %v16255_v40 = vld [vmem:[%s20962_s1 + $0x9b0] sm:$0xff]   ;;  %v16264_v57 = vld [vmem:[%s20962_s1 + $0xa80] sm:$0xff]   ;;  %v16266_v60 = vld [vmem:[%s20962_s1 + $0xac8] sm:$0xff]  }
 0x11c   :  { %v18084_v63 = vadd.f32 %v14434_v56, %v10416_v55  ;;  %14715 = vmatpush3.bf16.msra.mxu0 %v16222_v43  ;;  %v16262_v55 = vld [vmem:[%s20962_s1 + $0xac0] sm:$0xff]  }
 0x11d   :  { %14716 = vmatprep.subr.bf16.mxu0 %v16224_v50  ;;  %v16258_v50 = vld [vmem:[%s20962_s1 + $0x938] sm:$0xff]   ;;  %v16263_v56 = vld [vmem:[%s20962_s1 + $0xa00] sm:$0xff]  }
 0x11e   :  { %14737 = vmatpush3.bf16.msra.mxu1 %v16223_v49 }
 0x11f   :  { %14738 = vmatprep.subr.bf16.mxu1 %v16225_v58  ;;  %v2605_v58 = vcombine.high %v2589_v53, %v2589_v53 }
 0x120   :  { %14717 = vmatpush3.bf16.msra.mxu0 %v16226_v61  ;;  %v16267_v61 = vld [vmem:[%s20962_s1 + $0xa08] sm:$0xff]  }
 0x121   :  { %14746 = vmatprep.subr.bf16.mxu0 %v16228_v3  ;;  %v16273_v3 = vld [vmem:[%s20962_s1 + $0xa58] sm:$0xff]  }
 0x122   :  { %14739 = vmatpush3.bf16.msra.mxu1 %v16227_v0  ;;  %v16270_v0 = vld [vmem:[%s20962_s1 + $0xad0] sm:$0xff]  }
 0x123   :  { %10974 = vmatmul.mubr.bf16.vlgmr.msra.gmra.mrb[32].mxu0 %v2582_v2  ;;  %14768 = vmatprep.subr.bf16.mxu1 %v16229_v6  ;;  %v16272_v2 = vld [vmem:[%s20962_s1 + $0xa90] sm:$0xff]   ;;  %v16276_v6 = vld [vmem:[%s20962_s1 + $0xa98] sm:$0xff]  }
 0x124   :  { %14747 = vmatpush3.bf16.msra.mxu0 %v16230_v7  ;;  %11053 = vmatprep.mubr.bf16.mxu0 %v2603_v8  ;;  %v16277_v7 = vld [vmem:[%s20962_s1 + $0xa60] sm:$0xff]  }
 0x125   :  { %11014 = vmatmul.mubr.bf16.vlgmr.msra.gmra.mrb[32].mxu1 %v2604_v10  ;;  %14748 = vmatprep.subr.bf16.mxu0 %v16232_v11  ;;  %v16278_v8 = vld [vmem:[%s20962_s1 + $0xae0] sm:$0xff]   ;;  %v16281_v11 = vld [vmem:[%s20962_s1 + $0xa68] sm:$0xff]  }
 0x126   :  { %14769 = vmatpush3.bf16.msra.mxu1 %v16231_v9  ;;  %11093 = vmatprep.mubr.bf16.mxu1 %v2607_v13  ;;  %v16279_v9 = vld [vmem:[%s20962_s1 + $0xa20] sm:$0xff]   ;;  %v16283_v13 = vld [vmem:[%s20962_s1 + $0xa28] sm:$0xff]  }
 0x127   :  { %14770 = vmatprep.subr.bf16.mxu1 %v16233_v12  ;;  %v16280_v10 = vld [vmem:[%s20962_s1 + $0xaa0] sm:$0xff]   ;;  %v16282_v12 = vld [vmem:[%s20962_s1 + $0xae8] sm:$0xff]  }
 0x128   :  { %14749 = vmatpush3.bf16.msra.mxu0 %v16234_v14  ;;  %v16284_v14 = vld [vmem:[%s20962_s1 + $0xaa8] sm:$0xff]  }
 0x129   :  { %14750 = vmatprep.subr.bf16.mxu0 %v16236_v16 }
 0x12a   :  { %14771 = vmatpush3.bf16.msra.mxu1 %v16235_v15  ;;  %v16285_v15 = vld [vmem:[%s20962_s1 + $0xa70] sm:$0xff]  }
 0x12b   :  { %14772 = vmatprep.subr.bf16.mxu1 %v16237_v17  ;;  %v16286_v17 = vld [vmem:[%s20962_s1 + $0xaf0] sm:$0xff]  }
 0x12c   :  { %14751 = vmatpush3.bf16.msra.mxu0 %v16238_v18 }
 0x12d   :  { %14752 = vmatprep.subr.bf16.mxu0 %v16240_v20 }
 0x12e   :  { %14773 = vmatpush3.bf16.msra.mxu1 %v16239_v19  ;;  %v16287_v19 = vld [vmem:[%s20962_s1 + $0xa30] sm:$0xff]  }
 0x12f   :  { %14774 = vmatprep.subr.bf16.mxu1 %v16241_v21 }
 0x130   :  { %14753 = vmatpush3.bf16.msra.mxu0 %v16242_v22 }
 0x131   :  { %14754 = vmatprep.subr.bf16.mxu0 %v16244_v24  ;;  %v16289_v24 = vld [vmem:[%s20962_s1 + $0xa78] sm:$0xff]  }
 0x132   :  { %14775 = vmatpush3.bf16.msra.mxu1 %v16243_v23  ;;  %v16288_v23 = vld [vmem:[%s20962_s1 + $0xab0] sm:$0xff]  }
 0x133   :  { %14776 = vmatprep.subr.bf16.mxu1 %v16245_v25  ;;  %v21_v25 = vld [vmem:[%s20961_s0 + $0x28] sm:$0xff] }
 0x134   :  { %14755 = vmatpush3.bf16.msra.mxu0 %v16246_v26 }
 0x135   :  { %14756 = vmatprep.subr.bf16.mxu0 %v16248_v28  ;;  %v2615_v28 = vrot.slane %v21_v25, %v17257_v41 }
 0x136   :  { %14777 = vmatpush3.bf16.msra.mxu1 %v16247_v27  ;;  %v14454_v33 = vpop.f32.mrb[8].mxu0 }
 0x137   :  { %v14455_v35 = vpop.f32.mrb[9].mxu0  ;;  %14778 = vmatprep.subr.bf16.mxu1 %v16249_v29  ;;  %v2608_v29 = vcombine.high %v21_v25, %v21_v25  ;;  %v16323_v25 = vld [vmem:[%s20962_s1 + $0xb38] sm:$0xff]  }
 0x138   :  { %v14476_v37 = vpop.f32.mrb[8].mxu1  ;;  %v14456_v38 = vadd.f32 %v14455_v35, %v14454_v33  ;;  %v14457_v39 = vpop.f32.mrb[10].mxu0  ;;  %14757 = vmatpush3.bf16.msra.mxu0 %v16250_v30  ;;  %v16290_v33 = vld [vmem:[%s20962_s1 + $0xaf8] sm:$0xff]  }
 0x139   :  { %v14477_v43 = vpop.f32.mrb[9].mxu1  ;;  %v14458_v44 = vpop.f32.mrb[11].mxu0  ;;  %14758 = vmatprep.subr.bf16.mxu0 %v16252_v32  ;;  %v16291_v35 = vld [vmem:[%s20962_s1 + $0xa38] sm:$0xff]  }
 0x13a   :  { %v10496_v45 = vadd.f32 %v14456_v38, %v18084_v63  ;;  %v14478_v46 = vadd.f32 %v14477_v43, %v14476_v37  ;;  %v14479_v47 = vpop.f32.mrb[10].mxu1  ;;  %14779 = vmatpush3.bf16.msra.mxu1 %v16251_v31  ;;  %v16269_v63 = vld [vmem:[%s20962_s1 + $0xa50] sm:$0xff]   ;;  %v18294_v37 = vrot.slane %v2608_v29, %v17257_v41  ;;  %v16292_v39 = vld [vmem:[%s20962_s1 + $0xab8] sm:$0xff]   ;;  %v16293_v43 = vld [vmem:[%s20962_s1 + $0xb40] sm:$0xff]  }
 0x13b   :  { %v14480_v49 = vpop.f32.mrb[11].mxu1  ;;  %14780 = vmatprep.subr.bf16.mxu1 %v16253_v34  ;;  %v16295_v47 = vld [vmem:[%s20962_s1 + $0xb00] sm:$0xff]  }
 0x13c   :  { %v18188_v51 = vadd.f32 %v14478_v46, %v10496_v45  ;;  %14759 = vmatpush3.bf16.msra.mxu0 %v16254_v36  ;;  %v2623_v36 = vcombine.high %v2615_v28, %v2615_v28  ;;  %v2624_v44 = vcombine.high %v18294_v37, %v18294_v37  ;;  %v16294_v45 = vld [vmem:[%s20962_s1 + $0xbc0] sm:$0xff]  }
 0x13d   :  { %14760 = vmatprep.subr.bf16.mxu0 %v16256_v42  ;;  %v2631_v42 = vrot.slane %v2615_v28, %v17257_v41  ;;  %v16296_v49 = vld [vmem:[%s20962_s1 + $0xb80] sm:$0xff]   ;;  %v2638_v28 = vrot.slane %v18294_v37, %v17257_v41  ;;  %v16333_v37 = vld [vmem:[%s20962_s1 + $0xc88] sm:$0xff]  }
 0x13e   :  { %14781 = vmatpush3.bf16.msra.mxu1 %v16255_v40  ;;  %v2645_v40 = vrot.slane %v2623_v36, %v17257_v41  ;;  %v16326_v29 = vld [vmem:[%s20962_s1 + $0xc40] sm:$0xff]   ;;  %v16332_v36 = vld [vmem:[%s20962_s1 + $0xc08] sm:$0xff]  }
 0x13f   :  { %14782 = vmatprep.subr.bf16.mxu1 %v16257_v48  ;;  %v2652_v48 = vrot.slane %v2624_v44, %v17257_v41  ;;  %v16339_v44 = vld [vmem:[%s20962_s1 + $0xcd8] sm:$0xff]  }
 0x140   :  { %14761 = vmatpush3.bf16.msra.mxu0 %v16258_v50  ;;  %v2655_v46 = vcombine.high %v2645_v40, %v2645_v40  ;;  %v2653_v50 = vcombine.high %v2631_v42, %v2631_v42 }
 0x141   :  { %14790 = vmatprep.subr.bf16.mxu0 %v16261_v54  ;;  %v16299_v54 = vld [vmem:[%s20962_s1 + $0xb08] sm:$0xff]  }
 0x142   :  { %14783 = vmatpush3.bf16.msra.mxu1 %v16259_v52  ;;  %v16298_v52 = vld [vmem:[%s20962_s1 + $0xbc8] sm:$0xff]  }
 0x143   :  { %11054 = vmatmul.mubr.bf16.vlgmr.msra.gmra.mrb[36].mxu0 %v2589_v53  ;;  %14812 = vmatprep.subr.bf16.mxu1 %v16262_v55  ;;  %v2656_v53 = vcombine.high %v2652_v48, %v2652_v48  ;;  %v16300_v55 = vld [vmem:[%s20962_s1 + $0xb88] sm:$0xff]  }
 0x144   :  { %14791 = vmatpush3.bf16.msra.mxu0 %v16263_v56  ;;  %11133 = vmatprep.mubr.bf16.mxu0 %v2645_v40  ;;  %v16301_v56 = vld [vmem:[%s20962_s1 + $0xb50] sm:$0xff]  }
 0x145   :  { %11094 = vmatmul.mubr.bf16.vlgmr.msra.gmra.mrb[36].mxu1 %v2605_v58  ;;  %14792 = vmatprep.subr.bf16.mxu0 %v16265_v59  ;;  %v16303_v58 = vld [vmem:[%s20962_s1 + $0xb10] sm:$0xff]  }
 0x146   :  { %14813 = vmatpush3.bf16.msra.mxu1 %v16264_v57  ;;  %11173 = vmatprep.mubr.bf16.mxu1 %v2655_v46  ;;  %v16302_v57 = vld [vmem:[%s20962_s1 + $0xbd0] sm:$0xff]   ;;  %v16341_v46 = vld [vmem:[%s20962_s1 + $0xc98] sm:$0xff]  }
 0x147   :  { %14814 = vmatprep.subr.bf16.mxu1 %v16266_v60  ;;  %v16304_v59 = vld [vmem:[%s20962_s1 + $0xb90] sm:$0xff]   ;;  %v16305_v60 = vld [vmem:[%s20962_s1 + $0xb58] sm:$0xff]  }
 0x148   :  { %14793 = vmatpush3.bf16.msra.mxu0 %v16267_v61  ;;  %v16306_v61 = vld [vmem:[%s20962_s1 + $0xbd8] sm:$0xff]   ;;  %v16336_v40 = vld [vmem:[%s20962_s1 + $0xc10] sm:$0xff]  }
 0x149   :  { %14794 = vmatprep.subr.bf16.mxu0 %v16269_v63  ;;  %v16308_v63 = vld [vmem:[%s20962_s1 + $0xb98] sm:$0xff]  }
 0x14a   :  { %14815 = vmatpush3.bf16.msra.mxu1 %v16268_v62  ;;  %v16307_v62 = vld [vmem:[%s20962_s1 + $0xb18] sm:$0xff]  }
 0x14b   :  { %14816 = vmatprep.subr.bf16.mxu1 %v16270_v0  ;;  %v16309_v0 = vld [vmem:[%s20962_s1 + $0xb60] sm:$0xff]  }
 0x14c   :  { %14795 = vmatpush3.bf16.msra.mxu0 %v16271_v1  ;;  %v16310_v1 = vld [vmem:[%s20962_s1 + $0xbe0] sm:$0xff]  }
 0x14d   :  { %14796 = vmatprep.subr.bf16.mxu0 %v16273_v3  ;;  %v16312_v3 = vld [vmem:[%s20962_s1 + $0xba0] sm:$0xff]  }
 0x14e   :  { %14817 = vmatpush3.bf16.msra.mxu1 %v16272_v2  ;;  %v16311_v2 = vld [vmem:[%s20962_s1 + $0xb20] sm:$0xff]  }
 0x14f   :  { %14818 = vmatprep.subr.bf16.mxu1 %v16274_v4  ;;  %v16313_v4 = vld [vmem:[%s20962_s1 + $0xb68] sm:$0xff]  }
 0x150   :  { %14797 = vmatpush3.bf16.msra.mxu0 %v16275_v5  ;;  %v16314_v5 = vld [vmem:[%s20962_s1 + $0xbe8] sm:$0xff]  }
 0x151   :  { %14798 = vmatprep.subr.bf16.mxu0 %v16277_v7  ;;  %v16316_v7 = vld [vmem:[%s20962_s1 + $0xba8] sm:$0xff]  }
 0x152   :  { %14819 = vmatpush3.bf16.msra.mxu1 %v16276_v6  ;;  %v16315_v6 = vld [vmem:[%s20962_s1 + $0xb28] sm:$0xff]  }
 0x153   :  { %14820 = vmatprep.subr.bf16.mxu1 %v16278_v8  ;;  %v16317_v8 = vld [vmem:[%s20962_s1 + $0xb70] sm:$0xff]  }
 0x154   :  { %14799 = vmatpush3.bf16.msra.mxu0 %v16279_v9 }
 0x155   :  { %14800 = vmatprep.subr.bf16.mxu0 %v16281_v11 }
 0x156   :  { %14821 = vmatpush3.bf16.msra.mxu1 %v16280_v10  ;;  %v14498_v16 = vpop.f32.mrb[12].mxu0  ;;  %v16318_v10 = vld [vmem:[%s20962_s1 + $0xbf0] sm:$0xff]  }
 0x157   :  { %v14499_v18 = vpop.f32.mrb[13].mxu0  ;;  %14822 = vmatprep.subr.bf16.mxu1 %v16282_v12  ;;  %v16319_v12 = vld [vmem:[%s20962_s1 + $0xb30] sm:$0xff]  }
 0x158   :  { %v14520_v20 = vpop.f32.mrb[12].mxu1  ;;  %v14500_v21 = vadd.f32 %v14499_v18, %v14498_v16  ;;  %v14501_v22 = vpop.f32.mrb[14].mxu0  ;;  %14801 = vmatpush3.bf16.msra.mxu0 %v16283_v13  ;;  %v16320_v16 = vld [vmem:[%s20962_s1 + $0xbb0] sm:$0xff]  }
 0x159   :  { %v14521_v26 = vpop.f32.mrb[13].mxu1  ;;  %v14502_v27 = vpop.f32.mrb[15].mxu0  ;;  %14802 = vmatprep.subr.bf16.mxu0 %v16285_v15 }
 0x15a   :  { %v10576_v30 = vadd.f32 %v14500_v21, %v18188_v51  ;;  %v14522_v31 = vadd.f32 %v14521_v26, %v14520_v20  ;;  %v14523_v32 = vpop.f32.mrb[14].mxu1  ;;  %14823 = vmatpush3.bf16.msra.mxu1 %v16284_v14  ;;  %v16297_v51 = vld [vmem:[%s20962_s1 + $0xb48] sm:$0xff]   ;;  %v16324_v27 = vld [vmem:[%s20962_s1 + $0xbb8] sm:$0xff]  }
 0x15b   :  { %v14524_v34 = vpop.f32.mrb[15].mxu1  ;;  %14824 = vmatprep.subr.bf16.mxu1 %v16286_v17  ;;  %v16321_v17 = vld [vmem:[%s20962_s1 + $0xb78] sm:$0xff]   ;;  %v16329_v32 = vld [vmem:[%s20962_s1 + $0xc80] sm:$0xff]  }
 0x15c   :  { %v18296_v38 = vadd.f32 %v14522_v31, %v10576_v30  ;;  %14803 = vmatpush3.bf16.msra.mxu0 %v16287_v19  ;;  %v16327_v30 = vld [vmem:[%s20962_s1 + $0xcc0] sm:$0xff]   ;;  %v16330_v34 = vld [vmem:[%s20962_s1 + $0xc48] sm:$0xff]  }
 0x15d   :  { %14804 = vmatprep.subr.bf16.mxu0 %v16289_v24  ;;  %v16328_v31 = vld [vmem:[%s20962_s1 + $0xc00] sm:$0xff]  }
 0x15e   :  { %14825 = vmatpush3.bf16.msra.mxu1 %v16288_v23  ;;  %v16322_v23 = vld [vmem:[%s20962_s1 + $0xbf8] sm:$0xff]  }
 0x15f   :  { %14826 = vmatprep.subr.bf16.mxu1 %v16290_v33  ;;  %v2654_v33 = vcombine.high %v2638_v28, %v2638_v28 }
 0x160   :  { %14805 = vmatpush3.bf16.msra.mxu0 %v16291_v35  ;;  %v16331_v35 = vld [vmem:[%s20962_s1 + $0xcc8] sm:$0xff]  }
 0x161   :  { %14834 = vmatprep.subr.bf16.mxu0 %v16293_v43  ;;  %v16338_v43 = vld [vmem:[%s20962_s1 + $0xc58] sm:$0xff]  }
 0x162   :  { %14827 = vmatpush3.bf16.msra.mxu1 %v16292_v39  ;;  %v16335_v39 = vld [vmem:[%s20962_s1 + $0xcd0] sm:$0xff]  }
 0x163   :  { %11134 = vmatmul.mubr.bf16.vlgmr.msra.gmra.mrb[40].mxu0 %v2631_v42  ;;  %14856 = vmatprep.subr.bf16.mxu1 %v16294_v45  ;;  %v16337_v42 = vld [vmem:[%s20962_s1 + $0xc90] sm:$0xff]   ;;  %v16340_v45 = vld [vmem:[%s20962_s1 + $0xc18] sm:$0xff]  }
 0x164   :  { %14835 = vmatpush3.bf16.msra.mxu0 %v16295_v47  ;;  %11213 = vmatprep.mubr.bf16.mxu0 %v2652_v48  ;;  %v16342_v47 = vld [vmem:[%s20962_s1 + $0xc60] sm:$0xff]  }
 0x165   :  { %11174 = vmatmul.mubr.bf16.vlgmr.msra.gmra.mrb[40].mxu1 %v2653_v50  ;;  %14836 = vmatprep.subr.bf16.mxu0 %v16297_v51  ;;  %v16343_v48 = vld [vmem:[%s20962_s1 + $0xce0] sm:$0xff]   ;;  %v16346_v51 = vld [vmem:[%s20962_s1 + $0xc68] sm:$0xff]  }
 0x166   :  { %14857 = vmatpush3.bf16.msra.mxu1 %v16296_v49  ;;  %11253 = vmatprep.mubr.bf16.mxu1 %v2656_v53  ;;  %v16344_v49 = vld [vmem:[%s20962_s1 + $0xc20] sm:$0xff]   ;;  %v16348_v53 = vld [vmem:[%s20962_s1 + $0xc28] sm:$0xff]  }
 0x167   :  { %14858 = vmatprep.subr.bf16.mxu1 %v16298_v52  ;;  %v16345_v50 = vld [vmem:[%s20962_s1 + $0xca0] sm:$0xff]   ;;  %v16347_v52 = vld [vmem:[%s20962_s1 + $0xce8] sm:$0xff]  }
 0x168   :  { %14837 = vmatpush3.bf16.msra.mxu0 %v16299_v54  ;;  %v16349_v54 = vld [vmem:[%s20962_s1 + $0xca8] sm:$0xff]  }
 0x169   :  { %14838 = vmatprep.subr.bf16.mxu0 %v16301_v56 }
 0x16a   :  { %14859 = vmatpush3.bf16.msra.mxu1 %v16300_v55  ;;  %v16350_v55 = vld [vmem:[%s20962_s1 + $0xc70] sm:$0xff]  }
 0x16b   :  { %14860 = vmatprep.subr.bf16.mxu1 %v16302_v57  ;;  %v16351_v57 = vld [vmem:[%s20962_s1 + $0xcf0] sm:$0xff]  }
 0x16c   :  { %14839 = vmatpush3.bf16.msra.mxu0 %v16303_v58 }
 0x16d   :  { %14840 = vmatprep.subr.bf16.mxu0 %v16305_v60 }
 0x16e   :  { %14861 = vmatpush3.bf16.msra.mxu1 %v16304_v59  ;;  %v16352_v59 = vld [vmem:[%s20962_s1 + $0xc30] sm:$0xff]  }
 0x16f   :  { %14862 = vmatprep.subr.bf16.mxu1 %v16306_v61 }
 0x170   :  { %14841 = vmatpush3.bf16.msra.mxu0 %v16307_v62 }
 0x171   :  { %14842 = vmatprep.subr.bf16.mxu0 %v16309_v0 }
 0x172   :  { %14863 = vmatpush3.bf16.msra.mxu1 %v16308_v63  ;;  %v16353_v63 = vld [vmem:[%s20962_s1 + $0xcb0] sm:$0xff]  }
 0x173   :  { %14864 = vmatprep.subr.bf16.mxu1 %v16310_v1 }
 0x174   :  { %14843 = vmatpush3.bf16.msra.mxu0 %v16311_v2  ;;  %v16354_v2 = vld [vmem:[%s20962_s1 + $0xc78] sm:$0xff]  }
 0x175   :  { %14844 = vmatprep.subr.bf16.mxu0 %v16313_v4 }
 0x176   :  { %14865 = vmatpush3.bf16.msra.mxu1 %v16312_v3  ;;  %v14542_v9 = vpop.f32.mrb[16].mxu0  ;;  %v22_v3 = vld [vmem:[%s20961_s0 + $0x30] sm:$0xff] }
 0x177   :  { %v14543_v11 = vpop.f32.mrb[17].mxu0  ;;  %14866 = vmatprep.subr.bf16.mxu1 %v16314_v5 }
 0x178   :  { %v14564_v13 = vpop.f32.mrb[16].mxu1  ;;  %v14544_v14 = vadd.f32 %v14543_v11, %v14542_v9  ;;  %v14545_v15 = vpop.f32.mrb[18].mxu0  ;;  %14845 = vmatpush3.bf16.msra.mxu0 %v16315_v6  ;;  %v2657_v9 = vcombine.high %v22_v3, %v22_v3  ;;  %v16356_v11 = vld [vmem:[%s20962_s1 + $0xc38] sm:$0xff]  }
 0x179   :  { %v14565_v18 = vpop.f32.mrb[17].mxu1  ;;  %v14546_v19 = vpop.f32.mrb[19].mxu0  ;;  %14846 = vmatprep.subr.bf16.mxu0 %v16317_v8  ;;  %v2664_v8 = vrot.slane %v22_v3, %v17257_v41  ;;  %v16389_v3 = vld [vmem:[%s20962_s1 + $0xdb8] sm:$0xff]  }
 0x17a   :  { %v10656_v20 = vadd.f32 %v14544_v14, %v18296_v38  ;;  %v14566_v21 = vadd.f32 %v14565_v18, %v14564_v13  ;;  %v14567_v22 = vpop.f32.mrb[18].mxu1  ;;  %14867 = vmatpush3.bf16.msra.mxu1 %v16316_v7  ;;  %v16334_v38 = vld [vmem:[%s20962_s1 + $0xc50] sm:$0xff]   ;;  %v16355_v7 = vld [vmem:[%s20962_s1 + $0xcf8] sm:$0xff]   ;;  %v18511_v15 = vrot.slane %v2657_v9, %v17257_v41  ;;  %v16359_v19 = vld [vmem:[%s20962_s1 + $0xdc0] sm:$0xff]  }
 0x17b   :  { %v14568_v24 = vpop.f32.mrb[19].mxu1  ;;  %14868 = vmatprep.subr.bf16.mxu1 %v16318_v10  ;;  %v16357_v13 = vld [vmem:[%s20962_s1 + $0xcb8] sm:$0xff]   ;;  %v2672_v14 = vcombine.high %v2664_v8, %v2664_v8 }
 0x17c   :  { %v18400_v26 = vadd.f32 %v14566_v21, %v10656_v20  ;;  %14847 = vmatpush3.bf16.msra.mxu0 %v16319_v12  ;;  %v2673_v20 = vcombine.high %v18511_v15, %v18511_v15  ;;  %v16360_v21 = vld [vmem:[%s20962_s1 + $0xd00] sm:$0xff]  }
 0x17d   :  { %14848 = vmatprep.subr.bf16.mxu0 %v16321_v17  ;;  %v16358_v17 = vld [vmem:[%s20962_s1 + $0xd40] sm:$0xff]   ;;  %v2694_v18 = vrot.slane %v2672_v14, %v17257_v41  ;;  %v16399_v14 = vld [vmem:[%s20962_s1 + $0xe50] sm:$0xff]  }
 0x17e   :  { %14869 = vmatpush3.bf16.msra.mxu1 %v16320_v16  ;;  %v2680_v16 = vrot.slane %v2664_v8, %v17257_v41  ;;  %v2701_v24 = vrot.slane %v2673_v20, %v17257_v41  ;;  %v16394_v8 = vld [vmem:[%s20962_s1 + $0xe80] sm:$0xff]   ;;  %v16405_v20 = vld [vmem:[%s20962_s1 + $0xe18] sm:$0xff]  }
 0x17f   :  { %14870 = vmatprep.subr.bf16.mxu1 %v16322_v23  ;;  %v2704_v22 = vcombine.high %v2694_v18, %v2694_v18  ;;  %v16361_v23 = vld [vmem:[%s20962_s1 + $0xd80] sm:$0xff]  }
 0x180   :  { %14849 = vmatpush3.bf16.msra.mxu0 %v16323_v25  ;;  %v2702_v25 = vcombine.high %v2680_v16, %v2680_v16 }
 0x181   :  { %14878 = vmatprep.subr.bf16.mxu0 %v16326_v29  ;;  %v16364_v29 = vld [vmem:[%s20962_s1 + $0xd08] sm:$0xff]  }
 0x182   :  { %14871 = vmatpush3.bf16.msra.mxu1 %v16324_v27  ;;  %v16363_v27 = vld [vmem:[%s20962_s1 + $0xdc8] sm:$0xff]  }
 0x183   :  { %11214 = vmatmul.mubr.bf16.vlgmr.msra.gmra.mrb[44].mxu0 %v2638_v28  ;;  %14900 = vmatprep.subr.bf16.mxu1 %v16327_v30  ;;  %v2705_v28 = vcombine.high %v2701_v24, %v2701_v24  ;;  %v16365_v30 = vld [vmem:[%s20962_s1 + $0xd88] sm:$0xff]  }
 0x184   :  { %14879 = vmatpush3.bf16.msra.mxu0 %v16328_v31  ;;  %11293 = vmatprep.mubr.bf16.mxu0 %v2694_v18  ;;  %v16366_v31 = vld [vmem:[%s20962_s1 + $0xd50] sm:$0xff]   ;;  %v16403_v18 = vld [vmem:[%s20962_s1 + $0xe58] sm:$0xff]  }
 0x185   :  { %11254 = vmatmul.mubr.bf16.vlgmr.msra.gmra.mrb[44].mxu1 %v2654_v33  ;;  %14880 = vmatprep.subr.bf16.mxu0 %v16330_v34  ;;  %v16368_v33 = vld [vmem:[%s20962_s1 + $0xd10] sm:$0xff]  }
 0x186   :  { %14901 = vmatpush3.bf16.msra.mxu1 %v16329_v32  ;;  %11333 = vmatprep.mubr.bf16.mxu1 %v2704_v22  ;;  %v16367_v32 = vld [vmem:[%s20962_s1 + $0xdd0] sm:$0xff]   ;;  %v16407_v22 = vld [vmem:[%s20962_s1 + $0xe60] sm:$0xff]  }
 0x187   :  { %14902 = vmatprep.subr.bf16.mxu1 %v16331_v35  ;;  %v16369_v34 = vld [vmem:[%s20962_s1 + $0xd90] sm:$0xff]   ;;  %v16370_v35 = vld [vmem:[%s20962_s1 + $0xd58] sm:$0xff]  }
 0x188   :  { %14881 = vmatpush3.bf16.msra.mxu0 %v16332_v36  ;;  %v16371_v36 = vld [vmem:[%s20962_s1 + $0xdd8] sm:$0xff]  }
 0x189   :  { %14882 = vmatprep.subr.bf16.mxu0 %v16334_v38  ;;  %v16373_v38 = vld [vmem:[%s20962_s1 + $0xd98] sm:$0xff]  }
 0x18a   :  { %14903 = vmatpush3.bf16.msra.mxu1 %v16333_v37  ;;  %v16372_v37 = vld [vmem:[%s20962_s1 + $0xd18] sm:$0xff]  }
 0x18b   :  { %14904 = vmatprep.subr.bf16.mxu1 %v16335_v39  ;;  %v16374_v39 = vld [vmem:[%s20962_s1 + $0xd60] sm:$0xff]  }
 0x18c   :  { %14883 = vmatpush3.bf16.msra.mxu0 %v16336_v40  ;;  %v16375_v40 = vld [vmem:[%s20962_s1 + $0xde0] sm:$0xff]  }
 0x18d   :  { %14884 = vmatprep.subr.bf16.mxu0 %v16338_v43  ;;  %v16377_v43 = vld [vmem:[%s20962_s1 + $0xda0] sm:$0xff]  }
 0x18e   :  { %14905 = vmatpush3.bf16.msra.mxu1 %v16337_v42  ;;  %v16376_v42 = vld [vmem:[%s20962_s1 + $0xd20] sm:$0xff]  }
 0x18f   :  { %14906 = vmatprep.subr.bf16.mxu1 %v16339_v44  ;;  %v16378_v44 = vld [vmem:[%s20962_s1 + $0xd68] sm:$0xff]  }
 0x190   :  { %14885 = vmatpush3.bf16.msra.mxu0 %v16340_v45  ;;  %v16379_v45 = vld [vmem:[%s20962_s1 + $0xde8] sm:$0xff]  }
 0x191   :  { %14886 = vmatprep.subr.bf16.mxu0 %v16342_v47  ;;  %v16381_v47 = vld [vmem:[%s20962_s1 + $0xda8] sm:$0xff]  }
 0x192   :  { %14907 = vmatpush3.bf16.msra.mxu1 %v16341_v46  ;;  %v16380_v46 = vld [vmem:[%s20962_s1 + $0xd28] sm:$0xff]  }
 0x193   :  { %14908 = vmatprep.subr.bf16.mxu1 %v16343_v48  ;;  %v16382_v48 = vld [vmem:[%s20962_s1 + $0xd70] sm:$0xff]  }
 0x194   :  { %14887 = vmatpush3.bf16.msra.mxu0 %v16344_v49 }
 0x195   :  { %14888 = vmatprep.subr.bf16.mxu0 %v16346_v51 }
 0x196   :  { %14909 = vmatpush3.bf16.msra.mxu1 %v16345_v50  ;;  %v14586_v56 = vpop.f32.mrb[20].mxu0  ;;  %v16383_v50 = vld [vmem:[%s20962_s1 + $0xdf0] sm:$0xff]  }
 0x197   :  { %v14587_v58 = vpop.f32.mrb[21].mxu0  ;;  %14910 = vmatprep.subr.bf16.mxu1 %v16347_v52  ;;  %v16384_v52 = vld [vmem:[%s20962_s1 + $0xd30] sm:$0xff]  }
 0x198   :  { %v14608_v60 = vpop.f32.mrb[20].mxu1  ;;  %v14588_v61 = vadd.f32 %v14587_v58, %v14586_v56  ;;  %v14589_v62 = vpop.f32.mrb[22].mxu0  ;;  %14889 = vmatpush3.bf16.msra.mxu0 %v16348_v53  ;;  %v16385_v56 = vld [vmem:[%s20962_s1 + $0xdb0] sm:$0xff]  }
 0x199   :  { %v14609_v0 = vpop.f32.mrb[21].mxu1  ;;  %v14590_v1 = vpop.f32.mrb[23].mxu0  ;;  %14890 = vmatprep.subr.bf16.mxu0 %v16350_v55 }
 0x19a   :  { %v10736_v4 = vadd.f32 %v14588_v61, %v18400_v26  ;;  %v14610_v5 = vadd.f32 %v14609_v0, %v14608_v60  ;;  %v14611_v6 = vpop.f32.mrb[22].mxu1  ;;  %14911 = vmatpush3.bf16.msra.mxu1 %v16349_v54  ;;  %v16362_v26 = vld [vmem:[%s20962_s1 + $0xd48] sm:$0xff]   ;;  %v16388_v1 = vld [vmem:[%s20962_s1 + $0xd38] sm:$0xff]  }
 0x19b   :  { %v14612_v10 = vpop.f32.mrb[23].mxu1  ;;  %14912 = vmatprep.subr.bf16.mxu1 %v16351_v57  ;;  %v16386_v57 = vld [vmem:[%s20962_s1 + $0xd78] sm:$0xff]   ;;  %v16392_v6 = vld [vmem:[%s20962_s1 + $0xec0] sm:$0xff]  }
 0x19c   :  { %v18505_v12 = vadd.f32 %v14610_v5, %v10736_v4  ;;  %14891 = vmatpush3.bf16.msra.mxu0 %v16352_v59  ;;  %v2687_v4 = vrot.slane %v18511_v15, %v17257_v41  ;;  %v16391_v5 = vld [vmem:[%s20962_s1 + $0xe40] sm:$0xff]   ;;  %v16395_v10 = vld [vmem:[%s20962_s1 + $0xe48] sm:$0xff]   ;;  %v16400_v15 = vld [vmem:[%s20962_s1 + $0xed0] sm:$0xff]  }
 0x19d   :  { %14892 = vmatprep.subr.bf16.mxu0 %v16354_v2 }
 0x19e   :  { %14913 = vmatpush3.bf16.msra.mxu1 %v16353_v63  ;;  %v16387_v63 = vld [vmem:[%s20962_s1 + $0xdf8] sm:$0xff]   ;;  %v2703_v9 = vcombine.high %v2687_v4, %v2687_v4 }
 0x19f   :  { %14914 = vmatprep.subr.bf16.mxu1 %v16355_v7  ;;  %v16393_v7 = vld [vmem:[%s20962_s1 + $0xe00] sm:$0xff]  }
 0x1a0   :  { %14893 = vmatpush3.bf16.msra.mxu0 %v16356_v11  ;;  %v16396_v11 = vld [vmem:[%s20962_s1 + $0xec8] sm:$0xff]  }
 0x1a1   :  { %14922 = vmatprep.subr.bf16.mxu0 %v16358_v17  ;;  %v16402_v17 = vld [vmem:[%s20962_s1 + $0xe90] sm:$0xff]  }
 0x1a2   :  { %14915 = vmatpush3.bf16.msra.mxu1 %v16357_v13  ;;  %v16398_v13 = vld [vmem:[%s20962_s1 + $0xe88] sm:$0xff]  }
 0x1a3   :  { %11294 = vmatmul.mubr.bf16.vlgmr.msra.gmra.mrb[48].mxu0 %v2680_v16  ;;  %14944 = vmatprep.subr.bf16.mxu1 %v16359_v19  ;;  %v16401_v16 = vld [vmem:[%s20962_s1 + $0xe10] sm:$0xff]   ;;  %v16404_v19 = vld [vmem:[%s20962_s1 + $0xed8] sm:$0xff]  }
 0x1a4   :  { %14923 = vmatpush3.bf16.msra.mxu0 %v16360_v21  ;;  %11373 = vmatprep.mubr.bf16.mxu0 %v2701_v24  ;;  %v16406_v21 = vld [vmem:[%s20962_s1 + $0xe98] sm:$0xff]   ;;  %v16409_v24 = vld [vmem:[%s20962_s1 + $0xe20] sm:$0xff]  }
 0x1a5   :  { %11334 = vmatmul.mubr.bf16.vlgmr.msra.gmra.mrb[48].mxu1 %v2702_v25  ;;  %14924 = vmatprep.subr.bf16.mxu0 %v16362_v26  ;;  %v16410_v25 = vld [vmem:[%s20962_s1 + $0xea0] sm:$0xff]   ;;  %v16411_v26 = vld [vmem:[%s20962_s1 + $0xe68] sm:$0xff]  }
 0x1a6   :  { %14945 = vmatpush3.bf16.msra.mxu1 %v16361_v23  ;;  %11413 = vmatprep.mubr.bf16.mxu1 %v2705_v28  ;;  %v16408_v23 = vld [vmem:[%s20962_s1 + $0xee0] sm:$0xff]   ;;  %v16413_v28 = vld [vmem:[%s20962_s1 + $0xe28] sm:$0xff]  }
 0x1a7   :  { %14946 = vmatprep.subr.bf16.mxu1 %v16363_v27  ;;  %v16412_v27 = vld [vmem:[%s20962_s1 + $0xee8] sm:$0xff]  }
 0x1a8   :  { %14925 = vmatpush3.bf16.msra.mxu0 %v16364_v29  ;;  %v16414_v29 = vld [vmem:[%s20962_s1 + $0xea8] sm:$0xff]  }
 0x1a9   :  { %14926 = vmatprep.subr.bf16.mxu0 %v16366_v31 }
 0x1aa   :  { %14947 = vmatpush3.bf16.msra.mxu1 %v16365_v30  ;;  %v16415_v30 = vld [vmem:[%s20962_s1 + $0xe70] sm:$0xff]  }
 0x1ab   :  { %14948 = vmatprep.subr.bf16.mxu1 %v16367_v32  ;;  %v16416_v32 = vld [vmem:[%s20962_s1 + $0xef0] sm:$0xff]  }
 0x1ac   :  { %14927 = vmatpush3.bf16.msra.mxu0 %v16368_v33 }
 0x1ad   :  { %14928 = vmatprep.subr.bf16.mxu0 %v16370_v35 }
 0x1ae   :  { %14949 = vmatpush3.bf16.msra.mxu1 %v16369_v34  ;;  %v16417_v34 = vld [vmem:[%s20962_s1 + $0xe30] sm:$0xff]  }
 0x1af   :  { %14950 = vmatprep.subr.bf16.mxu1 %v16371_v36 }
 0x1b0   :  { %14929 = vmatpush3.bf16.msra.mxu0 %v16372_v37 }
 0x1b1   :  { %14930 = vmatprep.subr.bf16.mxu0 %v16374_v39 }
 0x1b2   :  { %14951 = vmatpush3.bf16.msra.mxu1 %v16373_v38  ;;  %v16418_v38 = vld [vmem:[%s20962_s1 + $0xeb0] sm:$0xff]  }
 0x1b3   :  { %14952 = vmatprep.subr.bf16.mxu1 %v16375_v40 }
 0x1b4   :  { %14931 = vmatpush3.bf16.msra.mxu0 %v16376_v42  ;;  %v16419_v42 = vld [vmem:[%s20962_s1 + $0xe78] sm:$0xff]  }
 0x1b5   :  { %14932 = vmatprep.subr.bf16.mxu0 %v16378_v44 }
 0x1b6   :  { %14953 = vmatpush3.bf16.msra.mxu1 %v16377_v43  ;;  %v14630_v49 = vpop.f32.mrb[24].mxu0  ;;  %v16420_v43 = vld [vmem:[%s20962_s1 + $0xef8] sm:$0xff]  }
 0x1b7   :  { %v14631_v51 = vpop.f32.mrb[25].mxu0  ;;  %14954 = vmatprep.subr.bf16.mxu1 %v16379_v45 }
 0x1b8   :  { %v14652_v53 = vpop.f32.mrb[24].mxu1  ;;  %v14632_v54 = vadd.f32 %v14631_v51, %v14630_v49  ;;  %v14633_v55 = vpop.f32.mrb[26].mxu0  ;;  %14933 = vmatpush3.bf16.msra.mxu0 %v16380_v46  ;;  %v16421_v49 = vld [vmem:[%s20962_s1 + $0xe38] sm:$0xff]  }
 0x1b9   :  { %v14653_v58 = vpop.f32.mrb[25].mxu1  ;;  %v14634_v59 = vpop.f32.mrb[27].mxu0  ;;  %14934 = vmatprep.subr.bf16.mxu0 %v16382_v48 }
 0x1ba   :  { %v10816_v60 = vadd.f32 %v14632_v54, %v18505_v12  ;;  %v14654_v61 = vadd.f32 %v14653_v58, %v14652_v53  ;;  %v14655_v62 = vpop.f32.mrb[26].mxu1  ;;  %14955 = vmatpush3.bf16.msra.mxu1 %v16381_v47  ;;  %v16397_v12 = vld [vmem:[%s20962_s1 + $0xe08] sm:$0xff]   ;;  %v23_v47 = vld [vmem:[%s20961_s0 + $0x38] sm:$0xff]  ;;  %v16424_v58 = vld [vmem:[%s20962_s1 + $0xfc0] sm:$0xff]  }
 0x1bb   :  { %v14656_v0 = vpop.f32.mrb[27].mxu1  ;;  %14956 = vmatprep.subr.bf16.mxu1 %v16383_v50  ;;  %v2713_v50 = vrot.slane %v23_v47, %v17257_v41  ;;  %v2706_v51 = vcombine.high %v23_v47, %v23_v47  ;;  %v16422_v53 = vld [vmem:[%s20962_s1 + $0xeb8] sm:$0xff]   ;;  %v16426_v62 = vld [vmem:[%s20962_s1 + $0xf80] sm:$0xff]  }
 0x1bc   :  { %v18612_v2 = vadd.f32 %v14654_v61, %v10816_v60  ;;  %14935 = vmatpush3.bf16.msra.mxu0 %v16384_v52  ;;  %v16425_v60 = vld [vmem:[%s20962_s1 + $0xf00] sm:$0xff]  }
 0x1bd   :  { %14936 = vmatprep.subr.bf16.mxu0 %v16386_v57  ;;  %v2721_v54 = vcombine.high %v2713_v50, %v2713_v50  ;;  %v2729_v55 = vrot.slane %v2713_v50, %v17257_v41  ;;  %v18727_v57 = vrot.slane %v2706_v51, %v17257_v41  ;;  %v16458_v47 = vld [vmem:[%s20962_s1 + $0x1000] sm:$0xff]   ;;  %v16460_v50 = vld [vmem:[%s20962_s1 + $0x1048] sm:$0xff]  }
 0x1be   :  { %14957 = vmatpush3.bf16.msra.mxu1 %v16385_v56  ;;  %v16423_v56 = vld [vmem:[%s20962_s1 + $0xf40] sm:$0xff]   ;;  %v16461_v51 = vld [vmem:[%s20962_s1 + $0x10c8] sm:$0xff]  }
 0x1bf   :  { %14958 = vmatprep.subr.bf16.mxu1 %v16387_v63  ;;  %v2743_v59 = vrot.slane %v2721_v54, %v17257_v41  ;;  %v2722_v61 = vcombine.high %v18727_v57, %v18727_v57  ;;  %v2751_v0 = vcombine.high %v2729_v55, %v2729_v55  ;;  %v16464_v54 = vld [vmem:[%s20962_s1 + $0x1050] sm:$0xff]  }
 0x1c0   :  { %14937 = vmatpush3.bf16.msra.mxu0 %v16388_v1  ;;  %v16427_v1 = vld [vmem:[%s20962_s1 + $0xf48] sm:$0xff]  }
 0x1c1   :  { %14966 = vmatprep.subr.bf16.mxu0 %v16391_v5  ;;  %v2753_v63 = vcombine.high %v2743_v59, %v2743_v59 }
 0x1c2   :  { %14959 = vmatpush3.bf16.msra.mxu1 %v16389_v3  ;;  %v16428_v3 = vld [vmem:[%s20962_s1 + $0xfc8] sm:$0xff]  }
 0x1c3   :  { %11374 = vmatmul.mubr.bf16.vlgmr.msra.gmra.mrb[52].mxu0 %v2687_v4  ;;  %14988 = vmatprep.subr.bf16.mxu1 %v16392_v6  ;;  %v16429_v4 = vld [vmem:[%s20962_s1 + $0xf08] sm:$0xff]  }
 0x1c4   :  { %14967 = vmatpush3.bf16.msra.mxu0 %v16393_v7  ;;  %11453 = vmatprep.mubr.bf16.mxu0 %v2743_v59  ;;  %v16430_v6 = vld [vmem:[%s20962_s1 + $0xf88] sm:$0xff]   ;;  %v16431_v7 = vld [vmem:[%s20962_s1 + $0xf50] sm:$0xff]   ;;  %v16469_v59 = vld [vmem:[%s20962_s1 + $0x10d8] sm:$0xff]  }
 0x1c5   :  { %11414 = vmatmul.mubr.bf16.vlgmr.msra.gmra.mrb[52].mxu1 %v2703_v9  ;;  %14968 = vmatprep.subr.bf16.mxu0 %v16395_v10  ;;  %v16433_v9 = vld [vmem:[%s20962_s1 + $0xf10] sm:$0xff]  }
 0x1c6   :  { %14989 = vmatpush3.bf16.msra.mxu1 %v16394_v8  ;;  %11493 = vmatprep.mubr.bf16.mxu1 %v2753_v63  ;;  %v16432_v8 = vld [vmem:[%s20962_s1 + $0xfd0] sm:$0xff]   ;;  %v16473_v63 = vld [vmem:[%s20962_s1 + $0x10e0] sm:$0xff]  }
 0x1c7   :  { %14990 = vmatprep.subr.bf16.mxu1 %v16396_v11  ;;  %v16434_v10 = vld [vmem:[%s20962_s1 + $0xf90] sm:$0xff]   ;;  %v16435_v11 = vld [vmem:[%s20962_s1 + $0xf58] sm:$0xff]  }
 0x1c8   :  { %14969 = vmatpush3.bf16.msra.mxu0 %v16397_v12  ;;  %v16436_v12 = vld [vmem:[%s20962_s1 + $0xfd8] sm:$0xff]  }
 0x1c9   :  { %14970 = vmatprep.subr.bf16.mxu0 %v16399_v14  ;;  %v16438_v14 = vld [vmem:[%s20962_s1 + $0xf98] sm:$0xff]  }
 0x1ca   :  { %14991 = vmatpush3.bf16.msra.mxu1 %v16398_v13  ;;  %v16437_v13 = vld [vmem:[%s20962_s1 + $0xf18] sm:$0xff]  }
 0x1cb   :  { %14992 = vmatprep.subr.bf16.mxu1 %v16400_v15  ;;  %v16439_v15 = vld [vmem:[%s20962_s1 + $0xf60] sm:$0xff]  }
 0x1cc   :  { %14971 = vmatpush3.bf16.msra.mxu0 %v16401_v16  ;;  %v16440_v16 = vld [vmem:[%s20962_s1 + $0xfe0] sm:$0xff]  }
 0x1cd   :  { %14972 = vmatprep.subr.bf16.mxu0 %v16403_v18  ;;  %v16442_v18 = vld [vmem:[%s20962_s1 + $0xfa0] sm:$0xff]  }
 0x1ce   :  { %14993 = vmatpush3.bf16.msra.mxu1 %v16402_v17  ;;  %v16441_v17 = vld [vmem:[%s20962_s1 + $0xf20] sm:$0xff]  }
 0x1cf   :  { %14994 = vmatprep.subr.bf16.mxu1 %v16404_v19  ;;  %v16443_v19 = vld [vmem:[%s20962_s1 + $0xf68] sm:$0xff]  }
 0x1d0   :  { %14973 = vmatpush3.bf16.msra.mxu0 %v16405_v20  ;;  %v16444_v20 = vld [vmem:[%s20962_s1 + $0xfe8] sm:$0xff]  }
 0x1d1   :  { %14974 = vmatprep.subr.bf16.mxu0 %v16407_v22  ;;  %v16446_v22 = vld [vmem:[%s20962_s1 + $0xfa8] sm:$0xff]  }
 0x1d2   :  { %14995 = vmatpush3.bf16.msra.mxu1 %v16406_v21  ;;  %v16445_v21 = vld [vmem:[%s20962_s1 + $0xf28] sm:$0xff]  }
 0x1d3   :  { %14996 = vmatprep.subr.bf16.mxu1 %v16408_v23  ;;  %v16447_v23 = vld [vmem:[%s20962_s1 + $0xf70] sm:$0xff]  }
 0x1d4   :  { %14975 = vmatpush3.bf16.msra.mxu0 %v16409_v24 }
 0x1d5   :  { %14976 = vmatprep.subr.bf16.mxu0 %v16411_v26 }
 0x1d6   :  { %14997 = vmatpush3.bf16.msra.mxu1 %v16410_v25  ;;  %v14674_v31 = vpop.f32.mrb[28].mxu0  ;;  %v16448_v25 = vld [vmem:[%s20962_s1 + $0xff0] sm:$0xff]  }
 0x1d7   :  { %v14675_v33 = vpop.f32.mrb[29].mxu0  ;;  %14998 = vmatprep.subr.bf16.mxu1 %v16412_v27  ;;  %v16449_v27 = vld [vmem:[%s20962_s1 + $0xf30] sm:$0xff]  }
 0x1d8   :  { %v14696_v35 = vpop.f32.mrb[28].mxu1  ;;  %v14676_v36 = vadd.f32 %v14675_v33, %v14674_v31  ;;  %v14677_v37 = vpop.f32.mrb[30].mxu0  ;;  %14977 = vmatpush3.bf16.msra.mxu0 %v16413_v28  ;;  %v16450_v31 = vld [vmem:[%s20962_s1 + $0xfb0] sm:$0xff]  }
 0x1d9   :  { %v14697_v39 = vpop.f32.mrb[29].mxu1  ;;  %v14678_v40 = vpop.f32.mrb[31].mxu0  ;;  %14978 = vmatprep.subr.bf16.mxu0 %v16415_v30 }
 0x1da   :  { %v10896_v44 = vadd.f32 %v14676_v36, %v18612_v2  ;;  %v14698_v45 = vadd.f32 %v14697_v39, %v14696_v35  ;;  %v14699_v46 = vpop.f32.mrb[30].mxu1  ;;  %14999 = vmatpush3.bf16.msra.mxu1 %v16414_v29  ;;  %v2750_v2 = vrot.slane %v2722_v61, %v17257_v41  ;;  %v16453_v40 = vld [vmem:[%s20962_s1 + $0xf38] sm:$0xff]  }
 0x1db   :  { %v14700_v48 = vpop.f32.mrb[31].mxu1  ;;  %15000 = vmatprep.subr.bf16.mxu1 %v16416_v32  ;;  %v16451_v32 = vld [vmem:[%s20962_s1 + $0xf78] sm:$0xff]   ;;  %v16457_v46 = vld [vmem:[%s20962_s1 + $0x10c0] sm:$0xff]  }
 0x1dc   :  { %v18717_v52 = vadd.f32 %v14698_v45, %v10896_v44  ;;  %14979 = vmatpush3.bf16.msra.mxu0 %v16417_v34  ;;  %v2754_v5 = vcombine.high %v2750_v2, %v2750_v2  ;;  %v2736_v44 = vrot.slane %v18727_v57, %v17257_v41  ;;  %v16456_v45 = vld [vmem:[%s20962_s1 + $0x1040] sm:$0xff]   ;;  %v16467_v57 = vld [vmem:[%s20962_s1 + $0x1090] sm:$0xff]   ;;  %v16471_v61 = vld [vmem:[%s20962_s1 + $0x1098] sm:$0xff]  }
 0x1dd   :  { %14980 = vmatprep.subr.bf16.mxu0 %v16419_v42  ;;  %v16459_v48 = vld [vmem:[%s20962_s1 + $0x1080] sm:$0xff]  }
 0x1de   :  { %15001 = vmatpush3.bf16.msra.mxu1 %v16418_v38  ;;  %v16452_v38 = vld [vmem:[%s20962_s1 + $0xff8] sm:$0xff]  }
 0x1df   :  { %15002 = vmatprep.subr.bf16.mxu1 %v16420_v43  ;;  %v16454_v43 = vld [vmem:[%s20962_s1 + $0xfb8] sm:$0xff]  }
 0x1e0   :  { %14981 = vmatpush3.bf16.msra.mxu0 %v16421_v49  ;;  %v2752_v49 = vcombine.high %v2736_v44, %v2736_v44 }
 0x1e1   :  { %15010 = vmatprep.subr.bf16.mxu0 %v16423_v56  ;;  %v16466_v56 = vld [vmem:[%s20962_s1 + $0x1010] sm:$0xff]  }
 0x1e2   :  { %15003 = vmatpush3.bf16.msra.mxu1 %v16422_v53  ;;  %v16463_v53 = vld [vmem:[%s20962_s1 + $0x1088] sm:$0xff]  }
 0x1e3   :  { %11454 = vmatmul.mubr.bf16.vlgmr.msra.gmra.mrb[56].mxu0 %v2729_v55  ;;  %15032 = vmatprep.subr.bf16.mxu1 %v16424_v58  ;;  %v16465_v55 = vld [vmem:[%s20962_s1 + $0x10d0] sm:$0xff]   ;;  %v16468_v58 = vld [vmem:[%s20962_s1 + $0x1058] sm:$0xff]  }
 0x1e4   :  { %15011 = vmatpush3.bf16.msra.mxu0 %v16425_v60  ;;  %11533 = vmatprep.mubr.bf16.mxu0 %v2750_v2  ;;  %v16470_v60 = vld [vmem:[%s20962_s1 + $0x1018] sm:$0xff]   ;;  %v16476_v2 = vld [vmem:[%s20962_s1 + $0x1068] sm:$0xff]  }
 0x1e5   :  { %11494 = vmatmul.mubr.bf16.vlgmr.msra.gmra.mrb[56].mxu1 %v2751_v0  ;;  %15012 = vmatprep.subr.bf16.mxu0 %v16427_v1  ;;  %v16474_v0 = vld [vmem:[%s20962_s1 + $0x1020] sm:$0xff]  }
 0x1e6   :  { %15033 = vmatpush3.bf16.msra.mxu1 %v16426_v62  ;;  %11573 = vmatprep.mubr.bf16.mxu1 %v2754_v5  ;;  %v16472_v62 = vld [vmem:[%s20962_s1 + $0x1060] sm:$0xff]   ;;  %v16479_v5 = vld [vmem:[%s20962_s1 + $0x10a8] sm:$0xff]  }
 0x1e7   :  { %15034 = vmatprep.subr.bf16.mxu1 %v16428_v3  ;;  %v16475_v1 = vld [vmem:[%s20962_s1 + $0x10a0] sm:$0xff]   ;;  %v16477_v3 = vld [vmem:[%s20962_s1 + $0x10e8] sm:$0xff]  }
 0x1e8   :  { %15013 = vmatpush3.bf16.msra.mxu0 %v16429_v4  ;;  %v16478_v4 = vld [vmem:[%s20962_s1 + $0x1028] sm:$0xff]  }
 0x1e9   :  { %15014 = vmatprep.subr.bf16.mxu0 %v16431_v7 }
 0x1ea   :  { %15035 = vmatpush3.bf16.msra.mxu1 %v16430_v6  ;;  %v16480_v6 = vld [vmem:[%s20962_s1 + $0x1070] sm:$0xff]  }
 0x1eb   :  { %15036 = vmatprep.subr.bf16.mxu1 %v16432_v8  ;;  %v16481_v8 = vld [vmem:[%s20962_s1 + $0x10f0] sm:$0xff]  }
 0x1ec   :  { %15015 = vmatpush3.bf16.msra.mxu0 %v16433_v9 }
 0x1ed   :  { %15016 = vmatprep.subr.bf16.mxu0 %v16435_v11 }
 0x1ee   :  { %15037 = vmatpush3.bf16.msra.mxu1 %v16434_v10  ;;  %v16482_v10 = vld [vmem:[%s20962_s1 + $0x1030] sm:$0xff]  }
 0x1ef   :  { %15038 = vmatprep.subr.bf16.mxu1 %v16436_v12 }
 0x1f0   :  { %15017 = vmatpush3.bf16.msra.mxu0 %v16437_v13 }
 0x1f1   :  { %15018 = vmatprep.subr.bf16.mxu0 %v16439_v15 }
 0x1f2   :  { %15039 = vmatpush3.bf16.msra.mxu1 %v16438_v14  ;;  %v16483_v14 = vld [vmem:[%s20962_s1 + $0x10b0] sm:$0xff]  }
 0x1f3   :  { %15040 = vmatprep.subr.bf16.mxu1 %v16440_v16 }
 0x1f4   :  { %15019 = vmatpush3.bf16.msra.mxu0 %v16441_v17  ;;  %v16484_v17 = vld [vmem:[%s20962_s1 + $0x1078] sm:$0xff]  }
 0x1f5   :  { %15020 = vmatprep.subr.bf16.mxu0 %v16443_v19 }
 0x1f6   :  { %15041 = vmatpush3.bf16.msra.mxu1 %v16442_v18  ;;  %v14718_v24 = vpop.f32.mrb[32].mxu0  ;;  %v16485_v18 = vld [vmem:[%s20962_s1 + $0x10f8] sm:$0xff]  }
 0x1f7   :  { %v14719_v26 = vpop.f32.mrb[33].mxu0  ;;  %15042 = vmatprep.subr.bf16.mxu1 %v16444_v20 }
 0x1f8   :  { %v14740_v28 = vpop.f32.mrb[32].mxu1  ;;  %v14720_v29 = vadd.f32 %v14719_v26, %v14718_v24  ;;  %v14721_v30 = vpop.f32.mrb[34].mxu0  ;;  %15021 = vmatpush3.bf16.msra.mxu0 %v16445_v21  ;;  %v24_v24 = vld [vmem:[%s20961_s0 + $0x40] sm:$0xff]  ;;  %v16487_v26 = vld [vmem:[%s20962_s1 + $0x10b8] sm:$0xff]  }
 0x1f9   :  { %v14741_v33 = vpop.f32.mrb[33].mxu1  ;;  %v14722_v34 = vpop.f32.mrb[35].mxu0  ;;  %15022 = vmatprep.subr.bf16.mxu0 %v16447_v23 }
 0x1fa   :  { %v10976_v35 = vadd.f32 %v14720_v29, %v18717_v52  ;;  %v14742_v36 = vadd.f32 %v14741_v33, %v14740_v28  ;;  %v14743_v37 = vpop.f32.mrb[34].mxu1  ;;  %15043 = vmatpush3.bf16.msra.mxu1 %v16446_v22  ;;  %v16462_v52 = vld [vmem:[%s20962_s1 + $0x1008] sm:$0xff]   ;;  %v16486_v22 = vld [vmem:[%s20962_s1 + $0x1038] sm:$0xff]   ;;  %v2755_v28 = vcombine.high %v24_v24, %v24_v24  ;;  %v16488_v29 = vld [vmem:[%s20962_s1 + $0x1140] sm:$0xff]  }
 0x1fb   :  { %v14744_v39 = vpop.f32.mrb[35].mxu1  ;;  %15044 = vmatprep.subr.bf16.mxu1 %v16448_v25  ;;  %v16490_v34 = vld [vmem:[%s20962_s1 + $0x1100] sm:$0xff]  }
 0x1fc   :  { %v18824_v42 = vadd.f32 %v14742_v36, %v10976_v35  ;;  %15023 = vmatpush3.bf16.msra.mxu0 %v16449_v27  ;;  %v2762_v27 = vrot.slane %v24_v24, %v17257_v41  ;;  %v18942_v33 = vrot.slane %v2755_v28, %v17257_v41  ;;  %v16491_v36 = vld [vmem:[%s20962_s1 + $0x1180] sm:$0xff]   ;;  %v16492_v39 = vld [vmem:[%s20962_s1 + $0x1148] sm:$0xff]  }
 0x1fd   :  { %15024 = vmatprep.subr.bf16.mxu0 %v16451_v32  ;;  %v16489_v32 = vld [vmem:[%s20962_s1 + $0x11c0] sm:$0xff]   ;;  %v16528_v28 = vld [vmem:[%s20962_s1 + $0x1288] sm:$0xff]  }
 0x1fe   :  { %15045 = vmatpush3.bf16.msra.mxu1 %v16450_v31  ;;  %v2770_v30 = vcombine.high %v2762_v27, %v2762_v27  ;;  %v2778_v31 = vrot.slane %v2762_v27, %v17257_v41  ;;  %v2771_v37 = vcombine.high %v18942_v33, %v18942_v33  ;;  %v16527_v27 = vld [vmem:[%s20962_s1 + $0x1208] sm:$0xff]  }
 0x1ff   :  { %15046 = vmatprep.subr.bf16.mxu1 %v16452_v38 }
 0x200   :  { %15025 = vmatpush3.bf16.msra.mxu0 %v16453_v40  ;;  %v2792_v35 = vrot.slane %v2770_v30, %v17257_v41  ;;  %v2800_v38 = vcombine.high %v2778_v31, %v2778_v31  ;;  %v16530_v30 = vld [vmem:[%s20962_s1 + $0x12d0] sm:$0xff]  }
 0x201   :  { %15054 = vmatprep.subr.bf16.mxu0 %v16456_v45  ;;  %v16495_v45 = vld [vmem:[%s20962_s1 + $0x1188] sm:$0xff]  }
 0x202   :  { %15047 = vmatpush3.bf16.msra.mxu1 %v16454_v43  ;;  %v2802_v40 = vcombine.high %v2792_v35, %v2792_v35  ;;  %v2799_v43 = vrot.slane %v2771_v37, %v17257_v41  ;;  %v16537_v37 = vld [vmem:[%s20962_s1 + $0x1260] sm:$0xff]  }
 0x203   :  { %11534 = vmatmul.mubr.bf16.vlgmr.msra.gmra.mrb[60].mxu0 %v2736_v44  ;;  %15076 = vmatprep.subr.bf16.mxu1 %v16457_v46  ;;  %v16494_v44 = vld [vmem:[%s20962_s1 + $0x1108] sm:$0xff]  }
 0x204   :  { %15055 = vmatpush3.bf16.msra.mxu0 %v16458_v47  ;;  %11613 = vmatprep.mubr.bf16.mxu0 %v2792_v35  ;;  %v2803_v46 = vcombine.high %v2799_v43, %v2799_v43  ;;  %v16496_v47 = vld [vmem:[%s20962_s1 + $0x1150] sm:$0xff]   ;;  %v16535_v35 = vld [vmem:[%s20962_s1 + $0x1218] sm:$0xff]  }
 0x205   :  { %11574 = vmatmul.mubr.bf16.vlgmr.msra.gmra.mrb[60].mxu1 %v2752_v49  ;;  %15056 = vmatprep.subr.bf16.mxu0 %v16460_v50  ;;  %v16498_v49 = vld [vmem:[%s20962_s1 + $0x1110] sm:$0xff]  }
 0x206   :  { %15077 = vmatpush3.bf16.msra.mxu1 %v16459_v48  ;;  %11653 = vmatprep.mubr.bf16.mxu1 %v2802_v40  ;;  %v16497_v48 = vld [vmem:[%s20962_s1 + $0x11d0] sm:$0xff]   ;;  %v16540_v40 = vld [vmem:[%s20962_s1 + $0x12a0] sm:$0xff]  }
 0x207   :  { %15078 = vmatprep.subr.bf16.mxu1 %v16461_v51  ;;  %v16499_v50 = vld [vmem:[%s20962_s1 + $0x1190] sm:$0xff]   ;;  %v16500_v51 = vld [vmem:[%s20962_s1 + $0x1158] sm:$0xff]  }
 0x208   :  { %15057 = vmatpush3.bf16.msra.mxu0 %v16462_v52  ;;  %v16501_v52 = vld [vmem:[%s20962_s1 + $0x11d8] sm:$0xff]  }
 0x209   :  { %15058 = vmatprep.subr.bf16.mxu0 %v16464_v54  ;;  %v16503_v54 = vld [vmem:[%s20962_s1 + $0x1198] sm:$0xff]  }
 0x20a   :  { %15079 = vmatpush3.bf16.msra.mxu1 %v16463_v53  ;;  %v16502_v53 = vld [vmem:[%s20962_s1 + $0x1118] sm:$0xff]  }
 0x20b   :  { %15080 = vmatprep.subr.bf16.mxu1 %v16465_v55  ;;  %v16504_v55 = vld [vmem:[%s20962_s1 + $0x1160] sm:$0xff]  }
 0x20c   :  { %15059 = vmatpush3.bf16.msra.mxu0 %v16466_v56  ;;  %v16505_v56 = vld [vmem:[%s20962_s1 + $0x11e0] sm:$0xff]  }
 0x20d   :  { %15060 = vmatprep.subr.bf16.mxu0 %v16468_v58  ;;  %v16507_v58 = vld [vmem:[%s20962_s1 + $0x11a0] sm:$0xff]  }
 0x20e   :  { %15081 = vmatpush3.bf16.msra.mxu1 %v16467_v57  ;;  %v16506_v57 = vld [vmem:[%s20962_s1 + $0x1120] sm:$0xff]  }
 0x20f   :  { %15082 = vmatprep.subr.bf16.mxu1 %v16469_v59  ;;  %v16508_v59 = vld [vmem:[%s20962_s1 + $0x1168] sm:$0xff]  }
 0x210   :  { %15061 = vmatpush3.bf16.msra.mxu0 %v16470_v60  ;;  %v16509_v60 = vld [vmem:[%s20962_s1 + $0x11e8] sm:$0xff]  }
 0x211   :  { %15062 = vmatprep.subr.bf16.mxu0 %v16472_v62  ;;  %v16511_v62 = vld [vmem:[%s20962_s1 + $0x11a8] sm:$0xff]  }
 0x212   :  { %15083 = vmatpush3.bf16.msra.mxu1 %v16471_v61  ;;  %v16510_v61 = vld [vmem:[%s20962_s1 + $0x1128] sm:$0xff]  }
 0x213   :  { %15084 = vmatprep.subr.bf16.mxu1 %v16473_v63  ;;  %v16512_v63 = vld [vmem:[%s20962_s1 + $0x1170] sm:$0xff]  }
 0x214   :  { %15063 = vmatpush3.bf16.msra.mxu0 %v16474_v0 }
 0x215   :  { %15064 = vmatprep.subr.bf16.mxu0 %v16476_v2 }
 0x216   :  { %15085 = vmatpush3.bf16.msra.mxu1 %v16475_v1  ;;  %v14762_v7 = vpop.f32.mrb[36].mxu0  ;;  %v16513_v1 = vld [vmem:[%s20962_s1 + $0x11f0] sm:$0xff]  }
 0x217   :  { %v14763_v9 = vpop.f32.mrb[37].mxu0  ;;  %15086 = vmatprep.subr.bf16.mxu1 %v16477_v3  ;;  %v16514_v3 = vld [vmem:[%s20962_s1 + $0x1130] sm:$0xff]  }
 0x218   :  { %v14784_v11 = vpop.f32.mrb[36].mxu1  ;;  %v14764_v12 = vadd.f32 %v14763_v9, %v14762_v7  ;;  %v14765_v13 = vpop.f32.mrb[38].mxu0  ;;  %15065 = vmatpush3.bf16.msra.mxu0 %v16478_v4  ;;  %v16515_v7 = vld [vmem:[%s20962_s1 + $0x11b0] sm:$0xff]  }
 0x219   :  { %v14785_v15 = vpop.f32.mrb[37].mxu1  ;;  %v14766_v16 = vpop.f32.mrb[39].mxu0  ;;  %15066 = vmatprep.subr.bf16.mxu0 %v16480_v6 }
 0x21a   :  { %v11056_v19 = vadd.f32 %v14764_v12, %v18824_v42  ;;  %v14786_v20 = vadd.f32 %v14785_v15, %v14784_v11  ;;  %v14787_v21 = vpop.f32.mrb[38].mxu1  ;;  %15087 = vmatpush3.bf16.msra.mxu1 %v16479_v5  ;;  %v16493_v42 = vld [vmem:[%s20962_s1 + $0x11c8] sm:$0xff]   ;;  %v16518_v16 = vld [vmem:[%s20962_s1 + $0x1138] sm:$0xff]  }
 0x21b   :  { %v14788_v23 = vpop.f32.mrb[39].mxu1  ;;  %15088 = vmatprep.subr.bf16.mxu1 %v16481_v8  ;;  %v16516_v8 = vld [vmem:[%s20962_s1 + $0x1178] sm:$0xff]   ;;  %v16522_v21 = vld [vmem:[%s20962_s1 + $0x12c0] sm:$0xff]  }
 0x21c   :  { %v18928_v25 = vadd.f32 %v14786_v20, %v11056_v19  ;;  %15067 = vmatpush3.bf16.msra.mxu0 %v16482_v10  ;;  %v2785_v19 = vrot.slane %v18942_v33, %v17257_v41  ;;  %v16521_v20 = vld [vmem:[%s20962_s1 + $0x1240] sm:$0xff]   ;;  %v16533_v33 = vld [vmem:[%s20962_s1 + $0x1258] sm:$0xff]  }
 0x21d   :  { %15068 = vmatprep.subr.bf16.mxu0 %v16484_v17  ;;  %v16524_v23 = vld [vmem:[%s20962_s1 + $0x1280] sm:$0xff]  }
 0x21e   :  { %15089 = vmatpush3.bf16.msra.mxu1 %v16483_v14  ;;  %v16517_v14 = vld [vmem:[%s20962_s1 + $0x11f8] sm:$0xff]   ;;  %v2801_v24 = vcombine.high %v2785_v19, %v2785_v19 }
 0x21f   :  { %15090 = vmatprep.subr.bf16.mxu1 %v16485_v18  ;;  %v16519_v18 = vld [vmem:[%s20962_s1 + $0x11b8] sm:$0xff]  }
 0x220   :  { %15069 = vmatpush3.bf16.msra.mxu0 %v16486_v22  ;;  %v16523_v22 = vld [vmem:[%s20962_s1 + $0x1200] sm:$0xff]  }
 0x221   :  { %15098 = vmatprep.subr.bf16.mxu0 %v16488_v29  ;;  %v16529_v29 = vld [vmem:[%s20962_s1 + $0x1250] sm:$0xff]  }
 0x222   :  { %15091 = vmatpush3.bf16.msra.mxu1 %v16487_v26  ;;  %v16526_v26 = vld [vmem:[%s20962_s1 + $0x12c8] sm:$0xff]  }
 0x223   :  { %11614 = vmatmul.mubr.bf16.vlgmr.msra.gmra.mrb[64].mxu0 %v2778_v31  ;;  %15120 = vmatprep.subr.bf16.mxu1 %v16489_v32  ;;  %v16531_v31 = vld [vmem:[%s20962_s1 + $0x1210] sm:$0xff]  }
 0x224   :  { %15099 = vmatpush3.bf16.msra.mxu0 %v16490_v34  ;;  %11693 = vmatprep.mubr.bf16.mxu0 %v2799_v43  ;;  %v16532_v32 = vld [vmem:[%s20962_s1 + $0x1290] sm:$0xff]   ;;  %v16534_v34 = vld [vmem:[%s20962_s1 + $0x12d8] sm:$0xff]   ;;  %v16542_v43 = vld [vmem:[%s20962_s1 + $0x12e8] sm:$0xff]  }
 0x225   :  { %11654 = vmatmul.mubr.bf16.vlgmr.msra.gmra.mrb[64].mxu1 %v2800_v38  ;;  %15100 = vmatprep.subr.bf16.mxu0 %v16492_v39  ;;  %v16538_v38 = vld [vmem:[%s20962_s1 + $0x12e0] sm:$0xff]  }
 0x226   :  { %15121 = vmatpush3.bf16.msra.mxu1 %v16491_v36  ;;  %11733 = vmatprep.mubr.bf16.mxu1 %v2803_v46  ;;  %v16536_v36 = vld [vmem:[%s20962_s1 + $0x1298] sm:$0xff]   ;;  %v16539_v39 = vld [vmem:[%s20962_s1 + $0x1220] sm:$0xff]   ;;  %v16545_v46 = vld [vmem:[%s20962_s1 + $0x1270] sm:$0xff]  }
 0x227   :  { %15122 = vmatprep.subr.bf16.mxu1 %v16493_v42  ;;  %v16541_v42 = vld [vmem:[%s20962_s1 + $0x1268] sm:$0xff]  }
 0x228   :  { %15101 = vmatpush3.bf16.msra.mxu0 %v16494_v44  ;;  %v16543_v44 = vld [vmem:[%s20962_s1 + $0x1228] sm:$0xff]  }
 0x229   :  { %15102 = vmatprep.subr.bf16.mxu0 %v16496_v47 }
 0x22a   :  { %15123 = vmatpush3.bf16.msra.mxu1 %v16495_v45  ;;  %v16544_v45 = vld [vmem:[%s20962_s1 + $0x12a8] sm:$0xff]  }
 0x22b   :  { %15124 = vmatprep.subr.bf16.mxu1 %v16497_v48  ;;  %v16546_v48 = vld [vmem:[%s20962_s1 + $0x12f0] sm:$0xff]  }
 0x22c   :  { %15103 = vmatpush3.bf16.msra.mxu0 %v16498_v49 }
 0x22d   :  { %15104 = vmatprep.subr.bf16.mxu0 %v16500_v51 }
 0x22e   :  { %15125 = vmatpush3.bf16.msra.mxu1 %v16499_v50  ;;  %v16547_v50 = vld [vmem:[%s20962_s1 + $0x1230] sm:$0xff]  }
 0x22f   :  { %15126 = vmatprep.subr.bf16.mxu1 %v16501_v52 }
 0x230   :  { %15105 = vmatpush3.bf16.msra.mxu0 %v16502_v53 }
 0x231   :  { %15106 = vmatprep.subr.bf16.mxu0 %v16504_v55 }
 0x232   :  { %15127 = vmatpush3.bf16.msra.mxu1 %v16503_v54 }
 0x233   :  { %15128 = vmatprep.subr.bf16.mxu1 %v16505_v56  ;;  %v16548_v56 = vld [vmem:[%s20962_s1 + $0x12b0] sm:$0xff]  }
 0x234   :  { %15107 = vmatpush3.bf16.msra.mxu0 %v16506_v57  ;;  %v16549_v57 = vld [vmem:[%s20962_s1 + $0x1278] sm:$0xff]  }
 0x235   :  { %15108 = vmatprep.subr.bf16.mxu0 %v16508_v59 }
 0x236   :  { %15129 = vmatpush3.bf16.msra.mxu1 %v16507_v58  ;;  %v14806_v0 = vpop.f32.mrb[40].mxu0 }
 0x237   :  { %v14807_v2 = vpop.f32.mrb[41].mxu0  ;;  %15130 = vmatprep.subr.bf16.mxu1 %v16509_v60 }
 0x238   :  { %v14828_v4 = vpop.f32.mrb[40].mxu1  ;;  %v14808_v5 = vadd.f32 %v14807_v2, %v14806_v0  ;;  %v14809_v6 = vpop.f32.mrb[42].mxu0  ;;  %15109 = vmatpush3.bf16.msra.mxu0 %v16510_v61  ;;  %v16550_v61 = vld [vmem:[%s20962_s1 + $0x12f8] sm:$0xff]  }
 0x239   :  { %v14829_v9 = vpop.f32.mrb[41].mxu1  ;;  %v14810_v10 = vpop.f32.mrb[43].mxu0  ;;  %15110 = vmatprep.subr.bf16.mxu0 %v16512_v63  ;;  %v16551_v63 = vld [vmem:[%s20962_s1 + $0x1238] sm:$0xff]  }
 0x23a   :  { %v11136_v11 = vadd.f32 %v14808_v5, %v18928_v25  ;;  %v14830_v12 = vadd.f32 %v14829_v9, %v14828_v4  ;;  %v14831_v13 = vpop.f32.mrb[42].mxu1  ;;  %15131 = vmatpush3.bf16.msra.mxu1 %v16511_v62  ;;  %v16525_v25 = vld [vmem:[%s20962_s1 + $0x1248] sm:$0xff]   ;;  %v16552_v5 = vld [vmem:[%s20962_s1 + $0x12b8] sm:$0xff]  }
 0x23b   :  { %v14832_v15 = vpop.f32.mrb[43].mxu1  ;;  %15132 = vmatprep.subr.bf16.mxu1 %v16513_v1  ;;  %v25_v1 = vld [vmem:[%s20961_s0 + $0x48] sm:$0xff] }
 0x23c   :  { %v19036_v17 = vadd.f32 %v14830_v12, %v11136_v11  ;;  %15111 = vmatpush3.bf16.msra.mxu0 %v16514_v3  ;;  %v2811_v2 = vrot.slane %v25_v1, %v17257_v41  ;;  %v16553_v3 = vld [vmem:[%s20962_s1 + $0x1340] sm:$0xff]   ;;  %v2804_v4 = vcombine.high %v25_v1, %v25_v1  ;;  %v16590_v1 = vld [vmem:[%s20962_s1 + $0x1448] sm:$0xff]  }
 0x23d   :  { %15112 = vmatprep.subr.bf16.mxu0 %v16516_v8  ;;  %v16554_v8 = vld [vmem:[%s20962_s1 + $0x13c0] sm:$0xff]  }
 0x23e   :  { %15133 = vmatpush3.bf16.msra.mxu1 %v16515_v7  ;;  %v2819_v6 = vcombine.high %v2811_v2, %v2811_v2  ;;  %v2827_v7 = vrot.slane %v2811_v2, %v17257_v41  ;;  %v19154_v9 = vrot.slane %v2804_v4, %v17257_v41  ;;  %v16555_v11 = vld [vmem:[%s20962_s1 + $0x1300] sm:$0xff]   ;;  %v16591_v2 = vld [vmem:[%s20962_s1 + $0x14c8] sm:$0xff]  }
 0x23f   :  { %15134 = vmatprep.subr.bf16.mxu1 %v16517_v14  ;;  %v16557_v14 = vld [vmem:[%s20962_s1 + $0x1348] sm:$0xff]  }
 0x240   :  { %15113 = vmatpush3.bf16.msra.mxu0 %v16518_v16  ;;  %v2841_v10 = vrot.slane %v2819_v6, %v17257_v41  ;;  %v2820_v12 = vcombine.high %v19154_v9, %v19154_v9  ;;  %v2849_v13 = vcombine.high %v2827_v7, %v2827_v7  ;;  %v16556_v16 = vld [vmem:[%s20962_s1 + $0x1380] sm:$0xff]   ;;  %v16593_v4 = vld [vmem:[%s20962_s1 + $0x1488] sm:$0xff]   ;;  %v16595_v6 = vld [vmem:[%s20962_s1 + $0x14d0] sm:$0xff]  }
 0x241   :  { %15142 = vmatprep.subr.bf16.mxu0 %v16521_v20 }
 0x242   :  { %15135 = vmatpush3.bf16.msra.mxu1 %v16519_v18  ;;  %v2851_v15 = vcombine.high %v2841_v10, %v2841_v10  ;;  %v16558_v18 = vld [vmem:[%s20962_s1 + $0x13c8] sm:$0xff]  }
 0x243   :  { %11694 = vmatmul.mubr.bf16.vlgmr.msra.gmra.mrb[68].mxu0 %v2785_v19  ;;  %15164 = vmatprep.subr.bf16.mxu1 %v16522_v21  ;;  %v16559_v19 = vld [vmem:[%s20962_s1 + $0x1308] sm:$0xff]   ;;  %v16561_v21 = vld [vmem:[%s20962_s1 + $0x1350] sm:$0xff]  }
 0x244   :  { %15143 = vmatpush3.bf16.msra.mxu0 %v16523_v22  ;;  %11773 = vmatprep.mubr.bf16.mxu0 %v2841_v10  ;;  %v16560_v22 = vld [vmem:[%s20962_s1 + $0x1388] sm:$0xff]   ;;  %v16599_v10 = vld [vmem:[%s20962_s1 + $0x14d8] sm:$0xff]  }
 0x245   :  { %11734 = vmatmul.mubr.bf16.vlgmr.msra.gmra.mrb[68].mxu1 %v2801_v24  ;;  %15144 = vmatprep.subr.bf16.mxu0 %v16525_v25  ;;  %v16563_v24 = vld [vmem:[%s20962_s1 + $0x1310] sm:$0xff]   ;;  %v16565_v25 = vld [vmem:[%s20962_s1 + $0x1358] sm:$0xff]  }
 0x246   :  { %15165 = vmatpush3.bf16.msra.mxu1 %v16524_v23  ;;  %11813 = vmatprep.mubr.bf16.mxu1 %v2851_v15  ;;  %v16562_v23 = vld [vmem:[%s20962_s1 + $0x13d0] sm:$0xff]   ;;  %v16604_v15 = vld [vmem:[%s20962_s1 + $0x1420] sm:$0xff]  }
 0x247   :  { %15166 = vmatprep.subr.bf16.mxu1 %v16526_v26  ;;  %v16564_v26 = vld [vmem:[%s20962_s1 + $0x1390] sm:$0xff]  }
 0x248   :  { %15145 = vmatpush3.bf16.msra.mxu0 %v16527_v27  ;;  %v16566_v27 = vld [vmem:[%s20962_s1 + $0x13d8] sm:$0xff]  }
 0x249   :  { %15146 = vmatprep.subr.bf16.mxu0 %v16529_v29  ;;  %v16569_v29 = vld [vmem:[%s20962_s1 + $0x1360] sm:$0xff]  }
 0x24a   :  { %15167 = vmatpush3.bf16.msra.mxu1 %v16528_v28  ;;  %v16567_v28 = vld [vmem:[%s20962_s1 + $0x1318] sm:$0xff]  }
 0x24b   :  { %15168 = vmatprep.subr.bf16.mxu1 %v16530_v30  ;;  %v16568_v30 = vld [vmem:[%s20962_s1 + $0x1398] sm:$0xff]  }
 0x24c   :  { %15147 = vmatpush3.bf16.msra.mxu0 %v16531_v31  ;;  %v16570_v31 = vld [vmem:[%s20962_s1 + $0x13e0] sm:$0xff]  }
 0x24d   :  { %15148 = vmatprep.subr.bf16.mxu0 %v16533_v33  ;;  %v16573_v33 = vld [vmem:[%s20962_s1 + $0x1368] sm:$0xff]  }
 0x24e   :  { %15169 = vmatpush3.bf16.msra.mxu1 %v16532_v32  ;;  %v16571_v32 = vld [vmem:[%s20962_s1 + $0x1320] sm:$0xff]  }
 0x24f   :  { %15170 = vmatprep.subr.bf16.mxu1 %v16534_v34  ;;  %v16572_v34 = vld [vmem:[%s20962_s1 + $0x13a0] sm:$0xff]  }
 0x250   :  { %15149 = vmatpush3.bf16.msra.mxu0 %v16535_v35  ;;  %v16574_v35 = vld [vmem:[%s20962_s1 + $0x13e8] sm:$0xff]  }
 0x251   :  { %15150 = vmatprep.subr.bf16.mxu0 %v16537_v37 }
 0x252   :  { %15171 = vmatpush3.bf16.msra.mxu1 %v16536_v36  ;;  %v16575_v36 = vld [vmem:[%s20962_s1 + $0x1328] sm:$0xff]  }
 0x253   :  { %15172 = vmatprep.subr.bf16.mxu1 %v16538_v38  ;;  %v16577_v38 = vld [vmem:[%s20962_s1 + $0x1370] sm:$0xff]  }
 0x254   :  { %15151 = vmatpush3.bf16.msra.mxu0 %v16539_v39 }
 0x255   :  { %15152 = vmatprep.subr.bf16.mxu0 %v16541_v42 }
 0x256   :  { %15173 = vmatpush3.bf16.msra.mxu1 %v16540_v40  ;;  %v14850_v47 = vpop.f32.mrb[44].mxu0  ;;  %v16576_v40 = vld [vmem:[%s20962_s1 + $0x13a8] sm:$0xff]  }
 0x257   :  { %v14851_v49 = vpop.f32.mrb[45].mxu0  ;;  %15174 = vmatprep.subr.bf16.mxu1 %v16542_v43 }
 0x258   :  { %v14872_v51 = vpop.f32.mrb[44].mxu1  ;;  %v14852_v52 = vadd.f32 %v14851_v49, %v14850_v47  ;;  %v14853_v53 = vpop.f32.mrb[46].mxu0  ;;  %15153 = vmatpush3.bf16.msra.mxu0 %v16543_v44  ;;  %v16580_v49 = vld [vmem:[%s20962_s1 + $0x13b0] sm:$0xff]  }
 0x259   :  { %v14873_v54 = vpop.f32.mrb[45].mxu1  ;;  %v14854_v55 = vpop.f32.mrb[47].mxu0  ;;  %15154 = vmatprep.subr.bf16.mxu0 %v16545_v46  ;;  %v16579_v46 = vld [vmem:[%s20962_s1 + $0x1330] sm:$0xff]   ;;  %v16581_v53 = vld [vmem:[%s20962_s1 + $0x1378] sm:$0xff]  }
 0x25a   :  { %v11216_v58 = vadd.f32 %v14852_v52, %v19036_v17  ;;  %v14874_v59 = vadd.f32 %v14873_v54, %v14872_v51  ;;  %v14875_v60 = vpop.f32.mrb[46].mxu1  ;;  %15175 = vmatpush3.bf16.msra.mxu1 %v16544_v45  ;;  %v2848_v17 = vrot.slane %v2820_v12, %v17257_v41  ;;  %v16578_v45 = vld [vmem:[%s20962_s1 + $0x13f0] sm:$0xff]   ;;  %v16582_v55 = vld [vmem:[%s20962_s1 + $0x13f8] sm:$0xff]  }
 0x25b   :  { %v14876_v62 = vpop.f32.mrb[47].mxu1  ;;  %15176 = vmatprep.subr.bf16.mxu1 %v16546_v48  ;;  %v16586_v60 = vld [vmem:[%s20962_s1 + $0x1440] sm:$0xff]   ;;  %v16601_v12 = vld [vmem:[%s20962_s1 + $0x1498] sm:$0xff]  }
 0x25c   :  { %v19137_v0 = vadd.f32 %v14874_v59, %v11216_v58  ;;  %15155 = vmatpush3.bf16.msra.mxu0 %v16547_v50  ;;  %v2852_v20 = vcombine.high %v2848_v17, %v2848_v17  ;;  %v16584_v58 = vld [vmem:[%s20962_s1 + $0x13b8] sm:$0xff]   ;;  %v2834_v59 = vrot.slane %v19154_v9, %v17257_v41  ;;  %v16588_v62 = vld [vmem:[%s20962_s1 + $0x1400] sm:$0xff]  }
 0x25d   :  { %15156 = vmatprep.subr.bf16.mxu0 %v16549_v57  ;;  %v16583_v57 = vld [vmem:[%s20962_s1 + $0x1338] sm:$0xff]  }
 0x25e   :  { %15177 = vmatpush3.bf16.msra.mxu1 %v16548_v56  ;;  %v16598_v9 = vld [vmem:[%s20962_s1 + $0x1458] sm:$0xff]  }
 0x25f   :  { %15178 = vmatprep.subr.bf16.mxu1 %v16550_v61  ;;  %v16587_v61 = vld [vmem:[%s20962_s1 + $0x14c0] sm:$0xff]  }
 0x260   :  { %15157 = vmatpush3.bf16.msra.mxu0 %v16551_v63  ;;  %v16589_v63 = vld [vmem:[%s20962_s1 + $0x1480] sm:$0xff]  }
 0x261   :  { %15186 = vmatprep.subr.bf16.mxu0 %v16553_v3  ;;  %v16592_v3 = vld [vmem:[%s20962_s1 + $0x1408] sm:$0xff]  }
 0x262   :  { %15179 = vmatpush3.bf16.msra.mxu1 %v16552_v5  ;;  %v16594_v5 = vld [vmem:[%s20962_s1 + $0x1450] sm:$0xff]  }
 0x263   :  { %15208 = vmatprep.subr.bf16.mxu1 %v16554_v8  ;;  %11774 = vmatmul.mubr.bf16.vlgmr.msra.gmra.mrb[72].mxu0 %v2827_v7  ;;  %v16596_v7 = vld [vmem:[%s20962_s1 + $0x1410] sm:$0xff]  }
 0x264   :  { %15187 = vmatpush3.bf16.msra.mxu0 %v16555_v11  ;;  %11853 = vmatprep.mubr.bf16.mxu0 %v2848_v17  ;;  %v16597_v8 = vld [vmem:[%s20962_s1 + $0x1490] sm:$0xff]   ;;  %v16600_v11 = vld [vmem:[%s20962_s1 + $0x1418] sm:$0xff]   ;;  %v16606_v17 = vld [vmem:[%s20962_s1 + $0x1468] sm:$0xff]  }
 0x265   :  { %11814 = vmatmul.mubr.bf16.vlgmr.msra.gmra.mrb[72].mxu1 %v2849_v13  ;;  %15188 = vmatprep.subr.bf16.mxu0 %v16557_v14  ;;  %v16602_v13 = vld [vmem:[%s20962_s1 + $0x1460] sm:$0xff]  }
 0x266   :  { %15209 = vmatpush3.bf16.msra.mxu1 %v16556_v16  ;;  %11893 = vmatprep.mubr.bf16.mxu1 %v2852_v20  ;;  %v16603_v14 = vld [vmem:[%s20962_s1 + $0x14e0] sm:$0xff]   ;;  %v16609_v20 = vld [vmem:[%s20962_s1 + $0x14a8] sm:$0xff]  }
 0x267   :  { %15210 = vmatprep.subr.bf16.mxu1 %v16558_v18  ;;  %v16605_v16 = vld [vmem:[%s20962_s1 + $0x14a0] sm:$0xff]   ;;  %v16607_v18 = vld [vmem:[%s20962_s1 + $0x14e8] sm:$0xff]  }
 0x268   :  { %15189 = vmatpush3.bf16.msra.mxu0 %v16559_v19  ;;  %v16608_v19 = vld [vmem:[%s20962_s1 + $0x1428] sm:$0xff]  }
 0x269   :  { %15190 = vmatprep.subr.bf16.mxu0 %v16561_v21 }
 0x26a   :  { %15211 = vmatpush3.bf16.msra.mxu1 %v16560_v22  ;;  %v16610_v22 = vld [vmem:[%s20962_s1 + $0x1470] sm:$0xff]  }
 0x26b   :  { %15212 = vmatprep.subr.bf16.mxu1 %v16562_v23 }
 0x26c   :  { %15191 = vmatpush3.bf16.msra.mxu0 %v16563_v24  ;;  %v16611_v24 = vld [vmem:[%s20962_s1 + $0x14f0] sm:$0xff]  }
 0x26d   :  { %15192 = vmatprep.subr.bf16.mxu0 %v16565_v25 }
 0x26e   :  { %15213 = vmatpush3.bf16.msra.mxu1 %v16564_v26 }
 0x26f   :  { %15214 = vmatprep.subr.bf16.mxu1 %v16566_v27 }
 0x270   :  { %15193 = vmatpush3.bf16.msra.mxu0 %v16567_v28 }
 0x271   :  { %15194 = vmatprep.subr.bf16.mxu0 %v16569_v29 }
 0x272   :  { %15215 = vmatpush3.bf16.msra.mxu1 %v16568_v30  ;;  %v16612_v30 = vld [vmem:[%s20962_s1 + $0x1430] sm:$0xff]  }
 0x273   :  { %15216 = vmatprep.subr.bf16.mxu1 %v16570_v31  ;;  %v16613_v31 = vld [vmem:[%s20962_s1 + $0x14b0] sm:$0xff]  }
 0x274   :  { %15195 = vmatpush3.bf16.msra.mxu0 %v16571_v32 }
 0x275   :  { %15196 = vmatprep.subr.bf16.mxu0 %v16573_v33 }
 0x276   :  { %v14894_v37 = vpop.f32.mrb[48].mxu0  ;;  %15217 = vmatpush3.bf16.msra.mxu1 %v16572_v34 }
 0x277   :  { %v14895_v39 = vpop.f32.mrb[49].mxu0  ;;  %15218 = vmatprep.subr.bf16.mxu1 %v16574_v35  ;;  %v16614_v35 = vld [vmem:[%s20962_s1 + $0x1478] sm:$0xff]  }
 0x278   :  { %v14916_v42 = vpop.f32.mrb[48].mxu1  ;;  %v14896_v43 = vadd.f32 %v14895_v39, %v14894_v37  ;;  %v14897_v44 = vpop.f32.mrb[50].mxu0  ;;  %15197 = vmatpush3.bf16.msra.mxu0 %v16575_v36  ;;  %v16615_v37 = vld [vmem:[%s20962_s1 + $0x14f8] sm:$0xff]  }
 0x279   :  { %v14917_v47 = vpop.f32.mrb[49].mxu1  ;;  %v14898_v48 = vpop.f32.mrb[51].mxu0  ;;  %15198 = vmatprep.subr.bf16.mxu0 %v16577_v38  ;;  %v16616_v39 = vld [vmem:[%s20962_s1 + $0x1438] sm:$0xff]  }
 0x27a   :  { %v11296_v50 = vadd.f32 %v14896_v43, %v19137_v0  ;;  %v14918_v51 = vadd.f32 %v14917_v47, %v14916_v42  ;;  %v14919_v52 = vpop.f32.mrb[50].mxu1  ;;  %15219 = vmatpush3.bf16.msra.mxu1 %v16576_v40  ;;  %v2850_v0 = vcombine.high %v2834_v59, %v2834_v59  ;;  %v26_v40 = vld [vmem:[%s20961_s0 + $0x50] sm:$0xff]  ;;  %v16618_v43 = vld [vmem:[%s20962_s1 + $0x1540] sm:$0xff]  }
 0x27b   :  { %v14920_v54 = vpop.f32.mrb[51].mxu1  ;;  %15220 = vmatprep.subr.bf16.mxu1 %v16578_v45  ;;  %v2860_v42 = vrot.slane %v26_v40, %v17257_v41  ;;  %v2853_v44 = vcombine.high %v26_v40, %v26_v40  ;;  %v16617_v45 = vld [vmem:[%s20962_s1 + $0x14b8] sm:$0xff]   ;;  %v16619_v48 = vld [vmem:[%s20962_s1 + $0x15c0] sm:$0xff]   ;;  %v16655_v40 = vld [vmem:[%s20962_s1 + $0x1648] sm:$0xff]  }
 0x27c   :  { %v19245_v56 = vadd.f32 %v14918_v51, %v11296_v50  ;;  %15199 = vmatpush3.bf16.msra.mxu0 %v16579_v46  ;;  %v16620_v50 = vld [vmem:[%s20962_s1 + $0x1500] sm:$0xff]  }
 0x27d   :  { %15200 = vmatprep.subr.bf16.mxu0 %v16581_v53  ;;  %v2868_v46 = vcombine.high %v2860_v42, %v2860_v42  ;;  %v2876_v47 = vrot.slane %v2860_v42, %v17257_v41  ;;  %v16621_v52 = vld [vmem:[%s20962_s1 + $0x1580] sm:$0xff]   ;;  %v16656_v42 = vld [vmem:[%s20962_s1 + $0x16c8] sm:$0xff]  }
 0x27e   :  { %15221 = vmatpush3.bf16.msra.mxu1 %v16580_v49  ;;  %v19366_v49 = vrot.slane %v2853_v44, %v17257_v41  ;;  %v16658_v44 = vld [vmem:[%s20962_s1 + $0x1688] sm:$0xff]  }
 0x27f   :  { %15222 = vmatprep.subr.bf16.mxu1 %v16582_v55  ;;  %v2890_v51 = vrot.slane %v2868_v46, %v17257_v41  ;;  %v2898_v54 = vcombine.high %v2876_v47, %v2876_v47  ;;  %v16622_v55 = vld [vmem:[%s20962_s1 + $0x1548] sm:$0xff]   ;;  %v16660_v46 = vld [vmem:[%s20962_s1 + $0x16d0] sm:$0xff]  }
 0x280   :  { %15201 = vmatpush3.bf16.msra.mxu0 %v16583_v57  ;;  %v2869_v53 = vcombine.high %v19366_v49, %v19366_v49  ;;  %v16623_v57 = vld [vmem:[%s20962_s1 + $0x15c8] sm:$0xff]  }
 0x281   :  { %15230 = vmatprep.subr.bf16.mxu0 %v16586_v60  ;;  %v16625_v60 = vld [vmem:[%s20962_s1 + $0x1588] sm:$0xff]  }
 0x282   :  { %15223 = vmatpush3.bf16.msra.mxu1 %v16584_v58  ;;  %v2897_v58 = vrot.slane %v2869_v53, %v17257_v41  ;;  %v16667_v53 = vld [vmem:[%s20962_s1 + $0x1660] sm:$0xff]  }
 0x283   :  { %11854 = vmatmul.mubr.bf16.vlgmr.msra.gmra.mrb[76].mxu0 %v2834_v59  ;;  %15252 = vmatprep.subr.bf16.mxu1 %v16587_v61  ;;  %v16624_v59 = vld [vmem:[%s20962_s1 + $0x1508] sm:$0xff]  }
 0x284   :  { %15231 = vmatpush3.bf16.msra.mxu0 %v16588_v62  ;;  %11933 = vmatprep.mubr.bf16.mxu0 %v2890_v51  ;;  %v2901_v61 = vcombine.high %v2897_v58, %v2897_v58  ;;  %v16626_v62 = vld [vmem:[%s20962_s1 + $0x1550] sm:$0xff]  }
 0x285   :  { %11894 = vmatmul.mubr.bf16.vlgmr.msra.gmra.mrb[76].mxu1 %v2850_v0  ;;  %15232 = vmatprep.subr.bf16.mxu0 %v16590_v1  ;;  %v16628_v0 = vld [vmem:[%s20962_s1 + $0x1510] sm:$0xff]  }
 0x286   :  { %15253 = vmatpush3.bf16.msra.mxu1 %v16589_v63  ;;  %v16627_v63 = vld [vmem:[%s20962_s1 + $0x15d0] sm:$0xff]  }
 0x287   :  { %15254 = vmatprep.subr.bf16.mxu1 %v16591_v2  ;;  %v16629_v1 = vld [vmem:[%s20962_s1 + $0x1590] sm:$0xff]   ;;  %v16630_v2 = vld [vmem:[%s20962_s1 + $0x1558] sm:$0xff]  }
 0x288   :  { %15233 = vmatpush3.bf16.msra.mxu0 %v16592_v3  ;;  %v16631_v3 = vld [vmem:[%s20962_s1 + $0x15d8] sm:$0xff]  }
 0x289   :  { %15234 = vmatprep.subr.bf16.mxu0 %v16594_v5  ;;  %v16633_v5 = vld [vmem:[%s20962_s1 + $0x1598] sm:$0xff]  }
 0x28a   :  { %15255 = vmatpush3.bf16.msra.mxu1 %v16593_v4  ;;  %v16632_v4 = vld [vmem:[%s20962_s1 + $0x1518] sm:$0xff]  }
 0x28b   :  { %15256 = vmatprep.subr.bf16.mxu1 %v16595_v6  ;;  %v16634_v6 = vld [vmem:[%s20962_s1 + $0x1560] sm:$0xff]  }
 0x28c   :  { %15235 = vmatpush3.bf16.msra.mxu0 %v16596_v7  ;;  %v16635_v7 = vld [vmem:[%s20962_s1 + $0x15e0] sm:$0xff]  }
 0x28d   :  { %15236 = vmatprep.subr.bf16.mxu0 %v16598_v9  ;;  %v16637_v9 = vld [vmem:[%s20962_s1 + $0x15a0] sm:$0xff]  }
 0x28e   :  { %15257 = vmatpush3.bf16.msra.mxu1 %v16597_v8  ;;  %v16636_v8 = vld [vmem:[%s20962_s1 + $0x1520] sm:$0xff]  }
 0x28f   :  { %15258 = vmatprep.subr.bf16.mxu1 %v16599_v10  ;;  %v16638_v10 = vld [vmem:[%s20962_s1 + $0x1568] sm:$0xff]  }
 0x290   :  { %15237 = vmatpush3.bf16.msra.mxu0 %v16600_v11  ;;  %v16639_v11 = vld [vmem:[%s20962_s1 + $0x15e8] sm:$0xff]  }
 0x291   :  { %15238 = vmatprep.subr.bf16.mxu0 %v16602_v13 }
 0x292   :  { %15259 = vmatpush3.bf16.msra.mxu1 %v16601_v12  ;;  %v16640_v12 = vld [vmem:[%s20962_s1 + $0x1528] sm:$0xff]  }
 0x293   :  { %15260 = vmatprep.subr.bf16.mxu1 %v16603_v14  ;;  %v16641_v14 = vld [vmem:[%s20962_s1 + $0x15a8] sm:$0xff]  }
 0x294   :  { %15239 = vmatpush3.bf16.msra.mxu0 %v16604_v15 }
 0x295   :  { %15240 = vmatprep.subr.bf16.mxu0 %v16606_v17 }
 0x296   :  { %v14938_v21 = vpop.f32.mrb[52].mxu0  ;;  %15261 = vmatpush3.bf16.msra.mxu1 %v16605_v16  ;;  %v16642_v16 = vld [vmem:[%s20962_s1 + $0x1570] sm:$0xff]  }
 0x297   :  { %v14939_v23 = vpop.f32.mrb[53].mxu0  ;;  %15262 = vmatprep.subr.bf16.mxu1 %v16607_v18 }
 0x298   :  { %v14960_v25 = vpop.f32.mrb[52].mxu1  ;;  %v14940_v26 = vadd.f32 %v14939_v23, %v14938_v21  ;;  %v14941_v27 = vpop.f32.mrb[54].mxu0  ;;  %15241 = vmatpush3.bf16.msra.mxu0 %v16608_v19  ;;  %v16644_v21 = vld [vmem:[%s20962_s1 + $0x1530] sm:$0xff]  }
 0x299   :  { %v14961_v28 = vpop.f32.mrb[53].mxu1  ;;  %v14942_v29 = vpop.f32.mrb[55].mxu0  ;;  %15242 = vmatprep.subr.bf16.mxu0 %v16610_v22  ;;  %v16645_v27 = vld [vmem:[%s20962_s1 + $0x15b0] sm:$0xff]  }
 0x29a   :  { %v11376_v32 = vadd.f32 %v14940_v26, %v19245_v56  ;;  %v14962_v33 = vadd.f32 %v14961_v28, %v14960_v25  ;;  %v14963_v34 = vpop.f32.mrb[54].mxu1  ;;  %15263 = vmatpush3.bf16.msra.mxu1 %v16609_v20  ;;  %v2900_v56 = vcombine.high %v2890_v51, %v2890_v51  ;;  %v16643_v20 = vld [vmem:[%s20962_s1 + $0x15f0] sm:$0xff]   ;;  %v16646_v29 = vld [vmem:[%s20962_s1 + $0x1578] sm:$0xff]  }
 0x29b   :  { %v14964_v36 = vpop.f32.mrb[55].mxu1  ;;  %15264 = vmatprep.subr.bf16.mxu1 %v16611_v24  ;;  %v2883_v34 = vrot.slane %v19366_v49, %v17257_v41  ;;  %v16663_v49 = vld [vmem:[%s20962_s1 + $0x1658] sm:$0xff]  }
 0x29c   :  { %v19346_v38 = vadd.f32 %v14962_v33, %v11376_v32  ;;  %15243 = vmatpush3.bf16.msra.mxu0 %v16612_v30  ;;  %11973 = vmatprep.mubr.bf16.mxu1 %v2900_v56  ;;  %v16648_v32 = vld [vmem:[%s20962_s1 + $0x1538] sm:$0xff]   ;;  %v16652_v36 = vld [vmem:[%s20962_s1 + $0x16c0] sm:$0xff]  }
 0x29d   :  { %15244 = vmatprep.subr.bf16.mxu0 %v16614_v35  ;;  %v16649_v33 = vld [vmem:[%s20962_s1 + $0x15b8] sm:$0xff]   ;;  %v16651_v35 = vld [vmem:[%s20962_s1 + $0x1640] sm:$0xff]  }
 0x29e   :  { %15265 = vmatpush3.bf16.msra.mxu1 %v16613_v31  ;;  %v16647_v31 = vld [vmem:[%s20962_s1 + $0x15f8] sm:$0xff]   ;;  %v16670_v56 = vld [vmem:[%s20962_s1 + $0x16a0] sm:$0xff]  }
 0x29f   :  { %15266 = vmatprep.subr.bf16.mxu1 %v16615_v37  ;;  %v16653_v37 = vld [vmem:[%s20962_s1 + $0x1600] sm:$0xff]   ;;  %v16665_v51 = vld [vmem:[%s20962_s1 + $0x1618] sm:$0xff]  }
 0x2a0   :  { %15245 = vmatpush3.bf16.msra.mxu0 %v16616_v39  ;;  %v2899_v39 = vcombine.high %v2883_v34, %v2883_v34 }
 0x2a1   :  { %15274 = vmatprep.subr.bf16.mxu0 %v16618_v43  ;;  %v16657_v43 = vld [vmem:[%s20962_s1 + $0x1608] sm:$0xff]  }
 0x2a2   :  { %15267 = vmatpush3.bf16.msra.mxu1 %v16617_v45  ;;  %v16659_v45 = vld [vmem:[%s20962_s1 + $0x1650] sm:$0xff]  }
 0x2a3   :  { %15296 = vmatprep.subr.bf16.mxu1 %v16619_v48  ;;  %11934 = vmatmul.mubr.bf16.vlgmr.msra.gmra.mrb[80].mxu0 %v2876_v47  ;;  %v16661_v47 = vld [vmem:[%s20962_s1 + $0x1610] sm:$0xff]  }
 0x2a4   :  { %15275 = vmatpush3.bf16.msra.mxu0 %v16620_v50  ;;  %12013 = vmatprep.mubr.bf16.mxu0 %v2897_v58  ;;  %v16662_v48 = vld [vmem:[%s20962_s1 + $0x1690] sm:$0xff]   ;;  %v16664_v50 = vld [vmem:[%s20962_s1 + $0x16d8] sm:$0xff]   ;;  %v16672_v58 = vld [vmem:[%s20962_s1 + $0x16e8] sm:$0xff]  }
 0x2a5   :  { %11974 = vmatmul.mubr.bf16.vlgmr.msra.gmra.mrb[80].mxu1 %v2898_v54  ;;  %15276 = vmatprep.subr.bf16.mxu0 %v16622_v55  ;;  %v16668_v54 = vld [vmem:[%s20962_s1 + $0x16e0] sm:$0xff]  }
 0x2a6   :  { %15297 = vmatpush3.bf16.msra.mxu1 %v16621_v52  ;;  %12053 = vmatprep.mubr.bf16.mxu1 %v2901_v61  ;;  %v16666_v52 = vld [vmem:[%s20962_s1 + $0x1698] sm:$0xff]   ;;  %v16669_v55 = vld [vmem:[%s20962_s1 + $0x1620] sm:$0xff]   ;;  %v16674_v61 = vld [vmem:[%s20962_s1 + $0x16a8] sm:$0xff]  }
 0x2a7   :  { %15298 = vmatprep.subr.bf16.mxu1 %v16623_v57  ;;  %v16671_v57 = vld [vmem:[%s20962_s1 + $0x1668] sm:$0xff]  }
 0x2a8   :  { %15277 = vmatpush3.bf16.msra.mxu0 %v16624_v59  ;;  %v16673_v59 = vld [vmem:[%s20962_s1 + $0x1628] sm:$0xff]  }
 0x2a9   :  { %15278 = vmatprep.subr.bf16.mxu0 %v16626_v62 }
 0x2aa   :  { %15299 = vmatpush3.bf16.msra.mxu1 %v16625_v60 }
 0x2ab   :  { %15300 = vmatprep.subr.bf16.mxu1 %v16627_v63  ;;  %v16675_v63 = vld [vmem:[%s20962_s1 + $0x1670] sm:$0xff]  }
 0x2ac   :  { %15279 = vmatpush3.bf16.msra.mxu0 %v16628_v0 }
 0x2ad   :  { %15280 = vmatprep.subr.bf16.mxu0 %v16630_v2 }
 0x2ae   :  { %15301 = vmatpush3.bf16.msra.mxu1 %v16629_v1 }
 0x2af   :  { %15302 = vmatprep.subr.bf16.mxu1 %v16631_v3 }
 0x2b0   :  { %15281 = vmatpush3.bf16.msra.mxu0 %v16632_v4 }
 0x2b1   :  { %15282 = vmatprep.subr.bf16.mxu0 %v16634_v6  ;;  %v16677_v6 = vld [vmem:[%s20962_s1 + $0x1630] sm:$0xff]  }
 0x2b2   :  { %15303 = vmatpush3.bf16.msra.mxu1 %v16633_v5  ;;  %v16676_v5 = vld [vmem:[%s20962_s1 + $0x16f0] sm:$0xff]  }
 0x2b3   :  { %15304 = vmatprep.subr.bf16.mxu1 %v16635_v7 }
 0x2b4   :  { %15283 = vmatpush3.bf16.msra.mxu0 %v16636_v8 }
 0x2b5   :  { %15284 = vmatprep.subr.bf16.mxu0 %v16638_v10  ;;  %v16678_v10 = vld [vmem:[%s20962_s1 + $0x16b0] sm:$0xff]  }
 0x2b6   :  { %v14982_v13 = vpop.f32.mrb[56].mxu0  ;;  %15305 = vmatpush3.bf16.msra.mxu1 %v16637_v9 }
 0x2b7   :  { %v14983_v15 = vpop.f32.mrb[57].mxu0  ;;  %15306 = vmatprep.subr.bf16.mxu1 %v16639_v11 }
 0x2b8   :  { %v15004_v17 = vpop.f32.mrb[56].mxu1  ;;  %v14984_v18 = vadd.f32 %v14983_v15, %v14982_v13  ;;  %v14985_v19 = vpop.f32.mrb[58].mxu0  ;;  %15285 = vmatpush3.bf16.msra.mxu0 %v16640_v12  ;;  %v16679_v12 = vld [vmem:[%s20962_s1 + $0x1678] sm:$0xff]  }
 0x2b9   :  { %v15005_v22 = vpop.f32.mrb[57].mxu1  ;;  %v14986_v23 = vpop.f32.mrb[59].mxu0  ;;  %15286 = vmatprep.subr.bf16.mxu0 %v16642_v16  ;;  %v16681_v15 = vld [vmem:[%s20962_s1 + $0x1638] sm:$0xff]  }
 0x2ba   :  { %v11456_v24 = vadd.f32 %v14984_v18, %v19346_v38  ;;  %v15006_v25 = vadd.f32 %v15005_v22, %v15004_v17  ;;  %v15007_v26 = vpop.f32.mrb[58].mxu1  ;;  %15307 = vmatpush3.bf16.msra.mxu1 %v16641_v14  ;;  %v16654_v38 = vld [vmem:[%s20962_s1 + $0x1680] sm:$0xff]   ;;  %v16680_v14 = vld [vmem:[%s20962_s1 + $0x16f8] sm:$0xff]  }
 0x2bb   :  { %v15008_v28 = vpop.f32.mrb[59].mxu1  ;;  %15308 = vmatprep.subr.bf16.mxu1 %v16643_v20  ;;  %v27_v16 = vld [vmem:[%s20961_s0 + $0x58] sm:$0xff]  ;;  %v16683_v18 = vld [vmem:[%s20962_s1 + $0x1740] sm:$0xff]  }
 0x2bc   :  { %v19454_v30 = vadd.f32 %v15006_v25, %v11456_v24  ;;  %15287 = vmatpush3.bf16.msra.mxu0 %v16644_v21  ;;  %v2909_v17 = vrot.slane %v27_v16, %v17257_v41  ;;  %v2902_v19 = vcombine.high %v27_v16, %v27_v16  ;;  %v16682_v20 = vld [vmem:[%s20962_s1 + $0x16b8] sm:$0xff]   ;;  %v16684_v23 = vld [vmem:[%s20962_s1 + $0x17c0] sm:$0xff]   ;;  %v16720_v16 = vld [vmem:[%s20962_s1 + $0x1848] sm:$0xff]  }
 0x2bd   :  { %15288 = vmatprep.subr.bf16.mxu0 %v16646_v29  ;;  %v16685_v25 = vld [vmem:[%s20962_s1 + $0x1700] sm:$0xff]  }
 0x2be   :  { %15309 = vmatpush3.bf16.msra.mxu1 %v16645_v27  ;;  %v2917_v21 = vcombine.high %v2909_v17, %v2909_v17  ;;  %v2925_v22 = vrot.slane %v2909_v17, %v17257_v41  ;;  %v19578_v24 = vrot.slane %v2902_v19, %v17257_v41  ;;  %v16686_v27 = vld [vmem:[%s20962_s1 + $0x1780] sm:$0xff]   ;;  %v16721_v17 = vld [vmem:[%s20962_s1 + $0x18c8] sm:$0xff]  }
 0x2bf   :  { %15310 = vmatprep.subr.bf16.mxu1 %v16647_v31  ;;  %v16723_v19 = vld [vmem:[%s20962_s1 + $0x1888] sm:$0xff]  }
 0x2c0   :  { %15289 = vmatpush3.bf16.msra.mxu0 %v16648_v32  ;;  %v2939_v26 = vrot.slane %v2917_v21, %v17257_v41  ;;  %v2918_v28 = vcombine.high %v19578_v24, %v19578_v24  ;;  %v2947_v29 = vcombine.high %v2925_v22, %v2925_v22  ;;  %v16688_v32 = vld [vmem:[%s20962_s1 + $0x17c8] sm:$0xff]   ;;  %v16725_v21 = vld [vmem:[%s20962_s1 + $0x18d0] sm:$0xff]  }
 0x2c1   :  { %15318 = vmatprep.subr.bf16.mxu0 %v16651_v35  ;;  %v16690_v35 = vld [vmem:[%s20962_s1 + $0x1788] sm:$0xff]  }
 0x2c2   :  { %15311 = vmatpush3.bf16.msra.mxu1 %v16649_v33  ;;  %v2949_v31 = vcombine.high %v2939_v26, %v2939_v26  ;;  %v2946_v33 = vrot.slane %v2918_v28, %v17257_v41  ;;  %v16732_v28 = vld [vmem:[%s20962_s1 + $0x1860] sm:$0xff]  }
 0x2c3   :  { %12014 = vmatmul.mubr.bf16.vlgmr.msra.gmra.mrb[84].mxu0 %v2883_v34  ;;  %15340 = vmatprep.subr.bf16.mxu1 %v16652_v36  ;;  %v16689_v34 = vld [vmem:[%s20962_s1 + $0x1708] sm:$0xff]  }
 0x2c4   :  { %15319 = vmatpush3.bf16.msra.mxu0 %v16653_v37  ;;  %12093 = vmatprep.mubr.bf16.mxu0 %v2939_v26  ;;  %v2950_v36 = vcombine.high %v2946_v33, %v2946_v33  ;;  %v16691_v37 = vld [vmem:[%s20962_s1 + $0x1750] sm:$0xff]   ;;  %v16730_v26 = vld [vmem:[%s20962_s1 + $0x1818] sm:$0xff]  }
 0x2c5   :  { %12054 = vmatmul.mubr.bf16.vlgmr.msra.gmra.mrb[84].mxu1 %v2899_v39  ;;  %15320 = vmatprep.subr.bf16.mxu0 %v16655_v40  ;;  %v16693_v39 = vld [vmem:[%s20962_s1 + $0x1710] sm:$0xff]  }
 0x2c6   :  { %15341 = vmatpush3.bf16.msra.mxu1 %v16654_v38  ;;  %12133 = vmatprep.mubr.bf16.mxu1 %v2949_v31  ;;  %v16692_v38 = vld [vmem:[%s20962_s1 + $0x17d0] sm:$0xff]   ;;  %v16735_v31 = vld [vmem:[%s20962_s1 + $0x18a0] sm:$0xff]  }
 0x2c7   :  { %15342 = vmatprep.subr.bf16.mxu1 %v16656_v42  ;;  %v16694_v40 = vld [vmem:[%s20962_s1 + $0x1790] sm:$0xff]   ;;  %v16695_v42 = vld [vmem:[%s20962_s1 + $0x1758] sm:$0xff]  }
 0x2c8   :  { %15321 = vmatpush3.bf16.msra.mxu0 %v16657_v43  ;;  %v16696_v43 = vld [vmem:[%s20962_s1 + $0x17d8] sm:$0xff]  }
 0x2c9   :  { %15322 = vmatprep.subr.bf16.mxu0 %v16659_v45  ;;  %v16698_v45 = vld [vmem:[%s20962_s1 + $0x1798] sm:$0xff]  }
 0x2ca   :  { %15343 = vmatpush3.bf16.msra.mxu1 %v16658_v44  ;;  %v16697_v44 = vld [vmem:[%s20962_s1 + $0x1718] sm:$0xff]  }
 0x2cb   :  { %15344 = vmatprep.subr.bf16.mxu1 %v16660_v46  ;;  %v16699_v46 = vld [vmem:[%s20962_s1 + $0x1760] sm:$0xff]  }
 0x2cc   :  { %15323 = vmatpush3.bf16.msra.mxu0 %v16661_v47  ;;  %v16700_v47 = vld [vmem:[%s20962_s1 + $0x17e0] sm:$0xff]  }
 0x2cd   :  { %15324 = vmatprep.subr.bf16.mxu0 %v16663_v49  ;;  %v16702_v49 = vld [vmem:[%s20962_s1 + $0x17a0] sm:$0xff]  }
 0x2ce   :  { %15345 = vmatpush3.bf16.msra.mxu1 %v16662_v48  ;;  %v16701_v48 = vld [vmem:[%s20962_s1 + $0x1720] sm:$0xff]  }
 0x2cf   :  { %15346 = vmatprep.subr.bf16.mxu1 %v16664_v50  ;;  %v16703_v50 = vld [vmem:[%s20962_s1 + $0x1768] sm:$0xff]  }
 0x2d0   :  { %15325 = vmatpush3.bf16.msra.mxu0 %v16665_v51  ;;  %v16704_v51 = vld [vmem:[%s20962_s1 + $0x17e8] sm:$0xff]  }
 0x2d1   :  { %15326 = vmatprep.subr.bf16.mxu0 %v16667_v53  ;;  %v16705_v53 = vld [vmem:[%s20962_s1 + $0x1728] sm:$0xff]  }
 0x2d2   :  { %15347 = vmatpush3.bf16.msra.mxu1 %v16666_v52 }
 0x2d3   :  { %15348 = vmatprep.subr.bf16.mxu1 %v16668_v54 }
 0x2d4   :  { %15327 = vmatpush3.bf16.msra.mxu0 %v16669_v55  ;;  %v16706_v55 = vld [vmem:[%s20962_s1 + $0x17a8] sm:$0xff]  }
 0x2d5   :  { %15328 = vmatprep.subr.bf16.mxu0 %v16671_v57 }
 0x2d6   :  { %v15026_v60 = vpop.f32.mrb[60].mxu0  ;;  %15349 = vmatpush3.bf16.msra.mxu1 %v16670_v56 }
 0x2d7   :  { %v15027_v62 = vpop.f32.mrb[61].mxu0  ;;  %15350 = vmatprep.subr.bf16.mxu1 %v16672_v58 }
 0x2d8   :  { %v15048_v0 = vpop.f32.mrb[60].mxu1  ;;  %v15028_v1 = vadd.f32 %v15027_v62, %v15026_v60  ;;  %v15029_v2 = vpop.f32.mrb[62].mxu0  ;;  %15329 = vmatpush3.bf16.msra.mxu0 %v16673_v59  ;;  %v16707_v59 = vld [vmem:[%s20962_s1 + $0x1770] sm:$0xff]  }
 0x2d9   :  { %v15049_v3 = vpop.f32.mrb[61].mxu1  ;;  %v15030_v4 = vpop.f32.mrb[63].mxu0  ;;  %15330 = vmatprep.subr.bf16.mxu0 %v16675_v63  ;;  %v16708_v60 = vld [vmem:[%s20962_s1 + $0x17f0] sm:$0xff]  }
 0x2da   :  { %v11536_v7 = vadd.f32 %v15028_v1, %v19454_v30  ;;  %v15050_v8 = vadd.f32 %v15049_v3, %v15048_v0  ;;  %v15051_v9 = vpop.f32.mrb[62].mxu1  ;;  %15351 = vmatpush3.bf16.msra.mxu1 %v16674_v61  ;;  %v16687_v30 = vld [vmem:[%s20962_s1 + $0x1748] sm:$0xff]   ;;  %v16709_v2 = vld [vmem:[%s20962_s1 + $0x1730] sm:$0xff]  }
 0x2db   :  { %v15052_v11 = vpop.f32.mrb[63].mxu1  ;;  %15352 = vmatprep.subr.bf16.mxu1 %v16676_v5  ;;  %v16710_v4 = vld [vmem:[%s20962_s1 + $0x17b0] sm:$0xff]   ;;  %v16714_v9 = vld [vmem:[%s20962_s1 + $0x17b8] sm:$0xff]  }
 0x2dc   :  { %v19555_v13 = vadd.f32 %v15050_v8, %v11536_v7  ;;  %15331 = vmatpush3.bf16.msra.mxu0 %v16677_v6  ;;  %v16711_v6 = vld [vmem:[%s20962_s1 + $0x1778] sm:$0xff]   ;;  %v16716_v11 = vld [vmem:[%s20962_s1 + $0x1840] sm:$0xff]  }
 0x2dd   :  { %15332 = vmatprep.subr.bf16.mxu0 %v16679_v12  ;;  %v16712_v7 = vld [vmem:[%s20962_s1 + $0x17f8] sm:$0xff]   ;;  %v16717_v12 = vld [vmem:[%s20962_s1 + $0x18c0] sm:$0xff]  }
 0x2de   :  { %15353 = vmatpush3.bf16.msra.mxu1 %v16678_v10  ;;  %v16713_v8 = vld [vmem:[%s20962_s1 + $0x1738] sm:$0xff]   ;;  %v2932_v10 = vrot.slane %v19578_v24, %v17257_v41 }
 0x2df   :  { %15354 = vmatprep.subr.bf16.mxu1 %v16680_v14  ;;  %v16719_v14 = vld [vmem:[%s20962_s1 + $0x1880] sm:$0xff]   ;;  %v16728_v24 = vld [vmem:[%s20962_s1 + $0x1858] sm:$0xff]  }
 0x2e0   :  { %15333 = vmatpush3.bf16.msra.mxu0 %v16681_v15  ;;  %v2948_v15 = vcombine.high %v2932_v10, %v2932_v10 }
 0x2e1   :  { %15362 = vmatprep.subr.bf16.mxu0 %v16683_v18  ;;  %v16722_v18 = vld [vmem:[%s20962_s1 + $0x1808] sm:$0xff]  }
 0x2e2   :  { %15355 = vmatpush3.bf16.msra.mxu1 %v16682_v20  ;;  %v16724_v20 = vld [vmem:[%s20962_s1 + $0x1850] sm:$0xff]  }
 0x2e3   :  { %15384 = vmatprep.subr.bf16.mxu1 %v16684_v23  ;;  %12094 = vmatmul.mubr.bf16.vlgmr.msra.gmra.mrb[88].mxu0 %v2925_v22  ;;  %v16726_v22 = vld [vmem:[%s20962_s1 + $0x1810] sm:$0xff]  }
 0x2e4   :  { %15363 = vmatpush3.bf16.msra.mxu0 %v16685_v25  ;;  %12173 = vmatprep.mubr.bf16.mxu0 %v2946_v33  ;;  %v16727_v23 = vld [vmem:[%s20962_s1 + $0x1890] sm:$0xff]   ;;  %v16729_v25 = vld [vmem:[%s20962_s1 + $0x18d8] sm:$0xff]   ;;  %v16737_v33 = vld [vmem:[%s20962_s1 + $0x18e8] sm:$0xff]  }
 0x2e5   :  { %12134 = vmatmul.mubr.bf16.vlgmr.msra.gmra.mrb[88].mxu1 %v2947_v29  ;;  %15364 = vmatprep.subr.bf16.mxu0 %v16687_v30  ;;  %v16733_v29 = vld [vmem:[%s20962_s1 + $0x18e0] sm:$0xff]  }
 0x2e6   :  { %15385 = vmatpush3.bf16.msra.mxu1 %v16686_v27  ;;  %12213 = vmatprep.mubr.bf16.mxu1 %v2950_v36  ;;  %v16731_v27 = vld [vmem:[%s20962_s1 + $0x1898] sm:$0xff]   ;;  %v16734_v30 = vld [vmem:[%s20962_s1 + $0x1820] sm:$0xff]  }
 0x2e7   :  { %15386 = vmatprep.subr.bf16.mxu1 %v16688_v32  ;;  %v16736_v32 = vld [vmem:[%s20962_s1 + $0x1868] sm:$0xff]  }
 0x2e8   :  { %15365 = vmatpush3.bf16.msra.mxu0 %v16689_v34 }
 0x2e9   :  { %15366 = vmatprep.subr.bf16.mxu0 %v16691_v37  ;;  %v16740_v37 = vld [vmem:[%s20962_s1 + $0x1870] sm:$0xff]  }
 0x2ea   :  { %15387 = vmatpush3.bf16.msra.mxu1 %v16690_v35  ;;  %v16738_v35 = vld [vmem:[%s20962_s1 + $0x1828] sm:$0xff]  }
 0x2eb   :  { %15388 = vmatprep.subr.bf16.mxu1 %v16692_v38 }
 0x2ec   :  { %15367 = vmatpush3.bf16.msra.mxu0 %v16693_v39 }
 0x2ed   :  { %15368 = vmatprep.subr.bf16.mxu0 %v16695_v42 }
 0x2ee   :  { %15389 = vmatpush3.bf16.msra.mxu1 %v16694_v40 }
 0x2ef   :  { %15390 = vmatprep.subr.bf16.mxu1 %v16696_v43  ;;  %v16739_v43 = vld [vmem:[%s20962_s1 + $0x18a8] sm:$0xff]  }
 0x2f0   :  { %15369 = vmatpush3.bf16.msra.mxu0 %v16697_v44 }
 0x2f1   :  { %15370 = vmatprep.subr.bf16.mxu0 %v16699_v46 }
 0x2f2   :  { %15391 = vmatpush3.bf16.msra.mxu1 %v16698_v45  ;;  %v16741_v45 = vld [vmem:[%s20962_s1 + $0x18f0] sm:$0xff]  }
 0x2f3   :  { %15392 = vmatprep.subr.bf16.mxu1 %v16700_v47 }
 0x2f4   :  { %15371 = vmatpush3.bf16.msra.mxu0 %v16701_v48 }
 0x2f5   :  { %15372 = vmatprep.subr.bf16.mxu0 %v16703_v50 }
 0x2f6   :  { %v15070_v52 = vpop.f32.mrb[64].mxu0  ;;  %15393 = vmatpush3.bf16.msra.mxu1 %v16702_v49  ;;  %v16742_v49 = vld [vmem:[%s20962_s1 + $0x1830] sm:$0xff]  }
 0x2f7   :  { %v15071_v54 = vpop.f32.mrb[65].mxu0  ;;  %15394 = vmatprep.subr.bf16.mxu1 %v16704_v51  ;;  %v16744_v51 = vld [vmem:[%s20962_s1 + $0x1878] sm:$0xff]  }
 0x2f8   :  { %v15092_v56 = vpop.f32.mrb[64].mxu1  ;;  %v15072_v57 = vadd.f32 %v15071_v54, %v15070_v52  ;;  %v15073_v58 = vpop.f32.mrb[66].mxu0  ;;  %15373 = vmatpush3.bf16.msra.mxu0 %v16705_v53  ;;  %v16743_v53 = vld [vmem:[%s20962_s1 + $0x18b0] sm:$0xff]   ;;  %v16745_v54 = vld [vmem:[%s20962_s1 + $0x18f8] sm:$0xff]  }
 0x2f9   :  { %v15093_v61 = vpop.f32.mrb[65].mxu1  ;;  %v15074_v62 = vpop.f32.mrb[67].mxu0  ;;  %15374 = vmatprep.subr.bf16.mxu0 %v16707_v59  ;;  %v16748_v58 = vld [vmem:[%s20962_s1 + $0x1940] sm:$0xff]  }
 0x2fa   :  { %v11616_v63 = vadd.f32 %v15072_v57, %v19555_v13  ;;  %v15094_v0 = vadd.f32 %v15093_v61, %v15092_v56  ;;  %v15095_v1 = vpop.f32.mrb[66].mxu1  ;;  %15395 = vmatpush3.bf16.msra.mxu1 %v16706_v55  ;;  %v16718_v13 = vld [vmem:[%s20962_s1 + $0x1800] sm:$0xff]   ;;  %v16746_v55 = vld [vmem:[%s20962_s1 + $0x1838] sm:$0xff]  }
 0x2fb   :  { %v15096_v3 = vpop.f32.mrb[67].mxu1  ;;  %15396 = vmatprep.subr.bf16.mxu1 %v16708_v60  ;;  %v28_v56 = vld [vmem:[%s20961_s0 + $0x60] sm:$0xff]  ;;  %v16747_v60 = vld [vmem:[%s20962_s1 + $0x18b8] sm:$0xff]  }
 0x2fc   :  { %v19663_v5 = vadd.f32 %v15094_v0, %v11616_v63  ;;  %15375 = vmatpush3.bf16.msra.mxu0 %v16709_v2  ;;  %v2958_v57 = vrot.slane %v28_v56, %v17257_v41  ;;  %v2951_v59 = vcombine.high %v28_v56, %v28_v56  ;;  %v16749_v63 = vld [vmem:[%s20962_s1 + $0x19c0] sm:$0xff]   ;;  %v16785_v56 = vld [vmem:[%s20962_s1 + $0x1a48] sm:$0xff]  }
 0x2fd   :  { %15376 = vmatprep.subr.bf16.mxu0 %v16711_v6  ;;  %v16750_v1 = vld [vmem:[%s20962_s1 + $0x1900] sm:$0xff]   ;;  %v16752_v6 = vld [vmem:[%s20962_s1 + $0x1948] sm:$0xff]  }
 0x2fe   :  { %15397 = vmatpush3.bf16.msra.mxu1 %v16710_v4  ;;  %v2966_v61 = vcombine.high %v2958_v57, %v2958_v57  ;;  %v2974_v62 = vrot.slane %v2958_v57, %v17257_v41  ;;  %v19790_v0 = vrot.slane %v2951_v59, %v17257_v41  ;;  %v16751_v3 = vld [vmem:[%s20962_s1 + $0x1980] sm:$0xff]   ;;  %v16786_v57 = vld [vmem:[%s20962_s1 + $0x1ac8] sm:$0xff]  }
 0x2ff   :  { %15398 = vmatprep.subr.bf16.mxu1 %v16712_v7  ;;  %v16788_v59 = vld [vmem:[%s20962_s1 + $0x1a88] sm:$0xff]  }
 0x300   :  { %15377 = vmatpush3.bf16.msra.mxu0 %v16713_v8  ;;  %v2988_v2 = vrot.slane %v2966_v61, %v17257_v41  ;;  %v2967_v4 = vcombine.high %v19790_v0, %v19790_v0  ;;  %v16753_v8 = vld [vmem:[%s20962_s1 + $0x19c8] sm:$0xff]   ;;  %v16790_v61 = vld [vmem:[%s20962_s1 + $0x1ad0] sm:$0xff]  }
 0x301   :  { %15406 = vmatprep.subr.bf16.mxu0 %v16716_v11  ;;  %v16755_v11 = vld [vmem:[%s20962_s1 + $0x1988] sm:$0xff]  }
 0x302   :  { %15399 = vmatpush3.bf16.msra.mxu1 %v16714_v9  ;;  %v2998_v7 = vcombine.high %v2988_v2, %v2988_v2  ;;  %v2995_v9 = vrot.slane %v2967_v4, %v17257_v41  ;;  %v16797_v4 = vld [vmem:[%s20962_s1 + $0x1a60] sm:$0xff]  }
 0x303   :  { %12174 = vmatmul.mubr.bf16.vlgmr.msra.gmra.mrb[92].mxu0 %v2932_v10  ;;  %15428 = vmatprep.subr.bf16.mxu1 %v16717_v12  ;;  %v16754_v10 = vld [vmem:[%s20962_s1 + $0x1908] sm:$0xff]  }
 0x304   :  { %15407 = vmatpush3.bf16.msra.mxu0 %v16718_v13  ;;  %12253 = vmatprep.mubr.bf16.mxu0 %v2988_v2  ;;  %v2999_v12 = vcombine.high %v2995_v9, %v2995_v9  ;;  %v16756_v13 = vld [vmem:[%s20962_s1 + $0x1950] sm:$0xff]   ;;  %v16795_v2 = vld [vmem:[%s20962_s1 + $0x1a18] sm:$0xff]  }
 0x305   :  { %12214 = vmatmul.mubr.bf16.vlgmr.msra.gmra.mrb[92].mxu1 %v2948_v15  ;;  %15408 = vmatprep.subr.bf16.mxu0 %v16720_v16  ;;  %v16758_v15 = vld [vmem:[%s20962_s1 + $0x1910] sm:$0xff]  }
 0x306   :  { %15429 = vmatpush3.bf16.msra.mxu1 %v16719_v14  ;;  %12293 = vmatprep.mubr.bf16.mxu1 %v2998_v7  ;;  %v16757_v14 = vld [vmem:[%s20962_s1 + $0x19d0] sm:$0xff]   ;;  %v16800_v7 = vld [vmem:[%s20962_s1 + $0x1aa0] sm:$0xff]  }
 0x307   :  { %15430 = vmatprep.subr.bf16.mxu1 %v16721_v17  ;;  %v16759_v16 = vld [vmem:[%s20962_s1 + $0x1990] sm:$0xff]   ;;  %v16760_v17 = vld [vmem:[%s20962_s1 + $0x1958] sm:$0xff]  }
 0x308   :  { %15409 = vmatpush3.bf16.msra.mxu0 %v16722_v18  ;;  %v16761_v18 = vld [vmem:[%s20962_s1 + $0x19d8] sm:$0xff]  }
 0x309   :  { %15410 = vmatprep.subr.bf16.mxu0 %v16724_v20  ;;  %v16763_v20 = vld [vmem:[%s20962_s1 + $0x1998] sm:$0xff]  }
 0x30a   :  { %15431 = vmatpush3.bf16.msra.mxu1 %v16723_v19  ;;  %v16762_v19 = vld [vmem:[%s20962_s1 + $0x1918] sm:$0xff]  }
 0x30b   :  { %15432 = vmatprep.subr.bf16.mxu1 %v16725_v21  ;;  %v16764_v21 = vld [vmem:[%s20962_s1 + $0x1960] sm:$0xff]  }
 0x30c   :  { %15411 = vmatpush3.bf16.msra.mxu0 %v16726_v22  ;;  %v16765_v22 = vld [vmem:[%s20962_s1 + $0x19e0] sm:$0xff]  }
 0x30d   :  { %15412 = vmatprep.subr.bf16.mxu0 %v16728_v24  ;;  %v16767_v24 = vld [vmem:[%s20962_s1 + $0x19a0] sm:$0xff]  }
 0x30e   :  { %15433 = vmatpush3.bf16.msra.mxu1 %v16727_v23  ;;  %v16766_v23 = vld [vmem:[%s20962_s1 + $0x1920] sm:$0xff]  }
 0x30f   :  { %15434 = vmatprep.subr.bf16.mxu1 %v16729_v25  ;;  %v16768_v25 = vld [vmem:[%s20962_s1 + $0x1968] sm:$0xff]  }
 0x310   :  { %15413 = vmatpush3.bf16.msra.mxu0 %v16730_v26  ;;  %v16769_v26 = vld [vmem:[%s20962_s1 + $0x19e8] sm:$0xff]  }
 0x311   :  { %15414 = vmatprep.subr.bf16.mxu0 %v16732_v28  ;;  %v16770_v28 = vld [vmem:[%s20962_s1 + $0x1928] sm:$0xff]  }
 0x312   :  { %15435 = vmatpush3.bf16.msra.mxu1 %v16731_v27 }
 0x313   :  { %15436 = vmatprep.subr.bf16.mxu1 %v16733_v29 }
 0x314   :  { %15415 = vmatpush3.bf16.msra.mxu0 %v16734_v30  ;;  %v16771_v30 = vld [vmem:[%s20962_s1 + $0x19a8] sm:$0xff]  }
 0x315   :  { %15416 = vmatprep.subr.bf16.mxu0 %v16736_v32 }
 0x316   :  { %v15114_v34 = vpop.f32.mrb[68].mxu0  ;;  %15437 = vmatpush3.bf16.msra.mxu1 %v16735_v31 }
 0x317   :  { %v15115_v36 = vpop.f32.mrb[69].mxu0  ;;  %15438 = vmatprep.subr.bf16.mxu1 %v16737_v33 }
 0x318   :  { %v15136_v38 = vpop.f32.mrb[68].mxu1  ;;  %v15116_v39 = vadd.f32 %v15115_v36, %v15114_v34  ;;  %v15117_v40 = vpop.f32.mrb[70].mxu0  ;;  %15417 = vmatpush3.bf16.msra.mxu0 %v16738_v35  ;;  %v16772_v34 = vld [vmem:[%s20962_s1 + $0x1970] sm:$0xff]  }
 0x319   :  { %v15137_v42 = vpop.f32.mrb[69].mxu1  ;;  %v15118_v44 = vpop.f32.mrb[71].mxu0  ;;  %15418 = vmatprep.subr.bf16.mxu0 %v16740_v37  ;;  %v16773_v35 = vld [vmem:[%s20962_s1 + $0x19f0] sm:$0xff]  }
 0x31a   :  { %v11696_v46 = vadd.f32 %v15116_v39, %v19663_v5  ;;  %v15138_v47 = vadd.f32 %v15137_v42, %v15136_v38  ;;  %v15139_v48 = vpop.f32.mrb[70].mxu1  ;;  %15439 = vmatpush3.bf16.msra.mxu1 %v16739_v43  ;;  %v2996_v5 = vcombine.high %v2974_v62, %v2974_v62  ;;  %v16774_v42 = vld [vmem:[%s20962_s1 + $0x1930] sm:$0xff]  }
 0x31b   :  { %v15140_v50 = vpop.f32.mrb[71].mxu1  ;;  %15440 = vmatprep.subr.bf16.mxu1 %v16741_v45  ;;  %v16775_v44 = vld [vmem:[%s20962_s1 + $0x19b0] sm:$0xff]   ;;  %v16778_v48 = vld [vmem:[%s20962_s1 + $0x1938] sm:$0xff]  }
 0x31c   :  { %v19764_v52 = vadd.f32 %v15138_v47, %v11696_v46  ;;  %15419 = vmatpush3.bf16.msra.mxu0 %v16742_v49  ;;  %v16776_v46 = vld [vmem:[%s20962_s1 + $0x1978] sm:$0xff]   ;;  %v2981_v50 = vrot.slane %v19790_v0, %v17257_v41 }
 0x31d   :  { %15420 = vmatprep.subr.bf16.mxu0 %v16744_v51  ;;  %v16777_v47 = vld [vmem:[%s20962_s1 + $0x19f8] sm:$0xff]   ;;  %v16781_v51 = vld [vmem:[%s20962_s1 + $0x1a40] sm:$0xff]  }
 0x31e   :  { %15441 = vmatpush3.bf16.msra.mxu1 %v16743_v53  ;;  %v16779_v49 = vld [vmem:[%s20962_s1 + $0x19b8] sm:$0xff]   ;;  %v16783_v53 = vld [vmem:[%s20962_s1 + $0x1a00] sm:$0xff]  }
 0x31f   :  { %15442 = vmatprep.subr.bf16.mxu1 %v16745_v54  ;;  %v16784_v54 = vld [vmem:[%s20962_s1 + $0x1a80] sm:$0xff]   ;;  %v16793_v0 = vld [vmem:[%s20962_s1 + $0x1a58] sm:$0xff]  }
 0x320   :  { %15421 = vmatpush3.bf16.msra.mxu0 %v16746_v55  ;;  %v2997_v55 = vcombine.high %v2981_v50, %v2981_v50 }
 0x321   :  { %15450 = vmatprep.subr.bf16.mxu0 %v16748_v58  ;;  %v16787_v58 = vld [vmem:[%s20962_s1 + $0x1a08] sm:$0xff]  }
 0x322   :  { %15443 = vmatpush3.bf16.msra.mxu1 %v16747_v60  ;;  %v16789_v60 = vld [vmem:[%s20962_s1 + $0x1a50] sm:$0xff]  }
 0x323   :  { %15472 = vmatprep.subr.bf16.mxu1 %v16749_v63  ;;  %12254 = vmatmul.mubr.bf16.vlgmr.msra.gmra.mrb[96].mxu0 %v2974_v62  ;;  %v16791_v62 = vld [vmem:[%s20962_s1 + $0x1a10] sm:$0xff]  }
 0x324   :  { %15451 = vmatpush3.bf16.msra.mxu0 %v16750_v1  ;;  %12333 = vmatprep.mubr.bf16.mxu0 %v2995_v9  ;;  %v16792_v63 = vld [vmem:[%s20962_s1 + $0x1a90] sm:$0xff]   ;;  %v16794_v1 = vld [vmem:[%s20962_s1 + $0x1ad8] sm:$0xff]   ;;  %v16802_v9 = vld [vmem:[%s20962_s1 + $0x1ae8] sm:$0xff]  }
 0x325   :  { %12294 = vmatmul.mubr.bf16.vlgmr.msra.gmra.mrb[96].mxu1 %v2996_v5  ;;  %15452 = vmatprep.subr.bf16.mxu0 %v16752_v6  ;;  %v16798_v5 = vld [vmem:[%s20962_s1 + $0x1ae0] sm:$0xff]  }
 0x326   :  { %15473 = vmatpush3.bf16.msra.mxu1 %v16751_v3  ;;  %12373 = vmatprep.mubr.bf16.mxu1 %v2999_v12  ;;  %v16796_v3 = vld [vmem:[%s20962_s1 + $0x1a98] sm:$0xff]   ;;  %v16799_v6 = vld [vmem:[%s20962_s1 + $0x1a20] sm:$0xff]  }
 0x327   :  { %15474 = vmatprep.subr.bf16.mxu1 %v16753_v8  ;;  %v16801_v8 = vld [vmem:[%s20962_s1 + $0x1a68] sm:$0xff]  }
 0x328   :  { %15453 = vmatpush3.bf16.msra.mxu0 %v16754_v10 }
 0x329   :  { %15454 = vmatprep.subr.bf16.mxu0 %v16756_v13  ;;  %v16805_v13 = vld [vmem:[%s20962_s1 + $0x1a70] sm:$0xff]  }
 0x32a   :  { %15475 = vmatpush3.bf16.msra.mxu1 %v16755_v11  ;;  %v16803_v11 = vld [vmem:[%s20962_s1 + $0x1a28] sm:$0xff]  }
 0x32b   :  { %15476 = vmatprep.subr.bf16.mxu1 %v16757_v14 }
 0x32c   :  { %15455 = vmatpush3.bf16.msra.mxu0 %v16758_v15 }
 0x32d   :  { %15456 = vmatprep.subr.bf16.mxu0 %v16760_v17 }
 0x32e   :  { %15477 = vmatpush3.bf16.msra.mxu1 %v16759_v16 }
 0x32f   :  { %15478 = vmatprep.subr.bf16.mxu1 %v16761_v18  ;;  %v16804_v18 = vld [vmem:[%s20962_s1 + $0x1aa8] sm:$0xff]  }
 0x330   :  { %15457 = vmatpush3.bf16.msra.mxu0 %v16762_v19 }
 0x331   :  { %15458 = vmatprep.subr.bf16.mxu0 %v16764_v21 }
 0x332   :  { %15479 = vmatpush3.bf16.msra.mxu1 %v16763_v20  ;;  %v16806_v20 = vld [vmem:[%s20962_s1 + $0x1af0] sm:$0xff]  }
 0x333   :  { %15480 = vmatprep.subr.bf16.mxu1 %v16765_v22 }
 0x334   :  { %15459 = vmatpush3.bf16.msra.mxu0 %v16766_v23 }
 0x335   :  { %15460 = vmatprep.subr.bf16.mxu0 %v16768_v25 }
 0x336   :  { %v15158_v27 = vpop.f32.mrb[72].mxu0  ;;  %15481 = vmatpush3.bf16.msra.mxu1 %v16767_v24  ;;  %v16807_v24 = vld [vmem:[%s20962_s1 + $0x1a30] sm:$0xff]  }
 0x337   :  { %v15159_v29 = vpop.f32.mrb[73].mxu0  ;;  %15482 = vmatprep.subr.bf16.mxu1 %v16769_v26  ;;  %v16809_v26 = vld [vmem:[%s20962_s1 + $0x1a78] sm:$0xff]  }
 0x338   :  { %v15180_v31 = vpop.f32.mrb[72].mxu1  ;;  %v15160_v32 = vadd.f32 %v15159_v29, %v15158_v27  ;;  %v15161_v33 = vpop.f32.mrb[74].mxu0  ;;  %15461 = vmatpush3.bf16.msra.mxu0 %v16770_v28  ;;  %v16808_v28 = vld [vmem:[%s20962_s1 + $0x1ab0] sm:$0xff]   ;;  %v16810_v29 = vld [vmem:[%s20962_s1 + $0x1af8] sm:$0xff]  }
 0x339   :  { %v15181_v36 = vpop.f32.mrb[73].mxu1  ;;  %v15162_v37 = vpop.f32.mrb[75].mxu0  ;;  %15462 = vmatprep.subr.bf16.mxu0 %v16772_v34  ;;  %v16813_v33 = vld [vmem:[%s20962_s1 + $0x1b40] sm:$0xff]  }
 0x33a   :  { %v11776_v38 = vadd.f32 %v15160_v32, %v19764_v52  ;;  %v15182_v39 = vadd.f32 %v15181_v36, %v15180_v31  ;;  %v15183_v40 = vpop.f32.mrb[74].mxu1  ;;  %15483 = vmatpush3.bf16.msra.mxu1 %v16771_v30  ;;  %v16782_v52 = vld [vmem:[%s20962_s1 + $0x1ac0] sm:$0xff]   ;;  %v16811_v30 = vld [vmem:[%s20962_s1 + $0x1a38] sm:$0xff]   ;;  %v29_v31 = vld [vmem:[%s20961_s0 + $0x68] sm:$0xff] }
 0x33b   :  { %v15184_v43 = vpop.f32.mrb[75].mxu1  ;;  %15484 = vmatprep.subr.bf16.mxu1 %v16773_v35  ;;  %v3007_v32 = vrot.slane %v29_v31, %v17257_v41  ;;  %v3000_v34 = vcombine.high %v29_v31, %v29_v31  ;;  %v16812_v35 = vld [vmem:[%s20962_s1 + $0x1ab8] sm:$0xff]   ;;  %v16815_v40 = vld [vmem:[%s20962_s1 + $0x1b00] sm:$0xff]   ;;  %v16850_v31 = vld [vmem:[%s20962_s1 + $0x1c48] sm:$0xff]  }
 0x33c   :  { %v19875_v45 = vadd.f32 %v15182_v39, %v11776_v38  ;;  %15463 = vmatpush3.bf16.msra.mxu0 %v16774_v42  ;;  %v16814_v38 = vld [vmem:[%s20962_s1 + $0x1bc0] sm:$0xff]  }
 0x33d   :  { %15464 = vmatprep.subr.bf16.mxu0 %v16776_v46  ;;  %v3015_v36 = vcombine.high %v3007_v32, %v3007_v32  ;;  %v3023_v37 = vrot.slane %v3007_v32, %v17257_v41  ;;  %v20002_v39 = vrot.slane %v3000_v34, %v17257_v41  ;;  %v16816_v43 = vld [vmem:[%s20962_s1 + $0x1b80] sm:$0xff]   ;;  %v16817_v46 = vld [vmem:[%s20962_s1 + $0x1b48] sm:$0xff]  }
 0x33e   :  { %15485 = vmatpush3.bf16.msra.mxu1 %v16775_v44  ;;  %v16851_v32 = vld [vmem:[%s20962_s1 + $0x1cc8] sm:$0xff]  }
 0x33f   :  { %15486 = vmatprep.subr.bf16.mxu1 %v16777_v47  ;;  %v3037_v42 = vrot.slane %v3015_v36, %v17257_v41  ;;  %v3016_v44 = vcombine.high %v20002_v39, %v20002_v39  ;;  %v16853_v34 = vld [vmem:[%s20962_s1 + $0x1c88] sm:$0xff]   ;;  %v16855_v36 = vld [vmem:[%s20962_s1 + $0x1cd0] sm:$0xff]  }
 0x340   :  { %15465 = vmatpush3.bf16.msra.mxu0 %v16778_v48  ;;  %v16818_v48 = vld [vmem:[%s20962_s1 + $0x1bc8] sm:$0xff]  }
 0x341   :  { %15494 = vmatprep.subr.bf16.mxu0 %v16781_v51  ;;  %v3047_v47 = vcombine.high %v3037_v42, %v3037_v42  ;;  %v16820_v51 = vld [vmem:[%s20962_s1 + $0x1b88] sm:$0xff]  }
 0x342   :  { %15487 = vmatpush3.bf16.msra.mxu1 %v16779_v49  ;;  %v3044_v49 = vrot.slane %v3016_v44, %v17257_v41  ;;  %v16862_v44 = vld [vmem:[%s20962_s1 + $0x1c60] sm:$0xff]  }
 0x343   :  { %12334 = vmatmul.mubr.bf16.vlgmr.msra.gmra.mrb[100].mxu0 %v2981_v50  ;;  %15516 = vmatprep.subr.bf16.mxu1 %v16782_v52  ;;  %v16819_v50 = vld [vmem:[%s20962_s1 + $0x1b08] sm:$0xff]  }
 0x344   :  { %15495 = vmatpush3.bf16.msra.mxu0 %v16783_v53  ;;  %12413 = vmatprep.mubr.bf16.mxu0 %v3037_v42  ;;  %v3048_v52 = vcombine.high %v3044_v49, %v3044_v49  ;;  %v16821_v53 = vld [vmem:[%s20962_s1 + $0x1b50] sm:$0xff]   ;;  %v16860_v42 = vld [vmem:[%s20962_s1 + $0x1c18] sm:$0xff]  }
 0x345   :  { %12374 = vmatmul.mubr.bf16.vlgmr.msra.gmra.mrb[100].mxu1 %v2997_v55  ;;  %15496 = vmatprep.subr.bf16.mxu0 %v16785_v56  ;;  %v16823_v55 = vld [vmem:[%s20962_s1 + $0x1b10] sm:$0xff]  }
 0x346   :  { %15517 = vmatpush3.bf16.msra.mxu1 %v16784_v54  ;;  %12453 = vmatprep.mubr.bf16.mxu1 %v3047_v47  ;;  %v16822_v54 = vld [vmem:[%s20962_s1 + $0x1bd0] sm:$0xff]   ;;  %v16865_v47 = vld [vmem:[%s20962_s1 + $0x1ca0] sm:$0xff]  }
 0x347   :  { %15518 = vmatprep.subr.bf16.mxu1 %v16786_v57  ;;  %v16824_v56 = vld [vmem:[%s20962_s1 + $0x1b90] sm:$0xff]   ;;  %v16825_v57 = vld [vmem:[%s20962_s1 + $0x1b58] sm:$0xff]  }
 0x348   :  { %15497 = vmatpush3.bf16.msra.mxu0 %v16787_v58  ;;  %v16826_v58 = vld [vmem:[%s20962_s1 + $0x1bd8] sm:$0xff]  }
 0x349   :  { %15498 = vmatprep.subr.bf16.mxu0 %v16789_v60  ;;  %v16828_v60 = vld [vmem:[%s20962_s1 + $0x1b98] sm:$0xff]  }
 0x34a   :  { %15519 = vmatpush3.bf16.msra.mxu1 %v16788_v59  ;;  %v16827_v59 = vld [vmem:[%s20962_s1 + $0x1b18] sm:$0xff]  }
 0x34b   :  { %15520 = vmatprep.subr.bf16.mxu1 %v16790_v61  ;;  %v16829_v61 = vld [vmem:[%s20962_s1 + $0x1b60] sm:$0xff]  }
 0x34c   :  { %15499 = vmatpush3.bf16.msra.mxu0 %v16791_v62  ;;  %v16830_v62 = vld [vmem:[%s20962_s1 + $0x1be0] sm:$0xff]  }
 0x34d   :  { %15500 = vmatprep.subr.bf16.mxu0 %v16793_v0  ;;  %v16832_v0 = vld [vmem:[%s20962_s1 + $0x1ba0] sm:$0xff]  }
 0x34e   :  { %15521 = vmatpush3.bf16.msra.mxu1 %v16792_v63  ;;  %v16831_v63 = vld [vmem:[%s20962_s1 + $0x1b20] sm:$0xff]  }
 0x34f   :  { %15522 = vmatprep.subr.bf16.mxu1 %v16794_v1  ;;  %v16833_v1 = vld [vmem:[%s20962_s1 + $0x1b68] sm:$0xff]  }
 0x350   :  { %15501 = vmatpush3.bf16.msra.mxu0 %v16795_v2  ;;  %v16834_v2 = vld [vmem:[%s20962_s1 + $0x1be8] sm:$0xff]  }
 0x351   :  { %15502 = vmatprep.subr.bf16.mxu0 %v16797_v4  ;;  %v16835_v4 = vld [vmem:[%s20962_s1 + $0x1b28] sm:$0xff]  }
 0x352   :  { %15523 = vmatpush3.bf16.msra.mxu1 %v16796_v3 }
 0x353   :  { %15524 = vmatprep.subr.bf16.mxu1 %v16798_v5 }
 0x354   :  { %15503 = vmatpush3.bf16.msra.mxu0 %v16799_v6  ;;  %v16836_v6 = vld [vmem:[%s20962_s1 + $0x1ba8] sm:$0xff]  }
 0x355   :  { %15504 = vmatprep.subr.bf16.mxu0 %v16801_v8 }
 0x356   :  { %v15202_v10 = vpop.f32.mrb[76].mxu0  ;;  %15525 = vmatpush3.bf16.msra.mxu1 %v16800_v7 }
 0x357   :  { %v15203_v12 = vpop.f32.mrb[77].mxu0  ;;  %15526 = vmatprep.subr.bf16.mxu1 %v16802_v9 }
 0x358   :  { %v15224_v14 = vpop.f32.mrb[76].mxu1  ;;  %v15204_v15 = vadd.f32 %v15203_v12, %v15202_v10  ;;  %v15205_v16 = vpop.f32.mrb[78].mxu0  ;;  %15505 = vmatpush3.bf16.msra.mxu0 %v16803_v11  ;;  %v16837_v10 = vld [vmem:[%s20962_s1 + $0x1b70] sm:$0xff]  }
 0x359   :  { %v15225_v17 = vpop.f32.mrb[77].mxu1  ;;  %v15206_v19 = vpop.f32.mrb[79].mxu0  ;;  %15506 = vmatprep.subr.bf16.mxu0 %v16805_v13  ;;  %v16838_v11 = vld [vmem:[%s20962_s1 + $0x1bf0] sm:$0xff]  }
 0x35a   :  { %v11856_v21 = vadd.f32 %v15204_v15, %v19875_v45  ;;  %v15226_v22 = vadd.f32 %v15225_v17, %v15224_v14  ;;  %v15227_v23 = vpop.f32.mrb[78].mxu1  ;;  %15527 = vmatpush3.bf16.msra.mxu1 %v16804_v18  ;;  %v3045_v45 = vcombine.high %v3023_v37, %v3023_v37  ;;  %v16839_v17 = vld [vmem:[%s20962_s1 + $0x1b30] sm:$0xff]  }
 0x35b   :  { %v15228_v25 = vpop.f32.mrb[79].mxu1  ;;  %15528 = vmatprep.subr.bf16.mxu1 %v16806_v20  ;;  %v16840_v19 = vld [vmem:[%s20962_s1 + $0x1bb0] sm:$0xff]   ;;  %v16843_v23 = vld [vmem:[%s20962_s1 + $0x1b38] sm:$0xff]  }
 0x35c   :  { %v19976_v27 = vadd.f32 %v15226_v22, %v11856_v21  ;;  %15507 = vmatpush3.bf16.msra.mxu0 %v16807_v24  ;;  %v16841_v21 = vld [vmem:[%s20962_s1 + $0x1b78] sm:$0xff]   ;;  %v3030_v25 = vrot.slane %v20002_v39, %v17257_v41 }
 0x35d   :  { %15508 = vmatprep.subr.bf16.mxu0 %v16809_v26  ;;  %v16842_v22 = vld [vmem:[%s20962_s1 + $0x1bf8] sm:$0xff]   ;;  %v16846_v26 = vld [vmem:[%s20962_s1 + $0x1c40] sm:$0xff]  }
 0x35e   :  { %15529 = vmatpush3.bf16.msra.mxu1 %v16808_v28  ;;  %v16844_v24 = vld [vmem:[%s20962_s1 + $0x1bb8] sm:$0xff]   ;;  %v16848_v28 = vld [vmem:[%s20962_s1 + $0x1c00] sm:$0xff]  }
 0x35f   :  { %15530 = vmatprep.subr.bf16.mxu1 %v16810_v29  ;;  %v16849_v29 = vld [vmem:[%s20962_s1 + $0x1c80] sm:$0xff]   ;;  %v16858_v39 = vld [vmem:[%s20962_s1 + $0x1c58] sm:$0xff]  }
 0x360   :  { %15509 = vmatpush3.bf16.msra.mxu0 %v16811_v30  ;;  %v3046_v30 = vcombine.high %v3030_v25, %v3030_v25 }
 0x361   :  { %15538 = vmatprep.subr.bf16.mxu0 %v16813_v33  ;;  %v16852_v33 = vld [vmem:[%s20962_s1 + $0x1c08] sm:$0xff]  }
 0x362   :  { %15531 = vmatpush3.bf16.msra.mxu1 %v16812_v35  ;;  %v16854_v35 = vld [vmem:[%s20962_s1 + $0x1c50] sm:$0xff]  }
 0x363   :  { %15560 = vmatprep.subr.bf16.mxu1 %v16814_v38  ;;  %12414 = vmatmul.mubr.bf16.vlgmr.msra.gmra.mrb[104].mxu0 %v3023_v37  ;;  %v16856_v37 = vld [vmem:[%s20962_s1 + $0x1c10] sm:$0xff]  }
 0x364   :  { %15539 = vmatpush3.bf16.msra.mxu0 %v16815_v40  ;;  %12493 = vmatprep.mubr.bf16.mxu0 %v3044_v49  ;;  %v16857_v38 = vld [vmem:[%s20962_s1 + $0x1c90] sm:$0xff]   ;;  %v16859_v40 = vld [vmem:[%s20962_s1 + $0x1cd8] sm:$0xff]   ;;  %v16867_v49 = vld [vmem:[%s20962_s1 + $0x1ce8] sm:$0xff]  }
 0x365   :  { %12454 = vmatmul.mubr.bf16.vlgmr.msra.gmra.mrb[104].mxu1 %v3045_v45  ;;  %15540 = vmatprep.subr.bf16.mxu0 %v16817_v46  ;;  %v16863_v45 = vld [vmem:[%s20962_s1 + $0x1ce0] sm:$0xff]  }
 0x366   :  { %15561 = vmatpush3.bf16.msra.mxu1 %v16816_v43  ;;  %12533 = vmatprep.mubr.bf16.mxu1 %v3048_v52  ;;  %v16861_v43 = vld [vmem:[%s20962_s1 + $0x1c98] sm:$0xff]   ;;  %v16864_v46 = vld [vmem:[%s20962_s1 + $0x1c20] sm:$0xff]  }
 0x367   :  { %15562 = vmatprep.subr.bf16.mxu1 %v16818_v48  ;;  %v16866_v48 = vld [vmem:[%s20962_s1 + $0x1c68] sm:$0xff]  }
 0x368   :  { %15541 = vmatpush3.bf16.msra.mxu0 %v16819_v50 }
 0x369   :  { %15542 = vmatprep.subr.bf16.mxu0 %v16821_v53  ;;  %v16870_v53 = vld [vmem:[%s20962_s1 + $0x1c70] sm:$0xff]  }
 0x36a   :  { %15563 = vmatpush3.bf16.msra.mxu1 %v16820_v51  ;;  %v16868_v51 = vld [vmem:[%s20962_s1 + $0x1c28] sm:$0xff]  }
 0x36b   :  { %15564 = vmatprep.subr.bf16.mxu1 %v16822_v54 }
 0x36c   :  { %15543 = vmatpush3.bf16.msra.mxu0 %v16823_v55 }
 0x36d   :  { %15544 = vmatprep.subr.bf16.mxu0 %v16825_v57 }
 0x36e   :  { %15565 = vmatpush3.bf16.msra.mxu1 %v16824_v56 }
 0x36f   :  { %15566 = vmatprep.subr.bf16.mxu1 %v16826_v58  ;;  %v16869_v58 = vld [vmem:[%s20962_s1 + $0x1ca8] sm:$0xff]  }
 0x370   :  { %15545 = vmatpush3.bf16.msra.mxu0 %v16827_v59 }
 0x371   :  { %15546 = vmatprep.subr.bf16.mxu0 %v16829_v61 }
 0x372   :  { %15567 = vmatpush3.bf16.msra.mxu1 %v16828_v60  ;;  %v16871_v60 = vld [vmem:[%s20962_s1 + $0x1cf0] sm:$0xff]  }
 0x373   :  { %15568 = vmatprep.subr.bf16.mxu1 %v16830_v62 }
 0x374   :  { %15547 = vmatpush3.bf16.msra.mxu0 %v16831_v63 }
 0x375   :  { %15548 = vmatprep.subr.bf16.mxu0 %v16833_v1 }
 0x376   :  { %v15246_v3 = vpop.f32.mrb[80].mxu0  ;;  %15569 = vmatpush3.bf16.msra.mxu1 %v16832_v0  ;;  %v16872_v0 = vld [vmem:[%s20962_s1 + $0x1c30] sm:$0xff]  }
 0x377   :  { %v15247_v5 = vpop.f32.mrb[81].mxu0  ;;  %15570 = vmatprep.subr.bf16.mxu1 %v16834_v2  ;;  %v16874_v2 = vld [vmem:[%s20962_s1 + $0x1c78] sm:$0xff]  }
 0x378   :  { %v15268_v7 = vpop.f32.mrb[80].mxu1  ;;  %v15248_v8 = vadd.f32 %v15247_v5, %v15246_v3  ;;  %v15249_v9 = vpop.f32.mrb[82].mxu0  ;;  %15549 = vmatpush3.bf16.msra.mxu0 %v16835_v4  ;;  %v16873_v4 = vld [vmem:[%s20962_s1 + $0x1cb0] sm:$0xff]   ;;  %v16875_v5 = vld [vmem:[%s20962_s1 + $0x1cf8] sm:$0xff]  }
 0x379   :  { %v15269_v12 = vpop.f32.mrb[81].mxu1  ;;  %v15250_v13 = vpop.f32.mrb[83].mxu0  ;;  %15550 = vmatprep.subr.bf16.mxu0 %v16837_v10  ;;  %v16878_v9 = vld [vmem:[%s20962_s1 + $0x1d40] sm:$0xff]  }
 0x37a   :  { %v11936_v14 = vadd.f32 %v15248_v8, %v19976_v27  ;;  %v15270_v15 = vadd.f32 %v15269_v12, %v15268_v7  ;;  %v15271_v16 = vpop.f32.mrb[82].mxu1  ;;  %15571 = vmatpush3.bf16.msra.mxu1 %v16836_v6  ;;  %v16847_v27 = vld [vmem:[%s20962_s1 + $0x1cc0] sm:$0xff]   ;;  %v16876_v6 = vld [vmem:[%s20962_s1 + $0x1c38] sm:$0xff]   ;;  %v30_v7 = vld [vmem:[%s20961_s0 + $0x70] sm:$0xff] }
 0x37b   :  { %v15272_v18 = vpop.f32.mrb[83].mxu1  ;;  %15572 = vmatprep.subr.bf16.mxu1 %v16838_v11  ;;  %v3056_v8 = vrot.slane %v30_v7, %v17257_v41  ;;  %v3049_v10 = vcombine.high %v30_v7, %v30_v7  ;;  %v16877_v11 = vld [vmem:[%s20962_s1 + $0x1cb8] sm:$0xff]   ;;  %v16880_v16 = vld [vmem:[%s20962_s1 + $0x1d00] sm:$0xff]   ;;  %v16915_v7 = vld [vmem:[%s20962_s1 + $0x1e48] sm:$0xff]  }
 0x37c   :  { %v20087_v20 = vadd.f32 %v15270_v15, %v11936_v14  ;;  %15551 = vmatpush3.bf16.msra.mxu0 %v16839_v17  ;;  %v16879_v14 = vld [vmem:[%s20962_s1 + $0x1dc0] sm:$0xff]  }
 0x37d   :  { %15552 = vmatprep.subr.bf16.mxu0 %v16841_v21  ;;  %v3064_v12 = vcombine.high %v3056_v8, %v3056_v8  ;;  %v3072_v13 = vrot.slane %v3056_v8, %v17257_v41  ;;  %v20214_v15 = vrot.slane %v3049_v10, %v17257_v41  ;;  %v16881_v18 = vld [vmem:[%s20962_s1 + $0x1d80] sm:$0xff]   ;;  %v16882_v21 = vld [vmem:[%s20962_s1 + $0x1d48] sm:$0xff]  }
 0x37e   :  { %15573 = vmatpush3.bf16.msra.mxu1 %v16840_v19  ;;  %v16916_v8 = vld [vmem:[%s20962_s1 + $0x1ec8] sm:$0xff]  }
 0x37f   :  { %15574 = vmatprep.subr.bf16.mxu1 %v16842_v22  ;;  %v3086_v17 = vrot.slane %v3064_v12, %v17257_v41  ;;  %v3065_v19 = vcombine.high %v20214_v15, %v20214_v15  ;;  %v16918_v10 = vld [vmem:[%s20962_s1 + $0x1e88] sm:$0xff]   ;;  %v16920_v12 = vld [vmem:[%s20962_s1 + $0x1ed0] sm:$0xff]  }
 0x380   :  { %15553 = vmatpush3.bf16.msra.mxu0 %v16843_v23  ;;  %v16883_v23 = vld [vmem:[%s20962_s1 + $0x1dc8] sm:$0xff]  }
 0x381   :  { %15582 = vmatprep.subr.bf16.mxu0 %v16846_v26  ;;  %v3096_v22 = vcombine.high %v3086_v17, %v3086_v17  ;;  %v16885_v26 = vld [vmem:[%s20962_s1 + $0x1d88] sm:$0xff]  }
 0x382   :  { %15575 = vmatpush3.bf16.msra.mxu1 %v16844_v24  ;;  %v3093_v24 = vrot.slane %v3065_v19, %v17257_v41  ;;  %v16927_v19 = vld [vmem:[%s20962_s1 + $0x1e60] sm:$0xff]  }
 0x383   :  { %12494 = vmatmul.mubr.bf16.vlgmr.msra.gmra.mrb[108].mxu0 %v3030_v25  ;;  %15604 = vmatprep.subr.bf16.mxu1 %v16847_v27  ;;  %v16884_v25 = vld [vmem:[%s20962_s1 + $0x1d08] sm:$0xff]  }
 0x384   :  { %15583 = vmatpush3.bf16.msra.mxu0 %v16848_v28  ;;  %12573 = vmatprep.mubr.bf16.mxu0 %v3086_v17  ;;  %v3097_v27 = vcombine.high %v3093_v24, %v3093_v24  ;;  %v16886_v28 = vld [vmem:[%s20962_s1 + $0x1d50] sm:$0xff]   ;;  %v16925_v17 = vld [vmem:[%s20962_s1 + $0x1e18] sm:$0xff]  }
 0x385   :  { %12534 = vmatmul.mubr.bf16.vlgmr.msra.gmra.mrb[108].mxu1 %v3046_v30  ;;  %15584 = vmatprep.subr.bf16.mxu0 %v16850_v31  ;;  %v16888_v30 = vld [vmem:[%s20962_s1 + $0x1d10] sm:$0xff]  }
 0x386   :  { %15605 = vmatpush3.bf16.msra.mxu1 %v16849_v29  ;;  %12613 = vmatprep.mubr.bf16.mxu1 %v3096_v22  ;;  %v16887_v29 = vld [vmem:[%s20962_s1 + $0x1dd0] sm:$0xff]   ;;  %v16930_v22 = vld [vmem:[%s20962_s1 + $0x1ea0] sm:$0xff]  }
 0x387   :  { %15606 = vmatprep.subr.bf16.mxu1 %v16851_v32  ;;  %v16889_v31 = vld [vmem:[%s20962_s1 + $0x1d90] sm:$0xff]   ;;  %v16890_v32 = vld [vmem:[%s20962_s1 + $0x1d58] sm:$0xff]  }
 0x388   :  { %15585 = vmatpush3.bf16.msra.mxu0 %v16852_v33  ;;  %v16891_v33 = vld [vmem:[%s20962_s1 + $0x1dd8] sm:$0xff]  }
 0x389   :  { %15586 = vmatprep.subr.bf16.mxu0 %v16854_v35  ;;  %v16893_v35 = vld [vmem:[%s20962_s1 + $0x1d98] sm:$0xff]  }
 0x38a   :  { %15607 = vmatpush3.bf16.msra.mxu1 %v16853_v34  ;;  %v16892_v34 = vld [vmem:[%s20962_s1 + $0x1d18] sm:$0xff]  }
 0x38b   :  { %15608 = vmatprep.subr.bf16.mxu1 %v16855_v36  ;;  %v16894_v36 = vld [vmem:[%s20962_s1 + $0x1d60] sm:$0xff]  }
 0x38c   :  { %15587 = vmatpush3.bf16.msra.mxu0 %v16856_v37  ;;  %v16895_v37 = vld [vmem:[%s20962_s1 + $0x1de0] sm:$0xff]  }
 0x38d   :  { %15588 = vmatprep.subr.bf16.mxu0 %v16858_v39  ;;  %v16897_v39 = vld [vmem:[%s20962_s1 + $0x1da0] sm:$0xff]  }
 0x38e   :  { %15609 = vmatpush3.bf16.msra.mxu1 %v16857_v38  ;;  %v16896_v38 = vld [vmem:[%s20962_s1 + $0x1d20] sm:$0xff]  }
 0x38f   :  { %15610 = vmatprep.subr.bf16.mxu1 %v16859_v40  ;;  %v16898_v40 = vld [vmem:[%s20962_s1 + $0x1d68] sm:$0xff]  }
 0x390   :  { %15589 = vmatpush3.bf16.msra.mxu0 %v16860_v42  ;;  %v16899_v42 = vld [vmem:[%s20962_s1 + $0x1de8] sm:$0xff]  }
 0x391   :  { %15590 = vmatprep.subr.bf16.mxu0 %v16862_v44  ;;  %v16900_v44 = vld [vmem:[%s20962_s1 + $0x1d28] sm:$0xff]  }
 0x392   :  { %15611 = vmatpush3.bf16.msra.mxu1 %v16861_v43 }
 0x393   :  { %15612 = vmatprep.subr.bf16.mxu1 %v16863_v45 }
 0x394   :  { %15591 = vmatpush3.bf16.msra.mxu0 %v16864_v46  ;;  %v16901_v46 = vld [vmem:[%s20962_s1 + $0x1da8] sm:$0xff]  }
 0x395   :  { %15592 = vmatprep.subr.bf16.mxu0 %v16866_v48 }
 0x396   :  { %v15290_v50 = vpop.f32.mrb[84].mxu0  ;;  %15613 = vmatpush3.bf16.msra.mxu1 %v16865_v47 }
 0x397   :  { %v15291_v52 = vpop.f32.mrb[85].mxu0  ;;  %15614 = vmatprep.subr.bf16.mxu1 %v16867_v49 }
 0x398   :  { %v15312_v54 = vpop.f32.mrb[84].mxu1  ;;  %v15292_v55 = vadd.f32 %v15291_v52, %v15290_v50  ;;  %v15293_v56 = vpop.f32.mrb[86].mxu0  ;;  %15593 = vmatpush3.bf16.msra.mxu0 %v16868_v51  ;;  %v16902_v50 = vld [vmem:[%s20962_s1 + $0x1d70] sm:$0xff]  }
 0x399   :  { %v15313_v57 = vpop.f32.mrb[85].mxu1  ;;  %v15294_v59 = vpop.f32.mrb[87].mxu0  ;;  %15594 = vmatprep.subr.bf16.mxu0 %v16870_v53  ;;  %v16903_v51 = vld [vmem:[%s20962_s1 + $0x1df0] sm:$0xff]  }
 0x39a   :  { %v12016_v61 = vadd.f32 %v15292_v55, %v20087_v20  ;;  %v15314_v62 = vadd.f32 %v15313_v57, %v15312_v54  ;;  %v15315_v63 = vpop.f32.mrb[86].mxu1  ;;  %15615 = vmatpush3.bf16.msra.mxu1 %v16869_v58  ;;  %v3094_v20 = vcombine.high %v3072_v13, %v3072_v13  ;;  %v16904_v57 = vld [vmem:[%s20962_s1 + $0x1d30] sm:$0xff]  }
 0x39b   :  { %v15316_v1 = vpop.f32.mrb[87].mxu1  ;;  %15616 = vmatprep.subr.bf16.mxu1 %v16871_v60  ;;  %v16905_v59 = vld [vmem:[%s20962_s1 + $0x1db0] sm:$0xff]   ;;  %v16908_v63 = vld [vmem:[%s20962_s1 + $0x1d38] sm:$0xff]  }
 0x39c   :  { %v20188_v3 = vadd.f32 %v15314_v62, %v12016_v61  ;;  %15595 = vmatpush3.bf16.msra.mxu0 %v16872_v0  ;;  %v16906_v61 = vld [vmem:[%s20962_s1 + $0x1d78] sm:$0xff]   ;;  %v3079_v1 = vrot.slane %v20214_v15, %v17257_v41 }
 0x39d   :  { %15596 = vmatprep.subr.bf16.mxu0 %v16874_v2  ;;  %v16907_v62 = vld [vmem:[%s20962_s1 + $0x1df8] sm:$0xff]   ;;  %v16911_v2 = vld [vmem:[%s20962_s1 + $0x1e40] sm:$0xff]  }
 0x39e   :  { %15617 = vmatpush3.bf16.msra.mxu1 %v16873_v4  ;;  %v16909_v0 = vld [vmem:[%s20962_s1 + $0x1db8] sm:$0xff]   ;;  %v16913_v4 = vld [vmem:[%s20962_s1 + $0x1e00] sm:$0xff]  }
 0x39f   :  { %15618 = vmatprep.subr.bf16.mxu1 %v16875_v5  ;;  %v16914_v5 = vld [vmem:[%s20962_s1 + $0x1e80] sm:$0xff]   ;;  %v16923_v15 = vld [vmem:[%s20962_s1 + $0x1e58] sm:$0xff]  }
 0x3a0   :  { %15597 = vmatpush3.bf16.msra.mxu0 %v16876_v6  ;;  %v3095_v6 = vcombine.high %v3079_v1, %v3079_v1 }
 0x3a1   :  { %15626 = vmatprep.subr.bf16.mxu0 %v16878_v9  ;;  %v16917_v9 = vld [vmem:[%s20962_s1 + $0x1e08] sm:$0xff]  }
 0x3a2   :  { %15619 = vmatpush3.bf16.msra.mxu1 %v16877_v11  ;;  %v16919_v11 = vld [vmem:[%s20962_s1 + $0x1e50] sm:$0xff]  }
 0x3a3   :  { %15648 = vmatprep.subr.bf16.mxu1 %v16879_v14  ;;  %12574 = vmatmul.mubr.bf16.vlgmr.msra.gmra.mrb[112].mxu0 %v3072_v13  ;;  %v16921_v13 = vld [vmem:[%s20962_s1 + $0x1e10] sm:$0xff]  }
 0x3a4   :  { %15627 = vmatpush3.bf16.msra.mxu0 %v16880_v16  ;;  %12653 = vmatprep.mubr.bf16.mxu0 %v3093_v24  ;;  %v16922_v14 = vld [vmem:[%s20962_s1 + $0x1e90] sm:$0xff]   ;;  %v16924_v16 = vld [vmem:[%s20962_s1 + $0x1ed8] sm:$0xff]   ;;  %v16932_v24 = vld [vmem:[%s20962_s1 + $0x1ee8] sm:$0xff]  }
 0x3a5   :  { %12614 = vmatmul.mubr.bf16.vlgmr.msra.gmra.mrb[112].mxu1 %v3094_v20  ;;  %15628 = vmatprep.subr.bf16.mxu0 %v16882_v21  ;;  %v16928_v20 = vld [vmem:[%s20962_s1 + $0x1ee0] sm:$0xff]  }
 0x3a6   :  { %15649 = vmatpush3.bf16.msra.mxu1 %v16881_v18  ;;  %12693 = vmatprep.mubr.bf16.mxu1 %v3097_v27  ;;  %v16926_v18 = vld [vmem:[%s20962_s1 + $0x1e98] sm:$0xff]   ;;  %v16929_v21 = vld [vmem:[%s20962_s1 + $0x1e20] sm:$0xff]  }
 0x3a7   :  { %15650 = vmatprep.subr.bf16.mxu1 %v16883_v23  ;;  %v16931_v23 = vld [vmem:[%s20962_s1 + $0x1e68] sm:$0xff]  }
 0x3a8   :  { %15629 = vmatpush3.bf16.msra.mxu0 %v16884_v25 }
 0x3a9   :  { %15630 = vmatprep.subr.bf16.mxu0 %v16886_v28  ;;  %v16935_v28 = vld [vmem:[%s20962_s1 + $0x1e70] sm:$0xff]  }
 0x3aa   :  { %15651 = vmatpush3.bf16.msra.mxu1 %v16885_v26  ;;  %v16933_v26 = vld [vmem:[%s20962_s1 + $0x1e28] sm:$0xff]  }
 0x3ab   :  { %15652 = vmatprep.subr.bf16.mxu1 %v16887_v29 }
 0x3ac   :  { %15631 = vmatpush3.bf16.msra.mxu0 %v16888_v30 }
 0x3ad   :  { %15632 = vmatprep.subr.bf16.mxu0 %v16890_v32 }
 0x3ae   :  { %15653 = vmatpush3.bf16.msra.mxu1 %v16889_v31 }
 0x3af   :  { %15654 = vmatprep.subr.bf16.mxu1 %v16891_v33  ;;  %v16934_v33 = vld [vmem:[%s20962_s1 + $0x1ea8] sm:$0xff]  }
 0x3b0   :  { %15633 = vmatpush3.bf16.msra.mxu0 %v16892_v34 }
 0x3b1   :  { %15634 = vmatprep.subr.bf16.mxu0 %v16894_v36 }
 0x3b2   :  { %15655 = vmatpush3.bf16.msra.mxu1 %v16893_v35  ;;  %v16936_v35 = vld [vmem:[%s20962_s1 + $0x1ef0] sm:$0xff]  }
 0x3b3   :  { %15656 = vmatprep.subr.bf16.mxu1 %v16895_v37 }
 0x3b4   :  { %15635 = vmatpush3.bf16.msra.mxu0 %v16896_v38 }
 0x3b5   :  { %15636 = vmatprep.subr.bf16.mxu0 %v16898_v40 }
 0x3b6   :  { %v15334_v43 = vpop.f32.mrb[88].mxu0  ;;  %15657 = vmatpush3.bf16.msra.mxu1 %v16897_v39  ;;  %v16937_v39 = vld [vmem:[%s20962_s1 + $0x1e30] sm:$0xff]  }
 0x3b7   :  { %v15335_v45 = vpop.f32.mrb[89].mxu0  ;;  %15658 = vmatprep.subr.bf16.mxu1 %v16899_v42  ;;  %v16939_v42 = vld [vmem:[%s20962_s1 + $0x1e78] sm:$0xff]  }
 0x3b8   :  { %v15356_v47 = vpop.f32.mrb[88].mxu1  ;;  %v15336_v48 = vadd.f32 %v15335_v45, %v15334_v43  ;;  %v15337_v49 = vpop.f32.mrb[90].mxu0  ;;  %15637 = vmatpush3.bf16.msra.mxu0 %v16900_v44  ;;  %v16938_v44 = vld [vmem:[%s20962_s1 + $0x1eb0] sm:$0xff]   ;;  %v16940_v45 = vld [vmem:[%s20962_s1 + $0x1ef8] sm:$0xff]  }
 0x3b9   :  { %v15357_v52 = vpop.f32.mrb[89].mxu1  ;;  %v15338_v53 = vpop.f32.mrb[91].mxu0  ;;  %15638 = vmatprep.subr.bf16.mxu0 %v16902_v50  ;;  %v16943_v49 = vld [vmem:[%s20962_s1 + $0x1f40] sm:$0xff]  }
 0x3ba   :  { %v12096_v54 = vadd.f32 %v15336_v48, %v20188_v3  ;;  %v15358_v55 = vadd.f32 %v15357_v52, %v15356_v47  ;;  %v15359_v56 = vpop.f32.mrb[90].mxu1  ;;  %15659 = vmatpush3.bf16.msra.mxu1 %v16901_v46  ;;  %v16912_v3 = vld [vmem:[%s20962_s1 + $0x1ec0] sm:$0xff]   ;;  %v16941_v46 = vld [vmem:[%s20962_s1 + $0x1e38] sm:$0xff]  }
 0x3bb   :  { %v15360_v58 = vpop.f32.mrb[91].mxu1  ;;  %15660 = vmatprep.subr.bf16.mxu1 %v16903_v51  ;;  %v31_v47 = vld [vmem:[%s20961_s0 + $0x78] sm:$0xff]  ;;  %v16945_v56 = vld [vmem:[%s20962_s1 + $0x1f00] sm:$0xff]  }
 0x3bc   :  { %v20299_v60 = vadd.f32 %v15358_v55, %v12096_v54  ;;  %15639 = vmatpush3.bf16.msra.mxu0 %v16904_v57  ;;  %v3105_v48 = vrot.slane %v31_v47, %v17257_v41  ;;  %v3098_v50 = vcombine.high %v31_v47, %v31_v47  ;;  %v16942_v51 = vld [vmem:[%s20962_s1 + $0x1eb8] sm:$0xff]   ;;  %v16944_v54 = vld [vmem:[%s20962_s1 + $0x1fc0] sm:$0xff]   ;;  %v16980_v47 = vld [vmem:[%s20962_s1 + $0x2048] sm:$0xff]  }
 0x3bd   :  { %15640 = vmatprep.subr.bf16.mxu0 %v16906_v61  ;;  %v16946_v58 = vld [vmem:[%s20962_s1 + $0x1f80] sm:$0xff]   ;;  %v16947_v61 = vld [vmem:[%s20962_s1 + $0x1f48] sm:$0xff]  }
 0x3be   :  { %15661 = vmatpush3.bf16.msra.mxu1 %v16905_v59  ;;  %v3113_v52 = vcombine.high %v3105_v48, %v3105_v48  ;;  %v3121_v53 = vrot.slane %v3105_v48, %v17257_v41  ;;  %v20426_v55 = vrot.slane %v3098_v50, %v17257_v41  ;;  %v16981_v48 = vld [vmem:[%s20962_s1 + $0x20c8] sm:$0xff]  }
 0x3bf   :  { %15662 = vmatprep.subr.bf16.mxu1 %v16907_v62  ;;  %v16983_v50 = vld [vmem:[%s20962_s1 + $0x2088] sm:$0xff]  }
 0x3c0   :  { %15641 = vmatpush3.bf16.msra.mxu0 %v16908_v63  ;;  %v3135_v57 = vrot.slane %v3113_v52, %v17257_v41  ;;  %v3114_v59 = vcombine.high %v20426_v55, %v20426_v55  ;;  %v16948_v63 = vld [vmem:[%s20962_s1 + $0x1fc8] sm:$0xff]   ;;  %v16985_v52 = vld [vmem:[%s20962_s1 + $0x20d0] sm:$0xff]  }
 0x3c1   :  { %15670 = vmatprep.subr.bf16.mxu0 %v16911_v2  ;;  %v16950_v2 = vld [vmem:[%s20962_s1 + $0x1f88] sm:$0xff]  }
 0x3c2   :  { %15663 = vmatpush3.bf16.msra.mxu1 %v16909_v0  ;;  %v3145_v62 = vcombine.high %v3135_v57, %v3135_v57  ;;  %v3142_v0 = vrot.slane %v3114_v59, %v17257_v41  ;;  %v16992_v59 = vld [vmem:[%s20962_s1 + $0x2060] sm:$0xff]  }
 0x3c3   :  { %12654 = vmatmul.mubr.bf16.vlgmr.msra.gmra.mrb[116].mxu0 %v3079_v1  ;;  %15692 = vmatprep.subr.bf16.mxu1 %v16912_v3  ;;  %v16949_v1 = vld [vmem:[%s20962_s1 + $0x1f08] sm:$0xff]  }
 0x3c4   :  { %15671 = vmatpush3.bf16.msra.mxu0 %v16913_v4  ;;  %12733 = vmatprep.mubr.bf16.mxu0 %v3135_v57  ;;  %v3146_v3 = vcombine.high %v3142_v0, %v3142_v0  ;;  %v16951_v4 = vld [vmem:[%s20962_s1 + $0x1f50] sm:$0xff]   ;;  %v16990_v57 = vld [vmem:[%s20962_s1 + $0x2018] sm:$0xff]  }
 0x3c5   :  { %12694 = vmatmul.mubr.bf16.vlgmr.msra.gmra.mrb[116].mxu1 %v3095_v6  ;;  %15672 = vmatprep.subr.bf16.mxu0 %v16915_v7  ;;  %v16953_v6 = vld [vmem:[%s20962_s1 + $0x1f10] sm:$0xff]  }
 0x3c6   :  { %15693 = vmatpush3.bf16.msra.mxu1 %v16914_v5  ;;  %12773 = vmatprep.mubr.bf16.mxu1 %v3145_v62  ;;  %v16952_v5 = vld [vmem:[%s20962_s1 + $0x1fd0] sm:$0xff]   ;;  %v16995_v62 = vld [vmem:[%s20962_s1 + $0x20a0] sm:$0xff]  }
 0x3c7   :  { %15694 = vmatprep.subr.bf16.mxu1 %v16916_v8  ;;  %v16954_v7 = vld [vmem:[%s20962_s1 + $0x1f90] sm:$0xff]   ;;  %v16955_v8 = vld [vmem:[%s20962_s1 + $0x1f58] sm:$0xff]  }
 0x3c8   :  { %15673 = vmatpush3.bf16.msra.mxu0 %v16917_v9  ;;  %v16956_v9 = vld [vmem:[%s20962_s1 + $0x1fd8] sm:$0xff]  }
 0x3c9   :  { %15674 = vmatprep.subr.bf16.mxu0 %v16919_v11  ;;  %v16958_v11 = vld [vmem:[%s20962_s1 + $0x1f98] sm:$0xff]  }
 0x3ca   :  { %15695 = vmatpush3.bf16.msra.mxu1 %v16918_v10  ;;  %v16957_v10 = vld [vmem:[%s20962_s1 + $0x1f18] sm:$0xff]  }
 0x3cb   :  { %15696 = vmatprep.subr.bf16.mxu1 %v16920_v12  ;;  %v16959_v12 = vld [vmem:[%s20962_s1 + $0x1f60] sm:$0xff]  }
 0x3cc   :  { %15675 = vmatpush3.bf16.msra.mxu0 %v16921_v13  ;;  %v16960_v13 = vld [vmem:[%s20962_s1 + $0x1fe0] sm:$0xff]  }
 0x3cd   :  { %15676 = vmatprep.subr.bf16.mxu0 %v16923_v15  ;;  %v16962_v15 = vld [vmem:[%s20962_s1 + $0x1fa0] sm:$0xff]  }
 0x3ce   :  { %15697 = vmatpush3.bf16.msra.mxu1 %v16922_v14  ;;  %v16961_v14 = vld [vmem:[%s20962_s1 + $0x1f20] sm:$0xff]  }
 0x3cf   :  { %15698 = vmatprep.subr.bf16.mxu1 %v16924_v16  ;;  %v16963_v16 = vld [vmem:[%s20962_s1 + $0x1f68] sm:$0xff]  }
 0x3d0   :  { %15677 = vmatpush3.bf16.msra.mxu0 %v16925_v17  ;;  %v16964_v17 = vld [vmem:[%s20962_s1 + $0x1fe8] sm:$0xff]  }
 0x3d1   :  { %15678 = vmatprep.subr.bf16.mxu0 %v16927_v19  ;;  %v16965_v19 = vld [vmem:[%s20962_s1 + $0x1f28] sm:$0xff]  }
 0x3d2   :  { %15699 = vmatpush3.bf16.msra.mxu1 %v16926_v18 }
 0x3d3   :  { %15700 = vmatprep.subr.bf16.mxu1 %v16928_v20 }
 0x3d4   :  { %15679 = vmatpush3.bf16.msra.mxu0 %v16929_v21  ;;  %v16966_v21 = vld [vmem:[%s20962_s1 + $0x1fa8] sm:$0xff]  }
 0x3d5   :  { %15680 = vmatprep.subr.bf16.mxu0 %v16931_v23 }
 0x3d6   :  { %v15378_v25 = vpop.f32.mrb[92].mxu0  ;;  %15701 = vmatpush3.bf16.msra.mxu1 %v16930_v22 }
 0x3d7   :  { %v15379_v27 = vpop.f32.mrb[93].mxu0  ;;  %15702 = vmatprep.subr.bf16.mxu1 %v16932_v24 }
 0x3d8   :  { %v15400_v29 = vpop.f32.mrb[92].mxu1  ;;  %v15380_v30 = vadd.f32 %v15379_v27, %v15378_v25  ;;  %v15381_v31 = vpop.f32.mrb[94].mxu0  ;;  %15681 = vmatpush3.bf16.msra.mxu0 %v16933_v26  ;;  %v16967_v25 = vld [vmem:[%s20962_s1 + $0x1f70] sm:$0xff]  }
 0x3d9   :  { %v15401_v32 = vpop.f32.mrb[93].mxu1  ;;  %v15382_v34 = vpop.f32.mrb[95].mxu0  ;;  %15682 = vmatprep.subr.bf16.mxu0 %v16935_v28  ;;  %v16968_v26 = vld [vmem:[%s20962_s1 + $0x1ff0] sm:$0xff]  }
 0x3da   :  { %v12176_v36 = vadd.f32 %v15380_v30, %v20299_v60  ;;  %v15402_v37 = vadd.f32 %v15401_v32, %v15400_v29  ;;  %v15403_v38 = vpop.f32.mrb[94].mxu1  ;;  %15703 = vmatpush3.bf16.msra.mxu1 %v16934_v33  ;;  %v3143_v60 = vcombine.high %v3121_v53, %v3121_v53  ;;  %v16969_v32 = vld [vmem:[%s20962_s1 + $0x1f30] sm:$0xff]  }
 0x3db   :  { %v15404_v40 = vpop.f32.mrb[95].mxu1  ;;  %15704 = vmatprep.subr.bf16.mxu1 %v16936_v35  ;;  %v16970_v34 = vld [vmem:[%s20962_s1 + $0x1fb0] sm:$0xff]   ;;  %v16973_v38 = vld [vmem:[%s20962_s1 + $0x1f38] sm:$0xff]  }
 0x3dc   :  { %v20400_v43 = vadd.f32 %v15402_v37, %v12176_v36  ;;  %15683 = vmatpush3.bf16.msra.mxu0 %v16937_v39  ;;  %v16971_v36 = vld [vmem:[%s20962_s1 + $0x1f78] sm:$0xff]   ;;  %v3128_v40 = vrot.slane %v20426_v55, %v17257_v41 }
 0x3dd   :  { %15684 = vmatprep.subr.bf16.mxu0 %v16939_v42  ;;  %v16972_v37 = vld [vmem:[%s20962_s1 + $0x1ff8] sm:$0xff]   ;;  %v16976_v42 = vld [vmem:[%s20962_s1 + $0x2040] sm:$0xff]  }
 0x3de   :  { %15705 = vmatpush3.bf16.msra.mxu1 %v16938_v44  ;;  %v16974_v39 = vld [vmem:[%s20962_s1 + $0x1fb8] sm:$0xff]   ;;  %v16978_v44 = vld [vmem:[%s20962_s1 + $0x2000] sm:$0xff]  }
 0x3df   :  { %15706 = vmatprep.subr.bf16.mxu1 %v16940_v45  ;;  %v16979_v45 = vld [vmem:[%s20962_s1 + $0x2080] sm:$0xff]   ;;  %v16988_v55 = vld [vmem:[%s20962_s1 + $0x2058] sm:$0xff]  }
 0x3e0   :  { %15685 = vmatpush3.bf16.msra.mxu0 %v16941_v46  ;;  %v3144_v46 = vcombine.high %v3128_v40, %v3128_v40 }
 0x3e1   :  { %15714 = vmatprep.subr.bf16.mxu0 %v16943_v49  ;;  %v16982_v49 = vld [vmem:[%s20962_s1 + $0x2008] sm:$0xff]  }
 0x3e2   :  { %15707 = vmatpush3.bf16.msra.mxu1 %v16942_v51  ;;  %v16984_v51 = vld [vmem:[%s20962_s1 + $0x2050] sm:$0xff]  }
 0x3e3   :  { %15736 = vmatprep.subr.bf16.mxu1 %v16944_v54  ;;  %12734 = vmatmul.mubr.bf16.vlgmr.msra.gmra.mrb[120].mxu0 %v3121_v53  ;;  %v16986_v53 = vld [vmem:[%s20962_s1 + $0x2010] sm:$0xff]  }
 0x3e4   :  { %15715 = vmatpush3.bf16.msra.mxu0 %v16945_v56  ;;  %12813 = vmatprep.mubr.bf16.mxu0 %v3142_v0  ;;  %v16987_v54 = vld [vmem:[%s20962_s1 + $0x2090] sm:$0xff]   ;;  %v16989_v56 = vld [vmem:[%s20962_s1 + $0x20d8] sm:$0xff]   ;;  %v16997_v0 = vld [vmem:[%s20962_s1 + $0x20e8] sm:$0xff]  }
 0x3e5   :  { %12774 = vmatmul.mubr.bf16.vlgmr.msra.gmra.mrb[120].mxu1 %v3143_v60  ;;  %15716 = vmatprep.subr.bf16.mxu0 %v16947_v61  ;;  %v16993_v60 = vld [vmem:[%s20962_s1 + $0x20e0] sm:$0xff]  }
 0x3e6   :  { %15737 = vmatpush3.bf16.msra.mxu1 %v16946_v58  ;;  %12853 = vmatprep.mubr.bf16.mxu1 %v3146_v3  ;;  %v16991_v58 = vld [vmem:[%s20962_s1 + $0x2098] sm:$0xff]   ;;  %v16994_v61 = vld [vmem:[%s20962_s1 + $0x2020] sm:$0xff]  }
 0x3e7   :  { %15738 = vmatprep.subr.bf16.mxu1 %v16948_v63  ;;  %v16996_v63 = vld [vmem:[%s20962_s1 + $0x2068] sm:$0xff]  }
 0x3e8   :  { %15717 = vmatpush3.bf16.msra.mxu0 %v16949_v1 }
 0x3e9   :  { %15718 = vmatprep.subr.bf16.mxu0 %v16951_v4  ;;  %v17000_v4 = vld [vmem:[%s20962_s1 + $0x2070] sm:$0xff]  }
 0x3ea   :  { %15739 = vmatpush3.bf16.msra.mxu1 %v16950_v2  ;;  %v16998_v2 = vld [vmem:[%s20962_s1 + $0x2028] sm:$0xff]  }
 0x3eb   :  { %15740 = vmatprep.subr.bf16.mxu1 %v16952_v5 }
 0x3ec   :  { %15719 = vmatpush3.bf16.msra.mxu0 %v16953_v6 }
 0x3ed   :  { %15720 = vmatprep.subr.bf16.mxu0 %v16955_v8 }
 0x3ee   :  { %15741 = vmatpush3.bf16.msra.mxu1 %v16954_v7 }
 0x3ef   :  { %15742 = vmatprep.subr.bf16.mxu1 %v16956_v9  ;;  %v16999_v9 = vld [vmem:[%s20962_s1 + $0x20a8] sm:$0xff]  }
 0x3f0   :  { %15721 = vmatpush3.bf16.msra.mxu0 %v16957_v10 }
 0x3f1   :  { %15722 = vmatprep.subr.bf16.mxu0 %v16959_v12 }
 0x3f2   :  { %15743 = vmatpush3.bf16.msra.mxu1 %v16958_v11  ;;  %v17001_v11 = vld [vmem:[%s20962_s1 + $0x20f0] sm:$0xff]  }
 0x3f3   :  { %15744 = vmatprep.subr.bf16.mxu1 %v16960_v13 }
 0x3f4   :  { %15723 = vmatpush3.bf16.msra.mxu0 %v16961_v14 }
 0x3f5   :  { %15724 = vmatprep.subr.bf16.mxu0 %v16963_v16 }
 0x3f6   :  { %v15422_v18 = vpop.f32.mrb[96].mxu0  ;;  %15745 = vmatpush3.bf16.msra.mxu1 %v16962_v15  ;;  %v17002_v15 = vld [vmem:[%s20962_s1 + $0x2030] sm:$0xff]  }
 0x3f7   :  { %v15423_v20 = vpop.f32.mrb[97].mxu0  ;;  %15746 = vmatprep.subr.bf16.mxu1 %v16964_v17  ;;  %v17004_v17 = vld [vmem:[%s20962_s1 + $0x2078] sm:$0xff]  }
 0x3f8   :  { %v15444_v22 = vpop.f32.mrb[96].mxu1  ;;  %v15424_v23 = vadd.f32 %v15423_v20, %v15422_v18  ;;  %v15425_v24 = vpop.f32.mrb[98].mxu0  ;;  %15725 = vmatpush3.bf16.msra.mxu0 %v16965_v19  ;;  %v17003_v19 = vld [vmem:[%s20962_s1 + $0x20b0] sm:$0xff]   ;;  %v17005_v20 = vld [vmem:[%s20962_s1 + $0x20f8] sm:$0xff]  }
 0x3f9   :  { %v15445_v27 = vpop.f32.mrb[97].mxu1  ;;  %v15426_v28 = vpop.f32.mrb[99].mxu0  ;;  %15726 = vmatprep.subr.bf16.mxu0 %v16967_v25  ;;  %v17008_v24 = vld [vmem:[%s20962_s1 + $0x2140] sm:$0xff]  }
 0x3fa   :  { %v12256_v29 = vadd.f32 %v15424_v23, %v20400_v43  ;;  %v15446_v30 = vadd.f32 %v15445_v27, %v15444_v22  ;;  %v15447_v31 = vpop.f32.mrb[98].mxu1  ;;  %15747 = vmatpush3.bf16.msra.mxu1 %v16966_v21  ;;  %v16977_v43 = vld [vmem:[%s20962_s1 + $0x20c0] sm:$0xff]   ;;  %v17006_v21 = vld [vmem:[%s20962_s1 + $0x2038] sm:$0xff]  }
 0x3fb   :  { %v15448_v33 = vpop.f32.mrb[99].mxu1  ;;  %15748 = vmatprep.subr.bf16.mxu1 %v16968_v26  ;;  %v32_v22 = vld [vmem:[%s20961_s0 + $0x80] sm:$0xff]  ;;  %v17007_v26 = vld [vmem:[%s20962_s1 + $0x20b8] sm:$0xff]  }
 0x3fc   :  { %v20511_v35 = vadd.f32 %v15446_v30, %v12256_v29  ;;  %15727 = vmatpush3.bf16.msra.mxu0 %v16969_v32  ;;  %v3154_v23 = vrot.slane %v32_v22, %v17257_v41  ;;  %v3147_v25 = vcombine.high %v32_v22, %v32_v22  ;;  %v17009_v29 = vld [vmem:[%s20962_s1 + $0x21c0] sm:$0xff]   ;;  %v17045_v22 = vld [vmem:[%s20962_s1 + $0x2248] sm:$0xff]  }
 0x3fd   :  { %15728 = vmatprep.subr.bf16.mxu0 %v16971_v36  ;;  %v17010_v31 = vld [vmem:[%s20962_s1 + $0x2100] sm:$0xff]   ;;  %v17012_v36 = vld [vmem:[%s20962_s1 + $0x2148] sm:$0xff]  }
 0x3fe   :  { %15749 = vmatpush3.bf16.msra.mxu1 %v16970_v34  ;;  %v3162_v27 = vcombine.high %v3154_v23, %v3154_v23  ;;  %v3170_v28 = vrot.slane %v3154_v23, %v17257_v41  ;;  %v20638_v30 = vrot.slane %v3147_v25, %v17257_v41  ;;  %v17011_v33 = vld [vmem:[%s20962_s1 + $0x2180] sm:$0xff]   ;;  %v17046_v23 = vld [vmem:[%s20962_s1 + $0x22c8] sm:$0xff]  }
 0x3ff   :  { %15750 = vmatprep.subr.bf16.mxu1 %v16972_v37  ;;  %v17048_v25 = vld [vmem:[%s20962_s1 + $0x2288] sm:$0xff]  }
 0x400   :  { %15729 = vmatpush3.bf16.msra.mxu0 %v16973_v38  ;;  %v3184_v32 = vrot.slane %v3162_v27, %v17257_v41  ;;  %v3163_v34 = vcombine.high %v20638_v30, %v20638_v30  ;;  %v17013_v38 = vld [vmem:[%s20962_s1 + $0x21c8] sm:$0xff]   ;;  %v17050_v27 = vld [vmem:[%s20962_s1 + $0x22d0] sm:$0xff]  }
 0x401   :  { %15758 = vmatprep.subr.bf16.mxu0 %v16976_v42  ;;  %v17015_v42 = vld [vmem:[%s20962_s1 + $0x2188] sm:$0xff]  }
 0x402   :  { %15751 = vmatpush3.bf16.msra.mxu1 %v16974_v39  ;;  %v3194_v37 = vcombine.high %v3184_v32, %v3184_v32  ;;  %v3191_v39 = vrot.slane %v3163_v34, %v17257_v41  ;;  %v17057_v34 = vld [vmem:[%s20962_s1 + $0x2260] sm:$0xff]  }
 0x403   :  { %12814 = vmatmul.mubr.bf16.vlgmr.msra.gmra.mrb[124].mxu0 %v3128_v40  ;;  %15780 = vmatprep.subr.bf16.mxu1 %v16977_v43  ;;  %v17014_v40 = vld [vmem:[%s20962_s1 + $0x2108] sm:$0xff]  }
 0x404   :  { %15759 = vmatpush3.bf16.msra.mxu0 %v16978_v44  ;;  %12893 = vmatprep.mubr.bf16.mxu0 %v3184_v32  ;;  %v3195_v43 = vcombine.high %v3191_v39, %v3191_v39  ;;  %v17016_v44 = vld [vmem:[%s20962_s1 + $0x2150] sm:$0xff]   ;;  %v17055_v32 = vld [vmem:[%s20962_s1 + $0x2218] sm:$0xff]  }
 0x405   :  { %12854 = vmatmul.mubr.bf16.vlgmr.msra.gmra.mrb[124].mxu1 %v3144_v46  ;;  %15760 = vmatprep.subr.bf16.mxu0 %v16980_v47  ;;  %v17018_v46 = vld [vmem:[%s20962_s1 + $0x2110] sm:$0xff]  }
 0x406   :  { %15781 = vmatpush3.bf16.msra.mxu1 %v16979_v45  ;;  %12933 = vmatprep.mubr.bf16.mxu1 %v3194_v37  ;;  %v17017_v45 = vld [vmem:[%s20962_s1 + $0x21d0] sm:$0xff]   ;;  %v17060_v37 = vld [vmem:[%s20962_s1 + $0x22a0] sm:$0xff]  }
 0x407   :  { %15782 = vmatprep.subr.bf16.mxu1 %v16981_v48  ;;  %v17019_v47 = vld [vmem:[%s20962_s1 + $0x2190] sm:$0xff]   ;;  %v17020_v48 = vld [vmem:[%s20962_s1 + $0x2158] sm:$0xff]  }
 0x408   :  { %15761 = vmatpush3.bf16.msra.mxu0 %v16982_v49  ;;  %v17021_v49 = vld [vmem:[%s20962_s1 + $0x21d8] sm:$0xff]  }
 0x409   :  { %15762 = vmatprep.subr.bf16.mxu0 %v16984_v51  ;;  %v17023_v51 = vld [vmem:[%s20962_s1 + $0x2198] sm:$0xff]  }
 0x40a   :  { %15783 = vmatpush3.bf16.msra.mxu1 %v16983_v50  ;;  %v17022_v50 = vld [vmem:[%s20962_s1 + $0x2118] sm:$0xff]  }
 0x40b   :  { %15784 = vmatprep.subr.bf16.mxu1 %v16985_v52  ;;  %v17024_v52 = vld [vmem:[%s20962_s1 + $0x2160] sm:$0xff]  }
 0x40c   :  { %15763 = vmatpush3.bf16.msra.mxu0 %v16986_v53  ;;  %v17025_v53 = vld [vmem:[%s20962_s1 + $0x21e0] sm:$0xff]  }
 0x40d   :  { %15764 = vmatprep.subr.bf16.mxu0 %v16988_v55  ;;  %v17027_v55 = vld [vmem:[%s20962_s1 + $0x21a0] sm:$0xff]  }
 0x40e   :  { %15785 = vmatpush3.bf16.msra.mxu1 %v16987_v54  ;;  %v17026_v54 = vld [vmem:[%s20962_s1 + $0x2120] sm:$0xff]  }
 0x40f   :  { %15786 = vmatprep.subr.bf16.mxu1 %v16989_v56  ;;  %v17028_v56 = vld [vmem:[%s20962_s1 + $0x2168] sm:$0xff]  }
 0x410   :  { %15765 = vmatpush3.bf16.msra.mxu0 %v16990_v57  ;;  %v17029_v57 = vld [vmem:[%s20962_s1 + $0x21e8] sm:$0xff]  }
 0x411   :  { %15766 = vmatprep.subr.bf16.mxu0 %v16992_v59  ;;  %v17030_v59 = vld [vmem:[%s20962_s1 + $0x2128] sm:$0xff]  }
 0x412   :  { %15787 = vmatpush3.bf16.msra.mxu1 %v16991_v58 }
 0x413   :  { %15788 = vmatprep.subr.bf16.mxu1 %v16993_v60 }
 0x414   :  { %15767 = vmatpush3.bf16.msra.mxu0 %v16994_v61  ;;  %v17031_v61 = vld [vmem:[%s20962_s1 + $0x21a8] sm:$0xff]  }
 0x415   :  { %15768 = vmatprep.subr.bf16.mxu0 %v16996_v63 }
 0x416   :  { %v15466_v1 = vpop.f32.mrb[100].mxu0  ;;  %15789 = vmatpush3.bf16.msra.mxu1 %v16995_v62 }
 0x417   :  { %v15467_v3 = vpop.f32.mrb[101].mxu0  ;;  %15790 = vmatprep.subr.bf16.mxu1 %v16997_v0 }
 0x418   :  { %v15488_v5 = vpop.f32.mrb[100].mxu1  ;;  %v15468_v6 = vadd.f32 %v15467_v3, %v15466_v1  ;;  %v15469_v7 = vpop.f32.mrb[102].mxu0  ;;  %15769 = vmatpush3.bf16.msra.mxu0 %v16998_v2  ;;  %v17032_v1 = vld [vmem:[%s20962_s1 + $0x2170] sm:$0xff]  }
 0x419   :  { %v15489_v8 = vpop.f32.mrb[101].mxu1  ;;  %v15470_v10 = vpop.f32.mrb[103].mxu0  ;;  %15770 = vmatprep.subr.bf16.mxu0 %v17000_v4  ;;  %v17033_v2 = vld [vmem:[%s20962_s1 + $0x21f0] sm:$0xff]  }
 0x41a   :  { %v12336_v12 = vadd.f32 %v15468_v6, %v20511_v35  ;;  %v15490_v13 = vadd.f32 %v15489_v8, %v15488_v5  ;;  %v15491_v14 = vpop.f32.mrb[102].mxu1  ;;  %15791 = vmatpush3.bf16.msra.mxu1 %v16999_v9  ;;  %v3192_v35 = vcombine.high %v3170_v28, %v3170_v28  ;;  %v17034_v8 = vld [vmem:[%s20962_s1 + $0x2130] sm:$0xff]  }
 0x41b   :  { %v15492_v16 = vpop.f32.mrb[103].mxu1  ;;  %15792 = vmatprep.subr.bf16.mxu1 %v17001_v11  ;;  %v17035_v10 = vld [vmem:[%s20962_s1 + $0x21b0] sm:$0xff]   ;;  %v17038_v14 = vld [vmem:[%s20962_s1 + $0x2138] sm:$0xff]  }
 0x41c   :  { %v20612_v18 = vadd.f32 %v15490_v13, %v12336_v12  ;;  %15771 = vmatpush3.bf16.msra.mxu0 %v17002_v15  ;;  %v17036_v12 = vld [vmem:[%s20962_s1 + $0x2178] sm:$0xff]   ;;  %v3177_v16 = vrot.slane %v20638_v30, %v17257_v41 }
 0x41d   :  { %15772 = vmatprep.subr.bf16.mxu0 %v17004_v17  ;;  %v17037_v13 = vld [vmem:[%s20962_s1 + $0x21f8] sm:$0xff]   ;;  %v17041_v17 = vld [vmem:[%s20962_s1 + $0x2240] sm:$0xff]  }
 0x41e   :  { %15793 = vmatpush3.bf16.msra.mxu1 %v17003_v19  ;;  %v17039_v15 = vld [vmem:[%s20962_s1 + $0x21b8] sm:$0xff]   ;;  %v17043_v19 = vld [vmem:[%s20962_s1 + $0x2200] sm:$0xff]  }
 0x41f   :  { %15794 = vmatprep.subr.bf16.mxu1 %v17005_v20  ;;  %v17044_v20 = vld [vmem:[%s20962_s1 + $0x2280] sm:$0xff]   ;;  %v17053_v30 = vld [vmem:[%s20962_s1 + $0x2258] sm:$0xff]  }
 0x420   :  { %15773 = vmatpush3.bf16.msra.mxu0 %v17006_v21  ;;  %v3193_v21 = vcombine.high %v3177_v16, %v3177_v16 }
 0x421   :  { %15802 = vmatprep.subr.bf16.mxu0 %v17008_v24  ;;  %v17047_v24 = vld [vmem:[%s20962_s1 + $0x2208] sm:$0xff]  }
 0x422   :  { %15795 = vmatpush3.bf16.msra.mxu1 %v17007_v26  ;;  %v17049_v26 = vld [vmem:[%s20962_s1 + $0x2250] sm:$0xff]  }
 0x423   :  { %15824 = vmatprep.subr.bf16.mxu1 %v17009_v29  ;;  %12894 = vmatmul.mubr.bf16.vlgmr.msra.gmra.mrb[128].mxu0 %v3170_v28  ;;  %v17051_v28 = vld [vmem:[%s20962_s1 + $0x2210] sm:$0xff]  }
 0x424   :  { %15803 = vmatpush3.bf16.msra.mxu0 %v17010_v31  ;;  %12973 = vmatprep.mubr.bf16.mxu0 %v3191_v39  ;;  %v17052_v29 = vld [vmem:[%s20962_s1 + $0x2290] sm:$0xff]   ;;  %v17054_v31 = vld [vmem:[%s20962_s1 + $0x22d8] sm:$0xff]   ;;  %v17062_v39 = vld [vmem:[%s20962_s1 + $0x22e8] sm:$0xff]  }
 0x425   :  { %12934 = vmatmul.mubr.bf16.vlgmr.msra.gmra.mrb[128].mxu1 %v3192_v35  ;;  %15804 = vmatprep.subr.bf16.mxu0 %v17012_v36  ;;  %v17058_v35 = vld [vmem:[%s20962_s1 + $0x22e0] sm:$0xff]  }
 0x426   :  { %15825 = vmatpush3.bf16.msra.mxu1 %v17011_v33  ;;  %13013 = vmatprep.mubr.bf16.mxu1 %v3195_v43  ;;  %v17056_v33 = vld [vmem:[%s20962_s1 + $0x2298] sm:$0xff]   ;;  %v17059_v36 = vld [vmem:[%s20962_s1 + $0x2220] sm:$0xff]  }
 0x427   :  { %15826 = vmatprep.subr.bf16.mxu1 %v17013_v38  ;;  %v17061_v38 = vld [vmem:[%s20962_s1 + $0x2268] sm:$0xff]  }
 0x428   :  { %15805 = vmatpush3.bf16.msra.mxu0 %v17014_v40 }
 0x429   :  { %15806 = vmatprep.subr.bf16.mxu0 %v17016_v44  ;;  %v17065_v44 = vld [vmem:[%s20962_s1 + $0x2270] sm:$0xff]  }
 0x42a   :  { %15827 = vmatpush3.bf16.msra.mxu1 %v17015_v42  ;;  %v17063_v42 = vld [vmem:[%s20962_s1 + $0x2228] sm:$0xff]  }
 0x42b   :  { %15828 = vmatprep.subr.bf16.mxu1 %v17017_v45 }
 0x42c   :  { %15807 = vmatpush3.bf16.msra.mxu0 %v17018_v46 }
 0x42d   :  { %15808 = vmatprep.subr.bf16.mxu0 %v17020_v48 }
 0x42e   :  { %15829 = vmatpush3.bf16.msra.mxu1 %v17019_v47 }
 0x42f   :  { %15830 = vmatprep.subr.bf16.mxu1 %v17021_v49  ;;  %v17064_v49 = vld [vmem:[%s20962_s1 + $0x22a8] sm:$0xff]  }
 0x430   :  { %15809 = vmatpush3.bf16.msra.mxu0 %v17022_v50 }
 0x431   :  { %15810 = vmatprep.subr.bf16.mxu0 %v17024_v52 }
 0x432   :  { %15831 = vmatpush3.bf16.msra.mxu1 %v17023_v51  ;;  %v17066_v51 = vld [vmem:[%s20962_s1 + $0x22f0] sm:$0xff]  }
 0x433   :  { %15832 = vmatprep.subr.bf16.mxu1 %v17025_v53 }
 0x434   :  { %15811 = vmatpush3.bf16.msra.mxu0 %v17026_v54 }
 0x435   :  { %15812 = vmatprep.subr.bf16.mxu0 %v17028_v56 }
 0x436   :  { %v15510_v58 = vpop.f32.mrb[104].mxu0  ;;  %15833 = vmatpush3.bf16.msra.mxu1 %v17027_v55  ;;  %v17067_v55 = vld [vmem:[%s20962_s1 + $0x2230] sm:$0xff]  }
 0x437   :  { %v15511_v60 = vpop.f32.mrb[105].mxu0  ;;  %15834 = vmatprep.subr.bf16.mxu1 %v17029_v57  ;;  %v17069_v57 = vld [vmem:[%s20962_s1 + $0x2278] sm:$0xff]  }
 0x438   :  { %v15532_v62 = vpop.f32.mrb[104].mxu1  ;;  %v15512_v63 = vadd.f32 %v15511_v60, %v15510_v58  ;;  %v15513_v0 = vpop.f32.mrb[106].mxu0  ;;  %15813 = vmatpush3.bf16.msra.mxu0 %v17030_v59  ;;  %v17068_v59 = vld [vmem:[%s20962_s1 + $0x22b0] sm:$0xff]   ;;  %v17070_v60 = vld [vmem:[%s20962_s1 + $0x22f8] sm:$0xff]  }
 0x439   :  { %v15533_v3 = vpop.f32.mrb[105].mxu1  ;;  %v15514_v4 = vpop.f32.mrb[107].mxu0  ;;  %15814 = vmatprep.subr.bf16.mxu0 %v17032_v1  ;;  %v17073_v0 = vld [vmem:[%s20962_s1 + $0x2340] sm:$0xff]  }
 0x43a   :  { %v12416_v5 = vadd.f32 %v15512_v63, %v20612_v18  ;;  %v15534_v6 = vadd.f32 %v15533_v3, %v15532_v62  ;;  %v15535_v7 = vpop.f32.mrb[106].mxu1  ;;  %15835 = vmatpush3.bf16.msra.mxu1 %v17031_v61  ;;  %v17042_v18 = vld [vmem:[%s20962_s1 + $0x22c0] sm:$0xff]   ;;  %v17071_v61 = vld [vmem:[%s20962_s1 + $0x2238] sm:$0xff]   ;;  %v33_v62 = vld [vmem:[%s20961_s0 + $0x88] sm:$0xff] }
 0x43b   :  { %v15536_v9 = vpop.f32.mrb[107].mxu1  ;;  %15836 = vmatprep.subr.bf16.mxu1 %v17033_v2  ;;  %v3203_v63 = vrot.slane %v33_v62, %v17257_v41  ;;  %v3196_v1 = vcombine.high %v33_v62, %v33_v62  ;;  %v17072_v2 = vld [vmem:[%s20962_s1 + $0x22b8] sm:$0xff]  }
 0x43c   :  { %v20723_v11 = vadd.f32 %v15534_v6, %v12416_v5  ;;  %15815 = vmatpush3.bf16.msra.mxu0 %v17034_v8  ;;  %v17074_v5 = vld [vmem:[%s20962_s1 + $0x23c0] sm:$0xff]  }
 0x43d   :  { %15816 = vmatprep.subr.bf16.mxu0 %v17036_v12  ;;  %v3211_v3 = vcombine.high %v3203_v63, %v3203_v63  ;;  %v3219_v4 = vrot.slane %v3203_v63, %v17257_v41  ;;  %v20850_v6 = vrot.slane %v3196_v1, %v17257_v41  ;;  %v17075_v8 = vld [vmem:[%s20962_s1 + $0x2300] sm:$0xff]  }
 0x43e   :  { %15837 = vmatpush3.bf16.msra.mxu1 %v17035_v10 }
 0x43f   :  { %15838 = vmatprep.subr.bf16.mxu1 %v17037_v13  ;;  %v3233_v7 = vrot.slane %v3211_v3, %v17257_v41  ;;  %v3212_v9 = vcombine.high %v20850_v6, %v20850_v6  ;;  %v3241_v10 = vcombine.high %v3219_v4, %v3219_v4  ;;  %v17076_v13 = vld [vmem:[%s20962_s1 + $0x2380] sm:$0xff]  }
 0x440   :  { %15817 = vmatpush3.bf16.msra.mxu0 %v17038_v14 }
 0x441   :  { %15846 = vmatprep.subr.bf16.mxu0 %v17041_v17  ;;  %v3243_v12 = vcombine.high %v3233_v7, %v3233_v7  ;;  %v3240_v14 = vrot.slane %v3212_v9, %v17257_v41 }
 0x442   :  { %15839 = vmatpush3.bf16.msra.mxu1 %v17039_v15  ;;  %v17078_v15 = vld [vmem:[%s20962_s1 + $0x23c8] sm:$0xff]  }
 0x443   :  { %12974 = vmatmul.mubr.bf16.vlgmr.msra.gmra.mrb[132].mxu0 %v3177_v16  ;;  %15868 = vmatprep.subr.bf16.mxu1 %v17042_v18  ;;  %v17079_v16 = vld [vmem:[%s20962_s1 + $0x2308] sm:$0xff]   ;;  %v3244_v17 = vcombine.high %v3240_v14, %v3240_v14  ;;  %v17081_v18 = vld [vmem:[%s20962_s1 + $0x2350] sm:$0xff]  }
 0x444   :  { %15847 = vmatpush3.bf16.msra.mxu0 %v17043_v19  ;;  %13053 = vmatprep.mubr.bf16.mxu0 %v3233_v7  ;;  %v17080_v19 = vld [vmem:[%s20962_s1 + $0x2388] sm:$0xff]  }
 0x445   :  { %13014 = vmatmul.mubr.bf16.vlgmr.msra.gmra.mrb[132].mxu1 %v3193_v21  ;;  %15848 = vmatprep.subr.bf16.mxu0 %v17045_v22  ;;  %v17083_v21 = vld [vmem:[%s20962_s1 + $0x2310] sm:$0xff]   ;;  %v17085_v22 = vld [vmem:[%s20962_s1 + $0x2358] sm:$0xff]  }
 0x446   :  { %15869 = vmatpush3.bf16.msra.mxu1 %v17044_v20  ;;  %13093 = vmatprep.mubr.bf16.mxu1 %v3243_v12  ;;  %v17082_v20 = vld [vmem:[%s20962_s1 + $0x23d0] sm:$0xff]  }
 0x447   :  { %15870 = vmatprep.subr.bf16.mxu1 %v17046_v23  ;;  %v17084_v23 = vld [vmem:[%s20962_s1 + $0x2390] sm:$0xff]  }
 0x448   :  { %15849 = vmatpush3.bf16.msra.mxu0 %v17047_v24  ;;  %v17086_v24 = vld [vmem:[%s20962_s1 + $0x23d8] sm:$0xff]  }
 0x449   :  { %15850 = vmatprep.subr.bf16.mxu0 %v17049_v26  ;;  %v17089_v26 = vld [vmem:[%s20962_s1 + $0x2360] sm:$0xff]  }
 0x44a   :  { %15871 = vmatpush3.bf16.msra.mxu1 %v17048_v25  ;;  %v17087_v25 = vld [vmem:[%s20962_s1 + $0x2318] sm:$0xff]  }
 0x44b   :  { %15872 = vmatprep.subr.bf16.mxu1 %v17050_v27  ;;  %v17088_v27 = vld [vmem:[%s20962_s1 + $0x2398] sm:$0xff]  }
 0x44c   :  { %15851 = vmatpush3.bf16.msra.mxu0 %v17051_v28  ;;  %v17090_v28 = vld [vmem:[%s20962_s1 + $0x23e0] sm:$0xff]  }
 0x44d   :  { %15852 = vmatprep.subr.bf16.mxu0 %v17053_v30  ;;  %v17093_v30 = vld [vmem:[%s20962_s1 + $0x2368] sm:$0xff]  }
 0x44e   :  { %15873 = vmatpush3.bf16.msra.mxu1 %v17052_v29  ;;  %v17091_v29 = vld [vmem:[%s20962_s1 + $0x2320] sm:$0xff]  }
 0x44f   :  { %15874 = vmatprep.subr.bf16.mxu1 %v17054_v31  ;;  %v17092_v31 = vld [vmem:[%s20962_s1 + $0x23a0] sm:$0xff]  }
 0x450   :  { %15853 = vmatpush3.bf16.msra.mxu0 %v17055_v32 }
 0x451   :  { %15854 = vmatprep.subr.bf16.mxu0 %v17057_v34 }
 0x452   :  { %15875 = vmatpush3.bf16.msra.mxu1 %v17056_v33  ;;  %v17094_v33 = vld [vmem:[%s20962_s1 + $0x23e8] sm:$0xff]  }
 0x453   :  { %15876 = vmatprep.subr.bf16.mxu1 %v17058_v35  ;;  %v17095_v35 = vld [vmem:[%s20962_s1 + $0x2328] sm:$0xff]  }
 0x454   :  { %15855 = vmatpush3.bf16.msra.mxu0 %v17059_v36 }
 0x455   :  { %15856 = vmatprep.subr.bf16.mxu0 %v17061_v38 }
 0x456   :  { %v15554_v40 = vpop.f32.mrb[108].mxu0  ;;  %15877 = vmatpush3.bf16.msra.mxu1 %v17060_v37 }
 0x457   :  { %v15555_v43 = vpop.f32.mrb[109].mxu0  ;;  %15878 = vmatprep.subr.bf16.mxu1 %v17062_v39  ;;  %v17096_v39 = vld [vmem:[%s20962_s1 + $0x23a8] sm:$0xff]  }
 0x458   :  { %v15576_v45 = vpop.f32.mrb[108].mxu1  ;;  %v15556_v46 = vadd.f32 %v15555_v43, %v15554_v40  ;;  %v15557_v47 = vpop.f32.mrb[110].mxu0  ;;  %15857 = vmatpush3.bf16.msra.mxu0 %v17063_v42  ;;  %v17097_v40 = vld [vmem:[%s20962_s1 + $0x2370] sm:$0xff]  }
 0x459   :  { %v15577_v48 = vpop.f32.mrb[109].mxu1  ;;  %v15558_v50 = vpop.f32.mrb[111].mxu0  ;;  %15858 = vmatprep.subr.bf16.mxu0 %v17065_v44  ;;  %v17098_v47 = vld [vmem:[%s20962_s1 + $0x23f0] sm:$0xff]  }
 0x45a   :  { %v12496_v52 = vadd.f32 %v15556_v46, %v20723_v11  ;;  %v15578_v53 = vadd.f32 %v15577_v48, %v15576_v45  ;;  %v15579_v54 = vpop.f32.mrb[110].mxu1  ;;  %15879 = vmatpush3.bf16.msra.mxu1 %v17064_v49  ;;  %v17077_v11 = vld [vmem:[%s20962_s1 + $0x2348] sm:$0xff]   ;;  %v17099_v49 = vld [vmem:[%s20962_s1 + $0x2330] sm:$0xff]  }
 0x45b   :  { %v15580_v56 = vpop.f32.mrb[111].mxu1  ;;  %15880 = vmatprep.subr.bf16.mxu1 %v17066_v51  ;;  %v17101_v51 = vld [vmem:[%s20962_s1 + $0x2378] sm:$0xff]  }
 0x45c   :  { %v20824_v58 = vadd.f32 %v15578_v53, %v12496_v52  ;;  %15859 = vmatpush3.bf16.msra.mxu0 %v17067_v55  ;;  %v17100_v52 = vld [vmem:[%s20962_s1 + $0x23b0] sm:$0xff]   ;;  %v17102_v53 = vld [vmem:[%s20962_s1 + $0x23f8] sm:$0xff]  }
 0x45d   :  { %15860 = vmatprep.subr.bf16.mxu0 %v17069_v57  ;;  %v17103_v54 = vld [vmem:[%s20962_s1 + $0x2338] sm:$0xff]  }
 0x45e   :  { %15881 = vmatpush3.bf16.msra.mxu1 %v17068_v59 }
 0x45f   :  { %15882 = vmatprep.subr.bf16.mxu1 %v17070_v60 }
 0x460   :  { %15861 = vmatpush3.bf16.msra.mxu0 %v17071_v61 }
 0x461   :  { %15890 = vmatprep.subr.bf16.mxu0 %v17073_v0 }
 0x462   :  { %15883 = vmatpush3.bf16.msra.mxu1 %v17072_v2 }
 0x463   :  { %15912 = vmatprep.subr.bf16.mxu1 %v17074_v5  ;;  %13054 = vmatmul.mubr.bf16.vlgmr.msra.gmra.mrb[136].mxu0 %v3219_v4 }
 0x464   :  { %15891 = vmatpush3.bf16.msra.mxu0 %v17075_v8  ;;  %13133 = vmatprep.mubr.bf16.mxu0 %v3240_v14 }
 0x465   :  { %13094 = vmatmul.mubr.bf16.vlgmr.msra.gmra.mrb[136].mxu1 %v3241_v10  ;;  %15892 = vmatprep.subr.bf16.mxu0 %v17077_v11 }
 0x466   :  { %15913 = vmatpush3.bf16.msra.mxu1 %v17076_v13  ;;  %13173 = vmatprep.mubr.bf16.mxu1 %v3244_v17 }
 0x467   :  { %15914 = vmatprep.subr.bf16.mxu1 %v17078_v15 }
 0x468   :  { %15893 = vmatpush3.bf16.msra.mxu0 %v17079_v16 }
 0x469   :  { %15894 = vmatprep.subr.bf16.mxu0 %v17081_v18 }
 0x46a   :  { %15915 = vmatpush3.bf16.msra.mxu1 %v17080_v19 }
 0x46b   :  { %15916 = vmatprep.subr.bf16.mxu1 %v17082_v20 }
 0x46c   :  { %15895 = vmatpush3.bf16.msra.mxu0 %v17083_v21 }
 0x46d   :  { %15896 = vmatprep.subr.bf16.mxu0 %v17085_v22 }
 0x46e   :  { %15917 = vmatpush3.bf16.msra.mxu1 %v17084_v23 }
 0x46f   :  { %15918 = vmatprep.subr.bf16.mxu1 %v17086_v24 }
 0x470   :  { %15897 = vmatpush3.bf16.msra.mxu0 %v17087_v25 }
 0x471   :  { %15898 = vmatprep.subr.bf16.mxu0 %v17089_v26 }
 0x472   :  { %15919 = vmatpush3.bf16.msra.mxu1 %v17088_v27 }
 0x473   :  { %15920 = vmatprep.subr.bf16.mxu1 %v17090_v28 }
 0x474   :  { %15899 = vmatpush3.bf16.msra.mxu0 %v17091_v29 }
 0x475   :  { %15900 = vmatprep.subr.bf16.mxu0 %v17093_v30 }
 0x476   :  { %v15598_v32 = vpop.f32.mrb[112].mxu0  ;;  %15921 = vmatpush3.bf16.msra.mxu1 %v17092_v31 }
 0x477   :  { %v15599_v34 = vpop.f32.mrb[113].mxu0  ;;  %15922 = vmatprep.subr.bf16.mxu1 %v17094_v33 }
 0x478   :  { %v15620_v36 = vpop.f32.mrb[112].mxu1  ;;  %v15600_v37 = vadd.f32 %v15599_v34, %v15598_v32  ;;  %v15601_v38 = vpop.f32.mrb[114].mxu0  ;;  %15901 = vmatpush3.bf16.msra.mxu0 %v17095_v35 }
 0x479   :  { %v15621_v42 = vpop.f32.mrb[113].mxu1  ;;  %v15602_v43 = vpop.f32.mrb[115].mxu0  ;;  %15902 = vmatprep.subr.bf16.mxu0 %v17097_v40 }
 0x47a   :  { %v12576_v44 = vadd.f32 %v15600_v37, %v20824_v58  ;;  %v15622_v45 = vadd.f32 %v15621_v42, %v15620_v36  ;;  %v15623_v46 = vpop.f32.mrb[114].mxu1  ;;  %15923 = vmatpush3.bf16.msra.mxu1 %v17096_v39 }
 0x47b   :  { %v15624_v48 = vpop.f32.mrb[115].mxu1  ;;  %15924 = vmatprep.subr.bf16.mxu1 %v17098_v47 }
 0x47c   :  { %v12616_v50 = vadd.f32 %v15622_v45, %v12576_v44  ;;  %15903 = vmatpush3.bf16.msra.mxu0 %v17099_v49 }
 0x47d   :  { %8 = vsyncpa [#allocation3], 0  ;;  %15904 = vmatprep.subr.bf16.mxu0 %v17101_v51  ;;  %v3226_v55 = vrot.slane %v20850_v6, %v17257_v41  ;;  %v17104_v56 = vld [vmem:[%s20962_s1 + $0x23b8] sm:$0xff]   ;;  %s17131_s1 = smov [#allocation2]   ;;  %vm13181_vm0 = vcmask 254976  }
 0x47e   :  { %15925 = vmatpush3.bf16.msra.mxu1 %v17100_v52  ;;  %s13189_s17 = sshll.u32 %s17131_s1, 4  ;;  %s13190_s17 = int_to_ptr.vmem [resolvable:$true] %s13189_s17 }
 0x47f   :  { %15926 = vmatprep.subr.bf16.mxu1 %v17102_v53  ;;  %v3242_v57 = vcombine.high %v3226_v55, %v3226_v55  ;;  %s17106_s18 = scalar_lea.vmem %s13190_s17, 32  ;;  %p17111_p1 = scmp.lt.s32.totalorder %s13190_s17, %s13190_s17 }
 0x480   :  { %15905 = vmatpush3.bf16.msra.mxu0 %v17103_v54  ;;  %p17107_p0 = scmp.ne.s32.totalorder %s13190_s17, %s17106_s18  ;;  %p17112_p2 = scmp.lt.s32.totalorder %s17106_s18, %s17106_s18 }
 0x482   :  { %15927 = vmatpush3.bf16.msra.mxu1 %v17104_v56  ;;  %p17113_p3 = por %p17112_p2, %p17111_p1 }
 0x483   :  { %13134 = vmatmul.mubr.bf16.vlgmr.msra.gmra.mrb[140].mxu0 %v3226_v55 }
 0x484   :  { %p17114_p4 = pnand %p17113_p3, %p17107_p0 }
 0x485   :  { %13174 = vmatmul.mubr.bf16.vlgmr.msra.gmra.mrb[140].mxu1 %v3242_v57 }
 0x496   :  { %v15642_v58 = vpop.f32.mrb[116].mxu0 }
 0x497   :  { %v15643_v59 = vpop.f32.mrb[117].mxu0 }
 0x498   :  { %v15664_v60 = vpop.f32.mrb[116].mxu1  ;;  %v15644_v61 = vadd.f32 %v15643_v59, %v15642_v58  ;;  %v15645_v62 = vpop.f32.mrb[118].mxu0 }
 0x499   :  { %v15665_v63 = vpop.f32.mrb[117].mxu1  ;;  %v15646_v0 = vpop.f32.mrb[119].mxu0 }
 0x49a   :  { %v12656_v1 = vadd.f32 %v15644_v61, %v12616_v50  ;;  %v15666_v41 = vadd.f32 %v15665_v63, %v15664_v60  ;;  %v15667_v2 = vpop.f32.mrb[118].mxu1 }
 0x49b   :  { %v15668_v3 = vpop.f32.mrb[119].mxu1 }
 0x49c   :  { %v12696_v4 = vadd.f32 %v15666_v41, %v12656_v1 }
 0x4b6   :  { %v15686_v5 = vpop.f32.mrb[120].mxu0 }
 0x4b7   :  { %v15687_v6 = vpop.f32.mrb[121].mxu0 }
 0x4b8   :  { %v15708_v7 = vpop.f32.mrb[120].mxu1  ;;  %v15688_v8 = vadd.f32 %v15687_v6, %v15686_v5  ;;  %v15689_v9 = vpop.f32.mrb[122].mxu0 }
 0x4b9   :  { %v15709_v10 = vpop.f32.mrb[121].mxu1  ;;  %v15690_v11 = vpop.f32.mrb[123].mxu0 }
 0x4ba   :  { %v12736_v12 = vadd.f32 %v15688_v8, %v12696_v4  ;;  %v15710_v13 = vadd.f32 %v15709_v10, %v15708_v7  ;;  %v15711_v14 = vpop.f32.mrb[122].mxu1 }
 0x4bb   :  { %v15712_v15 = vpop.f32.mrb[123].mxu1 }
 0x4bc   :  { %v12776_v16 = vadd.f32 %v15710_v13, %v12736_v12 }
 0x4d6   :  { %v15730_v17 = vpop.f32.mrb[124].mxu0 }
 0x4d7   :  { %v15731_v18 = vpop.f32.mrb[125].mxu0 }
 0x4d8   :  { %v15752_v19 = vpop.f32.mrb[124].mxu1  ;;  %v15732_v20 = vadd.f32 %v15731_v18, %v15730_v17  ;;  %v15733_v21 = vpop.f32.mrb[126].mxu0 }
 0x4d9   :  { %v15753_v22 = vpop.f32.mrb[125].mxu1  ;;  %v15734_v23 = vpop.f32.mrb[127].mxu0 }
 0x4da   :  { %v12816_v24 = vadd.f32 %v15732_v20, %v12776_v16  ;;  %v15754_v25 = vadd.f32 %v15753_v22, %v15752_v19  ;;  %v15755_v26 = vpop.f32.mrb[126].mxu1 }
 0x4db   :  { %v15756_v27 = vpop.f32.mrb[127].mxu1 }
 0x4dc   :  { %v12856_v28 = vadd.f32 %v15754_v25, %v12816_v24 }
 0x4f6   :  { %v15774_v29 = vpop.f32.mrb[128].mxu0 }
 0x4f7   :  { %v15775_v30 = vpop.f32.mrb[129].mxu0 }
 0x4f8   :  { %v15796_v31 = vpop.f32.mrb[128].mxu1  ;;  %v15776_v32 = vadd.f32 %v15775_v30, %v15774_v29  ;;  %v15777_v33 = vpop.f32.mrb[130].mxu0 }
 0x4f9   :  { %v15797_v34 = vpop.f32.mrb[129].mxu1  ;;  %v15778_v35 = vpop.f32.mrb[131].mxu0 }
 0x4fa   :  { %v12896_v36 = vadd.f32 %v15776_v32, %v12856_v28  ;;  %v15798_v37 = vadd.f32 %v15797_v34, %v15796_v31  ;;  %v15799_v38 = vpop.f32.mrb[130].mxu1 }
 0x4fb   :  { %v15800_v39 = vpop.f32.mrb[131].mxu1 }
 0x4fc   :  { %v12936_v40 = vadd.f32 %v15798_v37, %v12896_v36 }
 0x516   :  { %v15818_v42 = vpop.f32.mrb[132].mxu0 }
 0x517   :  { %v15819_v43 = vpop.f32.mrb[133].mxu0 }
 0x518   :  { %v15840_v44 = vpop.f32.mrb[132].mxu1  ;;  %v15820_v45 = vadd.f32 %v15819_v43, %v15818_v42  ;;  %v15821_v46 = vpop.f32.mrb[134].mxu0 }
 0x519   :  { %v15841_v47 = vpop.f32.mrb[133].mxu1  ;;  %v15822_v48 = vpop.f32.mrb[135].mxu0 }
 0x51a   :  { %v12976_v49 = vadd.f32 %v15820_v45, %v12936_v40  ;;  %v15842_v50 = vadd.f32 %v15841_v47, %v15840_v44  ;;  %v15843_v51 = vpop.f32.mrb[134].mxu1 }
 0x51b   :  { %v15844_v52 = vpop.f32.mrb[135].mxu1 }
 0x51c   :  { %v13016_v53 = vadd.f32 %v15842_v50, %v12976_v49 }
 0x536   :  { %v15862_v54 = vpop.f32.mrb[136].mxu0 }
 0x537   :  { %v15863_v55 = vpop.f32.mrb[137].mxu0 }
 0x538   :  { %v15884_v56 = vpop.f32.mrb[136].mxu1  ;;  %v15864_v57 = vadd.f32 %v15863_v55, %v15862_v54  ;;  %v15865_v58 = vpop.f32.mrb[138].mxu0 }
 0x539   :  { %v15885_v59 = vpop.f32.mrb[137].mxu1  ;;  %v15866_v60 = vpop.f32.mrb[139].mxu0 }
 0x53a   :  { %v13056_v61 = vadd.f32 %v15864_v57, %v13016_v53  ;;  %v15886_v62 = vadd.f32 %v15885_v59, %v15884_v56  ;;  %v15887_v63 = vpop.f32.mrb[138].mxu1 }
 0x53b   :  { %v15888_v0 = vpop.f32.mrb[139].mxu1 }
 0x53c   :  { %v13096_v1 = vadd.f32 %v15886_v62, %v13056_v61 }
 0x556   :  { %v15906_v41 = vpop.f32.mrb[140].mxu0 }
 0x557   :  { %v15907_v2 = vpop.f32.mrb[141].mxu0 }
 0x558   :  { %v15928_v3 = vpop.f32.mrb[140].mxu1  ;;  %v15908_v4 = vadd.f32 %v15907_v2, %v15906_v41  ;;  %v15909_v5 = vpop.f32.mrb[142].mxu0 }
 0x559   :  { %v15929_v6 = vpop.f32.mrb[141].mxu1  ;;  %v15910_v7 = vpop.f32.mrb[143].mxu0 }
 0x55a   :  { %v13136_v8 = vadd.f32 %v15908_v4, %v13096_v1  ;;  %v15930_v9 = vadd.f32 %v15929_v6, %v15928_v3  ;;  %v15931_v10 = vpop.f32.mrb[142].mxu1 }
 0x55b   :  { %v15932_v11 = vpop.f32.mrb[143].mxu1 }
 0x55c   :  { %v13176_v12 = vadd.f32 %v15930_v9, %v13136_v8 }
 0x55e   :  { %13182 = vst.msk [vmem:[#allocation2] sm:$0x3] %vm13181_vm0, %v13176_v12 }
 0x55f   :  { %17117 = shalt.err (!%p17114_p4)
}
 0x560   :  { %s17118_s21 = scalar_lea.hbm %s20964_s3, 32 }
 0x561   :  { %p17119_p5 = scmp.ne.s32.totalorder %s20964_s3, %s17118_s21  ;;  %p17122_p6 = scmp.lt.u32.totalorder %s17118_s21, %s20964_s3 }
 0x563   :  { %p17124_p7 = pnand %p17122_p6, %p17119_p5 }
 0x565   :  { %17127 = shalt.err (!%p17124_p7)
}
 0x566   :  { %13192 = dma.vmem_to_hbm [thread:$0]  %s13190_s17, 32, %s20964_s3, [#allocation3]  }
 0x567   :  { %17128 = dma.done.wait [#allocation3], 32  }
 0x568   :  { %17129 = vsyncadd [#allocation3], 4294967264 }
 0x569   :  { %13196 = vsyncpa [#allocation3], 1 }

</bundles_post_ra>
